<compile_context>
chip_gen: v6e
topology: v6e:2x2x1
jax: 0.10.0
libtpu: 0.0.40
codegen_flags: <defaults>
</compile_context>

<pallas_src>
import numpy as np
import jax
import jax.numpy as jnp
from jax.experimental import pallas as pl
from jax.experimental.pallas import tpu as pltpu


# ------------------------------ Pallas kernel -------------------------------
def _make_kernel(Hout, Wout, C1, C2, C3, do_round):
    H, W = Hout, Wout

    def _pad_hw(a):
        """Zero-pad the first two (spatial) dims of a (H, W, C) value by 1."""
        zr = jnp.zeros((1,) + a.shape[1:], a.dtype)
        a = jnp.concatenate([zr, a, zr], axis=0)
        zc = jnp.zeros((a.shape[0], 1) + a.shape[2:], a.dtype)
        return jnp.concatenate([zc, a, zc], axis=1)

    def kernel(mask_ref, ah_ref, awt_ref,
               w1_ref, b1_ref, w2_ref, b2_ref, w3_ref, b3_ref, o_ref):
        # ---- bilinear downsample (align_corners=False) as two small matmuls
        x = mask_ref[0]                                                    # (Hin, Win)
        t = jnp.dot(ah_ref[...], x, preferred_element_type=jnp.float32)   # (Hout, Win)
        m = jnp.dot(t, awt_ref[...], preferred_element_type=jnp.float32)  # (Hout, Wout)
        if do_round:
            m = jnp.round(m)

        # ---- conv1 (Cin = 1): 9 tap-shifted broadcast multiplies on the VPU
        mp = _pad_hw(m[:, :, None])                                        # (H+2, W+2, 1)
        w1 = w1_ref[...]                                                   # (9, C1)
        acc1 = jnp.zeros((H, W, C1), jnp.float32)
        for tap in range(9):
            dy, dx = tap // 3, tap % 3
            acc1 = acc1 + mp[dy:dy + H, dx:dx + W, :] * w1[tap][None, None, :]
        x1 = jnp.maximum(acc1 + b1_ref[...], 0.0)                          # (H, W, C1)

        # ---- generic 3x3 conv: 9 tap-shifted (H*W, Cin) @ (Cin, Cout) MXU dots
        def conv3x3_relu(xin, w_ref, b_ref, cout):
            cin = xin.shape[-1]
            xp = _pad_hw(xin)                                              # (H+2, W+2, cin)
            acc = jnp.zeros((H * W, cout), jnp.float32)
            for tap in range(9):
                dy, dx = tap // 3, tap % 3
                xt = xp[dy:dy + H, dx:dx + W, :].reshape(H * W, cin)
                acc = acc + jnp.dot(xt, w_ref[tap],
                                    preferred_element_type=jnp.float32)
            return jnp.maximum(acc + b_ref[...], 0.0)                      # (H*W, cout)

        x2 = conv3x3_relu(x1, w2_ref, b2_ref, C2).reshape(H, W, C2)
        x3 = conv3x3_relu(x2, w3_ref, b3_ref, C3)                          # (H*W, C3)

        # channel-first, lane-dense store: last dim = H*W (>= 128 multiple in
        # typical configs) -> unmasked vst; also matches NCHW with a pure
        # reshape on the host (no transpose op outside the kernel).
        o_ref[0] = x3.T                                                    # (C3, H*W)

    return kernel


# ------------------------------ host-side glue ------------------------------
def _interp_matrix(out_size, in_size):
    """A (out, in) s.t. A @ x == 1-D linear resample with PyTorch
    align_corners=False semantics (F.interpolate default)."""
    scale = in_size / out_size
    src = (np.arange(out_size, dtype=np.float64) + 0.5) * scale - 0.5
    src = np.maximum(src, 0.0)
    lo = np.clip(np.floor(src).astype(np.int64), 0, in_size - 1)
    hi = np.minimum(lo + 1, in_size - 1)
    frac = np.clip(src - lo, 0.0, 1.0)
    a = np.zeros((out_size, in_size), np.float32)
    rows = np.arange(out_size)
    a[rows, lo] += (1.0 - frac).astype(np.float32)
    a[rows, hi] += frac.astype(np.float32)
    return jnp.asarray(a)


def mask_encoder(mask, w1, b1, w2, b2, w3, b3, *, scale, do_round=False):
    """mask: (B, 1, Hin, Win) f32 NCHW.
       w_i: (Cout_i, Cin_i, 3, 3), b_i: (Cout_i,)."""
    B, Cin, Hin, Win = mask.shape
    assert Cin == 1
    Hout = int(np.floor(Hin / scale))
    Wout = int(np.floor(Win / scale))
    C1, C2, C3 = w1.shape[0], w2.shape[0], w3.shape[0]

    # tiny interpolation matrices (built once, constant under jit)
    ah = _interp_matrix(Hout, Hin)                    # (Hout, Hin)
    awt = _interp_matrix(Wout, Win).T                 # (Win, Wout)

    # weights in tap-major, channels-last form: (Cout,Cin,3,3) -> (9, Cin, Cout)
    def prep_w(w):
        return jnp.transpose(w, (2, 3, 1, 0)).reshape(9, w.shape[1], w.shape[0])

    w1k = prep_w(w1)[:, 0, :]                         # (9, C1)       (Cin = 1)
    w2k = prep_w(w2)                                  # (9, C1, C2)
    w3k = prep_w(w3)                                  # (9, C2, C3)
    b1k = b1.reshape(1, C1)
    b2k = b2.reshape(1, C2)
    b3k = b3.reshape(1, C3)

    x2d = mask[:, 0, :, :]                            # (B, Hin, Win)

    kernel = _make_kernel(Hout, Wout, C1, C2, C3, do_round)

    out = pl.pallas_call(
        kernel,
        out_shape=jax.ShapeDtypeStruct((B, C3, Hout * Wout), jnp.float32),
        grid_spec=pltpu.PrefetchScalarGridSpec(
            num_scalar_prefetch=0,
            grid=(B,),
            in_specs=[
                pl.BlockSpec((1, Hin, Win), lambda b: (b, 0, 0)),      # mask
                pl.BlockSpec((Hout, Hin), lambda b: (0, 0)),           # A_h
                pl.BlockSpec((Win, Wout), lambda b: (0, 0)),           # A_w^T
                pl.BlockSpec((9, C1), lambda b: (0, 0)),               # conv1 W
                pl.BlockSpec((1, C1), lambda b: (0, 0)),               # conv1 b
                pl.BlockSpec((9, C1, C2), lambda b: (0, 0, 0)),        # conv2 W
                pl.BlockSpec((1, C2), lambda b: (0, 0)),               # conv2 b
                pl.BlockSpec((9, C2, C3), lambda b: (0, 0, 0)),        # conv3 W
                pl.BlockSpec((1, C3), lambda b: (0, 0)),               # conv3 b
            ],
            out_specs=pl.BlockSpec((1, C3, Hout * Wout), lambda b: (b, 0, 0)),
        ),
        compiler_params=pltpu.CompilerParams(
            dimension_semantics=("parallel",)),
    )(x2d, ah, awt, w1k, b1k, w2k, b2k, w3k, b3k)

    # already channel-first: NC(HW) -> NCHW is a pure reshape (no transpose)
    return out.reshape(B, C3, Hout, Wout)


# ----------------------- independent pure-JAX reference ---------------------
def ref_forward(mask, scale, w1, b1, w2, b2, w3, b3, do_round=False):
    B, C, Hin, Win = mask.shape
    Hout = int(np.floor(Hin / scale))
    Wout = int(np.floor(Win / scale))

    def src_idx(out_size, in_size):
        s = in_size / out_size
        coords = (jnp.arange(out_size, dtype=jnp.float32) + 0.5) * s - 0.5
        coords = jnp.maximum(coords, 0.0)
        lo = jnp.clip(jnp.floor(coords).astype(jnp.int32), 0, in_size - 1)
        hi = jnp.minimum(lo + 1, in_size - 1)
        frac = jnp.clip(coords - lo.astype(jnp.float32), 0.0, 1.0)
        return lo, hi, frac

    h0, h1i, fh = src_idx(Hout, Hin)
    w0, w1i, fw = src_idx(Wout, Win)
    fh = fh[None, None, :, None]
    fw = fw[None, None, None, :]
    g = (mask[:, :, h0][:, :, :, w0] * (1 - fh) * (1 - fw)
         + mask[:, :, h0][:, :, :, w1i] * (1 - fh) * fw
         + mask[:, :, h1i][:, :, :, w0] * fh * (1 - fw)
         + mask[:, :, h1i][:, :, :, w1i] * fh * fw)
    if do_round:
        g = jnp.round(g)

    def conv_relu(x, w, b):
        y = jax.lax.conv_general_dilated(
            x, w, window_strides=(1, 1), padding='SAME',
            dimension_numbers=('NCHW', 'OIHW', 'NCHW'))
        return jnp.maximum(y + b[None, :, None, None], 0.0)

    x = conv_relu(g, w1, b1)
    x = conv_relu(x, w2, b2)
    x = conv_relu(x, w3, b3)
    return x


if __name__ == "__main__":
    B = 2
    out_ch = 32                    # -> conv channels 8, 16, 32
    scale = 2
    Hin = Win = 32                 # downsampled to 16 x 16

    key = jax.random.PRNGKey(0)
    k = jax.random.split(key, 7)
    C1, C2, C3 = out_ch // 4, out_ch // 2, out_ch
    mask = jax.random.uniform(k[0], (B, 1, Hin, Win), jnp.float32)
    w1 = jax.random.normal(k[1], (C1, 1, 3, 3), jnp.float32) * 0.3
    b1 = jax.random.normal(k[2], (C1,), jnp.float32) * 0.1
    w2 = jax.random.normal(k[3], (C2, C1, 3, 3), jnp.float32) * 0.2
    b2 = jax.random.normal(k[4], (C2,), jnp.float32) * 0.1
    w3 = jax.random.normal(k[5], (C3, C2, 3, 3), jnp.float32) * 0.15
    b3 = jax.random.normal(k[6], (C3,), jnp.float32) * 0.1

    out = mask_encoder(mask, w1, b1, w2, b2, w3, b3, scale=scale, do_round=False)
    out = jax.block_until_ready(out)

    ref = jax.block_until_ready(
        ref_forward(mask, scale, w1, b1, w2, b2, w3, b3, do_round=False))
    np.testing.assert_allclose(np.asarray(out), np.asarray(ref),
                               rtol=5e-4, atol=5e-4)
    print("KERNEL_OK")
</pallas_src>

<mosaic_0001>
module attributes {stable_mosaic.version = 11 : i64} {
  func.func @kernel(%arg0: i32, %arg1: memref<1x32x32xf32, #tpu.memory_space<vmem>>, %arg2: memref<16x32xf32, #tpu.memory_space<vmem>>, %arg3: memref<32x16xf32, #tpu.memory_space<vmem>>, %arg4: memref<9x8xf32, #tpu.memory_space<vmem>>, %arg5: memref<1x8xf32, #tpu.memory_space<vmem>>, %arg6: memref<9x8x16xf32, #tpu.memory_space<vmem>>, %arg7: memref<1x16xf32, #tpu.memory_space<vmem>>, %arg8: memref<9x16x32xf32, #tpu.memory_space<vmem>>, %arg9: memref<1x32xf32, #tpu.memory_space<vmem>>, %arg10: memref<1x32x256xf32, #tpu.memory_space<vmem>>) attributes {dimension_semantics = [#tpu.dimension_semantics<parallel>], iteration_bounds = array<i64: 2>, scalar_prefetch = 0 : i64, scratch_operands = 0 : i64, tpu.core_type = #tpu.core_type<tc>, window_params = [{transform_indices = @transform_0, window_bounds = array<i64: 1, 32, 32>}, {pipeline_mode = #tpu.pipeline_mode<synchronous>, transform_indices = @transform_1, window_bounds = array<i64: 16, 32>}, {pipeline_mode = #tpu.pipeline_mode<synchronous>, transform_indices = @transform_2, window_bounds = array<i64: 32, 16>}, {pipeline_mode = #tpu.pipeline_mode<synchronous>, transform_indices = @transform_3, window_bounds = array<i64: 9, 8>}, {pipeline_mode = #tpu.pipeline_mode<synchronous>, transform_indices = @transform_4, window_bounds = array<i64: 1, 8>}, {pipeline_mode = #tpu.pipeline_mode<synchronous>, transform_indices = @transform_5, window_bounds = array<i64: 9, 8, 16>}, {pipeline_mode = #tpu.pipeline_mode<synchronous>, transform_indices = @transform_6, window_bounds = array<i64: 1, 16>}, {pipeline_mode = #tpu.pipeline_mode<synchronous>, transform_indices = @transform_7, window_bounds = array<i64: 9, 16, 32>}, {pipeline_mode = #tpu.pipeline_mode<synchronous>, transform_indices = @transform_8, window_bounds = array<i64: 1, 32>}, {transform_indices = @transform_9, window_bounds = array<i64: 1, 32, 256>}]} {
    %c0 = arith.constant 0 : index
    %c0_0 = arith.constant 0 : index
    %c0_1 = arith.constant 0 : index
    %0 = vector.load %arg1[%c0, %c0_0, %c0_1] : memref<1x32x32xf32, #tpu.memory_space<vmem>>, vector<1x32x32xf32>
    %1 = vector.shape_cast %0 : vector<1x32x32xf32> to vector<32x32xf32>
    %c0_2 = arith.constant 0 : index
    %c0_3 = arith.constant 0 : index
    %2 = vector.load %arg2[%c0_2, %c0_3] : memref<16x32xf32, #tpu.memory_space<vmem>>, vector<16x32xf32>
    %cst = arith.constant dense<0.000000e+00> : vector<16x32xf32>
    %3 = tpu.matmul %2, %1, %cst {dimension_numbers = #tpu.dot_dimension_numbers<[1], [0], [0], [1], [0, 0, 1, 1], [], []>} : vector<16x32xf32>, vector<32x32xf32>, vector<16x32xf32> -> vector<16x32xf32>
    %c0_4 = arith.constant 0 : index
    %c0_5 = arith.constant 0 : index
    %4 = vector.load %arg3[%c0_4, %c0_5] : memref<32x16xf32, #tpu.memory_space<vmem>>, vector<32x16xf32>
    %cst_6 = arith.constant dense<0.000000e+00> : vector<16x16xf32>
    %5 = tpu.matmul %3, %4, %cst_6 {dimension_numbers = #tpu.dot_dimension_numbers<[1], [0], [0], [1], [0, 0, 1, 1], [], []>} : vector<16x32xf32>, vector<32x16xf32>, vector<16x16xf32> -> vector<16x16xf32>
    %6 = vector.shape_cast %5 : vector<16x16xf32> to vector<16x16x1xf32>
    %cst_7 = arith.constant 0.000000e+00 : f32
    %7 = vector.broadcast %cst_7 : f32 to vector<1x16x1xf32>
    %8 = tpu.concatenate %7, %6, %7 in 0 : vector<1x16x1xf32>, vector<16x16x1xf32>, vector<1x16x1xf32> -> vector<18x16x1xf32>
    %cst_8 = arith.constant 0.000000e+00 : f32
    %9 = vector.broadcast %cst_8 : f32 to vector<18x1x1xf32>
    %10 = tpu.concatenate %9, %8, %9 in 1 : vector<18x1x1xf32>, vector<18x16x1xf32>, vector<18x1x1xf32> -> vector<18x18x1xf32>
    %c0_9 = arith.constant 0 : index
    %c0_10 = arith.constant 0 : index
    %11 = vector.load %arg4[%c0_9, %c0_10] : memref<9x8xf32, #tpu.memory_space<vmem>>, vector<9x8xf32>
    %cst_11 = arith.constant 0.000000e+00 : f32
    %12 = vector.broadcast %cst_11 : f32 to vector<16x16x8xf32>
    %13 = vector.extract_strided_slice %10 {offsets = [0, 0, 0], sizes = [16, 16, 1], strides = [1, 1, 1]} : vector<18x18x1xf32> to vector<16x16x1xf32>
    %14 = vector.extract_strided_slice %11 {offsets = [0, 0], sizes = [1, 8], strides = [1, 1]} : vector<9x8xf32> to vector<1x8xf32>
    %15 = vector.shape_cast %14 : vector<1x8xf32> to vector<8xf32>
    %16 = vector.shape_cast %15 : vector<8xf32> to vector<1x1x8xf32>
    %17 = vector.broadcast %13 : vector<16x16x1xf32> to vector<16x16x8xf32>
    %18 = vector.broadcast %16 : vector<1x1x8xf32> to vector<16x16x8xf32>
    %19 = arith.mulf %17, %18 : vector<16x16x8xf32>
    %20 = arith.addf %12, %19 : vector<16x16x8xf32>
    %21 = vector.extract_strided_slice %10 {offsets = [0, 1, 0], sizes = [16, 16, 1], strides = [1, 1, 1]} : vector<18x18x1xf32> to vector<16x16x1xf32>
    %22 = vector.extract_strided_slice %11 {offsets = [1, 0], sizes = [1, 8], strides = [1, 1]} : vector<9x8xf32> to vector<1x8xf32>
    %23 = vector.shape_cast %22 : vector<1x8xf32> to vector<8xf32>
    %24 = vector.shape_cast %23 : vector<8xf32> to vector<1x1x8xf32>
    %25 = vector.broadcast %21 : vector<16x16x1xf32> to vector<16x16x8xf32>
    %26 = vector.broadcast %24 : vector<1x1x8xf32> to vector<16x16x8xf32>
    %27 = arith.mulf %25, %26 : vector<16x16x8xf32>
    %28 = arith.addf %20, %27 : vector<16x16x8xf32>
    %29 = vector.extract_strided_slice %10 {offsets = [0, 2, 0], sizes = [16, 16, 1], strides = [1, 1, 1]} : vector<18x18x1xf32> to vector<16x16x1xf32>
    %30 = vector.extract_strided_slice %11 {offsets = [2, 0], sizes = [1, 8], strides = [1, 1]} : vector<9x8xf32> to vector<1x8xf32>
    %31 = vector.shape_cast %30 : vector<1x8xf32> to vector<8xf32>
    %32 = vector.shape_cast %31 : vector<8xf32> to vector<1x1x8xf32>
    %33 = vector.broadcast %29 : vector<16x16x1xf32> to vector<16x16x8xf32>
    %34 = vector.broadcast %32 : vector<1x1x8xf32> to vector<16x16x8xf32>
    %35 = arith.mulf %33, %34 : vector<16x16x8xf32>
    %36 = arith.addf %28, %35 : vector<16x16x8xf32>
    %37 = vector.extract_strided_slice %10 {offsets = [1, 0, 0], sizes = [16, 16, 1], strides = [1, 1, 1]} : vector<18x18x1xf32> to vector<16x16x1xf32>
    %38 = vector.extract_strided_slice %11 {offsets = [3, 0], sizes = [1, 8], strides = [1, 1]} : vector<9x8xf32> to vector<1x8xf32>
    %39 = vector.shape_cast %38 : vector<1x8xf32> to vector<8xf32>
    %40 = vector.shape_cast %39 : vector<8xf32> to vector<1x1x8xf32>
    %41 = vector.broadcast %37 : vector<16x16x1xf32> to vector<16x16x8xf32>
    %42 = vector.broadcast %40 : vector<1x1x8xf32> to vector<16x16x8xf32>
    %43 = arith.mulf %41, %42 : vector<16x16x8xf32>
    %44 = arith.addf %36, %43 : vector<16x16x8xf32>
    %45 = vector.extract_strided_slice %10 {offsets = [1, 1, 0], sizes = [16, 16, 1], strides = [1, 1, 1]} : vector<18x18x1xf32> to vector<16x16x1xf32>
    %46 = vector.extract_strided_slice %11 {offsets = [4, 0], sizes = [1, 8], strides = [1, 1]} : vector<9x8xf32> to vector<1x8xf32>
    %47 = vector.shape_cast %46 : vector<1x8xf32> to vector<8xf32>
    %48 = vector.shape_cast %47 : vector<8xf32> to vector<1x1x8xf32>
    %49 = vector.broadcast %45 : vector<16x16x1xf32> to vector<16x16x8xf32>
    %50 = vector.broadcast %48 : vector<1x1x8xf32> to vector<16x16x8xf32>
    %51 = arith.mulf %49, %50 : vector<16x16x8xf32>
    %52 = arith.addf %44, %51 : vector<16x16x8xf32>
    %53 = vector.extract_strided_slice %10 {offsets = [1, 2, 0], sizes = [16, 16, 1], strides = [1, 1, 1]} : vector<18x18x1xf32> to vector<16x16x1xf32>
    %54 = vector.extract_strided_slice %11 {offsets = [5, 0], sizes = [1, 8], strides = [1, 1]} : vector<9x8xf32> to vector<1x8xf32>
    %55 = vector.shape_cast %54 : vector<1x8xf32> to vector<8xf32>
    %56 = vector.shape_cast %55 : vector<8xf32> to vector<1x1x8xf32>
    %57 = vector.broadcast %53 : vector<16x16x1xf32> to vector<16x16x8xf32>
    %58 = vector.broadcast %56 : vector<1x1x8xf32> to vector<16x16x8xf32>
    %59 = arith.mulf %57, %58 : vector<16x16x8xf32>
    %60 = arith.addf %52, %59 : vector<16x16x8xf32>
    %61 = vector.extract_strided_slice %10 {offsets = [2, 0, 0], sizes = [16, 16, 1], strides = [1, 1, 1]} : vector<18x18x1xf32> to vector<16x16x1xf32>
    %62 = vector.extract_strided_slice %11 {offsets = [6, 0], sizes = [1, 8], strides = [1, 1]} : vector<9x8xf32> to vector<1x8xf32>
    %63 = vector.shape_cast %62 : vector<1x8xf32> to vector<8xf32>
    %64 = vector.shape_cast %63 : vector<8xf32> to vector<1x1x8xf32>
    %65 = vector.broadcast %61 : vector<16x16x1xf32> to vector<16x16x8xf32>
    %66 = vector.broadcast %64 : vector<1x1x8xf32> to vector<16x16x8xf32>
    %67 = arith.mulf %65, %66 : vector<16x16x8xf32>
    %68 = arith.addf %60, %67 : vector<16x16x8xf32>
    %69 = vector.extract_strided_slice %10 {offsets = [2, 1, 0], sizes = [16, 16, 1], strides = [1, 1, 1]} : vector<18x18x1xf32> to vector<16x16x1xf32>
    %70 = vector.extract_strided_slice %11 {offsets = [7, 0], sizes = [1, 8], strides = [1, 1]} : vector<9x8xf32> to vector<1x8xf32>
    %71 = vector.shape_cast %70 : vector<1x8xf32> to vector<8xf32>
    %72 = vector.shape_cast %71 : vector<8xf32> to vector<1x1x8xf32>
    %73 = vector.broadcast %69 : vector<16x16x1xf32> to vector<16x16x8xf32>
    %74 = vector.broadcast %72 : vector<1x1x8xf32> to vector<16x16x8xf32>
    %75 = arith.mulf %73, %74 : vector<16x16x8xf32>
    %76 = arith.addf %68, %75 : vector<16x16x8xf32>
    %77 = vector.extract_strided_slice %10 {offsets = [2, 2, 0], sizes = [16, 16, 1], strides = [1, 1, 1]} : vector<18x18x1xf32> to vector<16x16x1xf32>
    %78 = vector.extract_strided_slice %11 {offsets = [8, 0], sizes = [1, 8], strides = [1, 1]} : vector<9x8xf32> to vector<1x8xf32>
    %79 = vector.shape_cast %78 : vector<1x8xf32> to vector<8xf32>
    %80 = vector.shape_cast %79 : vector<8xf32> to vector<1x1x8xf32>
    %81 = vector.broadcast %77 : vector<16x16x1xf32> to vector<16x16x8xf32>
    %82 = vector.broadcast %80 : vector<1x1x8xf32> to vector<16x16x8xf32>
    %83 = arith.mulf %81, %82 : vector<16x16x8xf32>
    %84 = arith.addf %76, %83 : vector<16x16x8xf32>
    %c0_12 = arith.constant 0 : index
    %c0_13 = arith.constant 0 : index
    %85 = vector.load %arg5[%c0_12, %c0_13] : memref<1x8xf32, #tpu.memory_space<vmem>>, vector<1x8xf32>
    %86 = vector.shape_cast %85 : vector<1x8xf32> to vector<1x1x8xf32>
    %87 = vector.broadcast %86 : vector<1x1x8xf32> to vector<16x16x8xf32>
    %88 = arith.addf %84, %87 : vector<16x16x8xf32>
    %cst_14 = arith.constant 0.000000e+00 : f32
    %89 = vector.broadcast %cst_14 : f32 to vector<16x16x8xf32>
    %90 = arith.maximumf %88, %89 : vector<16x16x8xf32>
    %cst_15 = arith.constant 0.000000e+00 : f32
    %91 = vector.broadcast %cst_15 : f32 to vector<1x16x8xf32>
    %92 = tpu.concatenate %91, %90, %91 in 0 : vector<1x16x8xf32>, vector<16x16x8xf32>, vector<1x16x8xf32> -> vector<18x16x8xf32>
    %cst_16 = arith.constant 0.000000e+00 : f32
    %93 = vector.broadcast %cst_16 : f32 to vector<18x1x8xf32>
    %94 = tpu.concatenate %93, %92, %93 in 1 : vector<18x1x8xf32>, vector<18x16x8xf32>, vector<18x1x8xf32> -> vector<18x18x8xf32>
    %cst_17 = arith.constant 0.000000e+00 : f32
    %95 = vector.broadcast %cst_17 : f32 to vector<256x16xf32>
    %96 = vector.extract_strided_slice %94 {offsets = [0, 0, 0], sizes = [16, 16, 8], strides = [1, 1, 1]} : vector<18x18x8xf32> to vector<16x16x8xf32>
    %97 = vector.shape_cast %96 : vector<16x16x8xf32> to vector<256x8xf32>
    %c0_18 = arith.constant 0 : index
    %c0_19 = arith.constant 0 : index
    %c0_20 = arith.constant 0 : index
    %98 = vector.load %arg6[%c0_18, %c0_19, %c0_20] : memref<9x8x16xf32, #tpu.memory_space<vmem>>, vector<1x8x16xf32>
    %99 = vector.shape_cast %98 : vector<1x8x16xf32> to vector<8x16xf32>
    %cst_21 = arith.constant dense<0.000000e+00> : vector<256x16xf32>
    %100 = tpu.matmul %97, %99, %cst_21 {dimension_numbers = #tpu.dot_dimension_numbers<[1], [0], [0], [1], [0, 0, 1, 1], [], []>} : vector<256x8xf32>, vector<8x16xf32>, vector<256x16xf32> -> vector<256x16xf32>
    %101 = arith.addf %95, %100 : vector<256x16xf32>
    %102 = vector.extract_strided_slice %94 {offsets = [0, 1, 0], sizes = [16, 16, 8], strides = [1, 1, 1]} : vector<18x18x8xf32> to vector<16x16x8xf32>
    %103 = vector.shape_cast %102 : vector<16x16x8xf32> to vector<256x8xf32>
    %c1 = arith.constant 1 : index
    %c0_22 = arith.constant 0 : index
    %c0_23 = arith.constant 0 : index
    %104 = vector.load %arg6[%c1, %c0_22, %c0_23] : memref<9x8x16xf32, #tpu.memory_space<vmem>>, vector<1x8x16xf32>
    %105 = vector.shape_cast %104 : vector<1x8x16xf32> to vector<8x16xf32>
    %cst_24 = arith.constant dense<0.000000e+00> : vector<256x16xf32>
    %106 = tpu.matmul %103, %105, %cst_24 {dimension_numbers = #tpu.dot_dimension_numbers<[1], [0], [0], [1], [0, 0, 1, 1], [], []>} : vector<256x8xf32>, vector<8x16xf32>, vector<256x16xf32> -> vector<256x16xf32>
    %107 = arith.addf %101, %106 : vector<256x16xf32>
    %108 = vector.extract_strided_slice %94 {offsets = [0, 2, 0], sizes = [16, 16, 8], strides = [1, 1, 1]} : vector<18x18x8xf32> to vector<16x16x8xf32>
    %109 = vector.shape_cast %108 : vector<16x16x8xf32> to vector<256x8xf32>
    %c2 = arith.constant 2 : index
    %c0_25 = arith.constant 0 : index
    %c0_26 = arith.constant 0 : index
    %110 = vector.load %arg6[%c2, %c0_25, %c0_26] : memref<9x8x16xf32, #tpu.memory_space<vmem>>, vector<1x8x16xf32>
    %111 = vector.shape_cast %110 : vector<1x8x16xf32> to vector<8x16xf32>
    %cst_27 = arith.constant dense<0.000000e+00> : vector<256x16xf32>
    %112 = tpu.matmul %109, %111, %cst_27 {dimension_numbers = #tpu.dot_dimension_numbers<[1], [0], [0], [1], [0, 0, 1, 1], [], []>} : vector<256x8xf32>, vector<8x16xf32>, vector<256x16xf32> -> vector<256x16xf32>
    %113 = arith.addf %107, %112 : vector<256x16xf32>
    %114 = vector.extract_strided_slice %94 {offsets = [1, 0, 0], sizes = [16, 16, 8], strides = [1, 1, 1]} : vector<18x18x8xf32> to vector<16x16x8xf32>
    %115 = vector.shape_cast %114 : vector<16x16x8xf32> to vector<256x8xf32>
    %c3 = arith.constant 3 : index
    %c0_28 = arith.constant 0 : index
    %c0_29 = arith.constant 0 : index
    %116 = vector.load %arg6[%c3, %c0_28, %c0_29] : memref<9x8x16xf32, #tpu.memory_space<vmem>>, vector<1x8x16xf32>
    %117 = vector.shape_cast %116 : vector<1x8x16xf32> to vector<8x16xf32>
    %cst_30 = arith.constant dense<0.000000e+00> : vector<256x16xf32>
    %118 = tpu.matmul %115, %117, %cst_30 {dimension_numbers = #tpu.dot_dimension_numbers<[1], [0], [0], [1], [0, 0, 1, 1], [], []>} : vector<256x8xf32>, vector<8x16xf32>, vector<256x16xf32> -> vector<256x16xf32>
    %119 = arith.addf %113, %118 : vector<256x16xf32>
    %120 = vector.extract_strided_slice %94 {offsets = [1, 1, 0], sizes = [16, 16, 8], strides = [1, 1, 1]} : vector<18x18x8xf32> to vector<16x16x8xf32>
    %121 = vector.shape_cast %120 : vector<16x16x8xf32> to vector<256x8xf32>
    %c4 = arith.constant 4 : index
    %c0_31 = arith.constant 0 : index
    %c0_32 = arith.constant 0 : index
    %122 = vector.load %arg6[%c4, %c0_31, %c0_32] : memref<9x8x16xf32, #tpu.memory_space<vmem>>, vector<1x8x16xf32>
    %123 = vector.shape_cast %122 : vector<1x8x16xf32> to vector<8x16xf32>
    %cst_33 = arith.constant dense<0.000000e+00> : vector<256x16xf32>
    %124 = tpu.matmul %121, %123, %cst_33 {dimension_numbers = #tpu.dot_dimension_numbers<[1], [0], [0], [1], [0, 0, 1, 1], [], []>} : vector<256x8xf32>, vector<8x16xf32>, vector<256x16xf32> -> vector<256x16xf32>
    %125 = arith.addf %119, %124 : vector<256x16xf32>
    %126 = vector.extract_strided_slice %94 {offsets = [1, 2, 0], sizes = [16, 16, 8], strides = [1, 1, 1]} : vector<18x18x8xf32> to vector<16x16x8xf32>
    %127 = vector.shape_cast %126 : vector<16x16x8xf32> to vector<256x8xf32>
    %c5 = arith.constant 5 : index
    %c0_34 = arith.constant 0 : index
    %c0_35 = arith.constant 0 : index
    %128 = vector.load %arg6[%c5, %c0_34, %c0_35] : memref<9x8x16xf32, #tpu.memory_space<vmem>>, vector<1x8x16xf32>
    %129 = vector.shape_cast %128 : vector<1x8x16xf32> to vector<8x16xf32>
    %cst_36 = arith.constant dense<0.000000e+00> : vector<256x16xf32>
    %130 = tpu.matmul %127, %129, %cst_36 {dimension_numbers = #tpu.dot_dimension_numbers<[1], [0], [0], [1], [0, 0, 1, 1], [], []>} : vector<256x8xf32>, vector<8x16xf32>, vector<256x16xf32> -> vector<256x16xf32>
    %131 = arith.addf %125, %130 : vector<256x16xf32>
    %132 = vector.extract_strided_slice %94 {offsets = [2, 0, 0], sizes = [16, 16, 8], strides = [1, 1, 1]} : vector<18x18x8xf32> to vector<16x16x8xf32>
    %133 = vector.shape_cast %132 : vector<16x16x8xf32> to vector<256x8xf32>
    %c6 = arith.constant 6 : index
    %c0_37 = arith.constant 0 : index
    %c0_38 = arith.constant 0 : index
    %134 = vector.load %arg6[%c6, %c0_37, %c0_38] : memref<9x8x16xf32, #tpu.memory_space<vmem>>, vector<1x8x16xf32>
    %135 = vector.shape_cast %134 : vector<1x8x16xf32> to vector<8x16xf32>
    %cst_39 = arith.constant dense<0.000000e+00> : vector<256x16xf32>
    %136 = tpu.matmul %133, %135, %cst_39 {dimension_numbers = #tpu.dot_dimension_numbers<[1], [0], [0], [1], [0, 0, 1, 1], [], []>} : vector<256x8xf32>, vector<8x16xf32>, vector<256x16xf32> -> vector<256x16xf32>
    %137 = arith.addf %131, %136 : vector<256x16xf32>
    %138 = vector.extract_strided_slice %94 {offsets = [2, 1, 0], sizes = [16, 16, 8], strides = [1, 1, 1]} : vector<18x18x8xf32> to vector<16x16x8xf32>
    %139 = vector.shape_cast %138 : vector<16x16x8xf32> to vector<256x8xf32>
    %c7 = arith.constant 7 : index
    %c0_40 = arith.constant 0 : index
    %c0_41 = arith.constant 0 : index
    %140 = vector.load %arg6[%c7, %c0_40, %c0_41] : memref<9x8x16xf32, #tpu.memory_space<vmem>>, vector<1x8x16xf32>
    %141 = vector.shape_cast %140 : vector<1x8x16xf32> to vector<8x16xf32>
    %cst_42 = arith.constant dense<0.000000e+00> : vector<256x16xf32>
    %142 = tpu.matmul %139, %141, %cst_42 {dimension_numbers = #tpu.dot_dimension_numbers<[1], [0], [0], [1], [0, 0, 1, 1], [], []>} : vector<256x8xf32>, vector<8x16xf32>, vector<256x16xf32> -> vector<256x16xf32>
    %143 = arith.addf %137, %142 : vector<256x16xf32>
    %144 = vector.extract_strided_slice %94 {offsets = [2, 2, 0], sizes = [16, 16, 8], strides = [1, 1, 1]} : vector<18x18x8xf32> to vector<16x16x8xf32>
    %145 = vector.shape_cast %144 : vector<16x16x8xf32> to vector<256x8xf32>
    %c8 = arith.constant 8 : index
    %c0_43 = arith.constant 0 : index
    %c0_44 = arith.constant 0 : index
    %146 = vector.load %arg6[%c8, %c0_43, %c0_44] : memref<9x8x16xf32, #tpu.memory_space<vmem>>, vector<1x8x16xf32>
    %147 = vector.shape_cast %146 : vector<1x8x16xf32> to vector<8x16xf32>
    %cst_45 = arith.constant dense<0.000000e+00> : vector<256x16xf32>
    %148 = tpu.matmul %145, %147, %cst_45 {dimension_numbers = #tpu.dot_dimension_numbers<[1], [0], [0], [1], [0, 0, 1, 1], [], []>} : vector<256x8xf32>, vector<8x16xf32>, vector<256x16xf32> -> vector<256x16xf32>
    %149 = arith.addf %143, %148 : vector<256x16xf32>
    %c0_46 = arith.constant 0 : index
    %c0_47 = arith.constant 0 : index
    %150 = vector.load %arg7[%c0_46, %c0_47] : memref<1x16xf32, #tpu.memory_space<vmem>>, vector<1x16xf32>
    %151 = vector.broadcast %150 : vector<1x16xf32> to vector<256x16xf32>
    %152 = arith.addf %149, %151 : vector<256x16xf32>
    %cst_48 = arith.constant 0.000000e+00 : f32
    %153 = vector.broadcast %cst_48 : f32 to vector<256x16xf32>
    %154 = arith.maximumf %152, %153 : vector<256x16xf32>
    %155 = vector.shape_cast %154 : vector<256x16xf32> to vector<16x16x16xf32>
    %cst_49 = arith.constant 0.000000e+00 : f32
    %156 = vector.broadcast %cst_49 : f32 to vector<1x16x16xf32>
    %157 = tpu.concatenate %156, %155, %156 in 0 : vector<1x16x16xf32>, vector<16x16x16xf32>, vector<1x16x16xf32> -> vector<18x16x16xf32>
    %cst_50 = arith.constant 0.000000e+00 : f32
    %158 = vector.broadcast %cst_50 : f32 to vector<18x1x16xf32>
    %159 = tpu.concatenate %158, %157, %158 in 1 : vector<18x1x16xf32>, vector<18x16x16xf32>, vector<18x1x16xf32> -> vector<18x18x16xf32>
    %cst_51 = arith.constant 0.000000e+00 : f32
    %160 = vector.broadcast %cst_51 : f32 to vector<256x32xf32>
    %161 = vector.extract_strided_slice %159 {offsets = [0, 0, 0], sizes = [16, 16, 16], strides = [1, 1, 1]} : vector<18x18x16xf32> to vector<16x16x16xf32>
    %162 = vector.shape_cast %161 : vector<16x16x16xf32> to vector<256x16xf32>
    %c0_52 = arith.constant 0 : index
    %c0_53 = arith.constant 0 : index
    %c0_54 = arith.constant 0 : index
    %163 = vector.load %arg8[%c0_52, %c0_53, %c0_54] : memref<9x16x32xf32, #tpu.memory_space<vmem>>, vector<1x16x32xf32>
    %164 = vector.shape_cast %163 : vector<1x16x32xf32> to vector<16x32xf32>
    %cst_55 = arith.constant dense<0.000000e+00> : vector<256x32xf32>
    %165 = tpu.matmul %162, %164, %cst_55 {dimension_numbers = #tpu.dot_dimension_numbers<[1], [0], [0], [1], [0, 0, 1, 1], [], []>} : vector<256x16xf32>, vector<16x32xf32>, vector<256x32xf32> -> vector<256x32xf32>
    %166 = arith.addf %160, %165 : vector<256x32xf32>
    %167 = vector.extract_strided_slice %159 {offsets = [0, 1, 0], sizes = [16, 16, 16], strides = [1, 1, 1]} : vector<18x18x16xf32> to vector<16x16x16xf32>
    %168 = vector.shape_cast %167 : vector<16x16x16xf32> to vector<256x16xf32>
    %c1_56 = arith.constant 1 : index
    %c0_57 = arith.constant 0 : index
    %c0_58 = arith.constant 0 : index
    %169 = vector.load %arg8[%c1_56, %c0_57, %c0_58] : memref<9x16x32xf32, #tpu.memory_space<vmem>>, vector<1x16x32xf32>
    %170 = vector.shape_cast %169 : vector<1x16x32xf32> to vector<16x32xf32>
    %cst_59 = arith.constant dense<0.000000e+00> : vector<256x32xf32>
    %171 = tpu.matmul %168, %170, %cst_59 {dimension_numbers = #tpu.dot_dimension_numbers<[1], [0], [0], [1], [0, 0, 1, 1], [], []>} : vector<256x16xf32>, vector<16x32xf32>, vector<256x32xf32> -> vector<256x32xf32>
    %172 = arith.addf %166, %171 : vector<256x32xf32>
    %173 = vector.extract_strided_slice %159 {offsets = [0, 2, 0], sizes = [16, 16, 16], strides = [1, 1, 1]} : vector<18x18x16xf32> to vector<16x16x16xf32>
    %174 = vector.shape_cast %173 : vector<16x16x16xf32> to vector<256x16xf32>
    %c2_60 = arith.constant 2 : index
    %c0_61 = arith.constant 0 : index
    %c0_62 = arith.constant 0 : index
    %175 = vector.load %arg8[%c2_60, %c0_61, %c0_62] : memref<9x16x32xf32, #tpu.memory_space<vmem>>, vector<1x16x32xf32>
    %176 = vector.shape_cast %175 : vector<1x16x32xf32> to vector<16x32xf32>
    %cst_63 = arith.constant dense<0.000000e+00> : vector<256x32xf32>
    %177 = tpu.matmul %174, %176, %cst_63 {dimension_numbers = #tpu.dot_dimension_numbers<[1], [0], [0], [1], [0, 0, 1, 1], [], []>} : vector<256x16xf32>, vector<16x32xf32>, vector<256x32xf32> -> vector<256x32xf32>
    %178 = arith.addf %172, %177 : vector<256x32xf32>
    %179 = vector.extract_strided_slice %159 {offsets = [1, 0, 0], sizes = [16, 16, 16], strides = [1, 1, 1]} : vector<18x18x16xf32> to vector<16x16x16xf32>
    %180 = vector.shape_cast %179 : vector<16x16x16xf32> to vector<256x16xf32>
    %c3_64 = arith.constant 3 : index
    %c0_65 = arith.constant 0 : index
    %c0_66 = arith.constant 0 : index
    %181 = vector.load %arg8[%c3_64, %c0_65, %c0_66] : memref<9x16x32xf32, #tpu.memory_space<vmem>>, vector<1x16x32xf32>
    %182 = vector.shape_cast %181 : vector<1x16x32xf32> to vector<16x32xf32>
    %cst_67 = arith.constant dense<0.000000e+00> : vector<256x32xf32>
    %183 = tpu.matmul %180, %182, %cst_67 {dimension_numbers = #tpu.dot_dimension_numbers<[1], [0], [0], [1], [0, 0, 1, 1], [], []>} : vector<256x16xf32>, vector<16x32xf32>, vector<256x32xf32> -> vector<256x32xf32>
    %184 = arith.addf %178, %183 : vector<256x32xf32>
    %185 = vector.extract_strided_slice %159 {offsets = [1, 1, 0], sizes = [16, 16, 16], strides = [1, 1, 1]} : vector<18x18x16xf32> to vector<16x16x16xf32>
    %186 = vector.shape_cast %185 : vector<16x16x16xf32> to vector<256x16xf32>
    %c4_68 = arith.constant 4 : index
    %c0_69 = arith.constant 0 : index
    %c0_70 = arith.constant 0 : index
    %187 = vector.load %arg8[%c4_68, %c0_69, %c0_70] : memref<9x16x32xf32, #tpu.memory_space<vmem>>, vector<1x16x32xf32>
    %188 = vector.shape_cast %187 : vector<1x16x32xf32> to vector<16x32xf32>
    %cst_71 = arith.constant dense<0.000000e+00> : vector<256x32xf32>
    %189 = tpu.matmul %186, %188, %cst_71 {dimension_numbers = #tpu.dot_dimension_numbers<[1], [0], [0], [1], [0, 0, 1, 1], [], []>} : vector<256x16xf32>, vector<16x32xf32>, vector<256x32xf32> -> vector<256x32xf32>
    %190 = arith.addf %184, %189 : vector<256x32xf32>
    %191 = vector.extract_strided_slice %159 {offsets = [1, 2, 0], sizes = [16, 16, 16], strides = [1, 1, 1]} : vector<18x18x16xf32> to vector<16x16x16xf32>
    %192 = vector.shape_cast %191 : vector<16x16x16xf32> to vector<256x16xf32>
    %c5_72 = arith.constant 5 : index
    %c0_73 = arith.constant 0 : index
    %c0_74 = arith.constant 0 : index
    %193 = vector.load %arg8[%c5_72, %c0_73, %c0_74] : memref<9x16x32xf32, #tpu.memory_space<vmem>>, vector<1x16x32xf32>
    %194 = vector.shape_cast %193 : vector<1x16x32xf32> to vector<16x32xf32>
    %cst_75 = arith.constant dense<0.000000e+00> : vector<256x32xf32>
    %195 = tpu.matmul %192, %194, %cst_75 {dimension_numbers = #tpu.dot_dimension_numbers<[1], [0], [0], [1], [0, 0, 1, 1], [], []>} : vector<256x16xf32>, vector<16x32xf32>, vector<256x32xf32> -> vector<256x32xf32>
    %196 = arith.addf %190, %195 : vector<256x32xf32>
    %197 = vector.extract_strided_slice %159 {offsets = [2, 0, 0], sizes = [16, 16, 16], strides = [1, 1, 1]} : vector<18x18x16xf32> to vector<16x16x16xf32>
    %198 = vector.shape_cast %197 : vector<16x16x16xf32> to vector<256x16xf32>
    %c6_76 = arith.constant 6 : index
    %c0_77 = arith.constant 0 : index
    %c0_78 = arith.constant 0 : index
    %199 = vector.load %arg8[%c6_76, %c0_77, %c0_78] : memref<9x16x32xf32, #tpu.memory_space<vmem>>, vector<1x16x32xf32>
    %200 = vector.shape_cast %199 : vector<1x16x32xf32> to vector<16x32xf32>
    %cst_79 = arith.constant dense<0.000000e+00> : vector<256x32xf32>
    %201 = tpu.matmul %198, %200, %cst_79 {dimension_numbers = #tpu.dot_dimension_numbers<[1], [0], [0], [1], [0, 0, 1, 1], [], []>} : vector<256x16xf32>, vector<16x32xf32>, vector<256x32xf32> -> vector<256x32xf32>
    %202 = arith.addf %196, %201 : vector<256x32xf32>
    %203 = vector.extract_strided_slice %159 {offsets = [2, 1, 0], sizes = [16, 16, 16], strides = [1, 1, 1]} : vector<18x18x16xf32> to vector<16x16x16xf32>
    %204 = vector.shape_cast %203 : vector<16x16x16xf32> to vector<256x16xf32>
    %c7_80 = arith.constant 7 : index
    %c0_81 = arith.constant 0 : index
    %c0_82 = arith.constant 0 : index
    %205 = vector.load %arg8[%c7_80, %c0_81, %c0_82] : memref<9x16x32xf32, #tpu.memory_space<vmem>>, vector<1x16x32xf32>
    %206 = vector.shape_cast %205 : vector<1x16x32xf32> to vector<16x32xf32>
    %cst_83 = arith.constant dense<0.000000e+00> : vector<256x32xf32>
    %207 = tpu.matmul %204, %206, %cst_83 {dimension_numbers = #tpu.dot_dimension_numbers<[1], [0], [0], [1], [0, 0, 1, 1], [], []>} : vector<256x16xf32>, vector<16x32xf32>, vector<256x32xf32> -> vector<256x32xf32>
    %208 = arith.addf %202, %207 : vector<256x32xf32>
    %209 = vector.extract_strided_slice %159 {offsets = [2, 2, 0], sizes = [16, 16, 16], strides = [1, 1, 1]} : vector<18x18x16xf32> to vector<16x16x16xf32>
    %210 = vector.shape_cast %209 : vector<16x16x16xf32> to vector<256x16xf32>
    %c8_84 = arith.constant 8 : index
    %c0_85 = arith.constant 0 : index
    %c0_86 = arith.constant 0 : index
    %211 = vector.load %arg8[%c8_84, %c0_85, %c0_86] : memref<9x16x32xf32, #tpu.memory_space<vmem>>, vector<1x16x32xf32>
    %212 = vector.shape_cast %211 : vector<1x16x32xf32> to vector<16x32xf32>
    %cst_87 = arith.constant dense<0.000000e+00> : vector<256x32xf32>
    %213 = tpu.matmul %210, %212, %cst_87 {dimension_numbers = #tpu.dot_dimension_numbers<[1], [0], [0], [1], [0, 0, 1, 1], [], []>} : vector<256x16xf32>, vector<16x32xf32>, vector<256x32xf32> -> vector<256x32xf32>
    %214 = arith.addf %208, %213 : vector<256x32xf32>
    %c0_88 = arith.constant 0 : index
    %c0_89 = arith.constant 0 : index
    %215 = vector.load %arg9[%c0_88, %c0_89] : memref<1x32xf32, #tpu.memory_space<vmem>>, vector<1x32xf32>
    %216 = vector.broadcast %215 : vector<1x32xf32> to vector<256x32xf32>
    %217 = arith.addf %214, %216 : vector<256x32xf32>
    %cst_90 = arith.constant 0.000000e+00 : f32
    %218 = vector.broadcast %cst_90 : f32 to vector<256x32xf32>
    %219 = arith.maximumf %217, %218 : vector<256x32xf32>
    %220 = tpu.transpose %219, [1, 0] : vector<256x32xf32> -> vector<32x256xf32>
    %c0_91 = arith.constant 0 : index
    %c0_92 = arith.constant 0 : index
    %c0_93 = arith.constant 0 : index
    %221 = vector.load %arg10[%c0_91, %c0_92, %c0_93] : memref<1x32x256xf32, #tpu.memory_space<vmem>>, vector<1x32x256xf32>
    %222 = vector.shape_cast %221 : vector<1x32x256xf32> to vector<32x256xf32>
    %223 = vector.shape_cast %220 : vector<32x256xf32> to vector<1x32x256xf32>
    tpu.vector_store %arg10[%c0_91, %c0_92, %c0_93], %223 {strides = array<i32>} : memref<1x32x256xf32, #tpu.memory_space<vmem>>, vector<1x32x256xf32>,
    return
  }
  func.func @transform_0(%arg0: i32) -> (i32, i32, i32) {
    %c0_i32 = arith.constant 0 : i32
    %c0_i32_0 = arith.constant 0 : i32
    %c0_i32_1 = arith.constant 0 : i32
    return %arg0, %c0_i32, %c0_i32_0 : i32, i32, i32
  }
  func.func @transform_1(%arg0: i32) -> (i32, i32) {
    %c0_i32 = arith.constant 0 : i32
    %c0_i32_0 = arith.constant 0 : i32
    %c0_i32_1 = arith.constant 0 : i32
    return %c0_i32, %c0_i32_0 : i32, i32
  }
  func.func @transform_2(%arg0: i32) -> (i32, i32) {
    %c0_i32 = arith.constant 0 : i32
    %c0_i32_0 = arith.constant 0 : i32
    %c0_i32_1 = arith.constant 0 : i32
    return %c0_i32, %c0_i32_0 : i32, i32
  }
  func.func @transform_3(%arg0: i32) -> (i32, i32) {
    %c0_i32 = arith.constant 0 : i32
    %c0_i32_0 = arith.constant 0 : i32
    %c0_i32_1 = arith.constant 0 : i32
    return %c0_i32, %c0_i32_0 : i32, i32
  }
  func.func @transform_4(%arg0: i32) -> (i32, i32) {
    %c0_i32 = arith.constant 0 : i32
    %c0_i32_0 = arith.constant 0 : i32
    %c0_i32_1 = arith.constant 0 : i32
    return %c0_i32, %c0_i32_0 : i32, i32
  }
  func.func @transform_5(%arg0: i32) -> (i32, i32, i32) {
    %c0_i32 = arith.constant 0 : i32
    %c0_i32_0 = arith.constant 0 : i32
    %c0_i32_1 = arith.constant 0 : i32
    %c0_i32_2 = arith.constant 0 : i32
    return %c0_i32, %c0_i32_0, %c0_i32_1 : i32, i32, i32
  }
  func.func @transform_6(%arg0: i32) -> (i32, i32) {
    %c0_i32 = arith.constant 0 : i32
    %c0_i32_0 = arith.constant 0 : i32
    %c0_i32_1 = arith.constant 0 : i32
    return %c0_i32, %c0_i32_0 : i32, i32
  }
  func.func @transform_7(%arg0: i32) -> (i32, i32, i32) {
    %c0_i32 = arith.constant 0 : i32
    %c0_i32_0 = arith.constant 0 : i32
    %c0_i32_1 = arith.constant 0 : i32
    %c0_i32_2 = arith.constant 0 : i32
    return %c0_i32, %c0_i32_0, %c0_i32_1 : i32, i32, i32
  }
  func.func @transform_8(%arg0: i32) -> (i32, i32) {
    %c0_i32 = arith.constant 0 : i32
    %c0_i32_0 = arith.constant 0 : i32
    %c0_i32_1 = arith.constant 0 : i32
    return %c0_i32, %c0_i32_0 : i32, i32
  }
  func.func @transform_9(%arg0: i32) -> (i32, i32, i32) {
    %c0_i32 = arith.constant 0 : i32
    %c0_i32_0 = arith.constant 0 : i32
    %c0_i32_1 = arith.constant 0 : i32
    return %arg0, %c0_i32, %c0_i32_0 : i32, i32, i32
  }
}

</mosaic_0001>

<bundles_post_ra>
// kernel: tpu_custom_call.1
= control target key start
LH: loop header
LB: loop body
LE: loop exit
PB: predicated region body
PF: predicated region fallthrough
CT: control target
= control target key end

     0   :  { %s17078_s0 = inlined_call_operand.hbm [shape: f32[2,32,32], index: 0, kind: input, shape index: {}]   ;;  %s17079_s1 = inlined_call_operand.hbm [shape: f32[16,32], index: 1, kind: input, shape index: {}]   ;;  %s17080_s2 = inlined_call_operand.vmem [shape: f32[32,16], index: 2, kind: input, shape index: {}]   ;;  %s17081_s3 = inlined_call_operand.vmem [shape: f32[9,8], index: 3, kind: input, shape index: {}]   ;;  %s17082_s4 = inlined_call_operand.vmem [shape: f32[1,8], index: 4, kind: input, shape index: {}]   ;;  %s17083_s5 = inlined_call_operand.vmem [shape: f32[9,8,16], index: 5, kind: input, shape index: {}]   ;;  %s17084_s6 = inlined_call_operand.vmem [shape: f32[1,16], index: 6, kind: input, shape index: {}]   ;;  %s17085_s7 = inlined_call_operand.hbm [shape: f32[9,16,32], index: 7, kind: input, shape index: {}]   ;;  %s17086_s8 = inlined_call_operand.vmem [shape: f32[1,32], index: 8, kind: input, shape index: {}]   ;;  %s17087_s9 = inlined_call_operand.hbm [shape: f32[2,32,256], index: 9, kind: output, shape index: {}]  }
   0x1   :  { %17416 = sst [smem:[#allocation120_spill]] %s17079_s1 }
   0x2   :  { %17417 = sst [smem:[#allocation121_spill]] %s17085_s7 }
   0x3   :  { %14 = vsyncpa [#allocation3], 0 }
   0x4   :  { %16 = vsyncpa [#allocation3 + $0x1], 0 }
   0x5   :  { %17 = vsyncpa [#allocation6], 0 }
   0x6   :  { %18 = vsyncpa [#allocation4], 0 }
   0x7   :  { %20 = vsyncpa [#allocation4 + $0x1], 0  ;;  %s11277_s30 = smov 0   ;;  %s11279_s10 = smov 0  }
   0x8   :  { %s11281_s11 = smov 0   ;;  %s11283_s12 = smov 0  }
   0x9 LB: > { %s11298_s13 = sadd.s32 4294967295, %s11215_s12   ;;  %s8814_s14 = sadd.s32 4294967294, %s11215_s12   ;;  %s11215_s12 = sphi %s11283_s12, %s18327_s12   ;;  %s11211_s11 = sphi %s11281_s11, %s18326_s11   ;;  %s11207_s10 = sphi %s11279_s10, %s18325_s10   ;;  %s11203_s30 = sphi %s11277_s30, %s18324_s30  }
   0xa   : > { %p46_p0 = scmp.ne.s32.totalorder %s11207_s10, %s11203_s30  ;;  %p17090_p1 = scmp.eq.s32.totalorder %s11298_s13, 0 }
   0xb   : > { %p238_p2 = scmp.eq.s32.totalorder %s11298_s13, 1  ;;  %p244_p3 = scmp.eq.s32.totalorder %s8814_s14, 1 }
   0xc   : > { %p11307_p4 = por %p17090_p1, %p46_p0  ;;  %p8815_p5 = scmp.ge.s32.totalorder %s11215_s12, 1 }
   0xd   : > { %p11312_p6 = por %p244_p3, %p46_p0  ;;  %p251_p7 = scmp.lt.s32.totalorder %s11215_s12, 3 }
   0xe   : > { %s17418_s15 = scalar_select %p11307_p4, 1, 0 }
   0xf   : > { %s17419_s16 = scalar_select %p11312_p6, 1, 0 }
  0x10   : > { %p11317_p8 = pnand %p8815_p5, %p251_p7  ;;  %s11217_s18 = smov [#allocation5]  }
  0x11   : > { %s263_s19 = sshll.u32 %s11217_s18, 4  ;;  %s11218_s21 = smov [#allocation7]   ;;  %s264_s19 = int_to_ptr.vmem [resolvable:$true] %s263_s19 }
  0x12   : > { %s17420_s17 = scalar_select %p11317_p8, 1, 0 }
  0x13   : > { %p10993_p9 = pneg %p11317_p8  ;;  %s291_s22 = sshll.u32 %s11218_s21, 4  ;;  %s292_s22 = int_to_ptr.vmem [resolvable:$true] %s291_s22 }
  0x14   : > { %s11078_s23 = scalar_lea.vmem %s264_s19, 256  ;;  %p11086_p5 = scmp.lt.s32.totalorder %s264_s19, %s264_s19 }
  0x15   : > { %p11326_p11 = pnand %p10993_p9, %p17090_p1  ;;  %p11079_p13 = scmp.ne.s32.totalorder %s264_s19, %s11078_s23 }
  0x16   : > { %p11087_p7 = scmp.lt.s32.totalorder %s11078_s23, %s11078_s23 }
  0x17   : > { %p11069_p12 = pneg %p11326_p11 }
  0x18   : > { %p11088_p10 = por %p11087_p7, %p11086_p5 }
  0x19   : > { %p11081_p0 = pnand %p11079_p13, %p11069_p12 }
  0x1b   : > { %p11082_p3 = pneg %p11081_p0 }
  0x1d   : > { %p11089_p9 = pnand %p11088_p10, %p11082_p3 }
  0x1f   : > { %11092 = shalt.err (!%p11089_p9)
}
  0x20   : > { %s17088_s24 = smov 128   ;;  %s17089_s25 = smov 8  }
  0x21   : > { %s17422_s1 = sld [smem:[#allocation120_spill]]  ;;  %s11104_s28 = scalar_lea.vmem %s292_s22, 2304 }
  0x22   : > { %p11105_p13 = scmp.ne.s32.totalorder %s292_s22, %s11104_s28  ;;  %p11112_p10 = scmp.lt.s32.totalorder %s292_s22, %s292_s22 }
  0x23   : > { %p11113_p3 = scmp.lt.s32.totalorder %s11104_s28, %s11104_s28 }
  0x24   : > { %p11107_p0 = pnand %p11105_p13, %p11069_p12 }
  0x25   : > { %p11114_p7 = por %p11113_p3, %p11112_p10 }
  0x26   : > { %p11108_p5 = pneg %p11107_p0 }
  0x27   : > { %10996 = dma.hbm_to_vmem [thread:$0]  (!%p11326_p11), %s17422_s1, 256, %s264_s19, [#allocation6], %s17088_s24, %s17088_s24, %s17089_s25  }
  0x28   : > { %p11115_p9 = pnand %p11114_p7, %p11108_p5 }
  0x2a   : > { %11118 = shalt.err (!%p11115_p9)
}
  0x2b   : > { %s17423_s7 = sld [smem:[#allocation121_spill]]  ;;  %s11355_s18 = sadd.s32 1, %s11215_s12  }
  0x2c   : > { %s33_s19 = sadd.s32 1, %s11211_s11  ;;  %s30_s20 = ssub.s32 %s11215_s12, %s11355_s18 }
  0x2d   : > { %p40_p12 = scmp.ne.s32.totalorder %s11211_s11, %s11207_s10  ;;  %p31_p13 = scmp.eq.s32.totalorder %s30_s20, 0 }
  0x2e   : > { %p41_p0 = scmp.eq.s32.totalorder %s11215_s12, 0  ;;  %p11010_p10 = scmp.lt.s32.totalorder %s11215_s12, 2 }
  0x2f   : > { %p11365_p5 = por %p238_p2, %p40_p12  ;;  %s308_s26 = sand.u32 1, %s11211_s11  }
  0x30   : > { %s11371_s23 = scalar_select %p31_p13, %s11211_s11, %s33_s19  }
  0x31   : > { %10999 = dma.hbm_to_vmem [thread:$0]  (!%p11326_p11), %s17423_s7, 2304, %s292_s22, [#allocation6], %s17088_s24, %s17088_s24, %s17089_s25  }
  0x32   : > { %s17424_s21 = scalar_select %p11365_p5, 1, 0 }
  0x33   : > { %17425 = sst [smem:[#allocation12_spill]] %s11371_s23  ;;  %p42_p3 = por %p41_p0, %p40_p12 }
  0x34   : > { %s8819_s27 = sshll.u32 %s308_s26, 5  ;;  %s9424_s22 = sshll.u32 %s11215_s12, 9 }
  0x35   : > { %s11378_s14 = scalar_lea.hbm %s17078_s0, %s9424_s22  ;;  %s312_s20 = scalar_lea.vmem [#allocation2], %s8819_s27 }
  0x36   : > { %s319_s24 = sshll.u32 %s312_s20, 4  ;;  %p11382_p2 = pnand %p11010_p10, %p42_p3  ;;  %s11380_s24 = int_to_ptr.vmem [resolvable:$true] %s319_s24 }
  0x37   : > { %s11386_s19 = scalar_lea.sflag [#allocation3], %s308_s26  ;;  %s11119_s1 = scalar_lea.hbm %s11378_s14, 512 }
  0x38   : > { %p11120_p11 = scmp.ne.s32.totalorder %s11378_s14, %s11119_s1  ;;  %p11121_p7 = pneg %p11382_p2 }
  0x39   : > { %s11124_s27 = scalar_lea.hbm %s17078_s0, 1024  ;;  %p11125_p13 = scmp.lt.s32.totalorder %s11378_s14, %s17078_s0 }
  0x3a   : > { %p11122_p9 = pnand %p11121_p7, %p11120_p11  ;;  %p11126_p0 = scmp.lt.s32.totalorder %s11124_s27, %s11119_s1 }
  0x3c   : > { %p11123_p12 = pneg %p11122_p9  ;;  %p11127_p10 = por %p11126_p0, %p11125_p13 }
  0x3e   : > { %p11128_p3 = pnand %p11127_p10, %p11123_p12 }
  0x40   : > { %11131 = shalt.err (!%p11128_p3)
}
  0x41   : > { %s11132_s26 = scalar_lea.vmem %s11380_s24, 512  ;;  %s11221_s7 = smov [#allocation2]  }
  0x42   : > { %p11133_p1 = scmp.ne.s32.totalorder %s11380_s24, %s11132_s26  ;;  %s11137_s23 = sshll.u32 %s11221_s7, 4  ;;  %s11138_s23 = int_to_ptr.vmem [resolvable:$false] %s11137_s23 }
  0x43   : > { %s11139_s22 = scalar_lea.vmem %s11138_s23, 1024  ;;  %p11140_p9 = scmp.lt.s32.totalorder %s11380_s24, %s11138_s23 }
  0x44   : > { %p11135_p6 = pnand %p11133_p1, %p11121_p7  ;;  %p11141_p5 = scmp.lt.s32.totalorder %s11139_s22, %s11132_s26 }
  0x46   : > { %p11136_p11 = pneg %p11135_p6  ;;  %p11142_p4 = por %p11141_p5, %p11140_p9 }
  0x48   : > { %p11143_p8 = pnand %p11142_p4, %p11136_p11 }
  0x4a   : > { %11146 = shalt.err (!%p11143_p8)
}
  0x4b   : > { %s17427_s1 = smov 8   ;;  %s17428_s28 = smov 128  }
  0x4c   : > { %11003 = dma.hbm_to_vmem [thread:$0]  (!%p11382_p2), %s11378_s14, 512, %s11380_s24, %s11386_s19, %s17428_s28, %s17428_s28, %s17427_s1  }
  0x4d   : > { %p17429_p1 = scmp.ne.s32.totalorder %s17420_s17, 0 }
  0x4f   : > { %331 = sbr.rel (%p17429_p1) target bundleno = 2125 (0x84d), region = 56 }
  0x54   : > { %s11413_s7 = sand.u32 1, %s11207_s10   ;;  %p17430_p4 = scmp.ne.s32.totalorder %s17418_s15, 0 }
  0x55   : > { %s8823_s23 = sshll.u32 %s11413_s7, 5  ;;  %s334_s27 = scalar_lea.sflag [#allocation3], %s11413_s7 }
  0x56   : > { %s337_s29 = scalar_lea.vmem [#allocation2], %s8823_s23 }
  0x57   : > { %11190 = dma.done.wait (%p17430_p4), %s334_s27, 512  }
  0x58   : > { %11192 = vsyncadd (%p17430_p4), %s334_s27, 4294966784  ;;  %p17431_p6 = scmp.eq.s32.totalorder %s11298_s13, 0 }
  0x5a   : > { %11194 = dma.done.wait (%p17431_p6), [#allocation6], 2560   ;;  %p17432_p8 = pmov %p17431_p6 }
  0x5b   : > { %vm386_vm0 = vcmask 261120   ;;  %v383_v0 = vld [vmem:[%s337_s29 + $0x18] sm:$0xff]  ;;  %v382_v1 = vld [vmem:[%s337_s29 + $0x10] sm:$0xff]  ;;  %v384_v2 = vld [vmem:[#allocation5] sm:$0xff]  ;;  %vm762_vm1 = vcmask 1040384   ;;  %v11222_v10 = vmov 0   ;;  %v553_v18 = vlaneseq }
  0x5c   : > { %11196 = vsyncadd (%p17432_p8), [#allocation6], 4294964736  ;;  %10041 = vmatprep.subr.mxu0 %v383_v0  ;;  %v381_v3 = vld [vmem:[%s337_s29 + $0x8] sm:$0xff]  ;;  %10049 = vmatprep.mubr.msk.f32.mxu0 %vm386_vm0, %v384_v2  ;;  %v471_v4 = vld [vmem:[%s17080_s2 + $0x18] sm:$0xff]  ;;  %v11223_v11 = vmov 0.0   ;;  %vm3118_vm2 = vcmask 64512  }
  0x5d   : > { %10042 = vmatpush3.msra.mxu0 %v383_v0  ;;  %v470_v5 = vld [vmem:[%s17080_s2 + $0x10] sm:$0xff]  ;;  %10052 = vmatprep.subr.mxu1 %v471_v4  ;;  %v380_v6 = vld [vmem:[%s337_s29] sm:$0xff]  ;;  %v385_v7 = vld [vmem:[#allocation5 + $0x8] sm:$0xff]  ;;  %v11439_v12 = vrot.slane %v11223_v11, 7  ;;  %v554_v19 = vshrl.u32 %v553_v18, 7  ;;  %vm1274_vm3 = vcmask 1046528  }
  0x5e   : > { %10043 = vmatprep.subr.mxu0 %v382_v1  ;;  %10053 = vmatpush3.msra.mxu1 %v471_v4  ;;  %v469_v8 = vld [vmem:[%s17080_s2 + $0x8] sm:$0xff]  ;;  %v468_v9 = vld [vmem:[%s17080_s2] sm:$0xff]  ;;  %vm1519_vm4 = vcmask 1045504   ;;  %vm6003_vm5 = vcmask 130048   ;;  %s8826_s14 = sshll.u32 %s11413_s7, 6  ;;  %s9425_s26 = sshll.u32 %s11298_s13, 10 }
  0x5f   : > { %10044 = vmatpush3.msra.mxu0 %v382_v1  ;;  %10054 = vmatprep.subr.mxu1 %v470_v5  ;;  %17433 = vst [vmem:[#allocation13_spill] sm:$0xff] %v11439_v12  ;;  %v11443_v13 = vsel %vm762_vm1, 0.0, %v11439_v12  ;;  %v11447_v14 = vsel %vm762_vm1, %v11439_v12, 0.0  ;;  %v11454_v20 = vsub.s32 0, %v554_v19  ;;  %v11457_v23 = vsub.s32 1, %v554_v19  ;;  %s379_s19 = scalar_lea.vmem [#allocation8], %s8826_s14  ;;  %s17035_s28 = scalar_lea.hbm %s17087_s9, %s9425_s26 }
  0x60   : > { %10045 = vmatprep.subr.mxu0 %v381_v3  ;;  %10055 = vmatpush3.msra.mxu1 %v470_v5  ;;  %17434 = vst [vmem:[#allocation14_spill] sm:$0xff] %v11443_v13  ;;  %17435 = vst [vmem:[#allocation15_spill] sm:$0xff] %v11447_v14  ;;  %v11055_v15 = vpack.i.bf16 %v11439_v12, %v11443_v13  ;;  %v11460_v25 = vsub.s32 2, %v554_v19  ;;  %v11463_v27 = vsub.s32 3, %v554_v19  ;;  %v11466_v29 = vsub.s32 4, %v554_v19  ;;  %s8722_s20 = sshll.u32 %s379_s19, 4  ;;  %s17030_s20 = int_to_ptr.vmem [resolvable:$true] %s8722_s20 }
  0x61   : > { %10046 = vmatpush3.msra.mxu0 %v381_v3  ;;  %10056 = vmatprep.subr.mxu1 %v469_v8  ;;  %v11469_v31 = vsub.s32 5, %v554_v19  ;;  %v11472_v33 = vsub.s32 6, %v554_v19  ;;  %v11482_v43 = vsub.s32 7, %v554_v19  ;;  %s8709_s23 = scalar_lea.sflag [#allocation4], %s11413_s7  ;;  %s11147_s27 = scalar_lea.vmem %s17030_s20, 1024 }
  0x62   : > { %10047 = vmatprep.subr.mxu0 %v380_v6  ;;  %10057 = vmatpush3.msra.mxu1 %v469_v8  ;;  %p11148_p5 = scmp.ne.s32.totalorder %s17030_s20, %s11147_s27  ;;  %p18320_p2 = scmp.ne.s32.totalorder %s17424_s21, 0 }
  0x63   : > { %10048 = vmatpush3.msra.mxu0 %v380_v6  ;;  %10058 = vmatprep.subr.mxu1 %v468_v9  ;;  %s11224_s13 = smov [#allocation8]  }
  0x64   : > { %10050 = vmatmul.mubr.msk.f32.vlgmr.msra.gmra.mxu0 %vm386_vm0, %v385_v7  ;;  %10059 = vmatpush3.msra.mxu1 %v468_v9  ;;  %p11149_p7 = pnand %p11148_p5, %p18320_p2  ;;  %s11151_s29 = sshll.u32 %s11224_s13, 4  ;;  %s11152_s29 = int_to_ptr.vmem [resolvable:$false] %s11151_s29 }
  0x65   : > { %11054 = vset.pattern.permute.xlu0 %v11222_v10  ;;  %11060 = vset.pattern.permute.xlu1 %v11222_v10  ;;  %s11153_s17 = scalar_lea.vmem %s11152_s29, 2048  ;;  %p11154_p13 = scmp.lt.s32.totalorder %s17030_s20, %s11152_s29 }
  0x66   : > { %1096 = vperm.xlu1 %11060, %v11447_v14   ;;  %11056 = vperm.xlu0 %11054, %v11055_v15   ;;  %p11150_p12 = pneg %p11149_p7  ;;  %p11155_p0 = scmp.lt.s32.totalorder %s11153_s17, %s11147_s27 }
  0x68   : > { %p11156_p10 = por %p11155_p0, %p11154_p13 }
  0x6a   : > { %p11157_p3 = pnand %p11156_p10, %p11150_p12 }
  0xe1   : > { %v11486_v46 = vpop.permute.xlu1 %1096  ;;  %v11488_v47 = vpop.permute.xlu0 %11056 }
  0xe2   : > { %17436 = vst [vmem:[#allocation16_spill] sm:$0xff] %v11486_v46 }
 0x124   : > { %v10051_v16 = vpop.f32.mrf.mxu0 }
 0x126   : > { %v459_v17 = vpop.f32.mrf.mxu0 }
 0x127   : > { %10060 = vmatprep.mubr.msk.f32.mxu1 %vm386_vm0, %v459_v17 }
 0x128   : > { %10061 = vmatmul.mubr.msk.f32.vlgmr.msra.gmra.mxu1 %vm386_vm0, %v10051_v16 }
 0x129   : > { %10115 = vmatprep.mubr.msk.f32.mxu1 %vm3118_vm2, %v11443_v13 }
 0x1e8   : > { %v10062_v21 = vpop.f32.mrf.mxu1 }
 0x1e9   : > { %v644_v22 = vrot.slane %v10062_v21, %v11454_v20  ;;  %v655_v24 = vrot.slane %v10062_v21, %v11457_v23  ;;  %v666_v26 = vrot.slane %v10062_v21, %v11460_v25  ;;  %v677_v28 = vrot.slane %v10062_v21, %v11463_v27 }
 0x1ea   : > { %v688_v30 = vrot.slane %v10062_v21, %v11466_v29  ;;  %v699_v32 = vrot.slane %v10062_v21, %v11469_v31  ;;  %v544_v34 = vpop.f32.mrf.mxu1  ;;  %v710_v35 = vrot.slane %v10062_v21, %v11472_v33  ;;  %v721_v44 = vrot.slane %v10062_v21, %v11482_v43 }
 0x1eb   : > { %650 = vbcast.lane.b32.xlu1 %v644_v22, 264  ;;  %646 = vbcast.lane.b32.xlu0 %v644_v22, 256  ;;  %v556_v36 = vrot.slane %v544_v34, %v11454_v20  ;;  %v567_v37 = vrot.slane %v544_v34, %v11457_v23  ;;  %v578_v38 = vrot.slane %v544_v34, %v11460_v25 }
 0x1ec   : > { %v589_v39 = vrot.slane %v544_v34, %v11463_v27  ;;  %v600_v40 = vrot.slane %v544_v34, %v11466_v29  ;;  %v611_v41 = vrot.slane %v544_v34, %v11469_v31  ;;  %v622_v42 = vrot.slane %v544_v34, %v11472_v33 }
 0x1ed   : > { %v633_v45 = vrot.slane %v544_v34, %v11482_v43 }
 0x1ef   : > { %661 = vbcast.lane.b32.xlu1 %v655_v24, 264  ;;  %657 = vbcast.lane.b32.xlu0 %v655_v24, 256 }
 0x1f3   : > { %672 = vbcast.lane.b32.xlu1 %v666_v26, 264  ;;  %668 = vbcast.lane.b32.xlu0 %v666_v26, 256 }
 0x1f7   : > { %683 = vbcast.lane.b32.xlu1 %v677_v28, 264  ;;  %679 = vbcast.lane.b32.xlu0 %v677_v28, 256 }
 0x1fb   : > { %694 = vbcast.lane.b32.xlu1 %v688_v30, 264  ;;  %690 = vbcast.lane.b32.xlu0 %v688_v30, 256 }
 0x1ff   : > { %705 = vbcast.lane.b32.xlu1 %v699_v32, 264  ;;  %701 = vbcast.lane.b32.xlu0 %v699_v32, 256 }
 0x203   : > { %712 = vbcast.lane.b32.xlu1 %v710_v35, 256  ;;  %558 = vbcast.lane.b32.xlu0 %v556_v36, 256 }
 0x207   : > { %569 = vbcast.lane.b32.xlu1 %v567_v37, 256  ;;  %562 = vbcast.lane.b32.xlu0 %v556_v36, 264 }
 0x20b   : > { %573 = vbcast.lane.b32.xlu1 %v567_v37, 264  ;;  %716 = vbcast.lane.b32.xlu0 %v710_v35, 264 }
 0x20f   : > { %584 = vbcast.lane.b32.xlu1 %v578_v38, 264  ;;  %580 = vbcast.lane.b32.xlu0 %v578_v38, 256 }
 0x213   : > { %595 = vbcast.lane.b32.xlu1 %v589_v39, 264  ;;  %591 = vbcast.lane.b32.xlu0 %v589_v39, 256 }
 0x217   : > { %606 = vbcast.lane.b32.xlu1 %v600_v40, 264  ;;  %602 = vbcast.lane.b32.xlu0 %v600_v40, 256 }
 0x21b   : > { %617 = vbcast.lane.b32.xlu1 %v611_v41, 264  ;;  %613 = vbcast.lane.b32.xlu0 %v611_v41, 256 }
 0x21f   : > { %628 = vbcast.lane.b32.xlu1 %v622_v42, 264  ;;  %624 = vbcast.lane.b32.xlu0 %v622_v42, 256 }
 0x223   : > { %727 = vbcast.lane.b32.xlu1 %v721_v44, 264  ;;  %635 = vbcast.lane.b32.xlu0 %v633_v45, 256 }
 0x227   : > { %639 = vbcast.lane.b32.xlu1 %v633_v45, 264  ;;  %723 = vbcast.lane.b32.xlu0 %v721_v44, 256 }
 0x25d   : > { %v651_v48 = vpop.permute.xlu1 %650  ;;  %v647_v49 = vpop.permute.xlu0 %646 }
 0x25e   : > { %v790_v50 = vrot.slane %v651_v48, 7  ;;  %v789_v51 = vrot.slane %v647_v49, 7 }
 0x260   : > { %v855_v52 = vsel %vm762_vm1, 0.0, %v789_v51  ;;  %v791_v53 = vsel %vm762_vm1, %v789_v51, %v790_v50  ;;  %v872_v58 = vsel %vm762_vm1, %v790_v50, 0.0 }
 0x261   : > { %v662_v54 = vpop.permute.xlu1 %661  ;;  %v658_v55 = vpop.permute.xlu0 %657  ;;  %965 = vperm.xlu1 %11060, %v855_v52   ;;  %969 = vperm.xlu0 %11054, %v791_v53  }
 0x262   : > { %v792_v56 = vrot.slane %v658_v55, 7  ;;  %v793_v57 = vrot.slane %v662_v54, 7 }
 0x264   : > { %v856_v59 = vsel %vm762_vm1, 0.0, %v792_v56  ;;  %v794_v0 = vsel %vm762_vm1, %v792_v56, %v793_v57  ;;  %v873_v1 = vsel %vm762_vm1, %v793_v57, 0.0 }
 0x265   : > { %v11494_v60 = vpop.permute.xlu1 %672  ;;  %v11496_v61 = vpop.permute.xlu0 %668  ;;  %1141 = vperm.xlu1 %11060, %v872_v58   ;;  %974 = vperm.xlu0 %11054, %v856_v59  }
 0x266   : > { %v796_v62 = vrot.slane %v11494_v60, 7  ;;  %v795_v63 = vrot.slane %v11496_v61, 7 }
 0x268   : > { %v11507_v2 = vsel %vm762_vm1, %v795_v63, %v796_v62 }
 0x269   : > { %v11509_v3 = vpop.permute.xlu1 %683  ;;  %v11511_v4 = vpop.permute.xlu0 %679  ;;  %978 = vperm.xlu1 %11060, %v794_v0   ;;  %1146 = vperm.xlu0 %11054, %v873_v1  }
 0x26a   : > { %v799_v5 = vrot.slane %v11509_v3, 7  ;;  %v798_v6 = vrot.slane %v11511_v4, 7 }
 0x26c   : > { %v11520_v7 = vsel %vm762_vm1, %v798_v6, %v799_v5  ;;  %v858_v60 = vsel %vm762_vm1, 0.0, %v798_v6 }
 0x26d   : > { %v11522_v8 = vpop.permute.xlu1 %694  ;;  %v11524_v9 = vpop.permute.xlu0 %690 }
 0x26e   : > { %v802_v10 = vrot.slane %v11522_v8, 7  ;;  %v801_v11 = vrot.slane %v11524_v9, 7 }
 0x270   : > { %v11533_v15 = vsel %vm762_vm1, %v801_v11, %v802_v10  ;;  %v876_v4 = vsel %vm762_vm1, %v802_v10, 0.0 }
 0x271   : > { %v11535_v16 = vpop.permute.xlu1 %705  ;;  %v11537_v17 = vpop.permute.xlu0 %701 }
 0x272   : > { %v805_v18 = vrot.slane %v11535_v16, 7  ;;  %v804_v19 = vrot.slane %v11537_v17, 7  ;;  %v11652_v17 = vld [vmem:[%s17081_s3] sm:$0xff] }
 0x274   : > { %v11546_v21 = vsel %vm762_vm1, %v804_v19, %v805_v18  ;;  %v860_v6 = vsel %vm762_vm1, 0.0, %v804_v19  ;;  %v877_v3 = vsel %vm762_vm1, %v805_v18, 0.0  ;;  %v11656_v18 = vrot.slane %v11652_v17, %v11466_v29 }
 0x275   : > { %v11548_v22 = vpop.permute.xlu1 %712  ;;  %v559_v24 = vpop.permute.xlu0 %558  ;;  %v11660_v19 = vrot.slane %v11652_v17, %v11469_v31 }
 0x276   : > { %v765_v26 = vrot.slane %v559_v24, 7  ;;  %v807_v40 = vrot.slane %v11548_v22, 7  ;;  %17439 = vst [vmem:[#allocation19_spill] sm:$0xff] %v11656_v18  ;;  %v11668_v22 = vrot.slane %v11652_v17, %v11460_v25 }
 0x278   : > { %v847_v28 = vsel %vm762_vm1, 0.0, %v765_v26  ;;  %17440 = vst [vmem:[#allocation20_spill] sm:$0xff] %v11668_v22 }
 0x279   : > { %v570_v30 = vpop.permute.xlu1 %569  ;;  %893 = vperm.xlu1 %11060, %v847_v28   ;;  %v563_v32 = vpop.permute.xlu0 %562 }
 0x27a   : > { %v766_v34 = vrot.slane %v563_v32, 7  ;;  %v768_v35 = vrot.slane %v570_v30, 7 }
 0x27c   : > { %v864_v36 = vsel %vm762_vm1, %v766_v34, 0.0  ;;  %v767_v37 = vsel %vm762_vm1, %v765_v26, %v766_v34  ;;  %v848_v45 = vsel %vm762_vm1, 0.0, %v768_v35 }
 0x27d   : > { %v574_v38 = vpop.permute.xlu1 %573  ;;  %1101 = vperm.xlu1 %11060, %v864_v36   ;;  %897 = vperm.xlu0 %11054, %v767_v37   ;;  %v11553_v39 = vpop.permute.xlu0 %716 }
 0x27e   : > { %v769_v41 = vrot.slane %v574_v38, 7  ;;  %v808_v42 = vrot.slane %v11553_v39, 7 }
 0x280   : > { %v770_v44 = vsel %vm762_vm1, %v768_v35, %v769_v41  ;;  %v11564_v48 = vsel %vm762_vm1, %v807_v40, %v808_v42  ;;  %v865_v53 = vsel %vm762_vm1, %v769_v41, 0.0  ;;  %v3005_v41 = vld [vmem:[%s17083_s5] sm:$0xff]  ;;  %v878_v9 = vsel %vm762_vm1, %v808_v42, 0.0  ;;  %v8898_v42 = vld [vmem:[%s17083_s5 + $0x10] sm:$0xff] }
 0x281   : > { %v585_v49 = vpop.permute.xlu1 %584  ;;  %906 = vperm.xlu1 %11060, %v770_v44   ;;  %902 = vperm.xlu0 %11054, %v848_v45   ;;  %v581_v50 = vpop.permute.xlu0 %580 }
 0x282   : > { %v771_v51 = vrot.slane %v581_v50, 7  ;;  %v772_v52 = vrot.slane %v585_v49, 7  ;;  %10113 = vmatprep.subr.mxu1 %v3005_v41 }
 0x283   : > { %10114 = vmatpush3.msra.mxu1 %v3005_v41  ;;  %v3036_v41 = vrot.slane %v11443_v13, 1 }
 0x284   : > { %v849_v54 = vsel %vm762_vm1, 0.0, %v771_v51  ;;  %v866_v59 = vsel %vm762_vm1, %v772_v52, 0.0  ;;  %v773_v0 = vsel %vm762_vm1, %v771_v51, %v772_v52  ;;  %10116 = vmatmul.mubr.msk.f32.vlgmr.msra.gmra.mxu1 %vm3118_vm2, %v11439_v12 }
 0x285   : > { %v596_v55 = vpop.permute.xlu1 %595  ;;  %1106 = vperm.xlu0 %11054, %v865_v53   ;;  %911 = vperm.xlu1 %11060, %v849_v54   ;;  %v592_v56 = vpop.permute.xlu0 %591 }
 0x286   : > { %v775_v57 = vrot.slane %v596_v55, 7  ;;  %v774_v58 = vrot.slane %v592_v56, 7  ;;  %v8833_v56 = vld [vmem:[%s17083_s5 + $0x8] sm:$0xff] }
 0x287   : > { %10063 = vmatprep.subr.mxu0 %v8833_v56 }
 0x288   : > { %v850_v28 = vsel %vm762_vm1, 0.0, %v774_v58  ;;  %v776_v30 = vsel %vm762_vm1, %v774_v58, %v775_v57  ;;  %v867_v36 = vsel %vm762_vm1, %v775_v57, 0.0  ;;  %10064 = vmatpush3.msra.mxu0 %v8833_v56 }
 0x289   : > { %v607_v1 = vpop.permute.xlu1 %606  ;;  %1111 = vperm.xlu1 %11060, %v866_v59   ;;  %915 = vperm.xlu0 %11054, %v773_v0   ;;  %v603_v24 = vpop.permute.xlu0 %602 }
 0x28a   : > { %v777_v26 = vrot.slane %v603_v24, 7  ;;  %v778_v35 = vrot.slane %v607_v1, 7  ;;  %10163 = vmatprep.subr.mxu0 %v8898_v42 }
 0x28c   : > { %v851_v37 = vsel %vm762_vm1, 0.0, %v777_v26  ;;  %v868_v49 = vsel %vm762_vm1, %v778_v35, 0.0  ;;  %v779_v50 = vsel %vm762_vm1, %v777_v26, %v778_v35 }
 0x28d   : > { %v618_v32 = vpop.permute.xlu1 %617  ;;  %920 = vperm.xlu0 %11054, %v850_v28   ;;  %924 = vperm.xlu1 %11060, %v776_v30   ;;  %v614_v34 = vpop.permute.xlu0 %613 }
 0x28e   : > { %v781_v44 = vrot.slane %v618_v32, 7  ;;  %v780_v45 = vrot.slane %v614_v34, 7 }
 0x290   : > { %v852_v54 = vsel %vm762_vm1, 0.0, %v780_v45  ;;  %v782_v55 = vsel %vm762_vm1, %v780_v45, %v781_v44  ;;  %v869_v58 = vsel %vm762_vm1, %v781_v44, 0.0  ;;  %v3037_v44 = vrot.slane %v11439_v12, 1 }
 0x291   : > { %v629_v38 = vpop.permute.xlu1 %628  ;;  %1116 = vperm.xlu0 %11054, %v867_v36   ;;  %929 = vperm.xlu1 %11060, %v851_v37   ;;  %v625_v51 = vpop.permute.xlu0 %624  ;;  %v857_v36 = vsel %vm762_vm1, 0.0, %v795_v63  ;;  %v3039_v37 = vrot.slane %v11447_v14, 1  ;;  %v11698_v45 = vunpack.i.h.bf16 %v11488_v47 }
 0x292   : > { %v783_v53 = vrot.slane %v625_v51, 7  ;;  %v784_v57 = vrot.slane %v629_v38, 7  ;;  %v874_v38 = vsel %vm762_vm1, %v796_v62, 0.0  ;;  %v11608_v61 = vsel %vm1274_vm3, %v3036_v41, %v3037_v44 }
 0x293   : > { %17437 = vst [vmem:[#allocation17_spill] sm:$0xff] %v11608_v61  ;;  %v11611_v63 = vsel %vm1274_vm3, %v3037_v44, %v3039_v37  ;;  %10065 = vmatprep.mubr.msk.f32.mxu0 %vm3118_vm2, %v11608_v61  ;;  %v875_v62 = vsel %vm762_vm1, %v799_v5, 0.0  ;;  %v861_v5 = vsel %vm762_vm1, 0.0, %v807_v40  ;;  %17443 = vst [vmem:[#allocation23_spill] sm:$0xff] %v11698_v45  ;;  %v11741_v37 = vmul.f32 %v11668_v22, %v11486_v46 }
 0x294   : > { %v853_v59 = vsel %vm762_vm1, 0.0, %v783_v53  ;;  %v870_v28 = vsel %vm762_vm1, %v784_v57, 0.0  ;;  %v785_v30 = vsel %vm762_vm1, %v783_v53, %v784_v57  ;;  %17438 = vst [vmem:[#allocation18_spill] sm:$0xff] %v11611_v63  ;;  %10066 = vmatmul.mubr.msk.f32.vlgmr.msra.gmra.mxu0 %vm3118_vm2, %v11611_v63  ;;  %v11747_v44 = vrot.slane %v11652_v17, %v11482_v43 }
 0x295   : > { %1121 = vperm.xlu1 %11060, %v868_v49   ;;  %933 = vperm.xlu0 %11054, %v779_v50   ;;  %v11583_v52 = vpop.permute.xlu1 %727  ;;  %v636_v0 = vpop.permute.xlu0 %635  ;;  %v11701_v49 = vunpack.i.l.bf16 %v11488_v47 }
 0x296   : > { %v786_v24 = vrot.slane %v636_v0, 7  ;;  %v811_v10 = vrot.slane %v11583_v52, 7  ;;  %10164 = vmatpush3.msra.mxu0 %v8898_v42  ;;  %v11779_v42 = vld [vmem:[%s17081_s3 + $0x8] ss:$0 sm:$0xff] }
 0x297   : > { %17444 = vst [vmem:[#allocation24_spill] sm:$0xff] %v11701_v49 }
 0x298   : > { %v854_v32 = vsel %vm762_vm1, 0.0, %v786_v24  ;;  %v879_v16 = vsel %vm762_vm1, %v811_v10, 0.0 }
 0x299   : > { %938 = vperm.xlu0 %11054, %v852_v54   ;;  %942 = vperm.xlu1 %11060, %v782_v55   ;;  %v640_v1 = vpop.permute.xlu1 %639 }
 0x29a   : > { %v787_v26 = vrot.slane %v640_v1, 7 }
 0x29c   : > { %v788_v34 = vsel %vm762_vm1, %v786_v24, %v787_v26  ;;  %v871_v35 = vsel %vm762_vm1, %v787_v26, 0.0 }
 0x29d   : > { %1126 = vperm.xlu0 %11054, %v869_v58   ;;  %947 = vperm.xlu1 %11060, %v853_v59  }
 0x2a1   : > { %1131 = vperm.xlu1 %11060, %v870_v28   ;;  %951 = vperm.xlu0 %11054, %v785_v30  }
 0x2a5   : > { %956 = vperm.xlu0 %11054, %v854_v32   ;;  %960 = vperm.xlu1 %11060, %v788_v34  }
 0x2a9   : > { %1136 = vperm.xlu0 %11054, %v871_v35   ;;  %983 = vperm.xlu1 %11060, %v857_v36   ;;  %v11737_v36 = vrot.slane %v11652_v17, %v11463_v27 }
 0x2ad   : > { %987 = vperm.xlu0 %11054, %v11507_v2   ;;  %1151 = vperm.xlu1 %11060, %v874_v38   ;;  %v859_v2 = vsel %vm762_vm1, 0.0, %v801_v11 }
 0x2b1   : > { %992 = vperm.xlu0 %11054, %v858_v60   ;;  %996 = vperm.xlu1 %11060, %v11520_v7   ;;  %v724_v7 = vpop.permute.xlu0 %723 }
 0x2b2   : > { %v810_v8 = vrot.slane %v724_v7, 7  ;;  %v1424_v7 = vmul.f32 %v11698_v45, %v11668_v22 }
 0x2b4   : > { %v862_v11 = vsel %vm762_vm1, 0.0, %v810_v8 }
 0x2b5   : > { %1156 = vperm.xlu0 %11054, %v875_v62   ;;  %1001 = vperm.xlu1 %11060, %v859_v2   ;;  %v11753_v62 = vmul.f32 %v11701_v49, %v11668_v22 }
 0x2b9   : > { %1005 = vperm.xlu0 %11054, %v11533_v15   ;;  %1161 = vperm.xlu1 %11060, %v876_v4   ;;  %v812_v15 = vsel %vm762_vm1, %v810_v8, %v811_v10 }
 0x2bd   : > { %1010 = vperm.xlu0 %11054, %v860_v6   ;;  %1014 = vperm.xlu1 %11060, %v11546_v21   ;;  %v11664_v21 = vrot.slane %v11652_v17, %v11457_v23 }
 0x2bf   : > { %v1180_v24 = vmul.f32 %v11664_v21, %v11486_v46  ;;  %v1178_v60 = vmul.f32 %v11701_v49, %v11664_v21  ;;  %v1179_v27 = vmul.f32 %v11698_v45, %v11664_v21 }
 0x2c1   : > { %1166 = vperm.xlu0 %11054, %v877_v3   ;;  %1019 = vperm.xlu1 %11060, %v861_v5   ;;  %v1278_v5 = vrot.slane %v1180_v24, 1 }
 0x2c5   : > { %1023 = vperm.xlu0 %11054, %v11564_v48   ;;  %1171 = vperm.xlu1 %11060, %v878_v9   ;;  %v11695_v48 = vrot.slane %v11652_v17, %v11454_v20  ;;  %v1523_v9 = vrot.slane %v11741_v37, 2 }
 0x2c7   : > { %v1031_v3 = vmul.f32 %v11698_v45, %v11695_v48 }
 0x2c9   : > { %1666 = vperm.xlu0 %11054, %v862_v11   ;;  %1670 = vperm.xlu1 %11060, %v812_v15  }
 0x2cd   : > { %1743 = vperm.xlu0 %11054, %v879_v16   ;;  %v1275_v16 = vrot.slane %v1178_v60, 1 }
 0x2dc   : > { %v11670_v39 = vpop.permute.xlu1 %965  ;;  %v11672_v40 = vpop.permute.xlu0 %969 }
 0x2dd   : > { %v11676_v29 = vmul.f32 %v11664_v21, %v11672_v40  ;;  %v11680_v31 = vmul.f32 %v11668_v22, %v11672_v40  ;;  %v11684_v23 = vmul.f32 %v11656_v18, %v11672_v40  ;;  %v11688_v25 = vmul.f32 %v11660_v19, %v11672_v40 }
 0x2de   : > { %v1049_v26 = vmul.f32 %v11695_v48, %v11672_v40  ;;  %v1774_v24 = vmul.f32 %v11656_v18, %v11670_v39  ;;  %v11934_v61 = vmul.f32 %v11737_v36, %v11670_v39 }
 0x2df   : > { %17441 = vst [vmem:[#allocation21_spill] sm:$0xff] %v11676_v29  ;;  %17442 = vst [vmem:[#allocation22_spill] sm:$0xff] %v11680_v31  ;;  %v17098_v20 = vrot.slane %v11676_v29, 1  ;;  %v17096_v56 = vrot.slane %v11680_v31, 2  ;;  %v1887_v47 = vrot.slane %v11684_v23, 1  ;;  %v2131_v57 = vrot.slane %v11688_v25, 2 }
 0x2e0   : > { %v1142_v50 = vpop.permute.xlu1 %1141  ;;  %v11703_v51 = vpop.permute.xlu0 %974  ;;  %v11848_v23 = vmul.f32 %v11664_v21, %v11670_v39  ;;  %v11860_v25 = vrot.slane %v11652_v17, %v11472_v33  ;;  %17473 = vst [vmem:[#allocation53_spill] sm:$0xff] %v11934_v61 }
 0x2e1   : > { %17445 = vst [vmem:[#allocation25_spill] sm:$0xff] %v11703_v51  ;;  %v1207_v52 = vmul.f32 %v11664_v21, %v1142_v50  ;;  %v1452_v53 = vmul.f32 %v11668_v22, %v1142_v50  ;;  %v1776_v54 = vmul.f32 %v11656_v18, %v1142_v50  ;;  %v2020_v55 = vmul.f32 %v11660_v19, %v1142_v50 }
 0x2e2   : > { %v2329_v10 = vmul.f32 %v11747_v44, %v1142_v50  ;;  %17460 = vst [vmem:[#allocation40_spill] sm:$0xff] %v11848_v23 }
 0x2e3   : > { %v1323_v58 = vrot.slane %v1207_v52, 1  ;;  %v1568_v59 = vrot.slane %v1452_v53, 2  ;;  %v1889_v0 = vrot.slane %v1776_v54, 1  ;;  %v2133_v1 = vrot.slane %v2020_v55, 2 }
 0x2e4   : > { %v11733_v35 = vpop.permute.xlu1 %978  ;;  %v11743_v41 = vpop.permute.xlu0 %1146  ;;  %v1520_v55 = vrot.slane %v11753_v62, 2 }
 0x2e5   : > { %v1324_v28 = vsel %vm1274_vm3, %v17098_v20, %v1323_v58  ;;  %v1569_v30 = vsel %vm1519_vm4, %v17096_v56, %v1568_v59  ;;  %v11726_v32 = vsel %vm1274_vm3, %v1887_v47, %v1889_v0  ;;  %v11731_v34 = vsel %vm1519_vm4, %v2131_v57, %v2133_v1  ;;  %17448 = vst [vmem:[#allocation28_spill] sm:$0xff] %v11733_v35 }
 0x2e6   : > { %17446 = vst [vmem:[#allocation26_spill] sm:$0xff] %v11726_v32  ;;  %17447 = vst [vmem:[#allocation27_spill] sm:$0xff] %v11731_v34  ;;  %v1406_v38 = vadd.f32 %v1324_v28, %v1049_v26  ;;  %v1696_v4 = vmul.f32 %v11737_v36, %v11733_v35  ;;  %v11761_v6 = vmul.f32 %v11656_v18, %v11733_v35  ;;  %v1276_v58 = vrot.slane %v1179_v27, 1 }
 0x2e7   : > { %v11765_v43 = vmul.f32 %v11660_v19, %v11733_v35  ;;  %v1779_v8 = vmul.f32 %v11656_v18, %v11743_v41  ;;  %v2023_v54 = vmul.f32 %v11660_v19, %v11743_v41  ;;  %v2573_v59 = vmul.f32 %v11779_v42, %v1142_v50 }
 0x2e8   : > { %v1651_v2 = vadd.f32 %v1569_v30, %v1406_v38  ;;  %17449 = vst [vmem:[#allocation29_spill] sm:$0xff] %v11761_v6  ;;  %v17095_v15 = vrot.slane %v11761_v6, 1  ;;  %v2327_v0 = vmul.f32 %v11747_v44, %v11670_v39  ;;  %v1521_v1 = vrot.slane %v1424_v7, 2 }
 0x2e9   : > { %17450 = vst [vmem:[#allocation30_spill] sm:$0xff] %v11765_v43  ;;  %v17094_v52 = vrot.slane %v11765_v43, 2  ;;  %v1894_v53 = vrot.slane %v1779_v8, 1  ;;  %v2138_v28 = vrot.slane %v2023_v54, 2  ;;  %v2440_v30 = vrot.slane %v2329_v10, 1 }
 0x2ea   : > { %v1728_v11 = vadd.f32 %v1696_v4, %v1651_v2  ;;  %v11795_v37 = vmul.f32 %v11664_v21, %v11733_v35  ;;  %v2328_v50 = vmul.f32 %v11747_v44, %v11672_v40  ;;  %v1210_v60 = vmul.f32 %v11664_v21, %v11743_v41 }
 0x2eb   : > { %v1895_v26 = vsel %vm1274_vm3, %v17095_v15, %v1894_v53  ;;  %v2139_v62 = vsel %vm1519_vm4, %v17094_v52, %v2138_v28  ;;  %v2437_v27 = vrot.slane %v2327_v0, 1  ;;  %v2571_v2 = vmul.f32 %v11779_v42, %v11670_v39 }
 0x2ec   : > { %17451 = vst [vmem:[#allocation31_spill] sm:$0xff] %v11795_v37  ;;  %v1977_v38 = vadd.f32 %v1895_v26, %v1728_v11  ;;  %v2684_v4 = vrot.slane %v2573_v59, 2  ;;  %v2438_v8 = vrot.slane %v2328_v50, 1  ;;  %v2572_v10 = vmul.f32 %v11779_v42, %v11672_v40 }
 0x2ed   : > { %v1279_v11 = vsel %vm1274_vm3, %v1276_v58, %v1278_v5  ;;  %v1030_v53 = vmul.f32 %v11701_v49, %v11695_v48  ;;  %v2681_v54 = vrot.slane %v2571_v2, 2  ;;  %v2018_v26 = vmul.f32 %v11660_v19, %v11670_v39 }
 0x2ee   : > { %v11806_v7 = vadd.f32 %v2139_v62, %v1977_v38  ;;  %v11816_v0 = vsel %vm1274_vm3, %v2437_v27, %v2438_v8  ;;  %v2682_v28 = vrot.slane %v2572_v10, 2  ;;  %v11819_v59 = vsel %vm1274_vm3, %v2438_v8, %v2440_v30 }
 0x2ef   : > { %17453 = vst [vmem:[#allocation33_spill] sm:$0xff] %v11816_v0  ;;  %17454 = vst [vmem:[#allocation34_spill] sm:$0xff] %v11819_v59  ;;  %v1886_v38 = vrot.slane %v1774_v24, 1  ;;  %v17097_v50 = vrot.slane %v11795_v37, 1  ;;  %v1328_v62 = vrot.slane %v1210_v60, 1  ;;  %v1277_v5 = vsel %vm1274_vm3, %v1275_v16, %v1276_v58 }
 0x2f0   : > { %17452 = vst [vmem:[#allocation32_spill] sm:$0xff] %v11806_v7  ;;  %v2130_v52 = vrot.slane %v2018_v26, 2  ;;  %v11824_v2 = vsel %vm1519_vm4, %v2681_v54, %v2682_v28  ;;  %v11827_v56 = vsel %vm1519_vm4, %v2682_v28, %v2684_v4  ;;  %v1388_v30 = vadd.f32 %v1279_v11, %v1031_v3 }
 0x2f1   : > { %17455 = vst [vmem:[#allocation35_spill] sm:$0xff] %v11824_v2  ;;  %17456 = vst [vmem:[#allocation36_spill] sm:$0xff] %v11827_v56  ;;  %v11832_v27 = vsel %vm1274_vm3, %v1886_v38, %v1887_v47  ;;  %v11836_v24 = vmul.f32 %v11668_v22, %v11733_v35  ;;  %v1455_v16 = vmul.f32 %v11668_v22, %v11743_v41 }
 0x2f2   : > { %17457 = vst [vmem:[#allocation37_spill] sm:$0xff] %v11832_v27  ;;  %v1524_v58 = vsel %vm1519_vm4, %v1521_v1, %v1523_v9  ;;  %v1387_v60 = vadd.f32 %v1277_v5, %v1030_v53  ;;  %v11844_v4 = vsel %vm1519_vm4, %v2130_v52, %v2131_v57  ;;  %v11852_v47 = vmul.f32 %v11668_v22, %v11670_v39 }
 0x2f3   : > { %17458 = vst [vmem:[#allocation38_spill] sm:$0xff] %v11836_v24  ;;  %17459 = vst [vmem:[#allocation39_spill] sm:$0xff] %v11844_v4  ;;  %v1329_v3 = vsel %vm1274_vm3, %v17097_v50, %v1328_v62  ;;  %v1522_v9 = vsel %vm1519_vm4, %v1520_v55, %v1521_v1  ;;  %v11864_v57 = vmul.f32 %v11664_v21, %v11703_v51  ;;  %v17099_v55 = vrot.slane %v11836_v24, 2 }
 0x2f4   : > { %v894_v15 = vpop.permute.xlu1 %893  ;;  %17461 = vst [vmem:[#allocation41_spill] sm:$0xff] %v11852_v47  ;;  %v11868_v52 = vmul.f32 %v11668_v22, %v11703_v51  ;;  %v1051_v8 = vmul.f32 %v11695_v48, %v11733_v35  ;;  %v11872_v11 = vadd.f32 %v1524_v58, %v1388_v30  ;;  %v1573_v1 = vrot.slane %v1455_v16, 2 }
 0x2f5   : > { %17462 = vst [vmem:[#allocation42_spill] sm:$0xff] %v11864_v57  ;;  %v11877_v33 = vmul.f32 %v11747_v44, %v11743_v41  ;;  %v11881_v53 = vmul.f32 %v11695_v48, %v11670_v39  ;;  %v11885_v26 = vmul.f32 %v11779_v42, %v11743_v41  ;;  %v1632_v28 = vadd.f32 %v1522_v9, %v1387_v60 }
 0x2f6   : > { %17463 = vst [vmem:[#allocation43_spill] sm:$0xff] %v11868_v52  ;;  %v1408_v54 = vadd.f32 %v1329_v3, %v1051_v8  ;;  %v11891_v5 = vmul.f32 %v11695_v48, %v11703_v51  ;;  %v11895_v30 = vmul.f32 %v11737_v36, %v11672_v40  ;;  %v11901_v41 = vmul.f32 %v11656_v18, %v11703_v51 }
 0x2f7   : > { %17464 = vst [vmem:[#allocation44_spill] sm:$0xff] %v11877_v33  ;;  %17465 = vst [vmem:[#allocation45_spill] sm:$0xff] %v11881_v53  ;;  %v1574_v3 = vsel %vm1519_vm4, %v17099_v55, %v1573_v1  ;;  %v11911_v50 = vmul.f32 %v11860_v25, %v11670_v39  ;;  %v1181_v62 = vmul.f32 %v11664_v21, %v894_v15 }
 0x2f8   : > { %v898_v10 = vpop.permute.xlu0 %897  ;;  %v1102_v17 = vpop.permute.xlu1 %1101  ;;  %17466 = vst [vmem:[#allocation46_spill] sm:$0xff] %v11885_v26  ;;  %17467 = vst [vmem:[#allocation47_spill] sm:$0xff] %v11891_v5  ;;  %v11913_v16 = vadd.f32 %v1574_v3, %v1408_v54  ;;  %v1426_v38 = vmul.f32 %v11668_v22, %v894_v15  ;;  %v1677_v1 = vmul.f32 %v11737_v36, %v894_v15 }
 0x2f9   : > { %17468 = vst [vmem:[#allocation48_spill] sm:$0xff] %v11895_v30  ;;  %17469 = vst [vmem:[#allocation49_spill] sm:$0xff] %v11901_v41  ;;  %v1182_v60 = vmul.f32 %v11664_v21, %v898_v10  ;;  %v1183_v8 = vmul.f32 %v11664_v21, %v1102_v17  ;;  %v1750_v55 = vmul.f32 %v11656_v18, %v894_v15  ;;  %v1280_v12 = vrot.slane %v1181_v62, 1 }
 0x2fa   : > { %17470 = vst [vmem:[#allocation50_spill] sm:$0xff] %v11911_v50  ;;  %17471 = vst [vmem:[#allocation51_spill] sm:$0xff] %v11913_v16  ;;  %v11923_v9 = vmul.f32 %v11660_v19, %v894_v15  ;;  %v11929_v54 = vmul.f32 %v11860_v25, %v11672_v40  ;;  %v1032_v3 = vmul.f32 %v11695_v48, %v894_v15  ;;  %v1525_v15 = vrot.slane %v1426_v38, 2 }
 0x2fb   : > { %v1281_v58 = vrot.slane %v1182_v60, 1  ;;  %v11938_v49 = vmul.f32 %v11860_v25, %v11703_v51  ;;  %v1283_v45 = vrot.slane %v1183_v8, 1  ;;  %v1428_v46 = vmul.f32 %v11668_v22, %v1102_v17 }
 0x2fc   : > { %v11918_v20 = vpop.permute.xlu0 %902  ;;  %v11925_v63 = vpop.permute.xlu1 %906  ;;  %17472 = vst [vmem:[#allocation52_spill] sm:$0xff] %v11929_v54  ;;  %v1427_v14 = vmul.f32 %v11668_v22, %v898_v10  ;;  %v11944_v40 = vmul.f32 %v11747_v44, %v11703_v51  ;;  %v1752_v60 = vmul.f32 %v11656_v18, %v1102_v17  ;;  %v1751_v39 = vmul.f32 %v11656_v18, %v898_v10 }
 0x2fd   : > { %17474 = vst [vmem:[#allocation54_spill] sm:$0xff] %v11938_v49  ;;  %v11948_v13 = vadd.f32 %v1677_v1, %v1632_v28  ;;  %v1846_v16 = vrot.slane %v1750_v55, 1  ;;  %v1996_v8 = vmul.f32 %v11660_v19, %v1102_v17  ;;  %v1033_v24 = vmul.f32 %v11695_v48, %v898_v10 }
 0x2fe   : > { %17475 = vst [vmem:[#allocation55_spill] sm:$0xff] %v11944_v40  ;;  %v1282_v5 = vsel %vm1274_vm3, %v1280_v12, %v1281_v58  ;;  %v1678_v57 = vmul.f32 %v11737_v36, %v898_v10  ;;  %v11957_v38 = vmul.f32 %v11747_v44, %v11733_v35  ;;  %v1528_v62 = vrot.slane %v1428_v46, 2 }
 0x2ff   : > { %v1284_v28 = vsel %vm1274_vm3, %v1281_v58, %v1283_v45  ;;  %v1526_v1 = vrot.slane %v1427_v14, 2  ;;  %v11961_v55 = vmul.f32 %v11660_v19, %v898_v10  ;;  %v1849_v17 = vrot.slane %v1752_v60, 1 }
 0x300   : > { %v1107_v37 = vpop.permute.xlu0 %1106  ;;  %17476 = vst [vmem:[#allocation56_spill] sm:$0xff] %v11957_v38  ;;  %v11963_v52 = vpop.permute.xlu1 %911  ;;  %v1847_v7 = vrot.slane %v1751_v39, 1  ;;  %v11967_v12 = vmul.f32 %v11664_v21, %v11918_v20  ;;  %v11971_v43 = vmul.f32 %v11668_v22, %v11918_v20  ;;  %v2093_v26 = vrot.slane %v1996_v8, 2 }
 0x301   : > { %v1389_v46 = vadd.f32 %v1282_v5, %v1032_v3  ;;  %v1186_v45 = vmul.f32 %v11664_v21, %v1107_v37  ;;  %v1390_v10 = vadd.f32 %v1284_v28, %v1033_v24  ;;  %v1710_v58 = vadd.f32 %v1678_v57, %v11872_v11 }
 0x302   : > { %v11978_v60 = vmul.f32 %v11695_v48, %v11918_v20  ;;  %v1755_v39 = vmul.f32 %v11656_v18, %v1107_v37  ;;  %v1527_v6 = vsel %vm1519_vm4, %v1525_v15, %v1526_v1  ;;  %v1529_v41 = vsel %vm1519_vm4, %v1526_v1, %v1528_v62 }
 0x303   : > { %v11986_v5 = vmul.f32 %v11664_v21, %v11925_v63  ;;  %v1850_v24 = vsel %vm1274_vm3, %v1847_v7, %v1849_v17  ;;  %v11993_v3 = vmul.f32 %v11656_v18, %v11925_v63  ;;  %v11995_v28 = vadd.f32 %v1527_v6, %v1389_v46 }
 0x304   : > { %v11999_v15 = vmul.f32 %v11656_v18, %v11918_v20  ;;  %v1035_v62 = vmul.f32 %v11695_v48, %v11925_v63  ;;  %v1288_v1 = vrot.slane %v1186_v45, 1  ;;  %v1112_v14 = vpop.permute.xlu1 %1111  ;;  %v1635_v17 = vadd.f32 %v1529_v41, %v1390_v10 }
 0x305   : > { %v1848_v57 = vsel %vm1274_vm3, %v1846_v16, %v1847_v7  ;;  %v12006_v11 = vmul.f32 %v11664_v21, %v11963_v52  ;;  %v1854_v8 = vrot.slane %v1755_v39, 1  ;;  %v12008_v33 = vadd.f32 %v1850_v24, %v1710_v58 }
 0x306   : > { %v17478_v6 = vrot.slane %v11961_v55, 2  ;;  %v17128_v53 = vrot.slane %v11986_v5, 1  ;;  %v1431_v45 = vmul.f32 %v11668_v22, %v1107_v37  ;;  %v12019_v41 = vmul.f32 %v11668_v22, %v11963_v52 }
 0x307   : > { %17477 = vst [vmem:[#allocation57_spill] sm:$0xff] %v12006_v11  ;;  %v1680_v7 = vmul.f32 %v11737_v36, %v11925_v63  ;;  %v1999_v10 = vmul.f32 %v11660_v19, %v1107_v37  ;;  %v12027_v58 = vmul.f32 %v11695_v48, %v11963_v52  ;;  %v12035_v39 = vmul.f32 %v11668_v22, %v11925_v63 }
 0x308   : > { %v12013_v46 = vsel %vm1519_vm4, %v17478_v6, %v2093_v26  ;;  %17479 = vst [vmem:[#allocation58_spill] sm:$0xff] %v12019_v41  ;;  %v12031_v26 = vmul.f32 %v11656_v18, %v11963_v52  ;;  %v1289_v24 = vsel %vm1274_vm3, %v17128_v53, %v1288_v1  ;;  %v12040_v6 = vpop.permute.xlu0 %915  ;;  %v12045_v47 = vmul.f32 %v11660_v19, %v11925_v63  ;;  %v12057_v53 = vpop.permute.xlu1 %924 }
 0x309   : > { %17480 = vst [vmem:[#allocation59_spill] sm:$0xff] %v12027_v58  ;;  %v1712_v40 = vadd.f32 %v1680_v7, %v1635_v17  ;;  %v17481_v31 = vrot.slane %v11993_v3, 1  ;;  %v1533_v29 = vrot.slane %v1431_v45, 2  ;;  %v12051_v34 = vmul.f32 %v11747_v44, %v1107_v37 }
 0x30a   : > { %v12054_v49 = vmul.f32 %v11779_v42, %v1107_v37  ;;  %v1189_v1 = vmul.f32 %v11664_v21, %v1112_v14  ;;  %v1392_v7 = vadd.f32 %v1289_v24, %v1035_v62  ;;  %v2098_v16 = vrot.slane %v1999_v10, 2 }
 0x30b   : > { %v1855_v23 = vsel %vm1274_vm3, %v17481_v31, %v1854_v8  ;;  %v1434_v32 = vmul.f32 %v11668_v22, %v1112_v14  ;;  %v17133_v4 = vrot.slane %v12035_v39, 2  ;;  %v12063_v8 = vmul.f32 %v11656_v18, %v1112_v14 }
 0x30c   : > { %v1961_v31 = vadd.f32 %v1855_v23, %v1712_v40  ;;  %v12067_v37 = vmul.f32 %v11664_v21, %v12040_v6  ;;  %v12071_v38 = vmul.f32 %v11660_v19, %v1112_v14  ;;  %v12074_v62 = vmul.f32 %v11747_v44, %v1112_v14  ;;  %v12084_v27 = vpop.permute.xlu0 %920 }
 0x30d   : > { %v12077_v10 = vmul.f32 %v11779_v42, %v1112_v14  ;;  %v1534_v23 = vsel %vm1519_vm4, %v17133_v4, %v1533_v29  ;;  %v1293_v17 = vrot.slane %v1189_v1, 1  ;;  %v17482_v51 = vrot.slane %v12045_v47, 2 }
 0x30e   : > { %v12086_v45 = vadd.f32 %v1534_v23, %v1392_v7  ;;  %v1538_v35 = vrot.slane %v1434_v32, 2  ;;  %v12093_v14 = vmul.f32 %v11668_v22, %v12040_v6  ;;  %v1037_v1 = vmul.f32 %v11695_v48, %v12040_v6  ;;  %v12101_v7 = vpop.permute.xlu1 %929 }
 0x30f   : > { %v2099_v61 = vsel %vm1519_vm4, %v17482_v51, %v2098_v16  ;;  %17484 = vst [vmem:[#allocation61_spill] sm:$0xff] %v12101_v7  ;;  %v12108_v16 = vmul.f32 %v11664_v21, %v12084_v27  ;;  %v12120_v29 = vmul.f32 %v11668_v22, %v12084_v27  ;;  %v1958_v23 = vadd.f32 %v1848_v57, %v11948_v13 }
 0x310   : > { %17483 = vst [vmem:[#allocation60_spill] sm:$0xff] %v12093_v14  ;;  %v12095_v2 = vadd.f32 %v2099_v61, %v1961_v31  ;;  %v12112_v61 = vmul.f32 %v11737_v36, %v12040_v6  ;;  %v12116_v31 = vmul.f32 %v11656_v18, %v12040_v6  ;;  %v12126_v51 = vmul.f32 %v11695_v48, %v12084_v27 }
 0x311   : > { %17485 = vst [vmem:[#allocation62_spill] sm:$0xff] %v12108_v16  ;;  %17486 = vst [vmem:[#allocation63_spill] sm:$0xff] %v12120_v29  ;;  %v12130_v24 = vmul.f32 %v11656_v18, %v12084_v27  ;;  %v12134_v40 = vmul.f32 %v11695_v48, %v12101_v7  ;;  %v12138_v4 = vmul.f32 %v11664_v21, %v12101_v7  ;;  %v17492_v57 = vrot.slane %v12067_v37, 1 }
 0x312   : > { %17487 = vst [vmem:[#allocation64_spill] sm:$0xff] %v12126_v51  ;;  %v12142_v13 = vmul.f32 %v11668_v22, %v12101_v7  ;;  %v17493_v0 = vrot.slane %v11961_v55, 2  ;;  %v17494_v50 = vrot.slane %v11923_v9, 2  ;;  %v2238_v30 = vmul.f32 %v11860_v25, %v11918_v20  ;;  %v12168_v9 = vpop.permute.xlu0 %1116 }
 0x313   : > { %17488 = vst [vmem:[#allocation65_spill] sm:$0xff] %v12130_v24  ;;  %17489 = vst [vmem:[#allocation66_spill] sm:$0xff] %v12134_v40  ;;  %v1294_v32 = vsel %vm1274_vm3, %v17492_v57, %v1293_v17  ;;  %v2306_v40 = vmul.f32 %v11747_v44, %v11918_v20  ;;  %v2307_v17 = vmul.f32 %v11747_v44, %v11925_v63 }
 0x314   : > { %17490 = vst [vmem:[#allocation67_spill] sm:$0xff] %v12138_v4  ;;  %17491 = vst [vmem:[#allocation68_spill] sm:$0xff] %v12142_v13  ;;  %v2092_v56 = vsel %vm1519_vm4, %v17494_v50, %v17493_v0  ;;  %v2550_v55 = vmul.f32 %v11779_v42, %v11918_v20  ;;  %v2551_v0 = vmul.f32 %v11779_v42, %v11925_v63 }
 0x315   : > { %v2202_v54 = vadd.f32 %v2092_v56, %v1958_v23  ;;  %v12166_v56 = vmul.f32 %v11656_v18, %v12101_v7  ;;  %v1394_v50 = vadd.f32 %v1294_v32, %v1037_v1  ;;  %v2402_v57 = vrot.slane %v2306_v40, 1 }
 0x316   : > { %v12172_v51 = vmul.f32 %v11664_v21, %v12057_v53  ;;  %v2403_v59 = vrot.slane %v2307_v17, 1  ;;  %v2646_v29 = vrot.slane %v2550_v55, 2  ;;  %v2647_v16 = vrot.slane %v2551_v0, 2 }
 0x317   : > { %17495 = vst [vmem:[#allocation69_spill] sm:$0xff] %v12166_v56  ;;  %v2270_v23 = vadd.f32 %v2238_v30, %v2202_v54  ;;  %v1039_v41 = vmul.f32 %v11695_v48, %v12057_v53  ;;  %v12179_v56 = vmul.f32 %v11668_v22, %v12057_v53  ;;  %v17496_v1 = vrot.slane %v12093_v14, 2 }
 0x318   : > { %v12186_v54 = vmul.f32 %v11656_v18, %v12057_v53  ;;  %v12190_v40 = vmul.f32 %v11660_v19, %v12057_v53  ;;  %v1192_v32 = vmul.f32 %v11664_v21, %v12168_v9  ;;  %v2404_v17 = vsel %vm1274_vm3, %v2402_v57, %v2403_v59  ;;  %v12207_v57 = vld [vmem:[%s17082_s4] ss:$0 sm:$0xff] }
 0x319   : > { %v1539_v30 = vsel %vm1519_vm4, %v17496_v1, %v1538_v35  ;;  %v1684_v24 = vmul.f32 %v11737_v36, %v12057_v53  ;;  %v2514_v35 = vadd.f32 %v2404_v17, %v2270_v23  ;;  %v1437_v4 = vmul.f32 %v11668_v22, %v12168_v9 }
 0x31a   : > { %v1639_v0 = vadd.f32 %v1539_v30, %v1394_v50  ;;  %v1761_v7 = vmul.f32 %v11656_v18, %v12168_v9  ;;  %v2648_v14 = vsel %vm1519_vm4, %v2646_v29, %v2647_v16  ;;  %v2203_v23 = vadd.f32 %v12013_v46, %v12008_v33 }
 0x31b   : > { %v2758_v30 = vadd.f32 %v2648_v14, %v2514_v35  ;;  %v2239_v17 = vmul.f32 %v11860_v25, %v11925_v63  ;;  %v1298_v13 = vrot.slane %v1192_v32, 1  ;;  %v17497_v29 = vrot.slane %v12051_v34, 1 }
 0x31c   : > { %v1716_v11 = vadd.f32 %v1684_v24, %v1639_v0  ;;  %v12221_v50 = vmul.f32 %v11660_v19, %v12168_v9  ;;  %v1543_v46 = vrot.slane %v1437_v4, 2  ;;  %v1864_v35 = vrot.slane %v1761_v7, 1 }
 0x31d   : > { %v2406_v58 = vsel %vm1274_vm3, %v2403_v59, %v17497_v29  ;;  %v2797_v14 = vadd.f32 %v12207_v57, %v2758_v30  ;;  %v2271_v33 = vadd.f32 %v2239_v17, %v2203_v23  ;;  %v1679_v63 = vmul.f32 %v11737_v36, %v11918_v20 }
 0x31e   : > { %v1851_v1 = vrot.slane %v11999_v15, 1  ;;  %v12229_v34 = vmul.f32 %v11747_v44, %v12168_v9  ;;  %v1997_v32 = vmul.f32 %v11660_v19, %v11918_v20  ;;  %v17498_v0 = vrot.slane %v12172_v51, 1 }
 0x31f   : > { %v2829_v59 = vmax.f32 %v2797_v14, 0.0  ;;  %v2515_v24 = vadd.f32 %v2406_v58, %v2271_v33  ;;  %v17499_v4 = vrot.slane %v12054_v49, 2  ;;  %v1711_v23 = vadd.f32 %v1679_v63, %v11995_v28 }
 0x320   : > { %v1299_v30 = vsel %vm1274_vm3, %v17498_v0, %v1298_v13  ;;  %v17500_v15 = vrot.slane %v11993_v3, 1  ;;  %v2095_v58 = vrot.slane %v1997_v32, 2  ;;  %v2309_v20 = vmul.f32 %v11747_v44, %v11963_v52 }
 0x321   : > { %v2650_v7 = vsel %vm1519_vm4, %v2647_v16, %v17499_v4  ;;  %v2893_v29 = vrot.slane %v2829_v59, 7  ;;  %v2108_v33 = vrot.slane %v12221_v50, 2  ;;  %v2310_v49 = vmul.f32 %v11747_v44, %v12040_v6  ;;  %v1122_v4 = vpop.permute.xlu1 %1121 }
 0x322   : > { %v1853_v17 = vsel %vm1274_vm3, %v1851_v1, %v17500_v15  ;;  %v2759_v14 = vadd.f32 %v2650_v7, %v2515_v24  ;;  %v2554_v16 = vmul.f32 %v11779_v42, %v12040_v6  ;;  %v17502_v13 = vrot.slane %v12045_v47, 2 }
 0x323   : > { %v1960_v55 = vadd.f32 %v1853_v17, %v1711_v23  ;;  %v12251_v28 = vsel %vm762_vm1, 0.0, %v2893_v29  ;;  %v2553_v63 = vmul.f32 %v11779_v42, %v11963_v52  ;;  %v2240_v59 = vmul.f32 %v11860_v25, %v11963_v52 }
 0x324   : > { %17501 = vst [vmem:[#allocation70_spill] sm:$0xff] %v12251_v28  ;;  %v2798_v3 = vadd.f32 %v12207_v57, %v2759_v14  ;;  %v2097_v1 = vsel %vm1519_vm4, %v2095_v58, %v17502_v13  ;;  %10118 = vmatprep.mubr.msk.f32.mxu1 %vm3118_vm2, %v12251_v28  ;;  %v2407_v24 = vrot.slane %v2309_v20, 1  ;;  %v2408_v32 = vrot.slane %v2310_v49, 1 }
 0x325   : > { %v2204_v50 = vadd.f32 %v2097_v1, %v1960_v55  ;;  %v12265_v0 = vmul.f32 %v11779_v42, %v12168_v9  ;;  %v2652_v7 = vrot.slane %v2554_v16, 2  ;;  %v2241_v23 = vmul.f32 %v11860_v25, %v12040_v6 }
 0x326   : > { %v2830_v47 = vmax.f32 %v2798_v3, 0.0  ;;  %v1396_v15 = vadd.f32 %v1299_v30, %v1039_v41  ;;  %v17503_v17 = vrot.slane %v12179_v56, 2  ;;  %v2409_v58 = vsel %vm1274_vm3, %v2407_v24, %v2408_v32  ;;  %v12279_v41 = vpop.permute.xlu0 %933 }
 0x327   : > { %v2272_v14 = vadd.f32 %v2240_v59, %v2204_v50  ;;  %v17504_v20 = vrot.slane %v12186_v54, 1  ;;  %v2651_v13 = vrot.slane %v2553_v63, 2  ;;  %v2273_v3 = vadd.f32 %v2241_v23, %v12095_v2 }
 0x328   : > { %v1544_v55 = vsel %vm1519_vm4, %v17503_v17, %v1543_v46  ;;  %v2894_v9 = vrot.slane %v2830_v47, 7  ;;  %v3041_v1 = vrot.slane %v12251_v28, 1  ;;  %v17505_v46 = vrot.slane %v12074_v62, 1 }
 0x329   : > { %v1865_v49 = vsel %vm1274_vm3, %v17504_v20, %v1864_v35  ;;  %v2516_v30 = vadd.f32 %v2409_v58, %v2272_v14  ;;  %v2653_v63 = vsel %vm1519_vm4, %v2651_v13, %v2652_v7  ;;  %v17508_v62 = vrot.slane %v12077_v10, 2  ;;  %v12302_v58 = vpop.permute.xlu1 %942 }
 0x32a   : > { %v2411_v50 = vsel %vm1274_vm3, %v2408_v32, %v17505_v46  ;;  %v12285_v59 = vsel %vm762_vm1, %v2893_v29, %v2894_v9  ;;  %v12288_v35 = vsel %vm762_vm1, %v2894_v9, 0.0  ;;  %v1965_v29 = vadd.f32 %v1865_v49, %v1716_v11 }
 0x32b   : > { %17506 = vst [vmem:[#allocation71_spill] sm:$0xff] %v12285_v59  ;;  %17507 = vst [vmem:[#allocation72_spill] sm:$0xff] %v12288_v35  ;;  %v2517_v2 = vadd.f32 %v2411_v50, %v2273_v3  ;;  %v3042_v24 = vrot.slane %v12285_v59, 1  ;;  %10119 = vmatmul.mubr.msk.f32.gmra.mxu1 %vm3118_vm2, %v12285_v59  ;;  %v3044_v47 = vrot.slane %v12288_v35, 1  ;;  %v2760_v23 = vadd.f32 %v2653_v63, %v2516_v30 }
 0x32c   : > { %v2655_v32 = vsel %vm1519_vm4, %v2652_v7, %v17508_v62  ;;  %v1195_v17 = vmul.f32 %v11664_v21, %v1122_v4  ;;  %v12300_v14 = vmul.f32 %v11668_v22, %v1122_v4  ;;  %v12305_v9 = vmul.f32 %v11656_v18, %v1122_v4 }
 0x32d   : > { %v2761_v20 = vadd.f32 %v2655_v32, %v2517_v2  ;;  %v12308_v13 = vsel %vm1274_vm3, %v3041_v1, %v3042_v24  ;;  %v12311_v3 = vsel %vm1274_vm3, %v3042_v24, %v3044_v47  ;;  %v2799_v10 = vadd.f32 %v12207_v57, %v2760_v23  ;;  %v12332_v2 = vpop.permute.xlu0 %938 }
 0x32e   : > { %17509 = vst [vmem:[#allocation73_spill] sm:$0xff] %v12308_v13  ;;  %17510 = vst [vmem:[#allocation74_spill] sm:$0xff] %v12311_v3  ;;  %v17511_v11 = vrot.slane %v12190_v40, 2  ;;  %v12319_v30 = vmul.f32 %v11660_v19, %v1122_v4  ;;  %10068 = vmatprep.mubr.msk.f32.mxu0 %vm3118_vm2, %v12308_v13  ;;  %v12324_v46 = vadd.f32 %v1544_v55, %v1396_v15  ;;  %v1303_v47 = vrot.slane %v1195_v17, 1 }
 0x32f   : > { %v2800_v1 = vadd.f32 %v12207_v57, %v2761_v20  ;;  %v12327_v50 = vmul.f32 %v11747_v44, %v1122_v4  ;;  %v12330_v63 = vmul.f32 %v11779_v42, %v1122_v4  ;;  %10069 = vmatmul.mubr.msk.f32.gmra.mxu0 %vm3118_vm2, %v12311_v3  ;;  %v12340_v23 = vmul.f32 %v11664_v21, %v12279_v41 }
 0x330   : > { %v2109_v7 = vsel %vm1519_vm4, %v17511_v11, %v2108_v33  ;;  %17512 = vst [vmem:[#allocation75_spill] sm:$0xff] %v12319_v30  ;;  %v2831_v33 = vmax.f32 %v2799_v10, 0.0  ;;  %v1548_v55 = vrot.slane %v12300_v14, 2  ;;  %v12346_v4 = vmul.f32 %v11668_v22, %v12279_v41  ;;  %v12357_v11 = vpop.permute.xlu1 %947 }
 0x331   : > { %v12336_v24 = vadd.f32 %v2109_v7, %v1965_v29  ;;  %17513 = vst [vmem:[#allocation76_spill] sm:$0xff] %v12340_v23  ;;  %v2832_v15 = vmax.f32 %v2800_v1, 0.0  ;;  %v12351_v29 = vmul.f32 %v11664_v21, %v12332_v2  ;;  %v12355_v17 = vmul.f32 %v11668_v22, %v12332_v2  ;;  %17517 = vst [vmem:[#allocation80_spill] sm:$0xff] %v12357_v11 }
 0x332   : > { %17514 = vst [vmem:[#allocation77_spill] sm:$0xff] %v12346_v4  ;;  %v2896_v32 = vrot.slane %v2831_v33, 7  ;;  %v1041_v1 = vmul.f32 %v11695_v48, %v12279_v41  ;;  %v12369_v62 = vmul.f32 %v11737_v36, %v12279_v41  ;;  %v12383_v49 = vmul.f32 %v11695_v48, %v12332_v2 }
 0x333   : > { %17515 = vst [vmem:[#allocation78_spill] sm:$0xff] %v12351_v29  ;;  %17516 = vst [vmem:[#allocation79_spill] sm:$0xff] %v12355_v17  ;;  %v2897_v10 = vrot.slane %v2832_v15, 7  ;;  %v12373_v15 = vmul.f32 %v11656_v18, %v12279_v41  ;;  %v12387_v16 = vmul.f32 %v11656_v18, %v12332_v2  ;;  %v12393_v20 = vmul.f32 %v11664_v21, %v12357_v11 }
 0x334   : > { %v12364_v33 = vsel %vm762_vm1, 0.0, %v2896_v32  ;;  %17520 = vst [vmem:[#allocation83_spill] sm:$0xff] %v12383_v49  ;;  %v12399_v14 = vmul.f32 %v11695_v48, %v12357_v11  ;;  %v12403_v13 = vmul.f32 %v11668_v22, %v12357_v11  ;;  %v12407_v35 = vmul.f32 %v11656_v18, %v12357_v11 }
 0x335   : > { %17518 = vst [vmem:[#allocation81_spill] sm:$0xff] %v12364_v33  ;;  %10121 = vmatprep.mubr.msk.f32.mxu1 %vm3118_vm2, %v12364_v33  ;;  %v12378_v7 = vsel %vm762_vm1, %v2896_v32, %v2897_v10  ;;  %17521 = vst [vmem:[#allocation84_spill] sm:$0xff] %v12387_v16  ;;  %v3046_v59 = vrot.slane %v12364_v33, 1  ;;  %v12412_v32 = vsel %vm762_vm1, %v2897_v10, 0.0  ;;  %v12416_v3 = vmul.f32 %v11695_v48, %v12302_v58 }
 0x336   : > { %17519 = vst [vmem:[#allocation82_spill] sm:$0xff] %v12378_v7  ;;  %10122 = vmatmul.mubr.msk.f32.gmra.mxu1 %vm3118_vm2, %v12378_v7  ;;  %17522 = vst [vmem:[#allocation85_spill] sm:$0xff] %v12393_v20  ;;  %v3047_v28 = vrot.slane %v12378_v7, 1  ;;  %v3049_v49 = vrot.slane %v12412_v32, 1  ;;  %v17528_v29 = vrot.slane %v11986_v5, 1  ;;  %v17531_v16 = vrot.slane %v12035_v39, 2 }
 0x337   : > { %17523 = vst [vmem:[#allocation86_spill] sm:$0xff] %v12399_v14  ;;  %17524 = vst [vmem:[#allocation87_spill] sm:$0xff] %v12403_v13  ;;  %v17527_v14 = vrot.slane %v12340_v23, 1  ;;  %v17532_v23 = vrot.slane %v11971_v43, 2  ;;  %v1856_v5 = vrot.slane %v12031_v26, 1  ;;  %v1681_v39 = vmul.f32 %v11737_v36, %v11963_v52 }
 0x338   : > { %17525 = vst [vmem:[#allocation88_spill] sm:$0xff] %v12407_v35  ;;  %17526 = vst [vmem:[#allocation89_spill] sm:$0xff] %v12412_v32  ;;  %v17529_v35 = vrot.slane %v11967_v12, 1  ;;  %v12429_v10 = vsel %vm1274_vm3, %v3046_v59, %v3047_v28  ;;  %v12440_v12 = vsel %vm1274_vm3, %v3047_v28, %v3049_v49  ;;  %v2000_v59 = vmul.f32 %v11660_v19, %v11963_v52  ;;  %v1127_v49 = vpop.permute.xlu0 %1126 }
 0x339   : > { %v1304_v17 = vsel %vm1274_vm3, %v17527_v14, %v1303_v47  ;;  %17530 = vst [vmem:[#allocation90_spill] sm:$0xff] %v12429_v10  ;;  %v1532_v47 = vsel %vm1519_vm4, %v17532_v23, %v17531_v16  ;;  %10071 = vmatprep.mubr.msk.f32.mxu0 %vm3118_vm2, %v12429_v10  ;;  %17533 = vst [vmem:[#allocation91_spill] sm:$0xff] %v12440_v12  ;;  %v2001_v16 = vmul.f32 %v11660_v19, %v12040_v6 }
 0x33a   : > { %v1287_v33 = vsel %vm1274_vm3, %v17529_v35, %v17528_v29  ;;  %v1857_v35 = vrot.slane %v12116_v31, 1  ;;  %10072 = vmatmul.mubr.msk.f32.gmra.mxu0 %vm3118_vm2, %v12440_v12  ;;  %v2312_v31 = vmul.f32 %v11747_v44, %v12084_v27  ;;  %v2313_v23 = vmul.f32 %v11747_v44, %v12057_v53 }
 0x33b   : > { %v1391_v11 = vadd.f32 %v1287_v33, %v11978_v60  ;;  %v1398_v60 = vadd.f32 %v1304_v17, %v1041_v1  ;;  %v12460_v29 = vmul.f32 %v11664_v21, %v12302_v58  ;;  %v12464_v52 = vmul.f32 %v11668_v22, %v12302_v58 }
 0x33c   : > { %v1858_v26 = vsel %vm1274_vm3, %v1856_v5, %v1857_v35  ;;  %v2101_v17 = vrot.slane %v2001_v16, 2  ;;  %v2100_v1 = vrot.slane %v2000_v59, 2  ;;  %v2556_v33 = vmul.f32 %v11779_v42, %v12084_v27 }
 0x33d   : > { %v1636_v43 = vadd.f32 %v1532_v47, %v1391_v11  ;;  %v17534_v11 = vrot.slane %v12346_v4, 2  ;;  %v2557_v47 = vmul.f32 %v11779_v42, %v12057_v53  ;;  %v12475_v28 = vmul.f32 %v11656_v18, %v12302_v58 }
 0x33e   : > { %v1198_v7 = vmul.f32 %v11664_v21, %v1127_v49  ;;  %v2102_v16 = vsel %vm1519_vm4, %v2100_v1, %v2101_v17  ;;  %v2413_v59 = vrot.slane %v2313_v23, 1  ;;  %v12483_v12 = vmul.f32 %v11660_v19, %v12302_v58 }
 0x33f   : > { %v1713_v6 = vadd.f32 %v1681_v39, %v1636_v43  ;;  %v1549_v14 = vsel %vm1519_vm4, %v17534_v11, %v1548_v55  ;;  %v1443_v39 = vmul.f32 %v11668_v22, %v1127_v49  ;;  %v2412_v55 = vrot.slane %v2312_v31, 1 }
 0x340   : > { %v1643_v5 = vadd.f32 %v1549_v14, %v1398_v60  ;;  %v2242_v14 = vmul.f32 %v11860_v25, %v12084_v27  ;;  %v1688_v10 = vmul.f32 %v11737_v36, %v12302_v58  ;;  %v2657_v32 = vrot.slane %v2557_v47, 2 }
 0x341   : > { %v1962_v43 = vadd.f32 %v1858_v26, %v1713_v6  ;;  %v1767_v26 = vmul.f32 %v11656_v18, %v1127_v49  ;;  %v2656_v6 = vrot.slane %v2556_v33, 2  ;;  %v1308_v1 = vrot.slane %v1198_v7, 1 }
 0x342   : > { %v12492_v13 = vadd.f32 %v1688_v10, %v1643_v5  ;;  %v1553_v20 = vrot.slane %v1443_v39, 2  ;;  %v17168_v4 = vrot.slane %v12483_v12, 2  ;;  %v2011_v30 = vmul.f32 %v11660_v19, %v1127_v49 }
 0x343   : > { %v2206_v60 = vadd.f32 %v2102_v16, %v1962_v43  ;;  %v2414_v43 = vsel %vm1274_vm3, %v2412_v55, %v2413_v59  ;;  %v1714_v16 = vadd.f32 %v12112_v61, %v12086_v45  ;;  %v17535_v47 = vrot.slane %v12063_v8, 1 }
 0x344   : > { %v1874_v23 = vrot.slane %v1767_v26, 1  ;;  %v12503_v7 = vmul.f32 %v11747_v44, %v1127_v49  ;;  %v2658_v10 = vsel %vm1519_vm4, %v2656_v6, %v2657_v32  ;;  %v17536_v39 = vrot.slane %v12460_v29, 1 }
 0x345   : > { %v2274_v11 = vadd.f32 %v2242_v14, %v2206_v60  ;;  %v1860_v31 = vsel %vm1274_vm3, %v1857_v35, %v17535_v47  ;;  %v12510_v61 = vmul.f32 %v11779_v42, %v1127_v49  ;;  %v17538_v35 = vrot.slane %v12464_v52, 2 }
 0x346   : > { %v1963_v5 = vadd.f32 %v1860_v31, %v1714_v16  ;;  %v1309_v45 = vsel %vm1274_vm3, %v17536_v39, %v1308_v1  ;;  %v2243_v26 = vmul.f32 %v11860_v25, %v12057_v53  ;;  %v17539_v6 = vrot.slane %v12067_v37, 1  ;;  %v17540_v31 = vld [vmem:[#allocation57_spill] sm:$0xff]  ;;  %v17546_v39 = vld [vmem:[#allocation58_spill] sm:$0xff] }
 0x347   : > { %v2518_v33 = vadd.f32 %v2414_v43, %v2274_v11  ;;  %v17537_v11 = vrot.slane %v12071_v38, 2  ;;  %v12518_v60 = vsel %vm1519_vm4, %v17538_v35, %v1553_v20  ;;  %v17541_v1 = vrot.slane %v17540_v31, 1 }
 0x348   : > { %v2118_v43 = vrot.slane %v2011_v30, 2  ;;  %v17547_v53 = vrot.slane %v17546_v39, 2  ;;  %v2003_v30 = vmul.f32 %v11660_v19, %v12084_v27  ;;  %v1132_v39 = vpop.permute.xlu1 %1131 }
 0x349   : > { %v2762_v55 = vadd.f32 %v2658_v10, %v2518_v33  ;;  %v2104_v8 = vsel %vm1519_vm4, %v2101_v17, %v17537_v11  ;;  %v1292_v49 = vsel %vm1274_vm3, %v17541_v1, %v17539_v6  ;;  %v17542_v17 = vrot.slane %v12229_v34, 1  ;;  %v17543_v33 = vld [vmem:[#allocation59_spill] sm:$0xff]  ;;  %v17544_v10 = vld [vmem:[#allocation60_spill] sm:$0xff]  ;;  %v17548_v11 = vld [vmem:[#allocation65_spill] sm:$0xff] }
 0x34a   : > { %v2207_v14 = vadd.f32 %v2104_v8, %v1963_v5  ;;  %v1393_v20 = vadd.f32 %v1292_v49, %v17543_v33  ;;  %v17545_v5 = vrot.slane %v17544_v10, 2  ;;  %v1861_v8 = vrot.slane %v17548_v11, 1 }
 0x34b   : > { %v2801_v38 = vadd.f32 %v12207_v57, %v2762_v55  ;;  %v2416_v16 = vsel %vm1274_vm3, %v2413_v59, %v17542_v17  ;;  %v1683_v34 = vmul.f32 %v11737_v36, %v12084_v27  ;;  %v17549_v59 = vld [vmem:[#allocation61_spill] sm:$0xff]  ;;  %v2105_v31 = vrot.slane %v2003_v30, 2 }
 0x34c   : > { %v2275_v47 = vadd.f32 %v2243_v26, %v2207_v14  ;;  %v1537_v37 = vsel %vm1519_vm4, %v17547_v53, %v17545_v5  ;;  %v2315_v6 = vmul.f32 %v11747_v44, %v17549_v59  ;;  %v1400_v14 = vadd.f32 %v1309_v45, %v12416_v3 }
 0x34d   : > { %v2833_v35 = vmax.f32 %v2801_v38, 0.0  ;;  %v1638_v55 = vadd.f32 %v1537_v37, %v1393_v20  ;;  %v2316_v1 = vmul.f32 %v11747_v44, %v12279_v41  ;;  %v17550_v49 = vrot.slane %v12475_v28, 1 }
 0x34e   : > { %v2519_v26 = vadd.f32 %v2416_v16, %v2275_v47  ;;  %v17551_v38 = vrot.slane %v12265_v0, 2  ;;  %v17552_v5 = vrot.slane %v12186_v54, 1  ;;  %v2560_v16 = vmul.f32 %v11779_v42, %v12279_v41 }
 0x34f   : > { %v1875_v17 = vsel %vm1274_vm3, %v17550_v49, %v1874_v23  ;;  %v2899_v33 = vrot.slane %v2833_v35, 7  ;;  %v1715_v27 = vadd.f32 %v1683_v34, %v1638_v55  ;;  %v2418_v45 = vrot.slane %v2316_v1, 1 }
 0x350   : > { %v2660_v20 = vsel %vm1519_vm4, %v2657_v32, %v17551_v38  ;;  %v1863_v3 = vsel %vm1274_vm3, %v1861_v8, %v17552_v5  ;;  %v2417_v53 = vrot.slane %v2315_v6, 1  ;;  %v2245_v0 = vmul.f32 %v11860_v25, %v12279_v41 }
 0x351   : > { %v2763_v10 = vadd.f32 %v2660_v20, %v2519_v26  ;;  %v12559_v47 = vsel %vm762_vm1, 0.0, %v2899_v33  ;;  %v1964_v23 = vadd.f32 %v1863_v3, %v1715_v27  ;;  %v17554_v32 = vrot.slane %v12190_v40, 2  ;;  %v12584_v20 = vpop.permute.xlu0 %951 }
 0x352   : > { %17553 = vst [vmem:[#allocation57_spill] sm:$0xff] %v12559_v47  ;;  %10124 = vmatprep.mubr.msk.f32.mxu1 %vm3118_vm2, %v12559_v47  ;;  %v2559_v11 = vmul.f32 %v11779_v42, %v17549_v59  ;;  %v2662_v8 = vrot.slane %v2560_v16, 2  ;;  %v2244_v55 = vmul.f32 %v11860_v25, %v17549_v59  ;;  %v2277_v34 = vadd.f32 %v2245_v0, %v12336_v24 }
 0x353   : > { %v2802_v54 = vadd.f32 %v12207_v57, %v2763_v10  ;;  %v2107_v37 = vsel %vm1519_vm4, %v2105_v31, %v17554_v32  ;;  %v2419_v1 = vsel %vm1274_vm3, %v2417_v53, %v2418_v45  ;;  %v17555_v40 = vrot.slane %v12327_v50, 1 }
 0x354   : > { %v2208_v35 = vadd.f32 %v2107_v37, %v1964_v23  ;;  %v1969_v49 = vadd.f32 %v1875_v17, %v12492_v13  ;;  %v2119_v38 = vsel %vm1519_vm4, %v17168_v4, %v2118_v43  ;;  %v12587_v24 = vmul.f32 %v11664_v21, %v1132_v39  ;;  %v12598_v43 = vpop.permute.xlu1 %960 }
 0x355   : > { %v2834_v26 = vmax.f32 %v2802_v54, 0.0  ;;  %v2421_v31 = vsel %vm1274_vm3, %v2418_v45, %v17555_v40  ;;  %v2661_v3 = vrot.slane %v2559_v11, 2  ;;  %v17556_v16 = vrot.slane %v12330_v63, 2 }
 0x356   : > { %v2276_v27 = vadd.f32 %v2244_v55, %v2208_v35  ;;  %v2521_v10 = vadd.f32 %v2421_v31, %v2277_v34  ;;  %v12593_v45 = vmul.f32 %v11668_v22, %v1132_v39  ;;  %v12596_v13 = vmul.f32 %v11656_v18, %v1132_v39 }
 0x357   : > { %v2900_v5 = vrot.slane %v2834_v26, 7  ;;  %v2665_v50 = vsel %vm1519_vm4, %v2662_v8, %v17556_v16  ;;  %v3051_v0 = vrot.slane %v12559_v47, 1  ;;  %v2663_v63 = vsel %vm1519_vm4, %v2661_v3, %v2662_v8  ;;  %v17580_v47 = vld [vmem:[#allocation64_spill] sm:$0xff] }
 0x358   : > { %v2520_v17 = vadd.f32 %v2419_v1, %v2276_v27  ;;  %v2765_v23 = vadd.f32 %v2665_v50, %v2521_v10  ;;  %v12617_v55 = vmul.f32 %v11660_v19, %v1132_v39  ;;  %v12620_v34 = vmul.f32 %v11747_v44, %v1132_v39  ;;  %v12628_v1 = vpop.permute.xlu0 %956 }
 0x359   : > { %v12601_v53 = vsel %vm762_vm1, %v2899_v33, %v2900_v5  ;;  %v12605_v54 = vsel %vm762_vm1, %v2900_v5, 0.0  ;;  %v12614_v33 = vadd.f32 %v12518_v60, %v1400_v14  ;;  %v12623_v8 = vmul.f32 %v11779_v42, %v1132_v39 }
 0x35a   : > { %17557 = vst [vmem:[#allocation59_spill] sm:$0xff] %v12601_v53  ;;  %17558 = vst [vmem:[#allocation60_spill] sm:$0xff] %v12605_v54  ;;  %10125 = vmatmul.mubr.msk.f32.gmra.mxu1 %vm3118_vm2, %v12601_v53  ;;  %v3052_v32 = vrot.slane %v12601_v53, 1  ;;  %v3054_v37 = vrot.slane %v12605_v54, 1  ;;  %v2764_v11 = vadd.f32 %v2663_v63, %v2520_v17  ;;  %v2804_v35 = vadd.f32 %v12207_v57, %v2765_v23 }
 0x35b   : > { %v12634_v31 = vadd.f32 %v2119_v38, %v1969_v49  ;;  %v1313_v27 = vrot.slane %v12587_v24, 1  ;;  %v12639_v10 = vmul.f32 %v11664_v21, %v12584_v20  ;;  %v12643_v42 = vmul.f32 %v11668_v22, %v12584_v20  ;;  %v12651_v24 = vpop.permute.xlu1 %983 }
 0x35c   : > { %v12626_v26 = vsel %vm1274_vm3, %v3051_v0, %v3052_v32  ;;  %v12631_v40 = vsel %vm1274_vm3, %v3052_v32, %v3054_v37  ;;  %v2803_v60 = vadd.f32 %v12207_v57, %v2764_v11  ;;  %v2836_v14 = vmax.f32 %v2804_v35, 0.0  ;;  %17563 = vst [vmem:[#allocation93_spill] sm:$0xff] %v12651_v24 }
 0x35d   : > { %17559 = vst [vmem:[#allocation58_spill] sm:$0xff] %v12626_v26  ;;  %17560 = vst [vmem:[#allocation65_spill] sm:$0xff] %v12631_v40  ;;  %10074 = vmatprep.mubr.msk.f32.mxu0 %vm3118_vm2, %v12626_v26  ;;  %v1045_v16 = vmul.f32 %v11695_v48, %v12584_v20  ;;  %v12658_v50 = vmul.f32 %v11664_v21, %v12628_v1  ;;  %v12662_v17 = vmul.f32 %v11668_v22, %v12628_v1 }
 0x35e   : > { %17561 = vst [vmem:[#allocation61_spill] sm:$0xff] %v12639_v10  ;;  %17562 = vst [vmem:[#allocation92_spill] sm:$0xff] %v12643_v42  ;;  %10075 = vmatmul.mubr.msk.f32.gmra.mxu0 %vm3118_vm2, %v12631_v40  ;;  %v2835_v49 = vmax.f32 %v2803_v60, 0.0  ;;  %v2903_v38 = vrot.slane %v2836_v14, 7  ;;  %v12668_v63 = vmul.f32 %v11737_v36, %v12584_v20  ;;  %v12674_v35 = vmul.f32 %v11656_v18, %v12584_v20  ;;  %v17576_v40 = vld [vmem:[#allocation62_spill] sm:$0xff] }
 0x35f   : > { %17564 = vst [vmem:[#allocation94_spill] sm:$0xff] %v12658_v50  ;;  %17565 = vst [vmem:[#allocation95_spill] sm:$0xff] %v12662_v17  ;;  %v12678_v60 = vmul.f32 %v11664_v21, %v12651_v24  ;;  %v12682_v14 = vmul.f32 %v11695_v48, %v12628_v1  ;;  %v12697_v4 = vmul.f32 %v11656_v18, %v12628_v1  ;;  %v17575_v37 = vrot.slane %v12172_v51, 1 }
 0x360   : > { %v2902_v32 = vrot.slane %v2835_v49, 7  ;;  %v12691_v5 = vsel %vm762_vm1, %v2903_v38, 0.0  ;;  %v12703_v6 = vmul.f32 %v11695_v48, %v12651_v24  ;;  %v12720_v11 = vmul.f32 %v11695_v48, %v12598_v43 }
 0x361   : > { %17566 = vst [vmem:[#allocation96_spill] sm:$0xff] %v12678_v60  ;;  %17567 = vst [vmem:[#allocation97_spill] sm:$0xff] %v12682_v14  ;;  %v3059_v39 = vrot.slane %v12691_v5, 1  ;;  %v17577_v26 = vrot.slane %v17576_v40, 1  ;;  %v12730_v53 = vmul.f32 %v11664_v21, %v12598_v43  ;;  %v17583_v40 = vld [vmem:[#allocation63_spill] sm:$0xff]  ;;  %v17585_v60 = vld [vmem:[#allocation69_spill] sm:$0xff] }
 0x362   : > { %v12685_v3 = vsel %vm762_vm1, 0.0, %v2902_v32  ;;  %v12688_v49 = vsel %vm762_vm1, %v2902_v32, %v2903_v38  ;;  %17570 = vst [vmem:[#allocation100_spill] sm:$0xff] %v12691_v5  ;;  %17571 = vst [vmem:[#allocation101_spill] sm:$0xff] %v12697_v4  ;;  %v12709_v38 = vmul.f32 %v11668_v22, %v12651_v24  ;;  %v12713_v32 = vmul.f32 %v11656_v18, %v12651_v24 }
 0x363   : > { %17568 = vst [vmem:[#allocation98_spill] sm:$0xff] %v12685_v3  ;;  %17569 = vst [vmem:[#allocation99_spill] sm:$0xff] %v12688_v49  ;;  %10127 = vmatprep.mubr.msk.f32.mxu1 %vm3118_vm2, %v12685_v3  ;;  %v3056_v23 = vrot.slane %v12685_v3, 1  ;;  %v3057_v0 = vrot.slane %v12688_v49, 1  ;;  %v1297_v54 = vsel %vm1274_vm3, %v17577_v26, %v17575_v37  ;;  %v17582_v26 = vrot.slane %v12179_v56, 2 }
 0x364   : > { %17572 = vst [vmem:[#allocation102_spill] sm:$0xff] %v12703_v6  ;;  %10128 = vmatmul.mubr.msk.f32.gmra.mxu1 %vm3118_vm2, %v12688_v49  ;;  %17573 = vst [vmem:[#allocation103_spill] sm:$0xff] %v12709_v38  ;;  %v17578_v49 = vrot.slane %v12639_v10, 1  ;;  %v1395_v6 = vadd.f32 %v1297_v54, %v17580_v47  ;;  %v17584_v37 = vrot.slane %v17583_v40, 2  ;;  %v1685_v54 = vmul.f32 %v11737_v36, %v17549_v59 }
 0x365   : > { %17574 = vst [vmem:[#allocation104_spill] sm:$0xff] %v12713_v32  ;;  %v12736_v3 = vsel %vm1274_vm3, %v3056_v23, %v3057_v0  ;;  %v12742_v51 = vsel %vm1274_vm3, %v3057_v0, %v3059_v39  ;;  %v1866_v32 = vrot.slane %v17585_v60, 1  ;;  %v2006_v39 = vmul.f32 %v11660_v19, %v17549_v59  ;;  %v1137_v0 = vpop.permute.xlu0 %1136 }
 0x366   : > { %v1314_v30 = vsel %vm1274_vm3, %v17578_v49, %v1313_v27  ;;  %17579 = vst [vmem:[#allocation62_spill] sm:$0xff] %v12736_v3  ;;  %10077 = vmatprep.mubr.msk.f32.mxu0 %vm3118_vm2, %v12736_v3  ;;  %17581 = vst [vmem:[#allocation64_spill] sm:$0xff] %v12742_v51  ;;  %v1542_v5 = vsel %vm1519_vm4, %v17584_v37, %v17582_v26  ;;  %v1867_v27 = vrot.slane %v12373_v15, 1  ;;  %v17586_v37 = vrot.slane %v12593_v45, 2 }
 0x367   : > { %10078 = vmatmul.mubr.msk.f32.gmra.mxu0 %vm3118_vm2, %v12742_v51  ;;  %v1640_v47 = vadd.f32 %v1542_v5, %v1395_v6  ;;  %v2007_v56 = vmul.f32 %v11660_v19, %v12279_v41  ;;  %v1402_v23 = vadd.f32 %v1314_v30, %v1045_v16  ;;  %v2318_v15 = vmul.f32 %v11747_v44, %v12332_v2  ;;  %v12773_v30 = vld [vmem:[%s17081_s3 + $0x8] ss:$0 sm:$0xff] }
 0x368   : > { %v1868_v49 = vsel %vm1274_vm3, %v1866_v32, %v1867_v27  ;;  %v2319_v60 = vmul.f32 %v11747_v44, %v12302_v58  ;;  %v12768_v59 = vmul.f32 %v11668_v22, %v12598_v43  ;;  %v2110_v41 = vrot.slane %v2006_v39, 2 }
 0x369   : > { %v1717_v26 = vadd.f32 %v1685_v54, %v1640_v47  ;;  %v2111_v40 = vrot.slane %v2007_v56, 2  ;;  %v2562_v16 = vmul.f32 %v12773_v30, %v12332_v2  ;;  %v2563_v32 = vmul.f32 %v12773_v30, %v12302_v58 }
 0x36a   : > { %v17587_v47 = vrot.slane %v12643_v42, 2  ;;  %v12786_v39 = vmul.f32 %v11656_v18, %v12598_v43  ;;  %v1204_v56 = vmul.f32 %v11664_v21, %v1137_v0  ;;  %v2422_v3 = vrot.slane %v2318_v15, 1 }
 0x36b   : > { %v1966_v6 = vadd.f32 %v1868_v49, %v1717_v26  ;;  %v2112_v51 = vsel %vm1519_vm4, %v2110_v41, %v2111_v40  ;;  %v2423_v38 = vrot.slane %v2319_v60, 1  ;;  %v12792_v24 = vmul.f32 %v11660_v19, %v12598_v43 }
 0x36c   : > { %v1559_v54 = vsel %vm1519_vm4, %v17587_v47, %v17586_v37  ;;  %v1449_v45 = vmul.f32 %v11668_v22, %v1137_v0  ;;  %v2246_v37 = vmul.f32 %v11860_v25, %v12332_v2  ;;  %v1692_v47 = vmul.f32 %v11737_v36, %v12598_v43 }
 0x36d   : > { %v1647_v5 = vadd.f32 %v1559_v54, %v1402_v23  ;;  %v2210_v17 = vadd.f32 %v2112_v51, %v1966_v6  ;;  %v1773_v49 = vmul.f32 %v11656_v18, %v1137_v0  ;;  %v2666_v23 = vrot.slane %v2562_v16, 2 }
 0x36e   : > { %v2667_v26 = vrot.slane %v2563_v32, 2  ;;  %v1318_v60 = vrot.slane %v1204_v56, 1  ;;  %v2017_v41 = vmul.f32 %v11660_v19, %v1137_v0  ;;  %v17196_v50 = vrot.slane %v12786_v39, 1 }
 0x36f   : > { %v2278_v54 = vadd.f32 %v2246_v37, %v2210_v17  ;;  %v1724_v14 = vadd.f32 %v1692_v47, %v1647_v5  ;;  %v2424_v51 = vsel %vm1274_vm3, %v2422_v3, %v2423_v38  ;;  %v1718_v6 = vadd.f32 %v12369_v62, %v12324_v46  ;;  %v17590_v47 = vld [vmem:[#allocation75_spill] sm:$0xff] }
 0x370   : > { %v17195_v4 = vrot.slane %v12792_v24, 2  ;;  %v1563_v42 = vrot.slane %v1449_v45, 2  ;;  %v17588_v16 = vrot.slane %v12305_v9, 1  ;;  %v1884_v56 = vrot.slane %v1773_v49, 1 }
 0x371   : > { %v2522_v10 = vadd.f32 %v2424_v51, %v2278_v54  ;;  %v12811_v15 = vmul.f32 %v11747_v44, %v1137_v0  ;;  %v2668_v17 = vsel %vm1519_vm4, %v2666_v23, %v2667_v26  ;;  %v17589_v3 = vrot.slane %v12730_v53, 1  ;;  %v17592_v51 = vld [vmem:[#allocation76_spill] sm:$0xff] }
 0x372   : > { %v1870_v32 = vsel %vm1274_vm3, %v1867_v27, %v17588_v16  ;;  %v2128_v46 = vrot.slane %v2017_v41, 2  ;;  %v17591_v45 = vrot.slane %v17590_v47, 2  ;;  %v12821_v9 = vmul.f32 %v12773_v30, %v1137_v0  ;;  %v17599_v47 = vld [vmem:[#allocation77_spill] sm:$0xff] }
 0x373   : > { %v1967_v5 = vadd.f32 %v1870_v32, %v1718_v6  ;;  %v1319_v37 = vsel %vm1274_vm3, %v17589_v3, %v1318_v60  ;;  %v2766_v62 = vadd.f32 %v2668_v17, %v2522_v10  ;;  %v2247_v49 = vmul.f32 %v11860_v25, %v12302_v58  ;;  %v17594_v6 = vld [vmem:[#allocation67_spill] sm:$0xff]  ;;  %v17598_v17 = vld [vmem:[#allocation66_spill] sm:$0xff] }
 0x374   : > { %v2114_v54 = vsel %vm1519_vm4, %v2111_v40, %v17591_v45  ;;  %v17593_v23 = vrot.slane %v17592_v51, 1  ;;  %v17595_v16 = vrot.slane %v17594_v6, 1  ;;  %v17596_v60 = vrot.slane %v12768_v59, 2  ;;  %v17603_v6 = vld [vmem:[#allocation84_spill] sm:$0xff] }
 0x375   : > { %v2211_v27 = vadd.f32 %v2114_v54, %v1967_v5  ;;  %v2805_v41 = vadd.f32 %v12207_v57, %v2766_v62  ;;  %v17597_v40 = vrot.slane %v12503_v7, 1  ;;  %v1404_v58 = vadd.f32 %v1319_v37, %v12720_v11  ;;  %v17601_v54 = vld [vmem:[#allocation68_spill] sm:$0xff] }
 0x376   : > { %v1302_v32 = vsel %vm1274_vm3, %v17595_v16, %v17593_v23  ;;  %v1564_v10 = vsel %vm1519_vm4, %v17596_v60, %v1563_v42  ;;  %v17600_v45 = vrot.slane %v17599_v47, 2  ;;  %v17602_v51 = vrot.slane %v17601_v54, 2  ;;  %v17604_v62 = vld [vmem:[#allocation80_spill] sm:$0xff] }
 0x377   : > { %v2426_v0 = vsel %vm1274_vm3, %v2423_v38, %v17597_v40  ;;  %v1397_v5 = vadd.f32 %v1302_v32, %v17598_v17  ;;  %v2279_v3 = vadd.f32 %v2247_v49, %v2211_v27  ;;  %v1871_v16 = vrot.slane %v17603_v6, 1 }
 0x378   : > { %v1547_v23 = vsel %vm1519_vm4, %v17602_v51, %v17600_v45  ;;  %v2837_v42 = vmax.f32 %v2805_v41, 0.0  ;;  %v1687_v7 = vmul.f32 %v11737_v36, %v12332_v2  ;;  %v2009_v38 = vmul.f32 %v11660_v19, %v12332_v2 }
 0x379   : > { %v1642_v60 = vadd.f32 %v1547_v23, %v1397_v5  ;;  %v1885_v11 = vsel %vm1274_vm3, %v17196_v50, %v1884_v56  ;;  %v2523_v37 = vadd.f32 %v2426_v0, %v2279_v3  ;;  %v2321_v27 = vmul.f32 %v11747_v44, %v17604_v62 }
 0x37a   : > { %v2322_v49 = vmul.f32 %v11747_v44, %v12584_v20  ;;  %v2905_v32 = vrot.slane %v2837_v42, 7  ;;  %v17605_v41 = vrot.slane %v12510_v61, 2  ;;  %v2115_v5 = vrot.slane %v2009_v38, 2 }
 0x37b   : > { %v1719_v17 = vadd.f32 %v1687_v7, %v1642_v60  ;;  %v17606_v2 = vrot.slane %v12475_v28, 1  ;;  %v2566_v0 = vmul.f32 %v12773_v30, %v12584_v20  ;;  %v2129_v3 = vsel %vm1519_vm4, %v17195_v4, %v2128_v46 }
 0x37c   : > { %v2670_v40 = vsel %vm1519_vm4, %v2667_v26, %v17605_v41  ;;  %v2428_v56 = vrot.slane %v2322_v49, 1  ;;  %v12869_v61 = vsel %vm762_vm1, 0.0, %v2905_v32  ;;  %v1152_v26 = vpop.permute.xlu1 %1151  ;;  %v17608_v23 = vrot.slane %v12483_v12, 2 }
 0x37d   : > { %v2767_v47 = vadd.f32 %v2670_v40, %v2523_v37  ;;  %v1873_v45 = vsel %vm1274_vm3, %v1871_v16, %v17606_v2  ;;  %17607 = vst [vmem:[#allocation63_spill] sm:$0xff] %v12869_v61  ;;  %10130 = vmatprep.mubr.msk.f32.mxu1 %vm3118_vm2, %v12869_v61  ;;  %v2427_v16 = vrot.slane %v2321_v27, 1  ;;  %v2565_v46 = vmul.f32 %v12773_v30, %v17604_v62 }
 0x37e   : > { %v1968_v51 = vadd.f32 %v1873_v45, %v1719_v17  ;;  %v2117_v6 = vsel %vm1519_vm4, %v2115_v5, %v17608_v23  ;;  %v1973_v42 = vadd.f32 %v1885_v11, %v1724_v14  ;;  %v2248_v7 = vmul.f32 %v11860_v25, %v17604_v62  ;;  %v12888_v17 = vpop.permute.xlu0 %987 }
 0x37f   : > { %v2806_v28 = vadd.f32 %v12207_v57, %v2767_v47  ;;  %v2249_v38 = vmul.f32 %v11860_v25, %v12584_v20  ;;  %v2429_v41 = vsel %vm1274_vm3, %v2427_v16, %v2428_v56  ;;  %v2672_v12 = vrot.slane %v2566_v0, 2 }
 0x380   : > { %v2212_v60 = vadd.f32 %v2117_v6, %v1968_v51  ;;  %v1649_v40 = vadd.f32 %v1564_v10, %v1404_v58  ;;  %v12886_v27 = vmul.f32 %v11664_v21, %v1152_v26  ;;  %v12892_v5 = vmul.f32 %v11668_v22, %v1152_v26  ;;  %v12900_v10 = vpop.permute.xlu1 %996 }
 0x381   : > { %v2838_v49 = vmax.f32 %v2806_v28, 0.0  ;;  %v2281_v11 = vadd.f32 %v2249_v38, %v12634_v31  ;;  %v2671_v2 = vrot.slane %v2565_v46, 2  ;;  %v17609_v45 = vrot.slane %v12620_v34, 1 }
 0x382   : > { %v2280_v14 = vadd.f32 %v2248_v7, %v2212_v60  ;;  %v12898_v0 = vmul.f32 %v11656_v18, %v1152_v26  ;;  %v3061_v58 = vrot.slane %v12869_v61, 1  ;;  %v17612_v34 = vrot.slane %v12623_v8, 2 }
 0x383   : > { %v2906_v47 = vrot.slane %v2838_v49, 7  ;;  %v2431_v51 = vsel %vm1274_vm3, %v2428_v56, %v17609_v45  ;;  %v2673_v16 = vsel %vm1519_vm4, %v2671_v2, %v2672_v12  ;;  %v12920_v49 = vmul.f32 %v11660_v19, %v1152_v26 }
 0x384   : > { %v2524_v28 = vadd.f32 %v2429_v41, %v2280_v14  ;;  %v2525_v23 = vadd.f32 %v2431_v51, %v2281_v11  ;;  %v2675_v56 = vsel %vm1519_vm4, %v2672_v12, %v17612_v34  ;;  %v12923_v41 = vmul.f32 %v11747_v44, %v1152_v26  ;;  %v12931_v14 = vpop.permute.xlu0 %992 }
 0x385   : > { %v12904_v31 = vsel %vm762_vm1, %v2905_v32, %v2906_v47  ;;  %v12907_v6 = vsel %vm762_vm1, %v2906_v47, 0.0  ;;  %v12917_v32 = vadd.f32 %v2129_v3, %v1973_v42  ;;  %17613 = vst [vmem:[#allocation76_spill] sm:$0xff] %v12920_v49  ;;  %v12926_v8 = vmul.f32 %v12773_v30, %v1152_v26  ;;  %v17616_v47 = vld [vmem:[#allocation48_spill] sm:$0xff] }
 0x386   : > { %17610 = vst [vmem:[#allocation69_spill] sm:$0xff] %v12904_v31  ;;  %17611 = vst [vmem:[#allocation75_spill] sm:$0xff] %v12907_v6  ;;  %10131 = vmatmul.mubr.msk.f32.gmra.mxu1 %vm3118_vm2, %v12904_v31  ;;  %v3062_v46 = vrot.slane %v12904_v31, 1  ;;  %v3064_v60 = vrot.slane %v12907_v6, 1  ;;  %v2768_v7 = vadd.f32 %v2673_v16, %v2524_v28  ;;  %v2769_v38 = vadd.f32 %v2675_v56, %v2525_v23 }
 0x387   : > { %v12939_v2 = vadd.f32 %v17616_v47, %v1649_v40  ;;  %v1333_v45 = vrot.slane %v12886_v27, 1  ;;  %v12945_v51 = vmul.f32 %v11664_v21, %v12888_v17  ;;  %v12952_v28 = vmul.f32 %v11668_v22, %v12888_v17  ;;  %v12956_v27 = vpop.permute.xlu1 %1001 }
 0x388   : > { %v12929_v12 = vsel %vm1274_vm3, %v3061_v58, %v3062_v46  ;;  %v12934_v11 = vsel %vm1274_vm3, %v3062_v46, %v3064_v60  ;;  %v2807_v3 = vadd.f32 %v12207_v57, %v2768_v7  ;;  %v2808_v42 = vadd.f32 %v12207_v57, %v2769_v38  ;;  %17619 = vst [vmem:[#allocation84_spill] sm:$0xff] %v12956_v27 }
 0x389   : > { %17614 = vst [vmem:[#allocation67_spill] sm:$0xff] %v12929_v12  ;;  %17615 = vst [vmem:[#allocation66_spill] sm:$0xff] %v12934_v11  ;;  %10080 = vmatprep.mubr.msk.f32.mxu0 %vm3118_vm2, %v12929_v12  ;;  %v1053_v16 = vmul.f32 %v11695_v48, %v12888_v17  ;;  %v12963_v34 = vmul.f32 %v11664_v21, %v12931_v14  ;;  %v12967_v56 = vmul.f32 %v11668_v22, %v12931_v14  ;;  %v17632_v12 = vld [vmem:[#allocation78_spill] sm:$0xff] }
 0x38a   : > { %17617 = vst [vmem:[#allocation77_spill] sm:$0xff] %v12945_v51  ;;  %17618 = vst [vmem:[#allocation68_spill] sm:$0xff] %v12952_v28  ;;  %10081 = vmatmul.mubr.msk.f32.gmra.mxu0 %vm3118_vm2, %v12934_v11  ;;  %v2839_v57 = vmax.f32 %v2807_v3, 0.0  ;;  %v2840_v40 = vmax.f32 %v2808_v42, 0.0  ;;  %v12974_v42 = vmul.f32 %v11737_v36, %v12888_v17  ;;  %v12978_v47 = vmul.f32 %v11656_v18, %v12888_v17 }
 0x38b   : > { %17620 = vst [vmem:[#allocation80_spill] sm:$0xff] %v12963_v34  ;;  %17621 = vst [vmem:[#allocation48_spill] sm:$0xff] %v12967_v56  ;;  %v12982_v23 = vmul.f32 %v11664_v21, %v12956_v27  ;;  %v12999_v50 = vmul.f32 %v11656_v18, %v12931_v14  ;;  %v13005_v37 = vmul.f32 %v11695_v48, %v12956_v27  ;;  %v17631_v11 = vrot.slane %v12460_v29, 1 }
 0x38c   : > { %v2908_v7 = vrot.slane %v2839_v57, 7  ;;  %v2909_v38 = vrot.slane %v2840_v40, 7  ;;  %v12987_v57 = vmul.f32 %v11695_v48, %v12931_v14  ;;  %v13015_v4 = vmul.f32 %v11656_v18, %v12956_v27 }
 0x38d   : > { %17622 = vst [vmem:[#allocation105_spill] sm:$0xff] %v12982_v23  ;;  %17626 = vst [vmem:[#allocation109_spill] sm:$0xff] %v12999_v50  ;;  %v13022_v26 = vmul.f32 %v11695_v48, %v12900_v10  ;;  %v17633_v6 = vrot.slane %v17632_v12, 1  ;;  %v17634_v61 = vrot.slane %v12945_v51, 1  ;;  %v17637_v29 = vrot.slane %v12464_v52, 2 }
 0x38e   : > { %17623 = vst [vmem:[#allocation106_spill] sm:$0xff] %v12987_v57  ;;  %v12990_v40 = vsel %vm762_vm1, 0.0, %v2908_v7  ;;  %v12993_v60 = vsel %vm762_vm1, %v2908_v7, %v2909_v38  ;;  %17627 = vst [vmem:[#allocation110_spill] sm:$0xff] %v13005_v37  ;;  %v13011_v7 = vmul.f32 %v11668_v22, %v12956_v27  ;;  %v13025_v3 = vsel %vm762_vm1, %v2909_v38, 0.0  ;;  %v17636_v37 = vld [vmem:[#allocation83_spill] sm:$0xff] }
 0x38f   : > { %17624 = vst [vmem:[#allocation107_spill] sm:$0xff] %v12990_v40  ;;  %17625 = vst [vmem:[#allocation108_spill] sm:$0xff] %v12993_v60  ;;  %10133 = vmatprep.mubr.msk.f32.mxu1 %vm3118_vm2, %v12990_v40  ;;  %v3066_v46 = vrot.slane %v12990_v40, 1  ;;  %v3067_v54 = vrot.slane %v12993_v60, 1  ;;  %v1307_v31 = vsel %vm1274_vm3, %v17633_v6, %v17631_v11  ;;  %v1334_v40 = vsel %vm1274_vm3, %v17634_v61, %v1333_v45  ;;  %v17638_v38 = vld [vmem:[#allocation79_spill] sm:$0xff]  ;;  %v17640_v11 = vld [vmem:[#allocation88_spill] sm:$0xff] }
 0x390   : > { %10134 = vmatmul.mubr.msk.f32.gmra.mxu1 %vm3118_vm2, %v12993_v60  ;;  %17628 = vst [vmem:[#allocation111_spill] sm:$0xff] %v13011_v7  ;;  %17629 = vst [vmem:[#allocation112_spill] sm:$0xff] %v13015_v4  ;;  %v3069_v58 = vrot.slane %v13025_v3, 1  ;;  %v1399_v23 = vadd.f32 %v1307_v31, %v17636_v37  ;;  %v17639_v12 = vrot.slane %v17638_v38, 2  ;;  %v1876_v4 = vrot.slane %v17640_v11, 1  ;;  %v13062_v38 = vpop.permute.xlu0 %1156 }
 0x391   : > { %17630 = vst [vmem:[#allocation113_spill] sm:$0xff] %v13025_v3  ;;  %v13036_v60 = vsel %vm1274_vm3, %v3066_v46, %v3067_v54  ;;  %v1877_v61 = vrot.slane %v12674_v35, 1  ;;  %v2012_v45 = vmul.f32 %v11660_v19, %v17604_v62  ;;  %v1689_v31 = vmul.f32 %v11737_v36, %v17604_v62 }
 0x392   : > { %17635 = vst [vmem:[#allocation78_spill] sm:$0xff] %v13036_v60  ;;  %10083 = vmatprep.mubr.msk.f32.mxu0 %vm3118_vm2, %v13036_v60  ;;  %v1552_v6 = vsel %vm1519_vm4, %v17639_v12, %v17637_v29  ;;  %v13052_v46 = vsel %vm1274_vm3, %v3067_v54, %v3069_v58  ;;  %v2013_v52 = vmul.f32 %v11660_v19, %v12584_v20  ;;  %v17644_v60 = vrot.slane %v12892_v5, 2 }
 0x393   : > { %17641 = vst [vmem:[#allocation83_spill] sm:$0xff] %v13052_v46  ;;  %v1644_v37 = vadd.f32 %v1552_v6, %v1399_v23  ;;  %v13060_v29 = vmul.f32 %v11664_v21, %v12900_v10  ;;  %10084 = vmatmul.mubr.msk.f32.gmra.mxu0 %vm3118_vm2, %v13052_v46  ;;  %v1878_v35 = vsel %vm1274_vm3, %v1876_v4, %v1877_v61  ;;  %v2120_v11 = vrot.slane %v2012_v45, 2 }
 0x394   : > { %v2324_v54 = vmul.f32 %v11747_v44, %v12628_v1  ;;  %v2325_v62 = vmul.f32 %v11747_v44, %v12598_v43  ;;  %v1410_v20 = vadd.f32 %v1334_v40, %v1053_v16  ;;  %v2121_v12 = vrot.slane %v2013_v52, 2 }
 0x395   : > { %17642 = vst [vmem:[#allocation79_spill] sm:$0xff] %v13060_v29  ;;  %v1721_v23 = vadd.f32 %v1689_v31, %v1644_v37  ;;  %v13074_v6 = vmul.f32 %v11668_v22, %v12900_v10  ;;  %v2568_v46 = vmul.f32 %v12773_v30, %v12628_v1  ;;  %v13080_v4 = vmul.f32 %v12773_v30, %v12598_v43 }
 0x396   : > { %v17645_v3 = vrot.slane %v12952_v28, 2  ;;  %v13089_v40 = vmul.f32 %v11656_v18, %v12900_v10  ;;  %v1216_v45 = vmul.f32 %v11664_v21, %v13062_v38  ;;  %v1785_v31 = vmul.f32 %v11656_v18, %v13062_v38 }
 0x397   : > { %17643 = vst [vmem:[#allocation88_spill] sm:$0xff] %v13074_v6  ;;  %v1970_v37 = vadd.f32 %v1878_v35, %v1721_v23  ;;  %v2122_v52 = vsel %vm1519_vm4, %v2120_v11, %v2121_v12  ;;  %v2432_v58 = vrot.slane %v2324_v54, 1  ;;  %v2433_v7 = vrot.slane %v2325_v62, 1 }
 0x398   : > { %v1579_v16 = vsel %vm1519_vm4, %v17645_v3, %v17644_v60  ;;  %v13098_v56 = vmul.f32 %v11660_v19, %v12900_v10  ;;  %v2250_v3 = vmul.f32 %v11860_v25, %v12628_v1  ;;  %v1461_v57 = vmul.f32 %v11668_v22, %v13062_v38 }
 0x399   : > { %v1655_v5 = vadd.f32 %v1579_v16, %v1410_v20  ;;  %v2214_v60 = vadd.f32 %v2122_v52, %v1970_v37  ;;  %v2029_v35 = vmul.f32 %v11660_v19, %v13062_v38  ;;  %v2676_v23 = vrot.slane %v2568_v46, 2 }
 0x39a   : > { %v2677_v11 = vrot.slane %v13080_v4, 2  ;;  %v1700_v62 = vmul.f32 %v11737_v36, %v12900_v10  ;;  %v1338_v20 = vrot.slane %v1216_v45, 1  ;;  %v17224_v37 = vrot.slane %v13074_v6, 2 }
 0x39b   : > { %v2282_v16 = vadd.f32 %v2250_v3, %v2214_v60  ;;  %v17226_v52 = vrot.slane %v13089_v40, 1  ;;  %v1904_v34 = vrot.slane %v1785_v31, 1  ;;  %v2434_v27 = vsel %vm1274_vm3, %v2432_v58, %v2433_v7 }
 0x39c   : > { %v1732_v50 = vadd.f32 %v1700_v62, %v1655_v5  ;;  %v17225_v28 = vrot.slane %v13098_v56, 2  ;;  %v1722_v4 = vadd.f32 %v12668_v63, %v12614_v33  ;;  %v1583_v54 = vrot.slane %v1461_v57, 2 }
 0x39d   : > { %v2526_v46 = vadd.f32 %v2434_v27, %v2282_v16  ;;  %v2148_v51 = vrot.slane %v2029_v35, 2  ;;  %v2678_v49 = vsel %vm1519_vm4, %v2676_v23, %v2677_v11  ;;  %v17646_v45 = vrot.slane %v12596_v13, 1  ;;  %v17651_v23 = vld [vmem:[#allocation85_spill] sm:$0xff] }
 0x39e   : > { %v17647_v3 = vrot.slane %v13060_v29, 1  ;;  %v13125_v58 = vmul.f32 %v11747_v44, %v13062_v38  ;;  %v1905_v33 = vsel %vm1274_vm3, %v17226_v52, %v1904_v34  ;;  %v17648_v63 = vrot.slane %v12617_v55, 2  ;;  %v17687_v52 = vld [vmem:[#allocation94_spill] sm:$0xff] }
 0x39f   : > { %v1880_v60 = vsel %vm1274_vm3, %v1877_v61, %v17646_v45  ;;  %v2770_v27 = vadd.f32 %v2678_v49, %v2526_v46  ;;  %v2251_v57 = vmul.f32 %v11860_v25, %v12598_v43  ;;  %v17649_v61 = vld [vmem:[#allocation61_spill] sm:$0xff]  ;;  %v17652_v62 = vrot.slane %v17651_v23, 1  ;;  %v17654_v46 = vld [vmem:[#allocation86_spill] sm:$0xff] }
 0x3a0   : > { %v1339_v31 = vsel %vm1274_vm3, %v17647_v3, %v1338_v20  ;;  %v1971_v5 = vadd.f32 %v1880_v60, %v1722_v4  ;;  %v2124_v13 = vsel %vm1519_vm4, %v2121_v12, %v17648_v63  ;;  %v17650_v35 = vrot.slane %v17649_v61, 1  ;;  %v13143_v49 = vld [vmem:[%s17082_s4] ss:$0 sm:$0xff]  ;;  %v17655_v4 = vld [vmem:[#allocation92_spill] sm:$0xff]  ;;  %v17657_v60 = vld [vmem:[#allocation87_spill] sm:$0xff] }
 0x3a1   : > { %v2809_v34 = vadd.f32 %v13143_v49, %v2770_v27  ;;  %v17653_v55 = vrot.slane %v12811_v15, 1  ;;  %v17656_v45 = vrot.slane %v17655_v4, 2  ;;  %v17658_v3 = vrot.slane %v17657_v60, 2 }
 0x3a2   : > { %v1312_v20 = vsel %vm1274_vm3, %v17652_v62, %v17650_v35  ;;  %v2215_v16 = vadd.f32 %v2124_v13, %v1971_v5  ;;  %v1691_v61 = vmul.f32 %v11737_v36, %v12628_v1  ;;  %v17659_v35 = vld [vmem:[#allocation101_spill] sm:$0xff]  ;;  %v2015_v27 = vmul.f32 %v11660_v19, %v12628_v1  ;;  %v8931_v1 = vld [vmem:[%s17083_s5 + $0x18] sm:$0xff] }
 0x3a3   : > { %v2436_v12 = vsel %vm1274_vm3, %v2433_v7, %v17653_v55  ;;  %v1401_v43 = vadd.f32 %v1312_v20, %v17654_v46  ;;  %v1557_v63 = vsel %vm1519_vm4, %v17658_v3, %v17656_v45  ;;  %v1881_v23 = vrot.slane %v17659_v35, 1  ;;  %v17660_v7 = vld [vmem:[#allocation52_spill] sm:$0xff]  ;;  %10213 = vmatprep.subr.mxu1 %v8931_v1 }
 0x3a4   : > { %v2841_v5 = vmax.f32 %v2809_v34, 0.0  ;;  %v2283_v15 = vadd.f32 %v2251_v57, %v2215_v16  ;;  %v2285_v62 = vadd.f32 %v17660_v7, %v12917_v32  ;;  %v1412_v20 = vadd.f32 %v1339_v31, %v13022_v26  ;;  %v1162_v34 = vpop.permute.xlu1 %1161  ;;  %v17661_v32 = vld [vmem:[#allocation34_spill] sm:$0xff]  ;;  %10214 = vmatpush3.msra.mxu1 %v8931_v1 }
 0x3a5   : > { %v1646_v13 = vadd.f32 %v1557_v63, %v1401_v43  ;;  %v1584_v55 = vsel %vm1519_vm4, %v17224_v37, %v1583_v54  ;;  %v13168_v46 = vmul.f32 %v12773_v30, %v13062_v38  ;;  %v2125_v4 = vrot.slane %v2015_v27, 2  ;;  %v13186_v63 = vpop.permute.xlu0 %1005  ;;  %v8964_v27 = vld [vmem:[%s17083_s5 + $0x20] sm:$0xff] }
 0x3a6   : > { %v2911_v57 = vrot.slane %v2841_v5, 7  ;;  %v2527_v16 = vadd.f32 %v2436_v12, %v2283_v15  ;;  %v2529_v45 = vadd.f32 %v17661_v32, %v2285_v62  ;;  %v1981_v26 = vadd.f32 %v1905_v33, %v1732_v50  ;;  %v17665_v33 = vld [vmem:[#allocation36_spill] sm:$0xff]  ;;  %10263 = vmatprep.subr.mxu0 %v8964_v27 }
 0x3a7   : > { %v1723_v43 = vadd.f32 %v1691_v61, %v1646_v13  ;;  %v2149_v54 = vsel %vm1519_vm4, %v17225_v28, %v2148_v51  ;;  %v17662_v38 = vrot.slane %v12821_v9, 2  ;;  %v17663_v60 = vrot.slane %v12786_v39, 1 }
 0x3a8   : > { %v13184_v12 = vsel %vm762_vm1, 0.0, %v2911_v57  ;;  %v2773_v35 = vadd.f32 %v17665_v33, %v2529_v45  ;;  %v1219_v9 = vmul.f32 %v11664_v21, %v1162_v34  ;;  %v13193_v51 = vmul.f32 %v11668_v22, %v1162_v34  ;;  %v17673_v45 = vld [vmem:[#allocation50_spill] sm:$0xff] }
 0x3a9   : > { %v2680_v31 = vsel %vm1519_vm4, %v2677_v11, %v17662_v38  ;;  %v1883_v3 = vsel %vm1274_vm3, %v1881_v23, %v17663_v60  ;;  %17664 = vst [vmem:[#allocation61_spill] sm:$0xff] %v13184_v12  ;;  %10136 = vmatprep.mubr.msk.f32.mxu1 %vm3118_vm2, %v13184_v12  ;;  %v13196_v39 = vmul.f32 %v11656_v18, %v1162_v34  ;;  %v17667_v11 = vrot.slane %v12792_v24, 2 }
 0x3aa   : > { %v2771_v61 = vadd.f32 %v2680_v31, %v2527_v16  ;;  %v1972_v50 = vadd.f32 %v1883_v3, %v1723_v43  ;;  %v13206_v15 = vmul.f32 %v11660_v19, %v1162_v34  ;;  %v13211_v1 = vmul.f32 %v11747_v44, %v1162_v34 }
 0x3ab   : > { %17666 = vst [vmem:[#allocation85_spill] sm:$0xff] %v13196_v39  ;;  %v2127_v23 = vsel %vm1519_vm4, %v2125_v4, %v17667_v11  ;;  %v13215_v24 = vmul.f32 %v11664_v21, %v13186_v63  ;;  %v2812_v4 = vadd.f32 %v13143_v49, %v2773_v35  ;;  %v13218_v16 = vadd.f32 %v1584_v55, %v1412_v20  ;;  %v13231_v55 = vpop.permute.xlu0 %1010 }
 0x3ac   : > { %17668 = vst [vmem:[#allocation86_spill] sm:$0xff] %v13206_v15  ;;  %v2810_v13 = vadd.f32 %v13143_v49, %v2771_v61  ;;  %v2216_v7 = vadd.f32 %v2127_v23, %v1972_v50  ;;  %17669 = vst [vmem:[#allocation92_spill] sm:$0xff] %v13211_v1  ;;  %v13221_v43 = vmul.f32 %v12773_v30, %v1162_v34  ;;  %v1343_v60 = vrot.slane %v1219_v9, 1  ;;  %v17676_v34 = vld [vmem:[#allocation33_spill] sm:$0xff]  ;;  %v17707_v15 = vld [vmem:[#allocation54_spill] sm:$0xff] }
 0x3ad   : > { %17670 = vst [vmem:[#allocation87_spill] sm:$0xff] %v13215_v24  ;;  %17671 = vst [vmem:[#allocation101_spill] sm:$0xff] %v13218_v16  ;;  %v13224_v31 = vadd.f32 %v2149_v54, %v1981_v26  ;;  %v1588_v3 = vrot.slane %v13193_v51, 2  ;;  %v1057_v33 = vmul.f32 %v11695_v48, %v13186_v63  ;;  %v17227_v26 = vrot.slane %v13215_v24, 1 }
 0x3ae   : > { %17672 = vst [vmem:[#allocation52_spill] sm:$0xff] %v13221_v43  ;;  %v2842_v32 = vmax.f32 %v2810_v13, 0.0  ;;  %v2284_v38 = vadd.f32 %v17673_v45, %v2216_v7  ;;  %17675 = vst [vmem:[#allocation36_spill] sm:$0xff] %v13231_v55  ;;  %v13238_v54 = vmul.f32 %v11668_v22, %v13186_v63  ;;  %v2844_v9 = vmax.f32 %v2812_v4, 0.0  ;;  %v17680_v13 = vld [vmem:[#allocation35_spill] sm:$0xff] }
 0x3af   : > { %17674 = vst [vmem:[#allocation34_spill] sm:$0xff] %v13224_v31  ;;  %v13254_v4 = vmul.f32 %v11664_v21, %v13231_v55  ;;  %v1344_v51 = vsel %vm1274_vm3, %v17227_v26, %v1343_v60  ;;  %v13286_v28 = vmul.f32 %v11695_v48, %v13231_v55  ;;  %v13296_v60 = vmul.f32 %v11656_v18, %v13231_v55 }
 0x3b0   : > { %v2912_v20 = vrot.slane %v2842_v32, 7  ;;  %v2528_v35 = vadd.f32 %v17676_v34, %v2284_v38  ;;  %17677 = vst [vmem:[#allocation50_spill] sm:$0xff] %v13238_v54  ;;  %v3071_v32 = vrot.slane %v13184_v12, 1  ;;  %v13265_v34 = vpop.permute.xlu1 %1014  ;;  %v2915_v37 = vrot.slane %v2844_v9, 7 }
 0x3b1   : > { %17683 = vst [vmem:[#allocation116_spill] sm:$0xff] %v13265_v34  ;;  %17689 = vst [vmem:[#allocation94_spill] sm:$0xff] %v13296_v60  ;;  %v13302_v26 = vmul.f32 %v11664_v21, %v13265_v34  ;;  %v1414_v5 = vadd.f32 %v1344_v51, %v1057_v33 }
 0x3b2   : > { %v13242_v23 = vsel %vm762_vm1, %v2911_v57, %v2912_v20  ;;  %v13245_v27 = vsel %vm762_vm1, %v2912_v20, 0.0  ;;  %v2772_v7 = vadd.f32 %v17680_v13, %v2528_v35  ;;  %v13259_v57 = vmul.f32 %v11737_v36, %v13186_v63 }
 0x3b3   : > { %17678 = vst [vmem:[#allocation33_spill] sm:$0xff] %v13242_v23  ;;  %17679 = vst [vmem:[#allocation114_spill] sm:$0xff] %v13245_v27  ;;  %10137 = vmatmul.mubr.msk.f32.gmra.mxu1 %vm3118_vm2, %v13242_v23  ;;  %v3072_v45 = vrot.slane %v13242_v23, 1  ;;  %v3074_v38 = vrot.slane %v13245_v27, 1  ;;  %v13263_v20 = vmul.f32 %v11656_v18, %v13186_v63  ;;  %v13269_v35 = vmul.f32 %v11668_v22, %v13231_v55  ;;  %v17700_v23 = vld [vmem:[#allocation25_spill] sm:$0xff] }
 0x3b4   : > { %17681 = vst [vmem:[#allocation35_spill] sm:$0xff] %v13259_v57  ;;  %v2811_v13 = vadd.f32 %v13143_v49, %v2772_v7  ;;  %v2574_v12 = vmul.f32 %v12773_v30, %v17700_v23  ;;  %v17708_v57 = vld [vmem:[#allocation27_spill] sm:$0xff] }
 0x3b5   : > { %17682 = vst [vmem:[#allocation115_spill] sm:$0xff] %v13263_v20  ;;  %v13273_v50 = vsel %vm1274_vm3, %v3071_v32, %v3072_v45  ;;  %v13276_v61 = vsel %vm1274_vm3, %v3072_v45, %v3074_v38  ;;  %v17686_v32 = vrot.slane %v12730_v53, 1  ;;  %v17688_v45 = vrot.slane %v17687_v52, 1 }
 0x3b6   : > { %17684 = vst [vmem:[#allocation117_spill] sm:$0xff] %v13273_v50  ;;  %17685 = vst [vmem:[#allocation118_spill] sm:$0xff] %v13276_v61  ;;  %10086 = vmatprep.mubr.msk.f32.mxu0 %vm3118_vm2, %v13273_v50  ;;  %v2843_v7 = vmax.f32 %v2811_v13, 0.0  ;;  %v17690_v13 = vld [vmem:[#allocation97_spill] sm:$0xff]  ;;  %v13307_v52 = vmul.f32 %v11668_v22, %v13265_v34  ;;  %v13317_v50 = vmul.f32 %v11695_v48, %v13265_v34 }
 0x3b7   : > { %v1317_v9 = vsel %vm1274_vm3, %v17688_v45, %v17686_v32  ;;  %10087 = vmatmul.mubr.msk.f32.gmra.mxu0 %vm3118_vm2, %v13276_v61  ;;  %v17691_v32 = vrot.slane %v12768_v59, 2  ;;  %v17692_v45 = vld [vmem:[#allocation95_spill] sm:$0xff]  ;;  %v17697_v59 = vrot.slane %v13238_v54, 2 }
 0x3b8   : > { %v1403_v62 = vadd.f32 %v1317_v9, %v17690_v13  ;;  %v2914_v53 = vrot.slane %v2843_v7, 7  ;;  %v17693_v38 = vrot.slane %v17692_v45, 2  ;;  %v13320_v7 = vsel %vm762_vm1, %v2915_v37, 0.0 }
 0x3b9   : > { %17694 = vst [vmem:[#allocation97_spill] sm:$0xff] %v13320_v7  ;;  %v1589_v9 = vsel %vm1519_vm4, %v17697_v59, %v1588_v3  ;;  %v3079_v61 = vrot.slane %v13320_v7, 1  ;;  %v13343_v59 = vpop.permute.xlu0 %1166  ;;  %v13358_v3 = vmul.f32 %v11656_v18, %v13265_v34 }
 0x3ba   : > { %v1562_v11 = vsel %vm1519_vm4, %v17693_v38, %v17691_v32  ;;  %v13323_v33 = vsel %vm762_vm1, 0.0, %v2914_v53  ;;  %v13326_v51 = vsel %vm762_vm1, %v2914_v53, %v2915_v37  ;;  %v17698_v38 = vld [vmem:[#allocation28_spill] sm:$0xff]  ;;  %v1659_v53 = vadd.f32 %v1589_v9, %v1414_v5 }
 0x3bb   : > { %v1648_v27 = vadd.f32 %v1562_v11, %v1403_v62  ;;  %17695 = vst [vmem:[#allocation95_spill] sm:$0xff] %v13323_v33  ;;  %17696 = vst [vmem:[#allocation119_spill] sm:$0xff] %v13326_v51  ;;  %v2575_v13 = vmul.f32 %v12773_v30, %v17698_v38  ;;  %10139 = vmatprep.mubr.msk.f32.mxu1 %vm3118_vm2, %v13323_v33  ;;  %v17699_v62 = vld [vmem:[#allocation53_spill] sm:$0xff]  ;;  %v3076_v32 = vrot.slane %v13323_v33, 1  ;;  %v3077_v45 = vrot.slane %v13326_v51, 1  ;;  %v17704_v9 = vld [vmem:[#allocation56_spill] sm:$0xff] }
 0x3bc   : > { %10140 = vmatmul.mubr.msk.f32.gmra.mxu1 %vm3118_vm2, %v13326_v51  ;;  %v13362_v5 = vmul.f32 %v11660_v19, %v13265_v34  ;;  %v2443_v37 = vrot.slane %v17704_v9, 1  ;;  %v2255_v24 = vmul.f32 %v11860_v25, %v17698_v38 }
 0x3bd   : > { %v1725_v11 = vadd.f32 %v17699_v62, %v1648_v27  ;;  %v1704_v27 = vmul.f32 %v11737_v36, %v13265_v34  ;;  %v17701_v62 = vld [vmem:[#allocation37_spill] sm:$0xff]  ;;  %v13351_v7 = vsel %vm1274_vm3, %v3076_v32, %v3077_v45  ;;  %v13354_v51 = vsel %vm1274_vm3, %v3077_v45, %v3079_v61  ;;  %v17705_v32 = vld [vmem:[#allocation39_spill] sm:$0xff]  ;;  %v17711_v34 = vld [vmem:[#allocation40_spill] sm:$0xff] }
 0x3be   : > { %17702 = vst [vmem:[#allocation28_spill] sm:$0xff] %v13351_v7  ;;  %17703 = vst [vmem:[#allocation53_spill] sm:$0xff] %v13354_v51  ;;  %v2687_v60 = vrot.slane %v2575_v13, 2  ;;  %10089 = vmatprep.mubr.msk.f32.mxu0 %vm3118_vm2, %v13351_v7  ;;  %v13371_v61 = vmul.f32 %v11668_v22, %v13343_v59  ;;  %v1791_v13 = vmul.f32 %v11656_v18, %v13343_v59  ;;  %v2686_v7 = vrot.slane %v2574_v12, 2  ;;  %v17717_v12 = vld [vmem:[#allocation55_spill] sm:$0xff] }
 0x3bf   : > { %v1974_v33 = vadd.f32 %v17701_v62, %v1725_v11  ;;  %v1222_v11 = vmul.f32 %v11664_v21, %v13343_v59  ;;  %10090 = vmatmul.mubr.msk.f32.gmra.mxu0 %vm3118_vm2, %v13354_v51  ;;  %v17706_v62 = vld [vmem:[#allocation26_spill] sm:$0xff]  ;;  %v13378_v9 = vadd.f32 %v1704_v27, %v1659_v53  ;;  %v17712_v51 = vrot.slane %v17711_v34, 1  ;;  %v17715_v27 = vld [vmem:[#allocation41_spill] sm:$0xff] }
 0x3c0   : > { %v1975_v54 = vadd.f32 %v17706_v62, %v12939_v2  ;;  %v17713_v2 = vld [vmem:[#allocation22_spill] sm:$0xff]  ;;  %v17716_v62 = vrot.slane %v17715_v27, 2  ;;  %v17718_v6 = vrot.slane %v17717_v12, 1  ;;  %v17722_v27 = vld [vmem:[#allocation49_spill] sm:$0xff]  ;;  %v13415_v12 = vpop.permute.xlu1 %1019 }
 0x3c1   : > { %v2218_v45 = vadd.f32 %v17705_v32, %v1974_v33  ;;  %v17709_v33 = vld [vmem:[#allocation21_spill] sm:$0xff]  ;;  %v17714_v53 = vrot.slane %v17713_v2, 2  ;;  %v1891_v43 = vrot.slane %v17722_v27, 1 }
 0x3c2   : > { %v2219_v16 = vadd.f32 %v17708_v57, %v1975_v54  ;;  %v17710_v32 = vrot.slane %v17709_v33, 1  ;;  %v2444_v38 = vsel %vm1274_vm3, %v17718_v6, %v2443_v37  ;;  %v2021_v57 = vmul.f32 %v11660_v19, %v17700_v23  ;;  %v17723_v6 = vld [vmem:[#allocation93_spill] sm:$0xff] }
 0x3c3   : > { %v2286_v39 = vadd.f32 %v17707_v15, %v2218_v45  ;;  %v1567_v20 = vsel %vm1519_vm4, %v17716_v62, %v17714_v53  ;;  %v2688_v15 = vsel %vm1519_vm4, %v2686_v7, %v2687_v60  ;;  %v17719_v45 = vld [vmem:[#allocation45_spill] sm:$0xff]  ;;  %v1695_v62 = vmul.f32 %v11737_v36, %v17700_v23 }
 0x3c4   : > { %v1322_v55 = vsel %vm1274_vm3, %v17712_v51, %v17710_v32  ;;  %v2287_v33 = vadd.f32 %v2255_v24, %v2219_v16  ;;  %v17720_v51 = vld [vmem:[#allocation44_spill] sm:$0xff]  ;;  %v2333_v7 = vmul.f32 %v11747_v44, %v17723_v6  ;;  %v2135_v27 = vrot.slane %v2021_v57, 2 }
 0x3c5   : > { %v1405_v54 = vadd.f32 %v1322_v55, %v17719_v45  ;;  %v2530_v34 = vadd.f32 %v2444_v38, %v2286_v39  ;;  %v17721_v32 = vrot.slane %v17720_v51, 1  ;;  %v13413_v55 = vmul.f32 %v11747_v44, %v12888_v17 }
 0x3c6   : > { %v17259_v39 = vrot.slane %v13358_v3, 1  ;;  %v1348_v45 = vrot.slane %v1222_v11, 1  ;;  %v2447_v11 = vrot.slane %v2333_v7, 1 }
 0x3c7   : > { %v2446_v2 = vsel %vm1274_vm3, %v2443_v37, %v17721_v32  ;;  %v1650_v53 = vadd.f32 %v1567_v20, %v1405_v54  ;;  %v2774_v24 = vadd.f32 %v2688_v15, %v2530_v34  ;;  %v17724_v37 = vld [vmem:[#allocation29_spill] sm:$0xff]  ;;  %v17726_v54 = vld [vmem:[#allocation46_spill] sm:$0xff]  ;;  %v17261_v29 = vrot.slane %v13413_v55, 1 }
 0x3c8   : > { %v2531_v16 = vadd.f32 %v2446_v2, %v2287_v33  ;;  %v17725_v38 = vrot.slane %v17724_v37, 1  ;;  %v17727_v23 = vrot.slane %v17726_v54, 2  ;;  %v13428_v15 = vmul.f32 %v12773_v30, %v12888_v17 }
 0x3c9   : > { %v1727_v32 = vadd.f32 %v1695_v62, %v1650_v53  ;;  %v2813_v31 = vadd.f32 %v13143_v49, %v2774_v24  ;;  %v1914_v34 = vrot.slane %v1791_v13, 1  ;;  %v17728_v53 = vld [vmem:[#allocation30_spill] sm:$0xff]  ;;  %v2577_v24 = vmul.f32 %v12773_v30, %v17723_v6 }
 0x3ca   : > { %v1893_v20 = vsel %vm1274_vm3, %v1891_v43, %v17725_v38  ;;  %v2690_v51 = vsel %vm1519_vm4, %v2687_v60, %v17727_v23  ;;  %v2256_v43 = vmul.f32 %v11860_v25, %v17723_v6  ;;  %v17729_v57 = vrot.slane %v17728_v53, 2 }
 0x3cb   : > { %v2775_v1 = vadd.f32 %v2690_v51, %v2531_v16  ;;  %v1976_v33 = vadd.f32 %v1893_v20, %v1727_v32  ;;  %v2845_v2 = vmax.f32 %v2813_v31, 0.0  ;;  %v17730_v16 = vrot.slane %v13302_v26, 1  ;;  %v1172_v20 = vpop.permute.xlu1 %1171 }
 0x3cc   : > { %v2137_v62 = vsel %vm1519_vm4, %v2135_v27, %v17729_v57  ;;  %v1593_v13 = vrot.slane %v13371_v61, 2  ;;  %v2035_v38 = vmul.f32 %v11660_v19, %v13343_v59  ;;  %v2449_v54 = vsel %vm1274_vm3, %v2447_v11, %v17261_v29  ;;  %v17748_v29 = vld [vmem:[#allocation32_spill] sm:$0xff] }
 0x3cd   : > { %v2814_v60 = vadd.f32 %v13143_v49, %v2775_v1  ;;  %v1349_v37 = vsel %vm1274_vm3, %v17730_v16, %v1348_v45  ;;  %v2220_v7 = vadd.f32 %v2137_v62, %v1976_v33  ;;  %v2917_v31 = vrot.slane %v2845_v2, 7 }
 0x3ce   : > { %v17260_v23 = vrot.slane %v13428_v15, 2  ;;  %v17258_v51 = vrot.slane %v13362_v5, 2  ;;  %v1915_v45 = vsel %vm1274_vm3, %v17259_v39, %v1914_v34  ;;  %v13454_v61 = vmul.f32 %v11747_v44, %v13343_v59 }
 0x3cf   : > { %v2846_v1 = vmax.f32 %v2814_v60, 0.0  ;;  %v2288_v32 = vadd.f32 %v2256_v43, %v2220_v7  ;;  %v1416_v27 = vadd.f32 %v1349_v37, %v13317_v50  ;;  %v13458_v33 = vsel %vm762_vm1, 0.0, %v2917_v31 }
 0x3d0   : > { %17731 = vst [vmem:[#allocation25_spill] sm:$0xff] %v13458_v33  ;;  %v2691_v11 = vrot.slane %v2577_v24, 2  ;;  %v17732_v60 = vrot.slane %v13307_v52, 2  ;;  %v2158_v57 = vrot.slane %v2035_v38, 2  ;;  %v13465_v34 = vmul.f32 %v12773_v30, %v13343_v59  ;;  %10142 = vmatprep.mubr.msk.f32.mxu1 %vm3118_vm2, %v13458_v33 }
 0x3d1   : > { %v2918_v2 = vrot.slane %v2846_v1, 7  ;;  %v2532_v43 = vadd.f32 %v2449_v54, %v2288_v32  ;;  %v1985_v50 = vadd.f32 %v1915_v45, %v13378_v9  ;;  %v13471_v62 = vmul.f32 %v11664_v21, %v1172_v20  ;;  %v13500_v32 = vpop.permute.xlu1 %1670 }
 0x3d2   : > { %v1594_v53 = vsel %vm1519_vm4, %v17732_v60, %v1593_v13  ;;  %v2693_v16 = vsel %vm1519_vm4, %v2691_v11, %v17260_v23  ;;  %v3081_v37 = vrot.slane %v13458_v33, 1  ;;  %v17734_v9 = vrot.slane %v13302_v26, 1  ;;  %17737 = vst [vmem:[#allocation39_spill] sm:$0xff] %v13500_v32 }
 0x3d3   : > { %v13474_v24 = vsel %vm762_vm1, %v2917_v31, %v2918_v2  ;;  %v2776_v59 = vadd.f32 %v2693_v16, %v2532_v43  ;;  %v17735_v38 = vrot.slane %v13254_v4, 1  ;;  %v13489_v31 = vmul.f32 %v11668_v22, %v1172_v20 }
 0x3d4   : > { %17733 = vst [vmem:[#allocation37_spill] sm:$0xff] %v13474_v24  ;;  %10143 = vmatmul.mubr.msk.f32.gmra.mxu1 %vm3118_vm2, %v13474_v24  ;;  %v3082_v13 = vrot.slane %v13474_v24, 1  ;;  %v13492_v1 = vmul.f32 %v11656_v18, %v1172_v20  ;;  %v13495_v54 = vmul.f32 %v11660_v19, %v1172_v20  ;;  %v13498_v45 = vmul.f32 %v11747_v44, %v1172_v20 }
 0x3d5   : > { %v1347_v7 = vsel %vm1274_vm3, %v17735_v38, %v17734_v9  ;;  %17736 = vst [vmem:[#allocation56_spill] sm:$0xff] %v13489_v31  ;;  %v13502_v11 = vadd.f32 %v1594_v53, %v1416_v27  ;;  %v2815_v4 = vadd.f32 %v13143_v49, %v2776_v59  ;;  %v2159_v43 = vsel %vm1519_vm4, %v17258_v51, %v2158_v57 }
 0x3d6   : > { %v13507_v60 = vsel %vm1274_vm3, %v3081_v37, %v3082_v13  ;;  %v13514_v9 = vmul.f32 %v12773_v30, %v1172_v20  ;;  %v1415_v27 = vadd.f32 %v1347_v7, %v13286_v28  ;;  %v13519_v53 = vadd.f32 %v2159_v43, %v1985_v50  ;;  %v13522_v37 = vpop.permute.xlu0 %1023 }
 0x3d7   : > { %17738 = vst [vmem:[#allocation26_spill] sm:$0xff] %v13507_v60  ;;  %10092 = vmatprep.mubr.msk.f32.mxu0 %vm3118_vm2, %v13507_v60  ;;  %v2847_v38 = vmax.f32 %v2815_v4, 0.0  ;;  %v13526_v57 = vmul.f32 %v11747_v44, %v13500_v32  ;;  %v13536_v50 = vmul.f32 %v12773_v30, %v13500_v32  ;;  %v13540_v7 = vmul.f32 %v11664_v21, %v13415_v12 }
 0x3d8   : > { %v17740_v4 = vrot.slane %v13307_v52, 2  ;;  %v17741_v43 = vrot.slane %v13269_v35, 2  ;;  %v13554_v16 = vmul.f32 %v11664_v21, %v13522_v37  ;;  %v13562_v35 = vmul.f32 %v11860_v25, %v13500_v32 }
 0x3d9   : > { %v13532_v28 = vrot.slane %v2847_v38, 7  ;;  %17739 = vst [vmem:[#allocation54_spill] sm:$0xff] %v13540_v7  ;;  %v13550_v38 = vmul.f32 %v11656_v18, %v13500_v32  ;;  %v1705_v21 = vmul.f32 %v11737_v36, %v13415_v12  ;;  %v2257_v23 = vmul.f32 %v11860_v25, %v12888_v17 }
 0x3da   : > { %v1592_v51 = vsel %vm1519_vm4, %v17741_v43, %v17740_v4  ;;  %v13567_v4 = vmul.f32 %v11656_v18, %v13522_v37  ;;  %v13578_v43 = vsel %vm762_vm1, %v2918_v2, 0.0  ;;  %v13588_v60 = vmul.f32 %v11668_v22, %v13522_v37 }
 0x3db   : > { %17742 = vst [vmem:[#allocation27_spill] sm:$0xff] %v13550_v38  ;;  %v1660_v59 = vadd.f32 %v1592_v51, %v1415_v27  ;;  %v13558_v39 = vsel %vm762_vm1, 0.0, %v13532_v28  ;;  %v1792_v51 = vmul.f32 %v11656_v18, %v13415_v12  ;;  %v2036_v27 = vmul.f32 %v11660_v19, %v13415_v12  ;;  %17743 = vst [vmem:[#allocation21_spill] sm:$0xff] %v13578_v43  ;;  %v17758_v18 = vld [vmem:[#allocation43_spill] sm:$0xff] }
 0x3dc   : > { %10145 = vmatprep.mubr.msk.f32.mxu1 %vm3118_vm2, %v13558_v39  ;;  %v3084_v20 = vrot.slane %v13578_v43, 1  ;;  %17744 = vst [vmem:[#allocation40_spill] sm:$0xff] %v13588_v60  ;;  %v17745_v33 = vrot.slane %v12923_v41, 1  ;;  %v17746_v2 = vrot.slane %v13413_v55, 1  ;;  %v1917_v52 = vrot.slane %v13567_v4, 1 }
 0x3dd   : > { %v1737_v24 = vadd.f32 %v1705_v21, %v1660_v59  ;;  %v2037_v43 = vmul.f32 %v11660_v19, %v13522_v37  ;;  %v2289_v7 = vadd.f32 %v2257_v23, %v17748_v29  ;;  %v1916_v38 = vrot.slane %v1792_v51, 1  ;;  %v17751_v59 = vld [vmem:[#allocation31_spill] sm:$0xff]  ;;  %v17753_v21 = vld [vmem:[#allocation42_spill] sm:$0xff] }
 0x3de   : > { %v2451_v26 = vsel %vm1274_vm3, %v17746_v2, %v17745_v33  ;;  %v13599_v31 = vsel %vm1274_vm3, %v3082_v13, %v3084_v20  ;;  %v2160_v32 = vrot.slane %v2036_v27, 2  ;;  %v17749_v41 = vrot.slane %v12926_v8, 2  ;;  %v13614_v20 = vpop.permute.xlu0 %1666  ;;  %v17755_v23 = vld [vmem:[#allocation47_spill] sm:$0xff] }
 0x3df   : > { %17747 = vst [vmem:[#allocation22_spill] sm:$0xff] %v13599_v31  ;;  %10093 = vmatmul.mubr.msk.f32.gmra.mxu0 %vm3118_vm2, %v13599_v31  ;;  %v17750_v55 = vrot.slane %v13428_v15, 2  ;;  %v17752_v4 = vrot.slane %v17751_v59, 1  ;;  %v17754_v2 = vrot.slane %v17753_v21, 1  ;;  %v2533_v29 = vadd.f32 %v2451_v26, %v2289_v7  ;;  %v17756_v31 = vld [vmem:[#allocation38_spill] sm:$0xff]  ;;  %v17760_v59 = vld [vmem:[#allocation104_spill] sm:$0xff] }
 0x3e0   : > { %v1697_v27 = vmul.f32 %v11737_v36, %v17723_v6  ;;  %v17278_v8 = vrot.slane %v12978_v47, 1  ;;  %v17757_v15 = vrot.slane %v17756_v31, 2  ;;  %v1896_v21 = vrot.slane %v17760_v59, 1 }
 0x3e1   : > { %v2695_v33 = vsel %vm1519_vm4, %v17750_v55, %v17749_v41  ;;  %v1327_v13 = vsel %vm1274_vm3, %v17754_v2, %v17752_v4  ;;  %v17759_v41 = vrot.slane %v17758_v18, 2  ;;  %v2024_v4 = vmul.f32 %v11660_v19, %v17723_v6 }
 0x3e2   : > { %v1407_v51 = vadd.f32 %v1327_v13, %v17755_v23  ;;  %v13630_v26 = vmul.f32 %v11660_v19, %v12888_v17  ;;  %v1918_v7 = vsel %vm1274_vm3, %v1916_v38, %v1917_v52  ;;  %v2161_v2 = vrot.slane %v2037_v43, 2  ;;  %v13661_v60 = vpop.permute.xlu0 %1743 }
 0x3e3   : > { %v1572_v55 = vsel %vm1519_vm4, %v17759_v41, %v17757_v15  ;;  %v2777_v13 = vadd.f32 %v2695_v33, %v2533_v29  ;;  %v1898_v18 = vsel %vm1274_vm3, %v1896_v21, %v17278_v8  ;;  %v2336_v15 = vmul.f32 %v11747_v44, %v12931_v14 }
 0x3e4   : > { %v1652_v23 = vadd.f32 %v1572_v55, %v1407_v51  ;;  %v13641_v6 = vmul.f32 %v11747_v44, %v12900_v10  ;;  %v2266_v17 = vmul.f32 %v11860_v25, %v13614_v20  ;;  %v13647_v38 = vmul.f32 %v11747_v44, %v13614_v20 }
 0x3e5   : > { %v2816_v43 = vadd.f32 %v13143_v49, %v2777_v13  ;;  %v1986_v29 = vadd.f32 %v1918_v7, %v1737_v24  ;;  %v2140_v51 = vrot.slane %v2024_v4, 2  ;;  %v2580_v41 = vmul.f32 %v12773_v30, %v12931_v14 }
 0x3e6   : > { %v1729_v33 = vadd.f32 %v1697_v27, %v1652_v23  ;;  %v13654_v55 = vmul.f32 %v12773_v30, %v12900_v10  ;;  %v2162_v59 = vsel %vm1519_vm4, %v2160_v32, %v2161_v2  ;;  %v13659_v21 = vmul.f32 %v12773_v30, %v13614_v20 }
 0x3e7   : > { %v2848_v8 = vmax.f32 %v2816_v43, 0.0  ;;  %v17761_v24 = vrot.slane %v13630_v26, 2  ;;  %v2452_v4 = vrot.slane %v2336_v15, 1  ;;  %v2453_v7 = vrot.slane %v13641_v6, 1  ;;  %v13679_v6 = vld [vmem:[%s17083_s5 + $0x28] sm:$0xff] }
 0x3e8   : > { %v1978_v31 = vadd.f32 %v1898_v18, %v1729_v33  ;;  %v1706_v13 = vmul.f32 %v11737_v36, %v13522_v37  ;;  %v3086_v32 = vrot.slane %v13558_v39, 1  ;;  %v2258_v30 = vmul.f32 %v11860_v25, %v12931_v14  ;;  %10313 = vmatprep.subr.mxu1 %v13679_v6 }
 0x3e9   : > { %v2142_v27 = vsel %vm1519_vm4, %v2140_v51, %v17761_v24  ;;  %v2921_v23 = vrot.slane %v2848_v8, 7  ;;  %v2696_v18 = vrot.slane %v2580_v41, 2  ;;  %v2697_v43 = vrot.slane %v13654_v55, 2 }
 0x3ea   : > { %v2222_v22 = vadd.f32 %v2142_v27, %v1978_v31  ;;  %v1738_v33 = vadd.f32 %v1706_v13, %v13502_v11  ;;  %v2350_v15 = vmul.f32 %v11747_v44, %v13661_v60  ;;  %v2230_v8 = vadd.f32 %v2162_v59, %v1986_v29 }
 0x3eb   : > { %v13683_v31 = vsel %vm762_vm1, %v13532_v28, %v2921_v23  ;;  %v17762_v41 = vrot.slane %v13492_v1, 1  ;;  %v2454_v24 = vsel %vm1274_vm3, %v2452_v4, %v2453_v7  ;;  %v17763_v29 = vrot.slane %v13495_v54, 2  ;;  %v13699_v1 = vld [vmem:[%s17081_s3 + $0x8] ss:$0 sm:$0xff] }
 0x3ec   : > { %v2290_v51 = vadd.f32 %v2258_v30, %v2222_v22  ;;  %10146 = vmatmul.mubr.msk.f32.gmra.mxu1 %vm3118_vm2, %v13683_v31  ;;  %v3087_v11 = vrot.slane %v13683_v31, 1  ;;  %v2475_v22 = vrot.slane %v2350_v15, 1  ;;  %v13706_v13 = vsel %vm762_vm1, %v2921_v23, 0.0 }
 0x3ed   : > { %v1920_v55 = vsel %vm1274_vm3, %v1917_v52, %v17762_v41  ;;  %v2164_v28 = vsel %vm1519_vm4, %v2161_v2, %v17763_v29  ;;  %v13703_v52 = vmul.f32 %v13699_v1, %v13661_v60  ;;  %v2698_v2 = vsel %vm1519_vm4, %v2696_v18, %v2697_v43 }
 0x3ee   : > { %v1987_v27 = vadd.f32 %v1920_v55, %v1738_v33  ;;  %v2534_v59 = vadd.f32 %v2454_v24, %v2290_v51  ;;  %v13710_v54 = vsel %vm1274_vm3, %v3086_v32, %v3087_v11  ;;  %v13713_v33 = vadd.f32 %v2266_v17, %v2230_v8  ;;  %v17766_v24 = vld [vmem:[#allocation51_spill] sm:$0xff] }
 0x3ef   : > { %17764 = vst [vmem:[#allocation41_spill] sm:$0xff] %v13710_v54  ;;  %10095 = vmatprep.mubr.msk.f32.mxu0 %vm3118_vm2, %v13710_v54  ;;  %v17765_v41 = vrot.slane %v13526_v57, 1  ;;  %v3089_v32 = vrot.slane %v13706_v13, 1  ;;  %v1730_v18 = vadd.f32 %v12974_v42, %v17766_v24  ;;  %v17767_v17 = vrot.slane %v12898_v0, 1  ;;  %v17797_v42 = vld [vmem:[#allocation106_spill] sm:$0xff] }
 0x3f0   : > { %v2231_v30 = vadd.f32 %v2164_v28, %v1987_v27  ;;  %v2778_v51 = vadd.f32 %v2698_v2, %v2534_v59  ;;  %v17768_v8 = vrot.slane %v12978_v47, 1  ;;  %v13733_v28 = vmul.f32 %v11695_v48, %v13522_v37  ;;  %v17772_v2 = vld [vmem:[#allocation76_spill] sm:$0xff] }
 0x3f1   : > { %v2476_v23 = vsel %vm1274_vm3, %v17765_v41, %v2475_v22  ;;  %v17769_v59 = vrot.slane %v13471_v62, 1  ;;  %v13744_v0 = vsel %vm1274_vm3, %v3087_v11, %v3089_v32  ;;  %v2259_v62 = vmul.f32 %v11860_v25, %v12900_v10  ;;  %v17776_v32 = vld [vmem:[#allocation77_spill] sm:$0xff] }
 0x3f2   : > { %v2299_v55 = vadd.f32 %v13562_v35, %v2231_v30  ;;  %v1900_v27 = vsel %vm1274_vm3, %v17768_v8, %v17767_v17  ;;  %v2817_v29 = vadd.f32 %v13143_v49, %v2778_v51  ;;  %v17770_v35 = vrot.slane %v13554_v16, 1  ;;  %17771 = vst [vmem:[#allocation55_spill] sm:$0xff] %v13744_v0  ;;  %10096 = vmatmul.mubr.msk.f32.gmra.mxu0 %vm3118_vm2, %v13744_v0 }
 0x3f3   : > { %v1979_v47 = vadd.f32 %v1900_v27, %v1730_v18  ;;  %v17773_v30 = vrot.slane %v17772_v2, 2  ;;  %v17774_v51 = vrot.slane %v13630_v26, 2  ;;  %v17775_v8 = vrot.slane %v13125_v58, 1  ;;  %v17778_v27 = vld [vmem:[#allocation96_spill] sm:$0xff] }
 0x3f4   : > { %v13740_v22 = vsel %vm1274_vm3, %v17770_v35, %v17769_v59  ;;  %v2849_v24 = vmax.f32 %v2817_v29, 0.0  ;;  %v13753_v17 = vadd.f32 %v2476_v23, %v2299_v55  ;;  %v17777_v18 = vrot.slane %v17776_v32, 1  ;;  %v17781_v23 = vld [vmem:[#allocation102_spill] sm:$0xff]  ;;  %v17782_v29 = vld [vmem:[#allocation68_spill] sm:$0xff]  ;;  %v17786_v32 = vld [vmem:[#allocation109_spill] sm:$0xff] }
 0x3f5   : > { %v2144_v41 = vsel %vm1519_vm4, %v17774_v51, %v17773_v30  ;;  %v2456_v11 = vsel %vm1274_vm3, %v2453_v7, %v17775_v8  ;;  %v17779_v59 = vrot.slane %v17778_v27, 1  ;;  %v17780_v2 = vrot.slane %v13168_v46, 2  ;;  %v17784_v51 = vld [vmem:[#allocation103_spill] sm:$0xff] }
 0x3f6   : > { %v2223_v35 = vadd.f32 %v2144_v41, %v1979_v47  ;;  %v17783_v30 = vrot.slane %v17782_v29, 2  ;;  %v17785_v15 = vrot.slane %v17784_v51, 2  ;;  %v2923_v7 = vrot.slane %v2849_v24, 7 }
 0x3f7   : > { %v1332_v26 = vsel %vm1274_vm3, %v17779_v59, %v17777_v18  ;;  %v2700_v10 = vsel %vm1519_vm4, %v2697_v43, %v17780_v2  ;;  %v1699_v8 = vmul.f32 %v11737_v36, %v12931_v14  ;;  %v1901_v27 = vrot.slane %v17786_v32, 1  ;;  %v17787_v43 = vld [vmem:[#allocation84_spill] sm:$0xff] }
 0x3f8   : > { %v1409_v55 = vadd.f32 %v1332_v26, %v17781_v23  ;;  %v1577_v58 = vsel %vm1519_vm4, %v17785_v15, %v17783_v30  ;;  %v2027_v47 = vmul.f32 %v11660_v19, %v12931_v14  ;;  %v2291_v46 = vadd.f32 %v2259_v62, %v2223_v35 }
 0x3f9   : > { %v2260_v18 = vmul.f32 %v11860_v25, %v17787_v43  ;;  %v2339_v59 = vmul.f32 %v11747_v44, %v17787_v43  ;;  %v13784_v26 = vsel %vm762_vm1, 0.0, %v2923_v7  ;;  %v17788_v15 = vrot.slane %v13089_v40, 1 }
 0x3fa   : > { %v1654_v41 = vadd.f32 %v1577_v58, %v1409_v55  ;;  %v2145_v2 = vrot.slane %v2027_v47, 2  ;;  %v2340_v23 = vmul.f32 %v11747_v44, %v13186_v63  ;;  %10148 = vmatprep.mubr.msk.f32.mxu1 %vm3118_vm2, %v13784_v26  ;;  %v2535_v14 = vadd.f32 %v2456_v11, %v2291_v46  ;;  %v17790_v47 = vld [vmem:[#allocation79_spill] sm:$0xff] }
 0x3fb   : > { %v1903_v24 = vsel %vm1274_vm3, %v1901_v27, %v17788_v15  ;;  %v3091_v62 = vrot.slane %v13784_v26, 1  ;;  %v2457_v55 = vrot.slane %v2339_v59, 1  ;;  %v17789_v29 = vrot.slane %v13098_v56, 2 }
 0x3fc   : > { %v1731_v35 = vadd.f32 %v1699_v8, %v1654_v41  ;;  %v2458_v51 = vrot.slane %v2340_v23, 1  ;;  %v2583_v40 = vmul.f32 %v13699_v1, %v17787_v43  ;;  %v2584_v58 = vmul.f32 %v13699_v1, %v13186_v63  ;;  %v17792_v8 = vld [vmem:[#allocation80_spill] sm:$0xff] }
 0x3fd   : > { %v2147_v30 = vsel %vm1519_vm4, %v2145_v2, %v17789_v29  ;;  %v2779_v32 = vadd.f32 %v2700_v10, %v2535_v14  ;;  %v2261_v11 = vmul.f32 %v11860_v25, %v13186_v63  ;;  %v17791_v46 = vrot.slane %v17790_v47, 1  ;;  %v17794_v23 = vld [vmem:[#allocation92_spill] sm:$0xff]  ;;  %v17796_v14 = vld [vmem:[#allocation34_spill] sm:$0xff] }
 0x3fe   : > { %v1980_v27 = vadd.f32 %v1903_v24, %v1731_v35  ;;  %v17793_v41 = vrot.slane %v17792_v8, 1  ;;  %v2459_v59 = vsel %vm1274_vm3, %v2457_v55, %v2458_v51  ;;  %v2701_v15 = vrot.slane %v2583_v40, 2  ;;  %v17798_v8 = vld [vmem:[#allocation52_spill] sm:$0xff] }
 0x3ff   : > { %v2702_v2 = vrot.slane %v2584_v58, 2  ;;  %v17795_v29 = vrot.slane %v17794_v23, 1  ;;  %v2818_v10 = vadd.f32 %v13143_v49, %v2779_v32  ;;  %v2293_v35 = vadd.f32 %v2261_v11, %v17796_v14  ;;  %v17800_v55 = vld [vmem:[#allocation88_spill] sm:$0xff] }
 0x400   : > { %v1337_v56 = vsel %vm1274_vm3, %v17793_v41, %v17791_v46  ;;  %v2224_v24 = vadd.f32 %v2147_v30, %v1980_v27  ;;  %v17799_v54 = vrot.slane %v17798_v8, 2  ;;  %v17801_v40 = vrot.slane %v17800_v55, 2  ;;  %v17802_v58 = vld [vmem:[#allocation48_spill] sm:$0xff] }
 0x401   : > { %v2461_v4 = vsel %vm1274_vm3, %v2458_v51, %v17795_v29  ;;  %v1411_v0 = vadd.f32 %v1337_v56, %v17797_v42  ;;  %v2703_v47 = vsel %vm1519_vm4, %v2701_v15, %v2702_v2  ;;  %v17803_v41 = vrot.slane %v17802_v58, 2  ;;  %v17804_v42 = vld [vmem:[#allocation112_spill] sm:$0xff]  ;;  %v17805_v15 = vld [vmem:[#allocation115_spill] sm:$0xff] }
 0x402   : > { %v2705_v46 = vsel %vm1519_vm4, %v2702_v2, %v17799_v54  ;;  %v1701_v51 = vmul.f32 %v11737_v36, %v17787_v43  ;;  %v2850_v30 = vmax.f32 %v2818_v10, 0.0  ;;  %v2292_v32 = vadd.f32 %v2260_v18, %v2224_v24 }
 0x403   : > { %v1582_v23 = vsel %vm1519_vm4, %v17803_v41, %v17801_v40  ;;  %v2537_v27 = vadd.f32 %v2461_v4, %v2293_v35  ;;  %v1906_v56 = vrot.slane %v17804_v42, 1  ;;  %v1907_v29 = vrot.slane %v17805_v15, 1  ;;  %v17806_v4 = vld [vmem:[#allocation36_spill] sm:$0xff] }
 0x404   : > { %v1656_v11 = vadd.f32 %v1582_v23, %v1411_v0  ;;  %v2030_v54 = vmul.f32 %v11660_v19, %v17787_v43  ;;  %v2031_v2 = vmul.f32 %v11660_v19, %v13186_v63  ;;  %v2924_v14 = vrot.slane %v2850_v30, 7  ;;  %v17808_v30 = vld [vmem:[#allocation116_spill] sm:$0xff] }
 0x405   : > { %v2536_v8 = vadd.f32 %v2459_v59, %v2292_v32  ;;  %v2781_v55 = vadd.f32 %v2705_v46, %v2537_v27  ;;  %v1908_v58 = vsel %vm1274_vm3, %v1906_v56, %v1907_v29  ;;  %v2262_v0 = vmul.f32 %v11860_v25, %v17806_v4 }
 0x406   : > { %v1733_v40 = vadd.f32 %v1701_v51, %v1656_v11  ;;  %v2150_v10 = vrot.slane %v2030_v54, 2  ;;  %v2151_v18 = vrot.slane %v2031_v2, 2  ;;  %v13836_v24 = vsel %vm762_vm1, %v2923_v7, %v2924_v14 }
 0x407   : > { %17807 = vst [vmem:[#allocation45_spill] sm:$0xff] %v13836_v24  ;;  %v2780_v35 = vadd.f32 %v2703_v47, %v2536_v8  ;;  %v13839_v43 = vsel %vm762_vm1, %v2924_v14, 0.0  ;;  %v2820_v63 = vadd.f32 %v13143_v49, %v2781_v55  ;;  %10149 = vmatmul.mubr.msk.f32.gmra.mxu1 %vm3118_vm2, %v13836_v24  ;;  %v3092_v59 = vrot.slane %v13836_v24, 1 }
 0x408   : > { %v3094_v46 = vrot.slane %v13839_v43, 1  ;;  %v1982_v41 = vadd.f32 %v1908_v58, %v1733_v40  ;;  %v2152_v23 = vsel %vm1519_vm4, %v2150_v10, %v2151_v18  ;;  %v2342_v47 = vmul.f32 %v11747_v44, %v17806_v4  ;;  %v17809_v40 = vld [vmem:[#allocation101_spill] sm:$0xff]  ;;  %v17810_v58 = vld [vmem:[#allocation35_spill] sm:$0xff] }
 0x409   : > { %v2819_v51 = vadd.f32 %v13143_v49, %v2780_v35  ;;  %v2852_v7 = vmax.f32 %v2820_v63, 0.0  ;;  %v2343_v32 = vmul.f32 %v11747_v44, %v17808_v30  ;;  %v13853_v27 = vsel %vm1274_vm3, %v3091_v62, %v3092_v59 }
 0x40a   : > { %v13856_v11 = vsel %vm1274_vm3, %v3092_v59, %v3094_v46  ;;  %v2226_v42 = vadd.f32 %v2152_v23, %v1982_v41  ;;  %v2586_v56 = vmul.f32 %v13699_v1, %v17806_v4  ;;  %10098 = vmatprep.mubr.msk.f32.mxu0 %vm3118_vm2, %v13853_v27  ;;  %v2462_v2 = vrot.slane %v2342_v47, 1  ;;  %v17811_v46 = vld [vmem:[#allocation85_spill] sm:$0xff] }
 0x40b   : > { %v2851_v15 = vmax.f32 %v2819_v51, 0.0  ;;  %v2927_v54 = vrot.slane %v2852_v7, 7  ;;  %v2463_v14 = vrot.slane %v2343_v32, 1  ;;  %10099 = vmatmul.mubr.msk.f32.gmra.mxu0 %vm3118_vm2, %v13856_v11  ;;  %v2587_v62 = vmul.f32 %v13699_v1, %v17808_v30 }
 0x40c   : > { %v2294_v8 = vadd.f32 %v2262_v0, %v2226_v42  ;;  %v2706_v55 = vrot.slane %v2586_v56, 2  ;;  %v1734_v10 = vadd.f32 %v17810_v58, %v17809_v40  ;;  %v17812_v41 = vrot.slane %v17811_v46, 1  ;;  %v17814_v56 = vld [vmem:[#allocation86_spill] sm:$0xff]  ;;  %v17819_v46 = vld [vmem:[#allocation87_spill] sm:$0xff] }
 0x40d   : > { %v2926_v35 = vrot.slane %v2851_v15, 7  ;;  %v2464_v63 = vsel %vm1274_vm3, %v2462_v2, %v2463_v14  ;;  %v13870_v59 = vsel %vm762_vm1, %v2927_v54, 0.0  ;;  %v2707_v7 = vrot.slane %v2587_v62, 2 }
 0x40e   : > { %v1910_v23 = vsel %vm1274_vm3, %v1907_v29, %v17812_v41  ;;  %v2538_v51 = vadd.f32 %v2464_v63, %v2294_v8  ;;  %v3099_v0 = vrot.slane %v13870_v59, 1  ;;  %v17815_v15 = vrot.slane %v17814_v56, 2 }
 0x40f   : > { %v1983_v47 = vadd.f32 %v1910_v23, %v1734_v10  ;;  %v13877_v32 = vsel %vm762_vm1, 0.0, %v2926_v35  ;;  %v13880_v42 = vsel %vm762_vm1, %v2926_v35, %v2927_v54  ;;  %v2263_v40 = vmul.f32 %v11860_v25, %v17808_v30  ;;  %v17821_v23 = vld [vmem:[#allocation105_spill] sm:$0xff] }
 0x410   : > { %17813 = vst [vmem:[#allocation44_spill] sm:$0xff] %v13880_v42  ;;  %v2154_v2 = vsel %vm1519_vm4, %v2151_v18, %v17815_v15  ;;  %10151 = vmatprep.mubr.msk.f32.mxu1 %vm3118_vm2, %v13877_v32  ;;  %v3096_v29 = vrot.slane %v13877_v32, 1  ;;  %v3097_v8 = vrot.slane %v13880_v42, 1  ;;  %v2708_v62 = vsel %vm1519_vm4, %v2706_v55, %v2707_v7 }
 0x411   : > { %v2227_v58 = vadd.f32 %v2154_v2, %v1983_v47  ;;  %v17816_v54 = vrot.slane %v13703_v52, 2  ;;  %v17817_v10 = vrot.slane %v13536_v50, 2  ;;  %10152 = vmatmul.mubr.msk.f32.gmra.mxu1 %vm3118_vm2, %v13880_v42  ;;  %v2782_v18 = vadd.f32 %v2708_v62, %v2538_v51  ;;  %v17823_v2 = vld [vmem:[#allocation110_spill] sm:$0xff] }
 0x412   : > { %v17818_v30 = vrot.slane %v13454_v61, 1  ;;  %v17820_v41 = vrot.slane %v17819_v46, 1  ;;  %v17822_v56 = vrot.slane %v17821_v23, 1  ;;  %v13909_v47 = vsel %vm1274_vm3, %v3096_v29, %v3097_v8  ;;  %v17824_v51 = vld [vmem:[#allocation50_spill] sm:$0xff] }
 0x413   : > { %v2720_v35 = vsel %vm1519_vm4, %v17817_v10, %v17816_v54  ;;  %v2295_v15 = vadd.f32 %v2263_v40, %v2227_v58  ;;  %10101 = vmatprep.mubr.msk.f32.mxu0 %vm3118_vm2, %v13909_v47  ;;  %v2821_v61 = vadd.f32 %v13143_v49, %v2782_v18  ;;  %v17825_v62 = vrot.slane %v17824_v51, 2  ;;  %v17826_v10 = vld [vmem:[#allocation111_spill] sm:$0xff] }
 0x414   : > { %v2466_v63 = vsel %vm1274_vm3, %v2463_v14, %v17818_v30  ;;  %v1342_v55 = vsel %vm1274_vm3, %v17822_v56, %v17820_v41  ;;  %v2787_v52 = vadd.f32 %v2720_v35, %v13753_v17  ;;  %v13916_v14 = vsel %vm1274_vm3, %v3097_v8, %v3099_v0  ;;  %v17828_v35 = vld [vmem:[#allocation94_spill] sm:$0xff] }
 0x415   : > { %v1413_v54 = vadd.f32 %v1342_v55, %v17823_v2  ;;  %v17827_v30 = vrot.slane %v17826_v10, 2  ;;  %v1911_v29 = vrot.slane %v17828_v35, 1  ;;  %10102 = vmatmul.mubr.msk.f32.gmra.mxu0 %vm3118_vm2, %v13916_v14  ;;  %v2539_v40 = vadd.f32 %v2466_v63, %v2295_v15 }
 0x416   : > { %v1703_v46 = vmul.f32 %v11737_v36, %v17806_v4  ;;  %v2033_v0 = vmul.f32 %v11660_v19, %v17806_v4  ;;  %v2853_v8 = vmax.f32 %v2821_v61, 0.0  ;;  %v17829_v18 = vrot.slane %v13465_v34, 2 }
 0x417   : > { %v1587_v17 = vsel %vm1519_vm4, %v17827_v30, %v17825_v62  ;;  %v2345_v23 = vmul.f32 %v11747_v44, %v13415_v12  ;;  %v2346_v56 = vmul.f32 %v11747_v44, %v13522_v37  ;;  %v2589_v2 = vmul.f32 %v13699_v1, %v13415_v12 }
 0x418   : > { %v1658_v58 = vadd.f32 %v1587_v17, %v1413_v54  ;;  %v2710_v41 = vsel %vm1519_vm4, %v2707_v7, %v17829_v18  ;;  %v2155_v15 = vrot.slane %v2033_v0, 2  ;;  %v2929_v54 = vrot.slane %v2853_v8, 7 }
 0x419   : > { %v2783_v55 = vadd.f32 %v2710_v41, %v2539_v40  ;;  %v17830_v4 = vrot.slane %v13358_v3, 1  ;;  %v2468_v34 = vrot.slane %v2346_v56, 1  ;;  %v2590_v7 = vmul.f32 %v13699_v1, %v13522_v37 }
 0x41a   : > { %v1735_v63 = vadd.f32 %v1703_v46, %v1658_v58  ;;  %v2264_v10 = vmul.f32 %v11860_v25, %v13415_v12  ;;  %v2467_v30 = vrot.slane %v2345_v23, 1  ;;  %v13948_v17 = vsel %vm762_vm1, 0.0, %v2929_v54 }
 0x41b   : > { %v1913_v61 = vsel %vm1274_vm3, %v1911_v29, %v17830_v4  ;;  %v2822_v51 = vadd.f32 %v13143_v49, %v2783_v55  ;;  %v17831_v35 = vrot.slane %v13362_v5, 2  ;;  %v2712_v40 = vrot.slane %v2590_v7, 2  ;;  %10154 = vmatprep.mubr.msk.f32.mxu1 %vm3118_vm2, %v13948_v17 }
 0x41c   : > { %v1984_v62 = vadd.f32 %v1913_v61, %v1735_v63  ;;  %v2265_v29 = vmul.f32 %v11860_v25, %v13522_v37  ;;  %v2469_v0 = vsel %vm1274_vm3, %v2467_v30, %v2468_v34  ;;  %v2711_v8 = vrot.slane %v2589_v2, 2 }
 0x41d   : > { %v2157_v3 = vsel %vm1519_vm4, %v2155_v15, %v17831_v35  ;;  %v2854_v58 = vmax.f32 %v2822_v51, 0.0  ;;  %v3101_v18 = vrot.slane %v13948_v17, 1  ;;  %v17832_v5 = vrot.slane %v13498_v45, 1  ;;  %v17838_v35 = vld [vmem:[#allocation20_spill] sm:$0xff] }
 0x41e   : > { %v2228_v46 = vadd.f32 %v2157_v3, %v1984_v62  ;;  %v2297_v41 = vadd.f32 %v2265_v29, %v13519_v53  ;;  %v17833_v56 = vrot.slane %v13526_v57, 1  ;;  %v17834_v37 = vrot.slane %v13647_v38, 1  ;;  %v17839_v3 = vld [vmem:[#allocation40_spill] sm:$0xff] }
 0x41f   : > { %v2471_v23 = vsel %vm1274_vm3, %v2468_v34, %v17832_v5  ;;  %v2930_v63 = vrot.slane %v2854_v58, 7  ;;  %v2713_v4 = vsel %vm1519_vm4, %v2711_v8, %v2712_v40  ;;  %v17835_v7 = vrot.slane %v13514_v9, 2 }
 0x420   : > { %v2474_v55 = vsel %vm1274_vm3, %v17834_v37, %v17833_v56  ;;  %v2296_v15 = vadd.f32 %v2264_v10, %v2228_v46  ;;  %v2541_v61 = vadd.f32 %v2471_v23, %v2297_v41  ;;  %v17836_v45 = vrot.slane %v13536_v50, 2  ;;  %v17840_v46 = vld [vmem:[#allocation19_spill] sm:$0xff]  ;;  %v14003_v41 = vld [vmem:[%s17082_s4] ss:$0 sm:$0xff] }
 0x421   : > { %v2542_v2 = vadd.f32 %v2474_v55, %v13713_v33  ;;  %v2715_v53 = vsel %vm1519_vm4, %v2712_v40, %v17835_v7  ;;  %v17837_v34 = vrot.slane %v13659_v21, 2  ;;  %v2826_v38 = vadd.f32 %v13143_v49, %v2787_v52  ;;  %v17841_v56 = vld [vmem:[#allocation39_spill] sm:$0xff] }
 0x422   : > { %v13980_v51 = vsel %vm762_vm1, %v2929_v54, %v2930_v63  ;;  %v2540_v62 = vadd.f32 %v2469_v0, %v2296_v15  ;;  %v13983_v10 = vsel %vm762_vm1, %v2930_v63, 0.0  ;;  %v2785_v21 = vadd.f32 %v2715_v53, %v2541_v61  ;;  %v17842_v37 = vld [vmem:[#allocation27_spill] sm:$0xff]  ;;  %v17844_v61 = vld [vmem:[#allocation54_spill] sm:$0xff] }
 0x423   : > { %v2718_v57 = vsel %vm1519_vm4, %v17837_v34, %v17836_v45  ;;  %10155 = vmatmul.mubr.msk.f32.gmra.mxu1 %vm3118_vm2, %v13980_v51  ;;  %v3102_v9 = vrot.slane %v13980_v51, 1  ;;  %v3104_v50 = vrot.slane %v13983_v10, 1  ;;  %v2858_v30 = vmax.f32 %v2826_v38, 0.0  ;;  %v17846_v45 = vld [vmem:[#allocation56_spill] sm:$0xff] }
 0x424   : > { %v2786_v33 = vadd.f32 %v2718_v57, %v2542_v2  ;;  %v1468_v52 = vmul.f32 %v17838_v35, %v13415_v12  ;;  %v1596_v54 = vrot.slane %v17839_v3, 2  ;;  %v2784_v40 = vadd.f32 %v2713_v4, %v2540_v62  ;;  %v14021_v4 = vpop.f32.mrf.mxu0 }
 0x425   : > { %v1418_v58 = vadd.f32 %v13740_v22, %v13733_v28  ;;  %v1797_v0 = vmul.f32 %v17840_v46, %v13661_v60  ;;  %v13998_v8 = vsel %vm1274_vm3, %v3101_v18, %v3102_v9  ;;  %v2824_v5 = vadd.f32 %v14003_v41, %v2785_v21 }
 0x426   : > { %v2825_v29 = vadd.f32 %v13143_v49, %v2786_v33  ;;  %10104 = vmatprep.mubr.msk.f32.mxu0 %vm3118_vm2, %v13998_v8  ;;  %v2823_v49 = vadd.f32 %v14003_v41, %v2784_v40  ;;  %v14010_v28 = vsel %vm1274_vm3, %v3102_v9, %v3104_v50  ;;  %v2936_v23 = vrot.slane %v2858_v30, 7  ;;  %v14031_v33 = vpop.f32.mrf.mxu1 }
 0x427   : > { %v1708_v18 = vmul.f32 %v11737_v36, %v17841_v56  ;;  %v17284_v55 = vrot.slane %v17842_v37, 1  ;;  %v14017_v63 = vmul.f32 %v11660_v19, %v17841_v56  ;;  %10105 = vmatmul.mubr.msk.f32.gmra.mxu0 %vm3118_vm2, %v14010_v28  ;;  %v2856_v15 = vmax.f32 %v2824_v5, 0.0 }
 0x428   : > { %v2857_v22 = vmax.f32 %v2825_v29, 0.0  ;;  %v17843_v2 = vrot.slane %v13554_v16, 1  ;;  %v17845_v7 = vrot.slane %v17844_v61, 1  ;;  %v17847_v34 = vrot.slane %v17846_v45, 2  ;;  %v14059_v56 = vpop.f32.mrf.mxu1 }
 0x429   : > { %v2855_v38 = vmax.f32 %v2823_v49, 0.0  ;;  %v1060_v9 = vmul.f32 %v11695_v48, %v13415_v12  ;;  %v1595_v50 = vrot.slane %v1468_v52, 2  ;;  %v2933_v30 = vrot.slane %v2856_v15, 7  ;;  %v14048_v48 = vpop.f32.mrf.mxu0  ;;  %17849 = vst [vmem:[#allocation93_spill] sm:$0xff] %v14059_v56  ;;  %v17859_v56 = vld [vmem:[#allocation70_spill] sm:$0xff] }
 0x42a   : > { %v1352_v53 = vsel %vm1274_vm3, %v17845_v7, %v17843_v2  ;;  %v1599_v57 = vsel %vm1519_vm4, %v1596_v54, %v17847_v34  ;;  %v2935_v62 = vrot.slane %v2857_v22, 7  ;;  %v1924_v35 = vrot.slane %v1797_v0, 1  ;;  %17848 = vst [vmem:[#allocation49_spill] sm:$0xff] %v14048_v48 }
 0x42b   : > { %v1663_v21 = vadd.f32 %v1599_v57, %v1418_v58  ;;  %v2932_v16 = vrot.slane %v2855_v38, 7  ;;  %v1417_v29 = vadd.f32 %v1352_v53, %v1060_v9  ;;  %v14042_v5 = vsel %vm762_vm1, %v2933_v30, 0.0  ;;  %v14075_v45 = vpop.f32.mrf.mxu0  ;;  %v17852_v38 = vld [vmem:[#allocation13_spill] sm:$0xff] }
 0x42c   : > { %v14036_v3 = vsel %vm762_vm1, 0.0, %v2935_v62  ;;  %v14039_v40 = vsel %vm762_vm1, %v2935_v62, %v2936_v23  ;;  %v14046_v22 = vsel %vm762_vm1, %v2936_v23, 0.0  ;;  %v2041_v12 = vmul.f32 %v11660_v19, %v13661_v60 }
 0x42d   : > { %v3112_v49 = vrot.slane %v14039_v40, 1  ;;  %v14053_v52 = vsel %vm762_vm1, 0.0, %v2932_v16  ;;  %v14056_v58 = vsel %vm762_vm1, %v2932_v16, %v2933_v30  ;;  %v3109_v0 = vrot.slane %v14042_v5, 1  ;;  %v14092_v30 = vpop.f32.mrf.mxu1 }
 0x42e   : > { %v1597_v15 = vsel %vm1519_vm4, %v1595_v50, %v1596_v54  ;;  %10157 = vmatprep.mubr.msk.f32.mxu1 %vm3118_vm2, %v14053_v52  ;;  %v3106_v23 = vrot.slane %v14053_v52, 1  ;;  %v3107_v2 = vrot.slane %v14056_v58, 1  ;;  %v3111_v60 = vrot.slane %v14036_v3, 1 }
 0x42f   : > { %v1795_v61 = vmul.f32 %v17840_v46, %v13614_v20  ;;  %v1740_v7 = vadd.f32 %v1708_v18, %v1663_v21  ;;  %v1925_v53 = vsel %vm1274_vm3, %v17284_v55, %v1924_v35  ;;  %10158 = vmatmul.mubr.msk.f32.gmra.mxu1 %vm3118_vm2, %v14056_v58  ;;  %v3114_v54 = vrot.slane %v14046_v22, 1  ;;  %v17851_v18 = vld [vmem:[#allocation14_spill] sm:$0xff]  ;;  %v17854_v35 = vld [vmem:[#allocation15_spill] sm:$0xff] }
 0x430   : > { %v14078_v34 = vsel %vm1274_vm3, %v3106_v23, %v3107_v2  ;;  %10160 = vmatprep.mubr.msk.f32.mxu1 %vm3118_vm2, %v14036_v3  ;;  %v14083_v46 = vsel %vm1274_vm3, %v3111_v60, %v3112_v49  ;;  %v3697_v57 = vrot.slane %v17851_v18, 2  ;;  %v3698_v62 = vrot.slane %v17852_v38, 2  ;;  %v17855_v23 = vld [vmem:[#allocation16_spill] sm:$0xff]  ;;  %v14123_v38 = vpop.f32.mrf.mxu1 }
 0x431   : > { %17850 = vst [vmem:[#allocation29_spill] sm:$0xff] %v14083_v46  ;;  %v1662_v9 = vadd.f32 %v1597_v15, %v1417_v29  ;;  %v2168_v50 = vrot.slane %v2041_v12, 2  ;;  %10107 = vmatprep.mubr.msk.f32.mxu0 %vm3118_vm2, %v14078_v34  ;;  %v14090_v21 = vsel %vm1274_vm3, %v3107_v2, %v3109_v0  ;;  %v3700_v16 = vrot.slane %v17854_v35, 2  ;;  %v17856_v29 = vld [vmem:[#allocation23_spill] sm:$0xff]  ;;  %17861 = vst [vmem:[#allocation42_spill] sm:$0xff] %v14123_v38  ;;  %v17865_v38 = vld [vmem:[#allocation81_spill] sm:$0xff] }
 0x432   : > { %17853 = vst [vmem:[#allocation46_spill] sm:$0xff] %v14090_v21  ;;  %v2353_v60 = vmul.f32 %v11747_v44, %v17855_v23  ;;  %v1989_v55 = vadd.f32 %v1925_v53, %v1740_v7  ;;  %10108 = vmatmul.mubr.msk.f32.gmra.mxu0 %vm3118_vm2, %v14090_v21  ;;  %v14101_v12 = vmul.f32 %v17856_v29, %v11747_v44  ;;  %v2166_v15 = vrot.slane %v14017_v63, 2  ;;  %v14113_v7 = vpop.f32.mrf.mxu0 }
 0x433   : > { %v1707_v0 = vmul.f32 %v11737_v36, %v13614_v20  ;;  %10161 = vmatmul.mubr.msk.f32.gmra.mxu1 %vm3118_vm2, %v14039_v40  ;;  %10110 = vmatprep.mubr.msk.f32.mxu0 %vm3118_vm2, %v14083_v46  ;;  %v14111_v2 = vsel %vm1274_vm3, %v3112_v49, %v3114_v54  ;;  %17858 = vst [vmem:[#allocation32_spill] sm:$0xff] %v14113_v7  ;;  %v1921_v53 = vrot.slane %v1795_v61, 1 }
 0x434   : > { %17857 = vst [vmem:[#allocation30_spill] sm:$0xff] %v14111_v2  ;;  %v2039_v35 = vmul.f32 %v11660_v19, %v13614_v20  ;;  %10215 = vmatprep.mubr.msk.f32.mxu1 %vm3118_vm2, %v17859_v56  ;;  %v14120_v36 = vsel %vm1519_vm4, %v3697_v57, %v3698_v62  ;;  %v2169_v48 = vsel %vm1519_vm4, %v2166_v15, %v2168_v50  ;;  %v14125_v18 = vpop.f32.mrf.mxu0  ;;  %v2480_v49 = vrot.slane %v2353_v60, 1  ;;  %v14134_v19 = vld [vmem:[%s17083_s5 + $0x38] sm:$0xff] }
 0x435   : > { %17860 = vst [vmem:[#allocation31_spill] sm:$0xff] %v14120_v36  ;;  %v1739_v63 = vadd.f32 %v1707_v0, %v1662_v9  ;;  %v2597_v61 = vmul.f32 %v13699_v1, %v17855_v23  ;;  %v2233_v54 = vadd.f32 %v2169_v48, %v1989_v55  ;;  %v2478_v20 = vrot.slane %v14101_v12, 1  ;;  %v17862_v9 = vld [vmem:[#allocation71_spill] sm:$0xff]  ;;  %v14149_v48 = vpop.f32.mrf.mxu1 }
 0x436   : > { %10111 = vmatmul.mubr.msk.f32.gmra.mxu0 %vm3118_vm2, %v14111_v2  ;;  %v14139_v57 = vmul.f32 %v13699_v1, %v17856_v29  ;;  %v3703_v50 = vrot.slane %v17862_v9, 2  ;;  %v14147_v55 = vsel %vm1519_vm4, %v3698_v62, %v3700_v16  ;;  %v17864_v23 = vrot.slane %v17842_v37, 1  ;;  %v14164_v37 = vpop.f32.mrf.mxu0 }
 0x437   : > { %10216 = vmatmul.mubr.msk.f32.vlgmr.msra.gmra.mxu1 %vm3118_vm2, %v17862_v9  ;;  %10165 = vmatprep.mubr.msk.f32.mxu0 %vm3118_vm2, %v14120_v36  ;;  %17863 = vst [vmem:[#allocation47_spill] sm:$0xff] %v14147_v55  ;;  %v2165_v12 = vrot.slane %v2039_v35, 2  ;;  %v2269_v0 = vmul.f32 %v17856_v29, %v11860_v25  ;;  %v17866_v9 = vld [vmem:[#allocation24_spill] sm:$0xff]  ;;  %v3702_v62 = vrot.slane %v17859_v56, 2  ;;  %17868 = vst [vmem:[#allocation38_spill] sm:$0xff] %v14164_v37  ;;  %v17869_v29 = vld [vmem:[#allocation82_spill] sm:$0xff] }
 0x438   : > { %v1923_v60 = vsel %vm1274_vm3, %v1921_v53, %v17864_v23  ;;  %10218 = vmatprep.mubr.msk.f32.mxu1 %vm3118_vm2, %v17865_v38  ;;  %v2351_v7 = vmul.f32 %v17866_v9, %v11747_v44  ;;  %10314 = vmatpush3.msra.mxu1 %v13679_v6  ;;  %v17867_v36 = vld [vmem:[#allocation72_spill] sm:$0xff]  ;;  %v2724_v53 = vrot.slane %v2597_v61, 2  ;;  %v3708_v23 = vrot.slane %v17869_v29, 2  ;;  %v14172_v44 = vld [vmem:[%s17083_s5 + $0x30] sm:$0xff] }
 0x439   : > { %v1988_v16 = vadd.f32 %v1923_v60, %v1739_v63  ;;  %v3705_v2 = vrot.slane %v17867_v36, 2  ;;  %10413 = vmatprep.subr.mxu1 %v14134_v19  ;;  %v2301_v35 = vadd.f32 %v2269_v0, %v2233_v54  ;;  %v2481_v6 = vsel %vm1274_vm3, %v2478_v20, %v2480_v49  ;;  %v11065_v36 = vld [vmem:[%s17083_s5 + $0x20] sm:$0xff]  ;;  %v14186_v54 = vpop.f32.mrf.mxu1  ;;  %v10076_v60 = vpop.f32.mrf.mxu0 }
 0x43a   : > { %10166 = vmatmul.mubr.msk.f32.vlgmr.msra.gmra.mxu0 %vm3118_vm2, %v14147_v55  ;;  %v2722_v56 = vrot.slane %v14139_v57, 2  ;;  %v14182_v63 = vsel %vm1519_vm4, %v3702_v62, %v3703_v50  ;;  %v2268_v61 = vmul.f32 %v17866_v9, %v11860_v25  ;;  %17870 = vst [vmem:[#allocation43_spill] sm:$0xff] %v14186_v54  ;;  %v17871_v49 = vld [vmem:[#allocation57_spill] sm:$0xff]  ;;  %v3707_v57 = vrot.slane %v17865_v38, 2  ;;  %v17873_v25 = vld [vmem:[#allocation59_spill] sm:$0xff] }
 0x43b   : > { %10219 = vmatmul.mubr.msk.f32.gmra.mxu1 %vm3118_vm2, %v17869_v29  ;;  %10264 = vmatpush3.msra.mxu0 %v11065_v36  ;;  %v17872_v0 = vld [vmem:[#allocation89_spill] sm:$0xff]  ;;  %v2167_v36 = vsel %vm1519_vm4, %v2165_v12, %v2166_v15  ;;  %v2477_v62 = vrot.slane %v2351_v7, 1  ;;  %v14196_v55 = vsel %vm1519_vm4, %v3703_v50, %v3705_v2  ;;  %v3713_v29 = vrot.slane %v17873_v25, 2  ;;  %v10126_v21 = vpop.f32.mrf.mxu1  ;;  %v14213_v12 = vpop.f32.mrf.mxu0 }
 0x43c   : > { %10168 = vmatprep.mubr.msk.f32.mxu0 %vm3118_vm2, %v14182_v63  ;;  %10221 = vmatprep.mubr.msk.f32.mxu1 %vm3118_vm2, %v17871_v49  ;;  %v3710_v37 = vrot.slane %v17872_v0, 2  ;;  %v2232_v54 = vadd.f32 %v2167_v36, %v1988_v16  ;;  %v2595_v46 = vmul.f32 %v13699_v1, %v17866_v9  ;;  %v14205_v0 = vsel %vm1519_vm4, %v3707_v57, %v3708_v23  ;;  %v17875_v9 = vld [vmem:[#allocation98_spill] sm:$0xff] }
 0x43d   : > { %10363 = vmatprep.subr.mxu0 %v14172_v44  ;;  %v2545_v15 = vadd.f32 %v2481_v6, %v2301_v35  ;;  %v2725_v7 = vsel %vm1519_vm4, %v2722_v56, %v2724_v53  ;;  %v3712_v1 = vrot.slane %v17871_v49, 2  ;;  %17874 = vst [vmem:[#allocation104_spill] sm:$0xff] %v14213_v12  ;;  %v2479_v53 = vsel %vm1274_vm3, %v2477_v62, %v2478_v20  ;;  %v10079_v49 = vpop.f32.mrf.mxu0 }
 0x43e   : > { %10169 = vmatmul.mubr.msk.f32.gmra.mxu0 %vm3118_vm2, %v14196_v55  ;;  %v2300_v2 = vadd.f32 %v2268_v61, %v2232_v54  ;;  %v2721_v50 = vrot.slane %v2595_v46, 2  ;;  %v14218_v16 = vsel %vm1519_vm4, %v3708_v23, %v3710_v37  ;;  %v14223_v6 = vadd.f32 %v14031_v33, %v14021_v4  ;;  %v17877_v61 = vld [vmem:[#allocation60_spill] sm:$0xff]  ;;  %v17878_v54 = vld [vmem:[#allocation99_spill] sm:$0xff] }
 0x43f   : > { %10222 = vmatmul.mubr.msk.f32.gmra.mxu1 %vm3118_vm2, %v17873_v25  ;;  %10171 = vmatprep.mubr.msk.f32.mxu0 %vm3118_vm2, %v14205_v0  ;;  %v2789_v35 = vadd.f32 %v2725_v7, %v2545_v15  ;;  %v14226_v57 = vsel %vm1519_vm4, %v3712_v1, %v3713_v29  ;;  %v3715_v46 = vrot.slane %v17877_v61, 2  ;;  %v3718_v36 = vrot.slane %v17878_v54, 2  ;;  %v14230_v25 = vpop.f32.mrf.mxu1  ;;  %v17883_v15 = vld [vmem:[#allocation63_spill] sm:$0xff] }
 0x440   : > { %10224 = vmatprep.mubr.msk.f32.mxu1 %vm3118_vm2, %v17875_v9  ;;  %17876 = vst [vmem:[#allocation51_spill] sm:$0xff] %v14223_v6  ;;  %v2544_v12 = vadd.f32 %v2479_v53, %v2300_v2  ;;  %17879 = vst [vmem:[#allocation76_spill] sm:$0xff] %v14230_v25  ;;  %v2723_v20 = vsel %vm1519_vm4, %v2721_v50, %v2722_v56  ;;  %v14238_v4 = vadd.f32 %v14092_v30, %v14075_v45  ;;  %v17905_v6 = vld [vmem:[#allocation37_spill] sm:$0xff] }
 0x441   : > { %v2828_v37 = vadd.f32 %v14003_v41, %v2789_v35  ;;  %v14242_v33 = vadd.f32 %v14149_v48, %v14125_v18  ;;  %v14248_v62 = vadd.f32 %v10126_v21, %v10076_v60  ;;  %v10129_v56 = vpop.f32.mrf.mxu1  ;;  %v3717_v45 = vrot.slane %v17875_v9, 2  ;;  %v17886_v48 = vld [vmem:[#allocation100_spill] sm:$0xff]  ;;  %v17888_v60 = vld [vmem:[#allocation69_spill] sm:$0xff]  ;;  %v17891_v35 = vld [vmem:[#allocation75_spill] sm:$0xff] }
 0x442   : > { %10172 = vmatmul.mubr.msk.f32.gmra.mxu0 %vm3118_vm2, %v14218_v16  ;;  %17880 = vst [vmem:[#allocation77_spill] sm:$0xff] %v14238_v4  ;;  %v2788_v23 = vadd.f32 %v2723_v20, %v2544_v12  ;;  %v14253_v7 = vadd.f32 %v10129_v56, %v10079_v49  ;;  %v14256_v18 = vsel %vm1519_vm4, %v3713_v29, %v3715_v46  ;;  %v3720_v1 = vrot.slane %v17886_v48, 2  ;;  %v17889_v12 = vld [vmem:[#allocation107_spill] sm:$0xff]  ;;  %v17894_v56 = vld [vmem:[#allocation61_spill] sm:$0xff] }
 0x443   : > { %17881 = vst [vmem:[#allocation96_spill] sm:$0xff] %v14242_v33  ;;  %10225 = vmatmul.mubr.msk.f32.gmra.mxu1 %vm3118_vm2, %v17878_v54  ;;  %10174 = vmatprep.mubr.msk.f32.mxu0 %vm3118_vm2, %v14226_v57  ;;  %17882 = vst [vmem:[#allocation102_spill] sm:$0xff] %v14248_v62  ;;  %v2860_v30 = vmax.f32 %v2828_v37, 0.0  ;;  %v14263_v21 = vsel %vm1519_vm4, %v3717_v45, %v3718_v36  ;;  %v3723_v50 = vrot.slane %v17888_v60, 2  ;;  %v3725_v61 = vrot.slane %v17891_v35, 2  ;;  %v17893_v37 = vld [vmem:[#allocation108_spill] sm:$0xff] }
 0x444   : > { %10227 = vmatprep.mubr.msk.f32.mxu1 %vm3118_vm2, %v17883_v15  ;;  %17884 = vst [vmem:[#allocation68_spill] sm:$0xff] %v14253_v7  ;;  %17885 = vst [vmem:[#allocation103_spill] sm:$0xff] %v14256_v18  ;;  %v2827_v2 = vadd.f32 %v14003_v41, %v2788_v23  ;;  %v3722_v41 = vrot.slane %v17883_v15, 2  ;;  %v14276_v53 = vsel %vm1519_vm4, %v3718_v36, %v3720_v1  ;;  %v3728_v23 = vrot.slane %v17893_v37, 2  ;;  %v17896_v48 = vld [vmem:[#allocation113_spill] sm:$0xff]  ;;  %v17899_v35 = vld [vmem:[#allocation95_spill] sm:$0xff] }
 0x445   : > { %17887 = vst [vmem:[#allocation109_spill] sm:$0xff] %v14263_v21  ;;  %v14270_v49 = vrot.slane %v2860_v30, 7  ;;  %17890 = vst [vmem:[#allocation84_spill] sm:$0xff] %v14276_v53  ;;  %v3727_v45 = vrot.slane %v17889_v12, 2  ;;  %v14300_v30 = vsel %vm1519_vm4, %v3723_v50, %v3725_v61  ;;  %v3730_v1 = vrot.slane %v17896_v48, 2  ;;  %v17900_v48 = vld [vmem:[#allocation114_spill] sm:$0xff] }
 0x446   : > { %10175 = vmatmul.mubr.msk.f32.gmra.mxu0 %vm3118_vm2, %v14256_v18  ;;  %v2859_v29 = vmax.f32 %v2827_v2, 0.0  ;;  %v14284_v20 = vsel %vm1519_vm4, %v3722_v41, %v3723_v50  ;;  %17895 = vst [vmem:[#allocation80_spill] sm:$0xff] %v14300_v30  ;;  %v3732_v50 = vrot.slane %v17894_v56, 2  ;;  %v3735_v25 = vrot.slane %v17900_v48, 2  ;;  %v17901_v7 = vld [vmem:[#allocation119_spill] sm:$0xff]  ;;  %v17902_v33 = vld [vmem:[#allocation25_spill] sm:$0xff] }
 0x447   : > { %10228 = vmatmul.mubr.msk.f32.gmra.mxu1 %vm3118_vm2, %v17888_v60  ;;  %10177 = vmatprep.mubr.msk.f32.mxu0 %vm3118_vm2, %v14263_v21  ;;  %17892 = vst [vmem:[#allocation79_spill] sm:$0xff] %v14284_v20  ;;  %v14306_v2 = vsel %vm1519_vm4, %v3727_v45, %v3728_v23  ;;  %v14317_v61 = vsel %vm1519_vm4, %v3728_v23, %v3730_v1  ;;  %v3738_v62 = vrot.slane %v17901_v7, 2  ;;  %v3737_v23 = vrot.slane %v17899_v35, 2  ;;  %v17903_v48 = vld [vmem:[#allocation97_spill] sm:$0xff] }
 0x448   : > { %10230 = vmatprep.mubr.msk.f32.mxu1 %vm3118_vm2, %v17889_v12  ;;  %v14279_v46 = vrot.slane %v2859_v29, 7  ;;  %17897 = vst [vmem:[#allocation92_spill] sm:$0xff] %v14306_v2  ;;  %v17898_v29 = vld [vmem:[#allocation33_spill] sm:$0xff]  ;;  %v3740_v4 = vrot.slane %v17903_v48, 2 }
 0x449   : > { %v3733_v41 = vrot.slane %v17898_v29, 2  ;;  %v17909_v48 = vld [vmem:[#allocation21_spill] sm:$0xff] }
 0x44a   : > { %10178 = vmatmul.mubr.msk.f32.gmra.mxu0 %vm3118_vm2, %v14276_v53  ;;  %v14294_v36 = vsel %vm762_vm1, %v14279_v46, %v14270_v49 }
 0x44b   : > { %10231 = vmatmul.mubr.msk.f32.gmra.mxu1 %vm3118_vm2, %v17893_v37  ;;  %10180 = vmatprep.mubr.msk.f32.mxu0 %vm3118_vm2, %v14284_v20  ;;  %v14323_v45 = vsel %vm1519_vm4, %v3732_v50, %v3733_v41  ;;  %v14334_v1 = vsel %vm1519_vm4, %v3733_v41, %v3735_v25  ;;  %v14340_v50 = vsel %vm1519_vm4, %v3737_v23, %v3738_v62  ;;  %v14349_v25 = vpop.f32.mrf.mxu0  ;;  %v3742_v41 = vrot.slane %v17902_v33, 2 }
 0x44c   : > { %10233 = vmatprep.mubr.msk.f32.mxu1 %vm3118_vm2, %v17894_v56  ;;  %17904 = vst [vmem:[#allocation34_spill] sm:$0xff] %v14340_v50  ;;  %17907 = vst [vmem:[#allocation52_spill] sm:$0xff] %v14349_v25  ;;  %v14355_v23 = vsel %vm1519_vm4, %v3738_v62, %v3740_v4  ;;  %v3748_v25 = vrot.slane %v13683_v31, 2  ;;  %v3750_v62 = vrot.slane %v13706_v13, 2 }
 0x44d   : > { %17908 = vst [vmem:[#allocation88_spill] sm:$0xff] %v14355_v23  ;;  %v10082_v37 = vpop.f32.mrf.mxu0 }
 0x44e   : > { %10181 = vmatmul.mubr.msk.f32.gmra.mxu0 %vm3118_vm2, %v14300_v30  ;;  %v14391_v13 = vsel %vm1519_vm4, %v3748_v25, %v3750_v62 }
 0x44f   : > { %10234 = vmatmul.mubr.msk.f32.gmra.mxu1 %vm3118_vm2, %v17898_v29  ;;  %10183 = vmatprep.mubr.msk.f32.mxu0 %vm3118_vm2, %v14306_v2  ;;  %v3745_v29 = vrot.slane %v17909_v48, 2  ;;  %17913 = vst [vmem:[#allocation36_spill] sm:$0xff] %v14391_v13 }
 0x450   : > { %10236 = vmatprep.mubr.msk.f32.mxu1 %vm3118_vm2, %v17899_v35  ;;  %v14347_v35 = vpop.f32.mrf.mxu1 }
 0x451   : > { %17906 = vst [vmem:[#allocation106_spill] sm:$0xff] %v14347_v35  ;;  %v3747_v35 = vrot.slane %v13558_v39, 2 }
 0x452   : > { %10184 = vmatmul.mubr.msk.f32.gmra.mxu0 %vm3118_vm2, %v14317_v61  ;;  %v10132_v56 = vpop.f32.mrf.mxu1 }
 0x453   : > { %10237 = vmatmul.mubr.msk.f32.gmra.mxu1 %vm3118_vm2, %v17901_v7  ;;  %10186 = vmatprep.mubr.msk.f32.mxu0 %vm3118_vm2, %v14323_v45  ;;  %v3743_v7 = vrot.slane %v17905_v6, 2  ;;  %v14365_v12 = vadd.f32 %v10132_v56, %v10082_v37  ;;  %v14380_v37 = vsel %vm1519_vm4, %v3747_v35, %v3748_v25  ;;  %v3753_v56 = vrot.slane %v13836_v24, 2 }
 0x454   : > { %10239 = vmatprep.mubr.msk.f32.mxu1 %vm3118_vm2, %v17902_v33  ;;  %17912 = vst [vmem:[#allocation115_spill] sm:$0xff] %v14380_v37  ;;  %v14400_v48 = vpop.f32.mrf.mxu1 }
 0x455   : > { %17911 = vst [vmem:[#allocation112_spill] sm:$0xff] %v14365_v12  ;;  %v14374_v4 = vsel %vm1519_vm4, %v3743_v7, %v3745_v29  ;;  %v3755_v29 = vrot.slane %v13839_v43, 2  ;;  %17915 = vst [vmem:[#allocation101_spill] sm:$0xff] %v14400_v48  ;;  %v14402_v12 = vpop.f32.mrf.mxu0  ;;  %v3757_v43 = vrot.slane %v13877_v32, 2  ;;  %v3760_v48 = vrot.slane %v13870_v59, 2 }
 0x456   : > { %10187 = vmatmul.mubr.msk.f32.gmra.mxu0 %vm3118_vm2, %v14334_v1  ;;  %17916 = vst [vmem:[#allocation35_spill] sm:$0xff] %v14402_v12  ;;  %v10135_v25 = vpop.f32.mrf.mxu1  ;;  %v3762_v59 = vrot.slane %v13948_v17, 2 }
 0x457   : > { %10240 = vmatmul.mubr.msk.f32.gmra.mxu1 %vm3118_vm2, %v17905_v6  ;;  %10189 = vmatprep.mubr.msk.f32.mxu0 %vm3118_vm2, %v14340_v50  ;;  %v14361_v6 = vsel %vm1519_vm4, %v3742_v41, %v3743_v7  ;;  %v3752_v7 = vrot.slane %v13784_v26, 2  ;;  %v3758_v41 = vrot.slane %v13880_v42, 2  ;;  %v10085_v62 = vpop.f32.mrf.mxu0 }
 0x458   : > { %10242 = vmatprep.mubr.msk.f32.mxu1 %vm3118_vm2, %v13558_v39  ;;  %17910 = vst [vmem:[#allocation48_spill] sm:$0xff] %v14361_v6 }
 0x459   : > { %v14397_v35 = vsel %vm1519_vm4, %v3752_v7, %v3753_v56  ;;  %v14412_v7 = vsel %vm1519_vm4, %v3753_v56, %v3755_v29  ;;  %v14420_v12 = vsel %vm1519_vm4, %v3757_v43, %v3758_v41  ;;  %v14431_v56 = vsel %vm1519_vm4, %v3758_v41, %v3760_v48 }
 0x45a   : > { %10190 = vmatmul.mubr.msk.f32.gmra.mxu0 %vm3118_vm2, %v14355_v23  ;;  %17914 = vst [vmem:[#allocation116_spill] sm:$0xff] %v14397_v35  ;;  %17917 = vst [vmem:[#allocation85_spill] sm:$0xff] %v14412_v7  ;;  %v3765_v29 = vrot.slane %v13983_v10, 2  ;;  %v3767_v41 = vrot.slane %v14053_v52, 2  ;;  %v3770_v48 = vrot.slane %v14042_v5, 2  ;;  %v3772_v5 = vrot.slane %v14036_v3, 2 }
 0x45b   : > { %10243 = vmatmul.mubr.msk.f32.gmra.mxu1 %vm3118_vm2, %v13683_v31  ;;  %10192 = vmatprep.mubr.msk.f32.mxu0 %vm3118_vm2, %v14361_v6  ;;  %17919 = vst [vmem:[#allocation87_spill] sm:$0xff] %v14420_v12  ;;  %17920 = vst [vmem:[#allocation105_spill] sm:$0xff] %v14431_v56 }
 0x45c   : > { %10245 = vmatprep.mubr.msk.f32.mxu1 %vm3118_vm2, %v13784_v26 }
 0x45e   : > { %10193 = vmatmul.mubr.msk.f32.gmra.mxu0 %vm3118_vm2, %v14374_v4 }
 0x45f   : > { %10246 = vmatmul.mubr.msk.f32.gmra.mxu1 %vm3118_vm2, %v13836_v24  ;;  %10195 = vmatprep.mubr.msk.f32.mxu0 %vm3118_vm2, %v14380_v37  ;;  %v14415_v24 = vadd.f32 %v10135_v25, %v10085_v62  ;;  %v3768_v25 = vrot.slane %v14056_v58, 2 }
 0x460   : > { %10248 = vmatprep.mubr.msk.f32.mxu1 %vm3118_vm2, %v13877_v32 }
 0x461   : > { %17918 = vst [vmem:[#allocation86_spill] sm:$0xff] %v14415_v24  ;;  %v14454_v62 = vsel %vm1519_vm4, %v3767_v41, %v3768_v25  ;;  %v3775_v41 = vrot.slane %v14046_v22, 2  ;;  %v17927_v22 = vld [vmem:[#allocation73_spill] sm:$0xff] }
 0x462   : > { %10196 = vmatmul.mubr.msk.f32.gmra.mxu0 %vm3118_vm2, %v14391_v13  ;;  %17923 = vst [vmem:[#allocation111_spill] sm:$0xff] %v14454_v62 }
 0x463   : > { %10249 = vmatmul.mubr.msk.f32.gmra.mxu1 %vm3118_vm2, %v13880_v42  ;;  %10198 = vmatprep.mubr.msk.f32.mxu0 %vm3118_vm2, %v14397_v35  ;;  %v3763_v42 = vrot.slane %v13980_v51, 2 }
 0x464   : > { %10251 = vmatprep.mubr.msk.f32.mxu1 %vm3118_vm2, %v13948_v17 }
 0x465   : > { %v14437_v43 = vsel %vm1519_vm4, %v3762_v59, %v3763_v42  ;;  %v14448_v10 = vsel %vm1519_vm4, %v3763_v42, %v3765_v29  ;;  %v3773_v59 = vrot.slane %v14039_v40, 2  ;;  %v14463_v42 = vsel %vm762_vm1, 0.0, %v14279_v46 }
 0x466   : > { %10199 = vmatmul.mubr.msk.f32.gmra.mxu0 %vm3118_vm2, %v14412_v7  ;;  %17921 = vst [vmem:[#allocation110_spill] sm:$0xff] %v14437_v43  ;;  %17922 = vst [vmem:[#allocation50_spill] sm:$0xff] %v14448_v10  ;;  %v14469_v29 = vsel %vm1519_vm4, %v3768_v25, %v3770_v48  ;;  %v17928_v25 = vld [vmem:[#allocation74_spill] sm:$0xff] }
 0x467   : > { %10252 = vmatmul.mubr.msk.f32.gmra.mxu1 %vm3118_vm2, %v13980_v51  ;;  %10201 = vmatprep.mubr.msk.f32.mxu0 %vm3118_vm2, %v14420_v12  ;;  %17924 = vst [vmem:[#allocation94_spill] sm:$0xff] %v14469_v29  ;;  %v14475_v24 = vsel %vm1519_vm4, %v3772_v5, %v3773_v59  ;;  %v14484_v46 = vsel %vm1519_vm4, %v3773_v59, %v3775_v41  ;;  %v17931_v48 = vld [vmem:[#allocation58_spill] sm:$0xff]  ;;  %v14520_v59 = vpop.f32.mrf.mxu1  ;;  %v14522_v5 = vpop.f32.mrf.mxu0 }
 0x468   : > { %10254 = vmatprep.mubr.msk.f32.mxu1 %vm3118_vm2, %v14053_v52  ;;  %17925 = vst [vmem:[#allocation20_spill] sm:$0xff] %v14475_v24  ;;  %17926 = vst [vmem:[#allocation40_spill] sm:$0xff] %v14484_v46  ;;  %v17935_v41 = vld [vmem:[#allocation62_spill] sm:$0xff] }
 0x469   : > { %17933 = vst [vmem:[#allocation19_spill] sm:$0xff] %v14520_v59  ;;  %17934 = vst [vmem:[#allocation39_spill] sm:$0xff] %v14522_v5  ;;  %v17938_v59 = vld [vmem:[#allocation67_spill] sm:$0xff]  ;;  %v17939_v5 = vld [vmem:[#allocation66_spill] sm:$0xff] }
 0x46a   : > { %10202 = vmatmul.mubr.msk.f32.gmra.mxu0 %vm3118_vm2, %v14431_v56 }
 0x46b   : > { %10255 = vmatmul.mubr.msk.f32.gmra.mxu1 %vm3118_vm2, %v14056_v58  ;;  %10204 = vmatprep.mubr.msk.f32.mxu0 %vm3118_vm2, %v14437_v43 }
 0x46c   : > { %10257 = vmatprep.mubr.msk.f32.mxu1 %vm3118_vm2, %v14036_v3 }
 0x46e   : > { %10205 = vmatmul.mubr.msk.f32.gmra.mxu0 %vm3118_vm2, %v14448_v10 }
 0x46f   : > { %10258 = vmatmul.mubr.msk.f32.gmra.mxu1 %vm3118_vm2, %v14039_v40  ;;  %10207 = vmatprep.mubr.msk.f32.mxu0 %vm3118_vm2, %v14454_v62 }
 0x470   : > { %10260 = vmatprep.mubr.msk.f32.mxu1 %vm3118_vm2, %v14463_v42 }
 0x472   : > { %10208 = vmatmul.mubr.msk.f32.gmra.mxu0 %vm3118_vm2, %v14469_v29 }
 0x473   : > { %10261 = vmatmul.mubr.msk.f32.gmra.mxu1 %vm3118_vm2, %v14294_v36  ;;  %10210 = vmatprep.mubr.msk.f32.mxu0 %vm3118_vm2, %v14475_v24 }
 0x474   : > { %10315 = vmatprep.mubr.msk.f32.mxu1 %vm3118_vm2, %v14182_v63  ;;  %v14500_v63 = vld [vmem:[%s17083_s5 + $0x40] sm:$0xff] }
 0x476   : > { %10211 = vmatmul.mubr.msk.f32.gmra.mxu0 %vm3118_vm2, %v14484_v46 }
 0x477   : > { %10316 = vmatmul.mubr.msk.f32.vlgmr.msra.gmra.mxu1 %vm3118_vm2, %v14196_v55  ;;  %10265 = vmatprep.mubr.msk.f32.mxu0 %vm3118_vm2, %v17927_v22  ;;  %v17929_v55 = vld [vmem:[#allocation90_spill] sm:$0xff]  ;;  %v10138_v22 = vpop.f32.mrf.mxu1 }
 0x478   : > { %10318 = vmatprep.mubr.msk.f32.mxu1 %vm3118_vm2, %v14205_v0  ;;  %10414 = vmatpush3.msra.mxu1 %v14134_v19  ;;  %v17930_v19 = vld [vmem:[#allocation91_spill] sm:$0xff] }
 0x47a   : > { %10266 = vmatmul.mubr.msk.f32.vlgmr.msra.gmra.mxu0 %vm3118_vm2, %v17928_v25  ;;  %v10088_v25 = vpop.f32.mrf.mxu0 }
 0x47b   : > { %10319 = vmatmul.mubr.msk.f32.gmra.mxu1 %vm3118_vm2, %v14218_v16  ;;  %10364 = vmatpush3.msra.mxu0 %v14172_v44  ;;  %v17932_v44 = vld [vmem:[#allocation65_spill] sm:$0xff] }
 0x47c   : > { %10268 = vmatprep.mubr.msk.f32.mxu0 %vm3118_vm2, %v17929_v55  ;;  %10321 = vmatprep.mubr.msk.f32.mxu1 %vm3118_vm2, %v14226_v57 }
 0x47d   : > { %10463 = vmatprep.subr.mxu0 %v14500_v63 }
 0x47e   : > { %10269 = vmatmul.mubr.msk.f32.gmra.mxu0 %vm3118_vm2, %v17930_v19 }
 0x47f   : > { %10322 = vmatmul.mubr.msk.f32.gmra.mxu1 %vm3118_vm2, %v14256_v18  ;;  %10271 = vmatprep.mubr.msk.f32.mxu0 %vm3118_vm2, %v17931_v48  ;;  %v14530_v18 = vadd.f32 %v10138_v22, %v10088_v25  ;;  %v17942_v22 = vld [vmem:[#allocation78_spill] sm:$0xff] }
 0x480   : > { %10324 = vmatprep.mubr.msk.f32.mxu1 %vm3118_vm2, %v14263_v21  ;;  %v17937_v21 = vld [vmem:[#allocation64_spill] sm:$0xff] }
 0x481   : > { %17936 = vst [vmem:[#allocation27_spill] sm:$0xff] %v14530_v18 }
 0x482   : > { %10272 = vmatmul.mubr.msk.f32.gmra.mxu0 %vm3118_vm2, %v17932_v44 }
 0x483   : > { %10325 = vmatmul.mubr.msk.f32.gmra.mxu1 %vm3118_vm2, %v14276_v53  ;;  %10274 = vmatprep.mubr.msk.f32.mxu0 %vm3118_vm2, %v17935_v41  ;;  %v14544_v53 = vpop.f32.mrf.mxu0 }
 0x484   : > { %10327 = vmatprep.mubr.msk.f32.mxu1 %vm3118_vm2, %v14284_v20  ;;  %v14542_v20 = vpop.f32.mrf.mxu1  ;;  %17941 = vst [vmem:[#allocation56_spill] sm:$0xff] %v14544_v53  ;;  %v17946_v53 = vld [vmem:[#allocation118_spill] sm:$0xff] }
 0x485   : > { %17940 = vst [vmem:[#allocation54_spill] sm:$0xff] %v14542_v20  ;;  %v10091_v18 = vpop.f32.mrf.mxu0  ;;  %v17945_v20 = vld [vmem:[#allocation117_spill] sm:$0xff] }
 0x486   : > { %10275 = vmatmul.mubr.msk.f32.gmra.mxu0 %vm3118_vm2, %v17937_v21  ;;  %v10141_v25 = vpop.f32.mrf.mxu1 }
 0x487   : > { %10328 = vmatmul.mubr.msk.f32.gmra.mxu1 %vm3118_vm2, %v14300_v30  ;;  %10277 = vmatprep.mubr.msk.f32.mxu0 %vm3118_vm2, %v17938_v59  ;;  %v14552_v30 = vadd.f32 %v10141_v25, %v10091_v18  ;;  %v17947_v18 = vld [vmem:[#allocation28_spill] sm:$0xff]  ;;  %v17948_v25 = vld [vmem:[#allocation53_spill] sm:$0xff] }
 0x488   : > { %10330 = vmatprep.mubr.msk.f32.mxu1 %vm3118_vm2, %v14306_v2  ;;  %v17944_v2 = vld [vmem:[#allocation83_spill] sm:$0xff] }
 0x489   : > { %17943 = vst [vmem:[#allocation15_spill] sm:$0xff] %v14552_v30  ;;  %v17949_v30 = vld [vmem:[#allocation26_spill] sm:$0xff] }
 0x48a   : > { %10278 = vmatmul.mubr.msk.f32.gmra.mxu0 %vm3118_vm2, %v17939_v5 }
 0x48b   : > { %10331 = vmatmul.mubr.msk.f32.gmra.mxu1 %vm3118_vm2, %v14317_v61  ;;  %10280 = vmatprep.mubr.msk.f32.mxu0 %vm3118_vm2, %v17942_v22 }
 0x48c   : > { %10333 = vmatprep.mubr.msk.f32.mxu1 %vm3118_vm2, %v14323_v45 }
 0x48e   : > { %10281 = vmatmul.mubr.msk.f32.gmra.mxu0 %vm3118_vm2, %v17944_v2 }
 0x48f   : > { %10334 = vmatmul.mubr.msk.f32.gmra.mxu1 %vm3118_vm2, %v14334_v1  ;;  %10283 = vmatprep.mubr.msk.f32.mxu0 %vm3118_vm2, %v17945_v20 }
 0x490   : > { %10336 = vmatprep.mubr.msk.f32.mxu1 %vm3118_vm2, %v14340_v50  ;;  %v17950_v50 = vld [vmem:[#allocation22_spill] sm:$0xff] }
 0x492   : > { %10284 = vmatmul.mubr.msk.f32.gmra.mxu0 %vm3118_vm2, %v17946_v53 }
 0x493   : > { %10337 = vmatmul.mubr.msk.f32.gmra.mxu1 %vm3118_vm2, %v14355_v23  ;;  %10286 = vmatprep.mubr.msk.f32.mxu0 %vm3118_vm2, %v17947_v18  ;;  %v17951_v23 = vld [vmem:[#allocation41_spill] sm:$0xff] }
 0x494   : > { %10339 = vmatprep.mubr.msk.f32.mxu1 %vm3118_vm2, %v14361_v6  ;;  %v17952_v6 = vld [vmem:[#allocation55_spill] sm:$0xff] }
 0x496   : > { %10287 = vmatmul.mubr.msk.f32.gmra.mxu0 %vm3118_vm2, %v17948_v25 }
 0x497   : > { %10340 = vmatmul.mubr.msk.f32.gmra.mxu1 %vm3118_vm2, %v14374_v4  ;;  %10289 = vmatprep.mubr.msk.f32.mxu0 %vm3118_vm2, %v17949_v30 }
 0x498   : > { %10342 = vmatprep.mubr.msk.f32.mxu1 %vm3118_vm2, %v14380_v37 }
 0x49a   : > { %10290 = vmatmul.mubr.msk.f32.gmra.mxu0 %vm3118_vm2, %v17950_v50 }
 0x49b   : > { %10343 = vmatmul.mubr.msk.f32.gmra.mxu1 %vm3118_vm2, %v14391_v13  ;;  %10292 = vmatprep.mubr.msk.f32.mxu0 %vm3118_vm2, %v17951_v23  ;;  %v17956_v13 = vld [vmem:[#allocation46_spill] sm:$0xff] }
 0x49c   : > { %10345 = vmatprep.mubr.msk.f32.mxu1 %vm3118_vm2, %v14397_v35  ;;  %v4634_v35 = vrot.slane %v14294_v36, 2 }
 0x49e   : > { %10293 = vmatmul.mubr.msk.f32.gmra.mxu0 %vm3118_vm2, %v17952_v6 }
 0x49f   : > { %10346 = vmatmul.mubr.msk.f32.gmra.mxu1 %vm3118_vm2, %v14412_v7  ;;  %10295 = vmatprep.mubr.msk.f32.mxu0 %vm3118_vm2, %v13853_v27 }
 0x4a0   : > { %10348 = vmatprep.mubr.msk.f32.mxu1 %vm3118_vm2, %v14420_v12  ;;  %v14610_v12 = vpop.f32.mrf.mxu1 }
 0x4a1   : > { %17953 = vst [vmem:[#allocation16_spill] sm:$0xff] %v14610_v12  ;;  %v4633_v12 = vrot.slane %v14463_v42, 2 }
 0x4a2   : > { %10296 = vmatmul.mubr.msk.f32.gmra.mxu0 %vm3118_vm2, %v13856_v11 }
 0x4a3   : > { %10349 = vmatmul.mubr.msk.f32.gmra.mxu1 %vm3118_vm2, %v14431_v56  ;;  %10298 = vmatprep.mubr.msk.f32.mxu0 %vm3118_vm2, %v13909_v47  ;;  %v14612_v56 = vpop.f32.mrf.mxu0 }
 0x4a4   : > { %10351 = vmatprep.mubr.msk.f32.mxu1 %vm3118_vm2, %v14437_v43  ;;  %17954 = vst [vmem:[#allocation23_spill] sm:$0xff] %v14612_v56  ;;  %v10144_v43 = vpop.f32.mrf.mxu1  ;;  %v4366_v56 = vrot.slane %v14294_v36, 1 }
 0x4a5   : > { %v10094_v7 = vpop.f32.mrf.mxu0 }
 0x4a6   : > { %10299 = vmatmul.mubr.msk.f32.gmra.mxu0 %vm3118_vm2, %v13916_v14 }
 0x4a7   : > { %10352 = vmatmul.mubr.msk.f32.gmra.mxu1 %vm3118_vm2, %v14448_v10  ;;  %10301 = vmatprep.mubr.msk.f32.mxu0 %vm3118_vm2, %v13998_v8  ;;  %v14623_v10 = vadd.f32 %v10144_v43, %v10094_v7  ;;  %v4365_v7 = vrot.slane %v14463_v42, 1 }
 0x4a8   : > { %10354 = vmatprep.mubr.msk.f32.mxu1 %vm3118_vm2, %v14454_v62  ;;  %v3004_v62 = vsel %vm762_vm1, %v14270_v49, 0.0  ;;  %v14636_v49 = vsel %vm1519_vm4, %v4633_v12, %v4634_v35 }
 0x4a9   : > { %17955 = vst [vmem:[#allocation70_spill] sm:$0xff] %v14623_v10  ;;  %v4636_v37 = vrot.slane %v3004_v62, 2  ;;  %v4368_v43 = vrot.slane %v3004_v62, 1  ;;  %v17959_v62 = vld [vmem:[#allocation82_spill] sm:$0xff] }
 0x4aa   : > { %10302 = vmatmul.mubr.msk.f32.gmra.mxu0 %vm3118_vm2, %v14010_v28 }
 0x4ab   : > { %10355 = vmatmul.mubr.msk.f32.gmra.mxu1 %vm3118_vm2, %v14469_v29  ;;  %10304 = vmatprep.mubr.msk.f32.mxu0 %vm3118_vm2, %v14078_v34  ;;  %v17957_v29 = vld [vmem:[#allocation29_spill] sm:$0xff]  ;;  %v14644_v10 = vsel %vm1519_vm4, %v4634_v35, %v4636_v37  ;;  %v14656_v12 = vsel %vm1274_vm3, %v4366_v56, %v4368_v43  ;;  %v14666_v37 = vpop.f32.mrf.mxu1  ;;  %v14668_v35 = vpop.f32.mrf.mxu0 }
 0x4ac   : > { %10357 = vmatprep.mubr.msk.f32.mxu1 %vm3118_vm2, %v14475_v24  ;;  %v17958_v24 = vld [vmem:[#allocation30_spill] sm:$0xff] }
 0x4ae   : > { %10305 = vmatmul.mubr.msk.f32.gmra.mxu0 %vm3118_vm2, %v17956_v13 }
 0x4af   : > { %10358 = vmatmul.mubr.msk.f32.gmra.mxu1 %vm3118_vm2, %v14484_v46  ;;  %10307 = vmatprep.mubr.msk.f32.mxu0 %vm3118_vm2, %v17957_v29  ;;  %v14647_v46 = vsel %vm1274_vm3, %v4365_v7, %v4366_v56  ;;  %v17960_v56 = vld [vmem:[#allocation57_spill] sm:$0xff] }
 0x4b0   : > { %10360 = vmatprep.mubr.msk.f32.mxu1 %vm3118_vm2, %v14636_v49 }
 0x4b2   : > { %10308 = vmatmul.mubr.msk.f32.gmra.mxu0 %vm3118_vm2, %v17958_v24 }
 0x4b3   : > { %10361 = vmatmul.mubr.msk.f32.gmra.mxu1 %vm3118_vm2, %v14644_v10  ;;  %10310 = vmatprep.mubr.msk.f32.mxu0 %vm3118_vm2, %v14647_v46 }
 0x4b4   : > { %10415 = vmatprep.mubr.msk.f32.mxu1 %vm3118_vm2, %v17929_v55  ;;  %v10097_v55 = vpop.f32.mrf.mxu0 }
 0x4b6   : > { %10311 = vmatmul.mubr.msk.f32.gmra.mxu0 %vm3118_vm2, %v14656_v12 }
 0x4b7   : > { %10416 = vmatmul.mubr.msk.f32.vlgmr.msra.gmra.mxu1 %vm3118_vm2, %v17930_v19  ;;  %10365 = vmatprep.mubr.msk.f32.mxu0 %vm3118_vm2, %v17865_v38  ;;  %v10147_v38 = vpop.f32.mrf.mxu1  ;;  %v17961_v19 = vld [vmem:[#allocation59_spill] sm:$0xff] }
 0x4b8   : > { %10418 = vmatprep.mubr.msk.f32.mxu1 %vm3118_vm2, %v17931_v48  ;;  %v14681_v48 = vadd.f32 %v10147_v38, %v10097_v55  ;;  %v17976_v38 = vld [vmem:[#allocation103_spill] sm:$0xff]  ;;  %v17977_v55 = vld [vmem:[#allocation77_spill] sm:$0xff] }
 0x4ba   : > { %10366 = vmatmul.mubr.msk.f32.vlgmr.msra.gmra.mxu0 %vm3118_vm2, %v17959_v62 }
 0x4bb   : > { %10419 = vmatmul.mubr.msk.f32.gmra.mxu1 %vm3118_vm2, %v17932_v44  ;;  %10464 = vmatpush3.msra.mxu0 %v14500_v63  ;;  %v17967_v44 = vld [vmem:[#allocation119_spill] sm:$0xff] }
 0x4bc   : > { %10368 = vmatprep.mubr.msk.f32.mxu0 %vm3118_vm2, %v17960_v56  ;;  %10421 = vmatprep.mubr.msk.f32.mxu1 %vm3118_vm2, %v17935_v41 }
 0x4be   : > { %10369 = vmatmul.mubr.msk.f32.gmra.mxu0 %vm3118_vm2, %v17961_v19 }
 0x4bf   : > { %10422 = vmatmul.mubr.msk.f32.gmra.mxu1 %vm3118_vm2, %v17937_v21  ;;  %10371 = vmatprep.mubr.msk.f32.mxu0 %vm3118_vm2, %v17875_v9  ;;  %v17962_v9 = vld [vmem:[#allocation107_spill] sm:$0xff]  ;;  %v14713_v21 = vpop.f32.mrf.mxu1 }
 0x4c0   : > { %10424 = vmatprep.mubr.msk.f32.mxu1 %vm3118_vm2, %v17938_v59 }
 0x4c2   : > { %10372 = vmatmul.mubr.msk.f32.gmra.mxu0 %vm3118_vm2, %v17878_v54  ;;  %v17963_v54 = vld [vmem:[#allocation108_spill] sm:$0xff] }
 0x4c3   : > { %10425 = vmatmul.mubr.msk.f32.gmra.mxu1 %vm3118_vm2, %v17939_v5  ;;  %10374 = vmatprep.mubr.msk.f32.mxu0 %vm3118_vm2, %v17883_v15  ;;  %v17964_v15 = vld [vmem:[#allocation61_spill] sm:$0xff] }
 0x4c4   : > { %10427 = vmatprep.mubr.msk.f32.mxu1 %vm3118_vm2, %v17942_v22 }
 0x4c6   : > { %10375 = vmatmul.mubr.msk.f32.gmra.mxu0 %vm3118_vm2, %v17888_v60  ;;  %v14715_v60 = vpop.f32.mrf.mxu0 }
 0x4c7   : > { %10428 = vmatmul.mubr.msk.f32.gmra.mxu1 %vm3118_vm2, %v17944_v2  ;;  %10377 = vmatprep.mubr.msk.f32.mxu0 %vm3118_vm2, %v17962_v9  ;;  %v17965_v2 = vld [vmem:[#allocation33_spill] sm:$0xff] }
 0x4c8   : > { %10430 = vmatprep.mubr.msk.f32.mxu1 %vm3118_vm2, %v17945_v20  ;;  %v17966_v20 = vld [vmem:[#allocation95_spill] sm:$0xff] }
 0x4ca   : > { %10378 = vmatmul.mubr.msk.f32.gmra.mxu0 %vm3118_vm2, %v17963_v54 }
 0x4cb   : > { %10431 = vmatmul.mubr.msk.f32.gmra.mxu1 %vm3118_vm2, %v17946_v53  ;;  %10380 = vmatprep.mubr.msk.f32.mxu0 %vm3118_vm2, %v17964_v15  ;;  %v10150_v53 = vpop.f32.mrf.mxu1  ;;  %v10100_v63 = vpop.f32.mrf.mxu0 }
 0x4cc   : > { %10433 = vmatprep.mubr.msk.f32.mxu1 %vm3118_vm2, %v17947_v18  ;;  %v14727_v59 = vadd.f32 %v10150_v53, %v10100_v63  ;;  %v17980_v53 = vld [vmem:[#allocation96_spill] sm:$0xff] }
 0x4cd   : > { %v14735_v5 = vpop.f32.mrf.mxu1  ;;  %v14737_v41 = vpop.f32.mrf.mxu0 }
 0x4ce   : > { %10381 = vmatmul.mubr.msk.f32.gmra.mxu0 %vm3118_vm2, %v17965_v2 }
 0x4cf   : > { %10434 = vmatmul.mubr.msk.f32.gmra.mxu1 %vm3118_vm2, %v17948_v25  ;;  %10383 = vmatprep.mubr.msk.f32.mxu0 %vm3118_vm2, %v17966_v20  ;;  %v17975_v25 = vld [vmem:[#allocation51_spill] sm:$0xff]  ;;  %v17979_v20 = vld [vmem:[#allocation84_spill] sm:$0xff] }
 0x4d0   : > { %10436 = vmatprep.mubr.msk.f32.mxu1 %vm3118_vm2, %v17949_v30  ;;  %v17968_v30 = vld [vmem:[#allocation37_spill] sm:$0xff] }
 0x4d2   : > { %10384 = vmatmul.mubr.msk.f32.gmra.mxu0 %vm3118_vm2, %v17967_v44 }
 0x4d3   : > { %10437 = vmatmul.mubr.msk.f32.gmra.mxu1 %vm3118_vm2, %v17950_v50  ;;  %10386 = vmatprep.mubr.msk.f32.mxu0 %vm3118_vm2, %v17902_v33  ;;  %v10153_v33 = vpop.f32.mrf.mxu1 }
 0x4d4   : > { %10439 = vmatprep.mubr.msk.f32.mxu1 %vm3118_vm2, %v17951_v23 }
 0x4d5   : > { %v10103_v50 = vpop.f32.mrf.mxu0 }
 0x4d6   : > { %10387 = vmatmul.mubr.msk.f32.gmra.mxu0 %vm3118_vm2, %v17968_v30  ;;  %v14749_v23 = vadd.f32 %v10153_v33, %v10103_v50  ;;  %v17981_v30 = vld [vmem:[#allocation79_spill] sm:$0xff] }
 0x4d7   : > { %10440 = vmatmul.mubr.msk.f32.gmra.mxu1 %vm3118_vm2, %v17952_v6  ;;  %10389 = vmatprep.mubr.msk.f32.mxu0 %vm3118_vm2, %v13558_v39  ;;  %v17969_v39 = vld [vmem:[#allocation45_spill] sm:$0xff] }
 0x4d8   : > { %10442 = vmatprep.mubr.msk.f32.mxu1 %vm3118_vm2, %v13853_v27  ;;  %v14775_v27 = vpop.f32.mrf.mxu0 }
 0x4da   : > { %10390 = vmatmul.mubr.msk.f32.gmra.mxu0 %vm3118_vm2, %v13683_v31  ;;  %v17970_v31 = vld [vmem:[#allocation44_spill] sm:$0xff] }
 0x4db   : > { %10443 = vmatmul.mubr.msk.f32.gmra.mxu1 %vm3118_vm2, %v13856_v11  ;;  %10392 = vmatprep.mubr.msk.f32.mxu0 %vm3118_vm2, %v13784_v26  ;;  %v14771_v26 = vpop.f32.mrf.mxu1 }
 0x4dc   : > { %10445 = vmatprep.mubr.msk.f32.mxu1 %vm3118_vm2, %v13909_v47 }
 0x4de   : > { %10393 = vmatmul.mubr.msk.f32.gmra.mxu0 %vm3118_vm2, %v17969_v39 }
 0x4df   : > { %10446 = vmatmul.mubr.msk.f32.gmra.mxu1 %vm3118_vm2, %v13916_v14  ;;  %10395 = vmatprep.mubr.msk.f32.mxu0 %vm3118_vm2, %v13877_v32 }
 0x4e0   : > { %10448 = vmatprep.mubr.msk.f32.mxu1 %vm3118_vm2, %v13998_v8 }
 0x4e2   : > { %10396 = vmatmul.mubr.msk.f32.gmra.mxu0 %vm3118_vm2, %v17970_v31  ;;  %v6002_v31 = vld [vmem:[#allocation7 + $0x18] sm:$0xff] }
 0x4e3   : > { %10449 = vmatmul.mubr.msk.f32.gmra.mxu1 %vm3118_vm2, %v14010_v28  ;;  %10398 = vmatprep.mubr.msk.f32.mxu0 %vm3118_vm2, %v13948_v17  ;;  %v10156_v11 = vpop.f32.mrf.mxu1 }
 0x4e4   : > { %10451 = vmatprep.mubr.msk.f32.mxu1 %vm3118_vm2, %v14078_v34  ;;  %10513 = vmatprep.subr.mxu1 %v6002_v31 }
 0x4e5   : > { %v14793_v14 = vpop.f32.mrf.mxu1  ;;  %10514 = vmatpush3.msra.mxu1 %v6002_v31  ;;  %v17992_v31 = vld [vmem:[#allocation88_spill] sm:$0xff] }
 0x4e6   : > { %10399 = vmatmul.mubr.msk.f32.gmra.mxu0 %vm3118_vm2, %v13980_v51 }
 0x4e7   : > { %10452 = vmatmul.mubr.msk.f32.gmra.mxu1 %vm3118_vm2, %v17956_v13  ;;  %10401 = vmatprep.mubr.msk.f32.mxu0 %vm3118_vm2, %v14053_v52  ;;  %v10106_v32 = vpop.f32.mrf.mxu0  ;;  %v17972_v52 = vld [vmem:[#allocation14_spill] sm:$0xff] }
 0x4e8   : > { %10454 = vmatprep.mubr.msk.f32.mxu1 %vm3118_vm2, %v17957_v29  ;;  %v14785_v47 = vadd.f32 %v10156_v11, %v10106_v32  ;;  %v17983_v32 = vld [vmem:[#allocation80_spill] sm:$0xff] }
 0x4e9   : > { %v14799_v17 = vpop.f32.mrf.mxu0 }
 0x4ea   : > { %10402 = vmatmul.mubr.msk.f32.gmra.mxu0 %vm3118_vm2, %v14056_v58  ;;  %v17973_v58 = vld [vmem:[#allocation18_spill] sm:$0xff] }
 0x4eb   : > { %10455 = vmatmul.mubr.msk.f32.gmra.mxu1 %vm3118_vm2, %v17958_v24  ;;  %10404 = vmatprep.mubr.msk.f32.mxu0 %vm3118_vm2, %v14036_v3  ;;  %v17971_v24 = vld [vmem:[#allocation17_spill] sm:$0xff] }
 0x4ec   : > { %10457 = vmatprep.mubr.msk.f32.mxu1 %vm3118_vm2, %v14647_v46 }
 0x4ee   : > { %10405 = vmatmul.mubr.msk.f32.gmra.mxu0 %vm3118_vm2, %v14039_v40 }
 0x4ef   : > { %v10159_v51 = vpop.f32.mrf.mxu1  ;;  %10458 = vmatmul.mubr.msk.f32.gmra.mxu1 %vm3118_vm2, %v14656_v12  ;;  %10407 = vmatprep.mubr.msk.f32.mxu0 %vm3118_vm2, %v14463_v42  ;;  %v17974_v42 = vld [vmem:[#allocation13_spill] sm:$0xff] }
 0x4f0   : > { %10460 = vmatprep.mubr.msk.f32.mxu1 %vm3118_vm2, %v17971_v24 }
 0x4f1   : > { %v14807_v8 = vpop.f32.mrf.mxu1 }
 0x4f2   : > { %v10109_v28 = vpop.f32.mrf.mxu0  ;;  %10408 = vmatmul.mubr.msk.f32.gmra.mxu0 %vm3118_vm2, %v14294_v36 }
 0x4f3   : > { %v14811_v3 = vadd.f32 %v10159_v51, %v10109_v28  ;;  %v10162_v40 = vpop.f32.mrf.mxu1  ;;  %10410 = vmatprep.mubr.msk.f32.mxu0 %vm3118_vm2, %v17972_v52  ;;  %10461 = vmatmul.mubr.msk.f32.gmra.mxu1 %vm3118_vm2, %v17973_v58  ;;  %v17984_v51 = vld [vmem:[#allocation102_spill] sm:$0xff] }
 0x4f4   : > { %v14817_v34 = vpop.f32.mrf.mxu0  ;;  %10517 = vmatprep.mubr.msk.f32.mxu1 %vm6003_vm5, %v17971_v24 }
 0x4f5   : > { %v14819_v6 = vpop.f32.mrf.mxu1 }
 0x4f6   : > { %v10112_v13 = vpop.f32.mrf.mxu0  ;;  %10411 = vmatmul.mubr.msk.f32.gmra.mxu0 %vm3118_vm2, %v17974_v42 }
 0x4f7   : > { %v14823_v29 = vadd.f32 %v10162_v40, %v10112_v13  ;;  %v10217_v36 = vpop.f32.mrf.mxu1  ;;  %10465 = vmatprep.mubr.msk.f32.mxu0 %vm3118_vm2, %v14205_v0  ;;  %v17985_v13 = vld [vmem:[#allocation92_spill] sm:$0xff] }
 0x4f8   : > { %v14827_v46 = vpop.f32.mrf.mxu0 }
 0x4f9   : > { %v14829_v22 = vpop.f32.mrf.mxu1 }
 0x4fa   : > { %v10167_v18 = vpop.f32.mrf.mxu0  ;;  %10466 = vmatmul.mubr.msk.f32.vlgmr.msra.gmra.mxu0 %vm3118_vm2, %v14218_v16  ;;  %v17978_v16 = vld [vmem:[#allocation109_spill] sm:$0xff] }
 0x4fb   : > { %v4069_v7 = vadd.f32 %v10167_v18, %v17975_v25  ;;  %v10220_v43 = vpop.f32.mrf.mxu1  ;;  %10468 = vmatprep.mubr.msk.f32.mxu0 %vm3118_vm2, %v14226_v57 }
 0x4fc   : > { %v14836_v12 = vpop.f32.mrf.mxu0 }
 0x4fd   : > { %v14838_v62 = vpop.f32.mrf.mxu1  ;;  %v14840_v56 = vadd.f32 %v10217_v36, %v4069_v7 }
 0x4fe   : > { %v10170_v0 = vpop.f32.mrf.mxu0  ;;  %10469 = vmatmul.mubr.msk.f32.gmra.mxu0 %vm3118_vm2, %v17976_v38 }
 0x4ff   : > { %v4071_v19 = vadd.f32 %v10170_v0, %v17977_v55  ;;  %v10223_v9 = vpop.f32.mrf.mxu1  ;;  %10471 = vmatprep.mubr.msk.f32.mxu0 %vm3118_vm2, %v17978_v16 }
 0x500   : > { %v14847_v54 = vpop.f32.mrf.mxu0 }
 0x501   : > { %v14849_v15 = vpop.f32.mrf.mxu1  ;;  %v14851_v57 = vadd.f32 %v10220_v43, %v4071_v19  ;;  %v17987_v43 = vld [vmem:[#allocation68_spill] sm:$0xff] }
 0x502   : > { %v10173_v2 = vpop.f32.mrf.mxu0  ;;  %10472 = vmatmul.mubr.msk.f32.gmra.mxu0 %vm3118_vm2, %v17979_v20 }
 0x503   : > { %v4073_v63 = vadd.f32 %v10173_v2, %v17980_v53  ;;  %v10226_v44 = vpop.f32.mrf.mxu1  ;;  %10474 = vmatprep.mubr.msk.f32.mxu0 %vm3118_vm2, %v17981_v30  ;;  %v17989_v2 = vld [vmem:[#allocation112_spill] sm:$0xff] }
 0x504   : > { %v14858_v33 = vpop.f32.mrf.mxu0 }
 0x505   : > { %v14860_v50 = vpop.f32.mrf.mxu1  ;;  %v14862_v39 = vadd.f32 %v10223_v9, %v4073_v63 }
 0x506   : > { %17982 = vst [vmem:[#allocation71_spill] sm:$0xff] %v14860_v50  ;;  %v10176_v11 = vpop.f32.mrf.mxu0  ;;  %10475 = vmatmul.mubr.msk.f32.gmra.mxu0 %vm3118_vm2, %v17983_v32  ;;  %v18014_v50 = vld [vmem:[#allocation20_spill] sm:$0xff] }
 0x507   : > { %v4075_v28 = vadd.f32 %v10176_v11, %v17984_v51  ;;  %v10229_v40 = vpop.f32.mrf.mxu1  ;;  %10477 = vmatprep.mubr.msk.f32.mxu0 %vm3118_vm2, %v17985_v13  ;;  %v17993_v11 = vld [vmem:[#allocation86_spill] sm:$0xff] }
 0x508   : > { %v14869_v36 = vpop.f32.mrf.mxu0 }
 0x509   : > { %v14871_v18 = vpop.f32.mrf.mxu1  ;;  %v14873_v25 = vadd.f32 %v10226_v44, %v4075_v28 }
 0x50a   : > { %17986 = vst [vmem:[#allocation81_spill] sm:$0xff] %v14871_v18  ;;  %v10179_v7 = vpop.f32.mrf.mxu0  ;;  %10478 = vmatmul.mubr.msk.f32.gmra.mxu0 %vm3118_vm2, %v14317_v61  ;;  %v17990_v61 = vld [vmem:[#allocation34_spill] sm:$0xff] }
 0x50b   : > { %v4077_v0 = vadd.f32 %v10179_v7, %v17987_v43  ;;  %v10232_v38 = vpop.f32.mrf.mxu1  ;;  %10480 = vmatprep.mubr.msk.f32.mxu0 %vm3118_vm2, %v14323_v45  ;;  %v17996_v43 = vld [vmem:[#allocation27_spill] sm:$0xff] }
 0x50c   : > { %v14880_v55 = vpop.f32.mrf.mxu0 }
 0x50d   : > { %v14882_v19 = vpop.f32.mrf.mxu1  ;;  %v14884_v9 = vadd.f32 %v10229_v40, %v4077_v0 }
 0x50e   : > { %17988 = vst [vmem:[#allocation24_spill] sm:$0xff] %v14882_v19  ;;  %v10182_v16 = vpop.f32.mrf.mxu0  ;;  %10481 = vmatmul.mubr.msk.f32.gmra.mxu0 %vm3118_vm2, %v14334_v1  ;;  %v17994_v1 = vld [vmem:[#allocation48_spill] sm:$0xff]  ;;  %v6001_v19 = vld [vmem:[#allocation7 + $0x10] sm:$0xff] }
 0x50f   : > { %v4079_v20 = vadd.f32 %v10182_v16, %v17989_v2  ;;  %v10235_v53 = vpop.f32.mrf.mxu1  ;;  %10483 = vmatprep.mubr.msk.f32.mxu0 %vm3118_vm2, %v17990_v61  ;;  %v17997_v16 = vld [vmem:[#allocation115_spill] sm:$0xff]  ;;  %10515 = vmatprep.subr.mxu1 %v6001_v19 }
 0x510   : > { %v14891_v63 = vpop.f32.mrf.mxu0  ;;  %10516 = vmatpush3.msra.mxu1 %v6001_v19 }
 0x511   : > { %v14893_v44 = vpop.f32.mrf.mxu1  ;;  %v14895_v45 = vadd.f32 %v10232_v38, %v4079_v20  ;;  %10518 = vmatmul.mubr.msk.f32.vlgmr.msra.gmra.mxu1 %vm6003_vm5, %v17973_v58 }
 0x512   : > { %17991 = vst [vmem:[#allocation72_spill] sm:$0xff] %v14893_v44  ;;  %v10185_v30 = vpop.f32.mrf.mxu0  ;;  %10484 = vmatmul.mubr.msk.f32.gmra.mxu0 %vm3118_vm2, %v17992_v31  ;;  %v17999_v31 = vld [vmem:[#allocation36_spill] sm:$0xff] }
 0x513   : > { %v4081_v32 = vadd.f32 %v10185_v30, %v17993_v11  ;;  %v10238_v51 = vpop.f32.mrf.mxu1  ;;  %10486 = vmatprep.mubr.msk.f32.mxu0 %vm3118_vm2, %v17994_v1 }
 0x514   : > { %v14902_v28 = vpop.f32.mrf.mxu0 }
 0x515   : > { %v14904_v40 = vpop.f32.mrf.mxu1  ;;  %v14906_v13 = vadd.f32 %v10235_v53, %v4081_v32  ;;  %v18000_v53 = vld [vmem:[#allocation15_spill] sm:$0xff] }
 0x516   : > { %17995 = vst [vmem:[#allocation89_spill] sm:$0xff] %v14904_v40  ;;  %v10188_v7 = vpop.f32.mrf.mxu0  ;;  %10487 = vmatmul.mubr.msk.f32.gmra.mxu0 %vm3118_vm2, %v14374_v4  ;;  %v18001_v4 = vld [vmem:[#allocation116_spill] sm:$0xff] }
 0x517   : > { %v4083_v0 = vadd.f32 %v10188_v7, %v17996_v43  ;;  %v10241_v38 = vpop.f32.mrf.mxu1  ;;  %10489 = vmatprep.mubr.msk.f32.mxu0 %vm3118_vm2, %v17997_v16 }
 0x518   : > { %v14913_v2 = vpop.f32.mrf.mxu0 }
 0x519   : > { %v14915_v20 = vpop.f32.mrf.mxu1  ;;  %v14917_v61 = vadd.f32 %v10238_v51, %v4083_v0  ;;  %v18004_v51 = vld [vmem:[#allocation70_spill] sm:$0xff] }
 0x51a   : > { %17998 = vst [vmem:[#allocation98_spill] sm:$0xff] %v14915_v20  ;;  %v10191_v30 = vpop.f32.mrf.mxu0  ;;  %10490 = vmatmul.mubr.msk.f32.gmra.mxu0 %vm3118_vm2, %v17999_v31  ;;  %v18003_v20 = vld [vmem:[#allocation85_spill] sm:$0xff]  ;;  %v18005_v31 = vld [vmem:[#allocation87_spill] sm:$0xff] }
 0x51b   : > { %v4085_v11 = vadd.f32 %v10191_v30, %v18000_v53  ;;  %v10244_v32 = vpop.f32.mrf.mxu1  ;;  %10492 = vmatprep.mubr.msk.f32.mxu0 %vm3118_vm2, %v18001_v4 }
 0x51c   : > { %v14924_v1 = vpop.f32.mrf.mxu0 }
 0x51d   : > { %v14926_v7 = vpop.f32.mrf.mxu1  ;;  %v14928_v43 = vadd.f32 %v10241_v38, %v4085_v11 }
 0x51e   : > { %18002 = vst [vmem:[#allocation60_spill] sm:$0xff] %v14926_v7  ;;  %v10194_v16 = vpop.f32.mrf.mxu0  ;;  %10493 = vmatmul.mubr.msk.f32.gmra.mxu0 %vm3118_vm2, %v18003_v20  ;;  %v18007_v7 = vld [vmem:[#allocation105_spill] sm:$0xff]  ;;  %v18008_v20 = vld [vmem:[#allocation110_spill] sm:$0xff] }
 0x51f   : > { %v4087_v0 = vadd.f32 %v10194_v16, %v18004_v51  ;;  %v10247_v40 = vpop.f32.mrf.mxu1  ;;  %10495 = vmatprep.mubr.msk.f32.mxu0 %vm3118_vm2, %v18005_v31 }
 0x520   : > { %v14935_v30 = vpop.f32.mrf.mxu0 }
 0x521   : > { %v14937_v53 = vpop.f32.mrf.mxu1  ;;  %v14939_v4 = vadd.f32 %v10244_v32, %v4087_v0  ;;  %v18010_v32 = vld [vmem:[#allocation50_spill] sm:$0xff] }
 0x522   : > { %18006 = vst [vmem:[#allocation99_spill] sm:$0xff] %v14937_v53  ;;  %v10197_v44 = vpop.f32.mrf.mxu0  ;;  %10496 = vmatmul.mubr.msk.f32.gmra.mxu0 %vm3118_vm2, %v18007_v7 }
 0x523   : > { %v4089_v38 = vadd.f32 %v10197_v44, %v14681_v48  ;;  %v10250_v11 = vpop.f32.mrf.mxu1  ;;  %10498 = vmatprep.mubr.msk.f32.mxu0 %vm3118_vm2, %v18008_v20  ;;  %v18011_v48 = vld [vmem:[#allocation111_spill] sm:$0xff] }
 0x524   : > { %v14946_v16 = vpop.f32.mrf.mxu0 }
 0x525   : > { %v14948_v51 = vpop.f32.mrf.mxu1  ;;  %v14950_v31 = vadd.f32 %v10247_v40, %v4089_v38  ;;  %v18013_v38 = vld [vmem:[#allocation94_spill] sm:$0xff] }
 0x526   : > { %18009 = vst [vmem:[#allocation63_spill] sm:$0xff] %v14948_v51  ;;  %v10200_v53 = vpop.f32.mrf.mxu0  ;;  %10499 = vmatmul.mubr.msk.f32.gmra.mxu0 %vm3118_vm2, %v18010_v32 }
 0x527   : > { %v4091_v7 = vadd.f32 %v10200_v53, %v14727_v59  ;;  %v10253_v0 = vpop.f32.mrf.mxu1  ;;  %10501 = vmatprep.mubr.msk.f32.mxu0 %vm3118_vm2, %v18011_v48 }
 0x528   : > { %v14957_v44 = vpop.f32.mrf.mxu0 }
 0x529   : > { %v14959_v20 = vpop.f32.mrf.mxu1  ;;  %v14961_v51 = vadd.f32 %v10250_v11, %v4091_v7 }
 0x52a   : > { %18012 = vst [vmem:[#allocation100_spill] sm:$0xff] %v14959_v20  ;;  %v10203_v40 = vpop.f32.mrf.mxu0  ;;  %10502 = vmatmul.mubr.msk.f32.gmra.mxu0 %vm3118_vm2, %v18013_v38  ;;  %v18016_v20 = vld [vmem:[#allocation40_spill] sm:$0xff] }
 0x52b   : > { %v4093_v32 = vadd.f32 %v10203_v40, %v14749_v23  ;;  %v10256_v18 = vpop.f32.mrf.mxu1  ;;  %10504 = vmatprep.mubr.msk.f32.mxu0 %vm3118_vm2, %v18014_v50 }
 0x52c   : > { %v14968_v59 = vpop.f32.mrf.mxu0 }
 0x52d   : > { %v14970_v53 = vpop.f32.mrf.mxu1  ;;  %v14972_v19 = vadd.f32 %v10253_v0, %v4093_v32 }
 0x52e   : > { %18015 = vst [vmem:[#allocation69_spill] sm:$0xff] %v14970_v53  ;;  %v10206_v48 = vpop.f32.mrf.mxu0  ;;  %10505 = vmatmul.mubr.msk.f32.gmra.mxu0 %vm3118_vm2, %v18016_v20  ;;  %v18018_v20 = vld [vmem:[#allocation31_spill] sm:$0xff] }
 0x52f   : > { %v4095_v11 = vadd.f32 %v10206_v48, %v14785_v47  ;;  %v10259_v7 = vpop.f32.mrf.mxu1  ;;  %10507 = vmatprep.mubr.msk.f32.mxu0 %vm3118_vm2, %v14636_v49 }
 0x530   : > { %v14979_v23 = vpop.f32.mrf.mxu0 }
 0x531   : > { %v14981_v40 = vpop.f32.mrf.mxu1  ;;  %v14983_v50 = vadd.f32 %v10256_v18, %v4095_v11 }
 0x532   : > { %18017 = vst [vmem:[#allocation75_spill] sm:$0xff] %v14981_v40  ;;  %v10209_v38 = vpop.f32.mrf.mxu0  ;;  %10508 = vmatmul.mubr.msk.f32.gmra.mxu0 %vm3118_vm2, %v14644_v10  ;;  %v18021_v40 = vld [vmem:[#allocation47_spill] sm:$0xff] }
 0x533   : > { %v4097_v0 = vadd.f32 %v10209_v38, %v14811_v3  ;;  %v10262_v32 = vpop.f32.mrf.mxu1  ;;  %10510 = vmatprep.mubr.msk.f32.mxu0 %vm3118_vm2, %v18018_v20 }
 0x534   : > { %v14990_v47 = vpop.f32.mrf.mxu0 }
 0x535   : > { %18019 = vst [vmem:[#allocation113_spill] sm:$0xff] %v14990_v47  ;;  %v14992_v48 = vpop.f32.mrf.mxu1  ;;  %v14994_v49 = vadd.f32 %v10259_v7, %v4097_v0 }
 0x536   : > { %18020 = vst [vmem:[#allocation114_spill] sm:$0xff] %v14992_v48  ;;  %v10212_v53 = vpop.f32.mrf.mxu0  ;;  %10511 = vmatmul.mubr.msk.f32.gmra.mxu0 %vm3118_vm2, %v18021_v40 }
 0x537   : > { %v4099_v18 = vadd.f32 %v10212_v53, %v14823_v29  ;;  %v14999_v11 = vpop.f32.mrf.mxu1  ;;  %10569 = vmatprep.mubr.msk.f32.mxu0 %vm6003_vm5, %v17972_v52 }
 0x538   : > { %18022 = vst [vmem:[#allocation25_spill] sm:$0xff] %v14999_v11  ;;  %v15001_v10 = vpop.f32.mrf.mxu0 }
 0x539   : > { %18023 = vst [vmem:[#allocation97_spill] sm:$0xff] %v15001_v10  ;;  %v15003_v3 = vpop.f32.mrf.mxu1  ;;  %v15005_v38 = vadd.f32 %v10262_v32, %v4099_v18 }
 0x53a   : > { %18024 = vst [vmem:[#allocation21_spill] sm:$0xff] %v15003_v3  ;;  %v10267_v20 = vpop.f32.mrf.mxu0 }
 0x53b   : > { %v15008_v47 = vadd.f32 %v10267_v20, %v14840_v56  ;;  %v15010_v7 = vpop.f32.mrf.mxu1 }
 0x53c   : > { %18026 = vst [vmem:[#allocation74_spill] sm:$0xff] %v15010_v7  ;;  %v15012_v0 = vpop.f32.mrf.mxu0 }
 0x53d   : > { %18025 = vst [vmem:[#allocation73_spill] sm:$0xff] %v15008_v47  ;;  %18027 = vst [vmem:[#allocation90_spill] sm:$0xff] %v15012_v0  ;;  %v15014_v48 = vpop.f32.mrf.mxu1 }
 0x53e   : > { %18028 = vst [vmem:[#allocation91_spill] sm:$0xff] %v15014_v48  ;;  %v10270_v40 = vpop.f32.mrf.mxu0 }
 0x53f   : > { %v15017_v29 = vadd.f32 %v10270_v40, %v14851_v57  ;;  %v10323_v53 = vpop.f32.mrf.mxu1 }
 0x540   : > { %v15019_v11 = vpop.f32.mrf.mxu0 }
 0x541   : > { %18029 = vst [vmem:[#allocation58_spill] sm:$0xff] %v15017_v29  ;;  %18030 = vst [vmem:[#allocation65_spill] sm:$0xff] %v15019_v11  ;;  %v15021_v3 = vpop.f32.mrf.mxu1  ;;  %v5894_v29 = vld [vmem:[#allocation7 + $0x8] sm:$0xff]  ;;  %v5893_v11 = vld [vmem:[#allocation7] sm:$0xff] }
 0x542   : > { %18031 = vst [vmem:[#allocation62_spill] sm:$0xff] %v15021_v3  ;;  %v10273_v32 = vpop.f32.mrf.mxu0  ;;  %10565 = vmatprep.subr.mxu0 %v5894_v29 }
 0x543   : > { %v4606_v18 = vadd.f32 %v10273_v32, %v14862_v39  ;;  %v10326_v56 = vpop.f32.mrf.mxu1  ;;  %10566 = vmatpush3.msra.mxu0 %v5894_v29 }
 0x544   : > { %v15024_v20 = vpop.f32.mrf.mxu0  ;;  %10567 = vmatprep.subr.mxu0 %v5893_v11 }
 0x545   : > { %v15026_v7 = vpop.f32.mrf.mxu1  ;;  %v15028_v47 = vadd.f32 %v10323_v53, %v4606_v18  ;;  %10568 = vmatpush3.msra.mxu0 %v5893_v11  ;;  %v6659_v18 = vld [vmem:[#allocation7 + $0x28] sm:$0xff] }
 0x546   : > { %18032 = vst [vmem:[#allocation64_spill] sm:$0xff] %v15026_v7  ;;  %v10276_v48 = vpop.f32.mrf.mxu0  ;;  %10570 = vmatmul.mubr.msk.f32.vlgmr.msra.gmra.mxu0 %vm6003_vm5, %v17974_v42  ;;  %10617 = vmatprep.subr.mxu1 %v6659_v18 }
 0x547   : > { %v4608_v0 = vadd.f32 %v10276_v48, %v14873_v25  ;;  %v10329_v57 = vpop.f32.mrf.mxu1  ;;  %10618 = vmatpush3.msra.mxu1 %v6659_v18 }
 0x548   : > { %v15031_v40 = vpop.f32.mrf.mxu0 }
 0x549   : > { %18033 = vst [vmem:[#allocation67_spill] sm:$0xff] %v15031_v40  ;;  %v15033_v10 = vpop.f32.mrf.mxu1  ;;  %v15035_v3 = vadd.f32 %v10326_v56, %v4608_v0 }
 0x54a   : > { %18034 = vst [vmem:[#allocation66_spill] sm:$0xff] %v15033_v10  ;;  %v10279_v39 = vpop.f32.mrf.mxu0 }
 0x54b   : > { %v4610_v32 = vadd.f32 %v10279_v39, %v14884_v9  ;;  %v10332_v7 = vpop.f32.mrf.mxu1 }
 0x54c   : > { %v15038_v53 = vpop.f32.mrf.mxu0 }
 0x54d   : > { %v15040_v25 = vpop.f32.mrf.mxu1  ;;  %v15042_v48 = vadd.f32 %v10329_v57, %v4610_v32 }
 0x54e   : > { %18035 = vst [vmem:[#allocation78_spill] sm:$0xff] %v15040_v25  ;;  %v10282_v40 = vpop.f32.mrf.mxu0 }
 0x54f   : > { %v4612_v9 = vadd.f32 %v10282_v40, %v14895_v45  ;;  %v10335_v0 = vpop.f32.mrf.mxu1 }
 0x550   : > { %v15053_v11 = vpop.f32.mrf.mxu0 }
 0x551   : > { %v15055_v29 = vpop.f32.mrf.mxu1  ;;  %v15057_v56 = vadd.f32 %v10332_v7, %v4612_v9 }
 0x552   : > { %18036 = vst [vmem:[#allocation83_spill] sm:$0xff] %v15055_v29  ;;  %v10285_v57 = vpop.f32.mrf.mxu0 }
 0x553   : > { %v4614_v39 = vadd.f32 %v10285_v57, %v14906_v13  ;;  %v10338_v32 = vpop.f32.mrf.mxu1 }
 0x554   : > { %v15060_v45 = vpop.f32.mrf.mxu0 }
 0x555   : > { %v15062_v40 = vpop.f32.mrf.mxu1  ;;  %v15064_v42 = vadd.f32 %v10335_v0, %v4614_v39 }
 0x556   : > { %18037 = vst [vmem:[#allocation117_spill] sm:$0xff] %v15062_v40  ;;  %v10288_v52 = vpop.f32.mrf.mxu0 }
 0x557   : > { %v4616_v58 = vadd.f32 %v10288_v52, %v14917_v61  ;;  %v10341_v24 = vpop.f32.mrf.mxu1 }
 0x558   : > { %v15067_v25 = vpop.f32.mrf.mxu0 }
 0x559   : > { %18038 = vst [vmem:[#allocation118_spill] sm:$0xff] %v15067_v25  ;;  %v15069_v29 = vpop.f32.mrf.mxu1  ;;  %v15071_v7 = vadd.f32 %v10338_v32, %v4616_v58 }
 0x55a   : > { %18039 = vst [vmem:[#allocation28_spill] sm:$0xff] %v15069_v29  ;;  %v10291_v18 = vpop.f32.mrf.mxu0 }
 0x55b   : > { %v4618_v13 = vadd.f32 %v10291_v18, %v14928_v43  ;;  %v10344_v9 = vpop.f32.mrf.mxu1 }
 0x55c   : > { %v15074_v57 = vpop.f32.mrf.mxu0 }
 0x55d   : > { %18040 = vst [vmem:[#allocation53_spill] sm:$0xff] %v15074_v57  ;;  %v15076_v10 = vpop.f32.mrf.mxu1  ;;  %v15078_v0 = vadd.f32 %v10341_v24, %v4618_v13 }
 0x55e   : > { %18041 = vst [vmem:[#allocation26_spill] sm:$0xff] %v15076_v10  ;;  %v10294_v39 = vpop.f32.mrf.mxu0 }
 0x55f   : > { %v4620_v52 = vadd.f32 %v10294_v39, %v14939_v4  ;;  %v10347_v61 = vpop.f32.mrf.mxu1 }
 0x560   : > { %v15081_v40 = vpop.f32.mrf.mxu0 }
 0x561   : > { %18042 = vst [vmem:[#allocation22_spill] sm:$0xff] %v15081_v40  ;;  %v15083_v25 = vpop.f32.mrf.mxu1  ;;  %v15085_v58 = vadd.f32 %v10344_v9, %v4620_v52 }
 0x562   : > { %18043 = vst [vmem:[#allocation41_spill] sm:$0xff] %v15083_v25  ;;  %v10297_v32 = vpop.f32.mrf.mxu0 }
 0x563   : > { %v4622_v43 = vadd.f32 %v10297_v32, %v14950_v31  ;;  %v10350_v18 = vpop.f32.mrf.mxu1 }
 0x564   : > { %v15088_v29 = vpop.f32.mrf.mxu0 }
 0x565   : > { %18044 = vst [vmem:[#allocation55_spill] sm:$0xff] %v15088_v29  ;;  %v15090_v57 = vpop.f32.mrf.mxu1  ;;  %v15092_v24 = vadd.f32 %v10347_v61, %v4622_v43  ;;  %v6658_v43 = vld [vmem:[#allocation7 + $0x20] sm:$0xff] }
 0x566   : > { %18045 = vst [vmem:[#allocation46_spill] sm:$0xff] %v15090_v57  ;;  %v10300_v13 = vpop.f32.mrf.mxu0  ;;  %10619 = vmatprep.subr.mxu1 %v6658_v43 }
 0x567   : > { %v4624_v4 = vadd.f32 %v10300_v13, %v14961_v51  ;;  %v10353_v39 = vpop.f32.mrf.mxu1  ;;  %10620 = vmatpush3.msra.mxu1 %v6658_v43 }
 0x568   : > { %v15095_v10 = vpop.f32.mrf.mxu0 }
 0x569   : > { %18046 = vst [vmem:[#allocation29_spill] sm:$0xff] %v15095_v10  ;;  %v15097_v40 = vpop.f32.mrf.mxu1  ;;  %v15099_v9 = vadd.f32 %v10350_v18, %v4624_v4 }
 0x56a   : > { %18047 = vst [vmem:[#allocation30_spill] sm:$0xff] %v15097_v40  ;;  %v10303_v52 = vpop.f32.mrf.mxu0 }
 0x56b   : > { %v4626_v31 = vadd.f32 %v10303_v52, %v14972_v19  ;;  %v10356_v32 = vpop.f32.mrf.mxu1 }
 0x56c   : > { %v15102_v25 = vpop.f32.mrf.mxu0 }
 0x56d   : > { %18048 = vst [vmem:[#allocation82_spill] sm:$0xff] %v15102_v25  ;;  %v15104_v29 = vpop.f32.mrf.mxu1  ;;  %v15106_v61 = vadd.f32 %v10353_v39, %v4626_v31 }
 0x56e   : > { %18049 = vst [vmem:[#allocation57_spill] sm:$0xff] %v15104_v29  ;;  %v10306_v57 = vpop.f32.mrf.mxu0 }
 0x56f   : > { %v4628_v51 = vadd.f32 %v10306_v57, %v14983_v50  ;;  %v10359_v13 = vpop.f32.mrf.mxu1 }
 0x570   : > { %v15109_v40 = vpop.f32.mrf.mxu0 }
 0x571   : > { %v15111_v18 = vpop.f32.mrf.mxu1  ;;  %v15113_v4 = vadd.f32 %v10356_v32, %v4628_v51 }
 0x572   : > { %18050 = vst [vmem:[#allocation59_spill] sm:$0xff] %v15111_v18  ;;  %v10309_v19 = vpop.f32.mrf.mxu0 }
 0x573   : > { %v4630_v52 = vadd.f32 %v10309_v19, %v14994_v49  ;;  %v10362_v25 = vpop.f32.mrf.mxu1 }
 0x574   : > { %v15116_v29 = vpop.f32.mrf.mxu0 }
 0x575   : > { %18051 = vst [vmem:[#allocation107_spill] sm:$0xff] %v15116_v29  ;;  %v15118_v39 = vpop.f32.mrf.mxu1  ;;  %v15120_v31 = vadd.f32 %v10359_v13, %v4630_v52 }
 0x576   : > { %18052 = vst [vmem:[#allocation108_spill] sm:$0xff] %v15118_v39  ;;  %v10312_v10 = vpop.f32.mrf.mxu0 }
 0x577   : > { %v4632_v50 = vadd.f32 %v10312_v10, %v15005_v38  ;;  %v15123_v57 = vpop.f32.mrf.mxu1 }
 0x578   : > { %18053 = vst [vmem:[#allocation61_spill] sm:$0xff] %v15123_v57  ;;  %v15125_v43 = vpop.f32.mrf.mxu0 }
 0x579   : > { %18054 = vst [vmem:[#allocation33_spill] sm:$0xff] %v15125_v43  ;;  %v15127_v18 = vadd.f32 %v10362_v25, %v4632_v50  ;;  %v15131_v51 = vpop.f32.mrf.mxu1  ;;  %v6983_v50 = vld [vmem:[#allocation7 + $0x38] sm:$0xff] }
 0x57a   : > { %v15129_v32 = vpop.f32.mrf.mxu0  ;;  %18056 = vst [vmem:[#allocation119_spill] sm:$0xff] %v15131_v51  ;;  %10669 = vmatprep.subr.mxu0 %v6983_v50  ;;  %v6982_v51 = vld [vmem:[#allocation7 + $0x30] sm:$0xff] }
 0x57b   : > { %18055 = vst [vmem:[#allocation95_spill] sm:$0xff] %v15127_v18  ;;  %v15137_v39 = vpop.f32.mrf.mxu1  ;;  %10670 = vmatpush3.msra.mxu0 %v6983_v50 }
 0x57c   : > { %v15133_v49 = vpop.f32.mrf.mxu0  ;;  %18059 = vst [vmem:[#allocation44_spill] sm:$0xff] %v15137_v39  ;;  %10671 = vmatprep.subr.mxu0 %v6982_v51 }
 0x57d   : > { %18057 = vst [vmem:[#allocation37_spill] sm:$0xff] %v15133_v49  ;;  %v15144_v38 = vpop.f32.mrf.mxu1  ;;  %10672 = vmatpush3.msra.mxu0 %v6982_v51 }
 0x57e   : > { %v15135_v19 = vpop.f32.mrf.mxu0  ;;  %18062 = vst [vmem:[#allocation77_spill] sm:$0xff] %v15144_v38 }
 0x57f   : > { %18058 = vst [vmem:[#allocation45_spill] sm:$0xff] %v15135_v19  ;;  %v15151_v19 = vpop.f32.mrf.mxu1 }
 0x580   : > { %v15139_v13 = vpop.f32.mrf.mxu0  ;;  %18065 = vst [vmem:[#allocation96_spill] sm:$0xff] %v15151_v19 }
 0x581   : > { %18060 = vst [vmem:[#allocation51_spill] sm:$0xff] %v15139_v13  ;;  %v15158_v38 = vpop.f32.mrf.mxu1 }
 0x582   : > { %v10373_v52 = vpop.f32.mrf.mxu0  ;;  %18068 = vst [vmem:[#allocation102_spill] sm:$0xff] %v15158_v38 }
 0x583   : > { %v15142_v10 = vadd.f32 %v10373_v52, %v15028_v47  ;;  %v7254_v52 = vld [vmem:[#allocation7 + $0x48] sm:$0xff] }
 0x584   : > { %v15146_v25 = vpop.f32.mrf.mxu0  ;;  %10721 = vmatprep.subr.mxu1 %v7254_v52 }
 0x585   : > { %18061 = vst [vmem:[#allocation103_spill] sm:$0xff] %v15142_v10  ;;  %18063 = vst [vmem:[#allocation109_spill] sm:$0xff] %v15146_v25 }
 0x586   : > { %v10376_v43 = vpop.f32.mrf.mxu0 }
 0x587   : > { %v15149_v57 = vadd.f32 %v10376_v43, %v15035_v3  ;;  %v15165_v43 = vpop.f32.mrf.mxu1 }
 0x588   : > { %v15153_v39 = vpop.f32.mrf.mxu0  ;;  %18071 = vst [vmem:[#allocation112_spill] sm:$0xff] %v15165_v43 }
 0x589   : > { %18064 = vst [vmem:[#allocation84_spill] sm:$0xff] %v15149_v57  ;;  %18066 = vst [vmem:[#allocation79_spill] sm:$0xff] %v15153_v39  ;;  %v15172_v19 = vpop.f32.mrf.mxu1 }
 0x58a   : > { %v10379_v47 = vpop.f32.mrf.mxu0  ;;  %18074 = vst [vmem:[#allocation86_spill] sm:$0xff] %v15172_v19 }
 0x58b   : > { %v15156_v10 = vadd.f32 %v10379_v47, %v15042_v48 }
 0x58c   : > { %v15160_v25 = vpop.f32.mrf.mxu0 }
 0x58d   : > { %18067 = vst [vmem:[#allocation80_spill] sm:$0xff] %v15156_v10  ;;  %18069 = vst [vmem:[#allocation92_spill] sm:$0xff] %v15160_v25  ;;  %v15179_v10 = vpop.f32.mrf.mxu1  ;;  %v18097_v25 = vld [vmem:[#allocation106_spill] sm:$0xff] }
 0x58e   : > { %v10382_v13 = vpop.f32.mrf.mxu0  ;;  %18077 = vst [vmem:[#allocation115_spill] sm:$0xff] %v15179_v10  ;;  %v18086_v10 = vld [vmem:[#allocation49_spill] sm:$0xff] }
 0x58f   : > { %v15163_v3 = vadd.f32 %v10382_v13, %v15057_v56  ;;  %v15186_v43 = vpop.f32.mrf.mxu1 }
 0x590   : > { %v15167_v50 = vpop.f32.mrf.mxu0  ;;  %18080 = vst [vmem:[#allocation116_spill] sm:$0xff] %v15186_v43 }
 0x591   : > { %18070 = vst [vmem:[#allocation68_spill] sm:$0xff] %v15163_v3  ;;  %18072 = vst [vmem:[#allocation34_spill] sm:$0xff] %v15167_v50  ;;  %v15193_v19 = vpop.f32.mrf.mxu1 }
 0x592   : > { %v10385_v57 = vpop.f32.mrf.mxu0  ;;  %18083 = vst [vmem:[#allocation87_spill] sm:$0xff] %v15193_v19  ;;  %v18096_v19 = vld [vmem:[#allocation52_spill] sm:$0xff] }
 0x593   : > { %v15170_v51 = vadd.f32 %v10385_v57, %v15064_v42  ;;  %v15206_v50 = vpop.f32.mrf.mxu1 }
 0x594   : > { %v15174_v48 = vpop.f32.mrf.mxu0  ;;  %18092 = vst [vmem:[#allocation50_spill] sm:$0xff] %v15206_v50 }
 0x595   : > { %18073 = vst [vmem:[#allocation88_spill] sm:$0xff] %v15170_v51  ;;  %18075 = vst [vmem:[#allocation48_spill] sm:$0xff] %v15174_v48  ;;  %v18090_v48 = vld [vmem:[#allocation38_spill] sm:$0xff] }
 0x596   : > { %v10388_v47 = vpop.f32.mrf.mxu0 }
 0x597   : > { %v15177_v52 = vadd.f32 %v10388_v47, %v15071_v7 }
 0x598   : > { %v15181_v56 = vpop.f32.mrf.mxu0 }
 0x599   : > { %18076 = vst [vmem:[#allocation27_spill] sm:$0xff] %v15177_v52  ;;  %18078 = vst [vmem:[#allocation36_spill] sm:$0xff] %v15181_v56  ;;  %v18087_v56 = vld [vmem:[#allocation93_spill] sm:$0xff] }
 0x59a   : > { %v10391_v13 = vpop.f32.mrf.mxu0 }
 0x59b   : > { %v15184_v3 = vadd.f32 %v10391_v13, %v15078_v0  ;;  %v3539_v0 = vadd.f32 %v18087_v56, %v18086_v10  ;;  %v18088_v13 = vld [vmem:[#allocation32_spill] sm:$0xff]  ;;  %v18100_v10 = vld [vmem:[#allocation39_spill] sm:$0xff] }
 0x59c   : > { %v15188_v42 = vpop.f32.mrf.mxu0  ;;  %v18101_v56 = vld [vmem:[#allocation19_spill] sm:$0xff] }
 0x59d   : > { %18079 = vst [vmem:[#allocation15_spill] sm:$0xff] %v15184_v3  ;;  %18081 = vst [vmem:[#allocation85_spill] sm:$0xff] %v15188_v42  ;;  %v18089_v3 = vld [vmem:[#allocation42_spill] sm:$0xff]  ;;  %v18091_v42 = vld [vmem:[#allocation43_spill] sm:$0xff]  ;;  %v3599_v18 = vadd.f32 %v18101_v56, %v18100_v10 }
 0x59e   : > { %v10394_v57 = vpop.f32.mrf.mxu0  ;;  %v3549_v43 = vadd.f32 %v18089_v3, %v18088_v13  ;;  %v3559_v38 = vadd.f32 %v18091_v42, %v18090_v48  ;;  %v18102_v3 = vld [vmem:[#allocation56_spill] sm:$0xff]  ;;  %v18103_v13 = vld [vmem:[#allocation54_spill] sm:$0xff]  ;;  %v18104_v48 = vld [vmem:[#allocation23_spill] sm:$0xff] }
 0x59f   : > { %v15191_v51 = vadd.f32 %v10394_v57, %v15085_v58  ;;  %v18094_v57 = vld [vmem:[#allocation104_spill] sm:$0xff]  ;;  %v3609_v49 = vadd.f32 %v18103_v13, %v18102_v3  ;;  %v18115_v56 = vld [vmem:[#allocation98_spill] sm:$0xff] }
 0x5a0   : > { %v15195_v7 = vpop.f32.mrf.mxu0  ;;  %v18105_v42 = vld [vmem:[#allocation16_spill] sm:$0xff]  ;;  %v4070_v29 = vadd.f32 %v14847_v54, %v3549_v43 }
 0x5a1   : > { %18082 = vst [vmem:[#allocation70_spill] sm:$0xff] %v15191_v51  ;;  %18084 = vst [vmem:[#allocation105_spill] sm:$0xff] %v15195_v7  ;;  %v18095_v51 = vld [vmem:[#allocation76_spill] sm:$0xff]  ;;  %v3619_v50 = vadd.f32 %v18105_v42, %v18104_v48  ;;  %v18117_v42 = vld [vmem:[#allocation67_spill] sm:$0xff] }
 0x5a2   : > { %v10397_v47 = vpop.f32.mrf.mxu0  ;;  %v3569_v7 = vadd.f32 %v18095_v51, %v18094_v57 }
 0x5a3   : > { %v15198_v52 = vadd.f32 %v10397_v47, %v15092_v24  ;;  %v3579_v24 = vadd.f32 %v18097_v25, %v18096_v19  ;;  %v18098_v47 = vld [vmem:[#allocation35_spill] sm:$0xff]  ;;  %v3629_v19 = vadd.f32 %v14666_v37, %v14668_v35  ;;  %v3639_v25 = vadd.f32 %v14713_v21, %v14715_v60 }
 0x5a4   : > { %v15208_v58 = vpop.f32.mrf.mxu0  ;;  %v4074_v54 = vadd.f32 %v14869_v36, %v3569_v7  ;;  %v3669_v35 = vadd.f32 %v14793_v14, %v14799_v17  ;;  %v3679_v21 = vadd.f32 %v14807_v8, %v14817_v34  ;;  %v3689_v60 = vadd.f32 %v14819_v6, %v14827_v46  ;;  %v18106_v46 = vld [vmem:[#allocation71_spill] sm:$0xff] }
 0x5a5   : > { %18085 = vst [vmem:[#allocation110_spill] sm:$0xff] %v15198_v52  ;;  %18093 = vst [vmem:[#allocation111_spill] sm:$0xff] %v15208_v58  ;;  %v18099_v52 = vld [vmem:[#allocation101_spill] sm:$0xff]  ;;  %v4068_v58 = vadd.f32 %v14836_v12, %v3539_v0  ;;  %v3659_v12 = vadd.f32 %v14771_v26, %v14775_v27  ;;  %v4076_v43 = vadd.f32 %v14880_v55, %v3579_v24  ;;  %v15238_v0 = vpop.f32.mrf.mxu1 }
 0x5a6   : > { %v3589_v39 = vadd.f32 %v18099_v52, %v18098_v47  ;;  %v10400_v51 = vpop.f32.mrf.mxu0  ;;  %v4072_v52 = vadd.f32 %v14858_v33, %v3559_v38  ;;  %v3649_v47 = vadd.f32 %v14735_v5, %v14737_v41  ;;  %v4080_v41 = vadd.f32 %v14902_v28, %v3599_v18  ;;  %v18107_v28 = vld [vmem:[#allocation81_spill] sm:$0xff] }
 0x5a7   : > { %v15230_v57 = vadd.f32 %v10400_v51, %v15099_v9  ;;  %v4082_v26 = vadd.f32 %v14913_v2, %v3609_v49  ;;  %v4332_v27 = vadd.f32 %v14829_v22, %v4068_v58  ;;  %v4334_v33 = vadd.f32 %v14838_v62, %v4070_v29  ;;  %v15263_v2 = vpop.f32.mrf.mxu1  ;;  %v18109_v9 = vld [vmem:[#allocation24_spill] sm:$0xff]  ;;  %v18110_v18 = vld [vmem:[#allocation97_spill] sm:$0xff] }
 0x5a8   : > { %v15240_v37 = vpop.f32.mrf.mxu0  ;;  %v4078_v5 = vadd.f32 %v14891_v63, %v3589_v39  ;;  %v4084_v55 = vadd.f32 %v14924_v1, %v3619_v50  ;;  %v4086_v14 = vadd.f32 %v14935_v30, %v3629_v19  ;;  %v4336_v17 = vadd.f32 %v14849_v15, %v4072_v52  ;;  %v18108_v15 = vld [vmem:[#allocation113_spill] sm:$0xff]  ;;  %v18111_v39 = vld [vmem:[#allocation90_spill] sm:$0xff]  ;;  %v18112_v49 = vld [vmem:[#allocation72_spill] sm:$0xff] }
 0x5a9   : > { %v4088_v34 = vadd.f32 %v14946_v16, %v3639_v25  ;;  %v4090_v6 = vadd.f32 %v14957_v44, %v3649_v47  ;;  %v4338_v63 = vadd.f32 %v18106_v46, %v4074_v54  ;;  %v4340_v22 = vadd.f32 %v18107_v28, %v4076_v43  ;;  %v18113_v50 = vld [vmem:[#allocation89_spill] sm:$0xff]  ;;  %v18118_v19 = vld [vmem:[#allocation99_spill] sm:$0xff]  ;;  %v18127_v46 = vld [vmem:[#allocation58_spill] sm:$0xff] }
 0x5aa   : > { %v10403_v36 = vpop.f32.mrf.mxu0  ;;  %v4092_v1 = vadd.f32 %v14968_v59, %v3659_v12  ;;  %v4094_v30 = vadd.f32 %v14979_v23, %v3669_v35  ;;  %v4096_v29 = vadd.f32 %v18108_v15, %v3679_v21  ;;  %v4098_v16 = vadd.f32 %v18110_v18, %v3689_v60  ;;  %v18114_v24 = vld [vmem:[#allocation65_spill] sm:$0xff]  ;;  %v18116_v59 = vld [vmem:[#allocation60_spill] sm:$0xff]  ;;  %v18119_v52 = vld [vmem:[#allocation63_spill] sm:$0xff]  ;;  %v15285_v12 = vpop.f32.mrf.mxu1 }
 0x5ab   : > { %v15257_v8 = vadd.f32 %v10403_v36, %v15106_v61  ;;  %v4342_v61 = vadd.f32 %v18109_v9, %v4078_v5  ;;  %v4601_v44 = vadd.f32 %v18111_v39, %v4332_v27  ;;  %v4344_v38 = vadd.f32 %v18112_v49, %v4080_v41  ;;  %v18120_v35 = vld [vmem:[#allocation100_spill] sm:$0xff]  ;;  %v18121_v60 = vld [vmem:[#allocation69_spill] sm:$0xff]  ;;  %v18129_v28 = vld [vmem:[#allocation91_spill] sm:$0xff] }
 0x5ac   : > { %v15265_v62 = vpop.f32.mrf.mxu0  ;;  %v4346_v7 = vadd.f32 %v18113_v50, %v4082_v26  ;;  %v4603_v10 = vadd.f32 %v18114_v24, %v4334_v33  ;;  %v4348_v3 = vadd.f32 %v18115_v56, %v4084_v55  ;;  %v4350_v13 = vadd.f32 %v18116_v59, %v4086_v14  ;;  %v18123_v26 = vld [vmem:[#allocation114_spill] sm:$0xff]  ;;  %v18124_v33 = vld [vmem:[#allocation73_spill] sm:$0xff]  ;;  %v18133_v18 = vld [vmem:[#allocation64_spill] sm:$0xff]  ;;  %v15309_v39 = vpop.f32.mrf.mxu1 }
 0x5ad   : > { %v4605_v48 = vadd.f32 %v15024_v20, %v4336_v17  ;;  %v4607_v51 = vadd.f32 %v18117_v42, %v4338_v63  ;;  %v4352_v25 = vadd.f32 %v18118_v19, %v4088_v34  ;;  %v4354_v47 = vadd.f32 %v18119_v52, %v4090_v6  ;;  %v18125_v36 = vld [vmem:[#allocation25_spill] sm:$0xff]  ;;  %v18132_v9 = vld [vmem:[#allocation62_spill] sm:$0xff]  ;;  %v18140_v19 = vld [vmem:[#allocation107_spill] sm:$0xff] }
 0x5ae   : > { %v10406_v58 = vpop.f32.mrf.mxu0  ;;  %v4609_v43 = vadd.f32 %v15038_v53, %v4340_v22  ;;  %v4356_v21 = vadd.f32 %v18120_v35, %v4092_v1  ;;  %v4358_v5 = vadd.f32 %v18121_v60, %v4094_v30  ;;  %v4611_v20 = vadd.f32 %v15053_v11, %v4342_v61  ;;  %v18126_v14 = vld [vmem:[#allocation21_spill] sm:$0xff]  ;;  %v18128_v53 = vld [vmem:[#allocation74_spill] sm:$0xff] }
 0x5af   : > { %v15279_v23 = vadd.f32 %v10406_v58, %v15113_v4  ;;  %v18122_v4 = vld [vmem:[#allocation75_spill] sm:$0xff]  ;;  %v4362_v27 = vadd.f32 %v18123_v26, %v4098_v16  ;;  %v4870_v55 = vadd.f32 %v18125_v36, %v18124_v33  ;;  %v4869_v17 = vadd.f32 %v18126_v14, %v4601_v44  ;;  %v18130_v30 = vld [vmem:[#allocation118_spill] sm:$0xff]  ;;  %v18131_v15 = vld [vmem:[#allocation53_spill] sm:$0xff]  ;;  %v10441_v36 = vpop.f32.mrf.mxu1 }
 0x5b0   : > { %v15287_v54 = vpop.f32.mrf.mxu0  ;;  %v4360_v41 = vadd.f32 %v18122_v4, %v4096_v29  ;;  %v4613_v6 = vadd.f32 %v15060_v45, %v4344_v38  ;;  %v4872_v63 = vadd.f32 %v18128_v53, %v18127_v46  ;;  %v4871_v22 = vadd.f32 %v18129_v28, %v4603_v10  ;;  %v18134_v45 = vld [vmem:[#allocation22_spill] sm:$0xff]  ;;  %v18135_v38 = vld [vmem:[#allocation55_spill] sm:$0xff]  ;;  %v18137_v10 = vld [vmem:[#allocation29_spill] sm:$0xff] }
 0x5b1   : > { %v4615_v11 = vadd.f32 %v18130_v30, %v4346_v7  ;;  %v4617_v29 = vadd.f32 %v18131_v15, %v4348_v3  ;;  %v4873_v61 = vadd.f32 %v18132_v9, %v4605_v48  ;;  %v4875_v16 = vadd.f32 %v18133_v18, %v4607_v51  ;;  %v18138_v56 = vld [vmem:[#allocation82_spill] sm:$0xff]  ;;  %v18141_v35 = vld [vmem:[#allocation37_spill] sm:$0xff]  ;;  %v18145_v33 = vld [vmem:[#allocation51_spill] sm:$0xff] }
 0x5b2   : > { %v10409_v34 = vpop.f32.mrf.mxu0  ;;  %v4619_v49 = vadd.f32 %v18134_v45, %v4350_v13  ;;  %v4621_v50 = vadd.f32 %v18135_v38, %v4352_v25  ;;  %v5129_v58 = vadd.f32 %v15129_v32, %v4870_v55  ;;  %v4623_v7 = vadd.f32 %v18137_v10, %v4354_v47  ;;  %v18139_v48 = vld [vmem:[#allocation78_spill] sm:$0xff]  ;;  %v18142_v13 = vld [vmem:[#allocation83_spill] sm:$0xff]  ;;  %v18144_v32 = vld [vmem:[#allocation45_spill] sm:$0xff] }
 0x5b3   : > { %v15303_v1 = vadd.f32 %v10409_v34, %v15120_v31  ;;  %v18136_v31 = vld [vmem:[#allocation66_spill] sm:$0xff]  ;;  %v4625_v3 = vadd.f32 %v18138_v56, %v4356_v21  ;;  %v4627_v59 = vadd.f32 %v15109_v40, %v4358_v5  ;;  %v4879_v42 = vadd.f32 %v18139_v48, %v4611_v20  ;;  %v18143_v25 = vld [vmem:[#allocation95_spill] sm:$0xff]  ;;  %v18146_v21 = vld [vmem:[#allocation117_spill] sm:$0xff]  ;;  %v5308_v48 = vpop.f32.mrf.mxu1 }
 0x5b4   : > { %v15311_v44 = vpop.f32.mrf.mxu0  ;;  %v4877_v24 = vadd.f32 %v18136_v31, %v4609_v43  ;;  %v4629_v52 = vadd.f32 %v18140_v19, %v4360_v41  ;;  %v5128_v60 = vadd.f32 %v18141_v35, %v4869_v17  ;;  %v4881_v4 = vadd.f32 %v18142_v13, %v4613_v6  ;;  %v18147_v40 = vld [vmem:[#allocation28_spill] sm:$0xff]  ;;  %v18148_v14 = vld [vmem:[#allocation109_spill] sm:$0xff]  ;;  %v18149_v34 = vld [vmem:[#allocation26_spill] sm:$0xff] }
 0x5b5   : > { %v5131_v43 = vadd.f32 %v18144_v32, %v4872_v63  ;;  %v5130_v47 = vadd.f32 %v18145_v33, %v4871_v22  ;;  %v4883_v55 = vadd.f32 %v18146_v21, %v4615_v11  ;;  %v4885_v5 = vadd.f32 %v18147_v40, %v4617_v29  ;;  %v18150_v46 = vld [vmem:[#allocation41_spill] sm:$0xff]  ;;  %v18152_v30 = vld [vmem:[#allocation79_spill] sm:$0xff]  ;;  %v18153_v15 = vld [vmem:[#allocation46_spill] sm:$0xff] }
 0x5b6   : > { %v10412_v51 = vpop.f32.mrf.mxu0  ;;  %v5132_v41 = vadd.f32 %v18148_v14, %v4873_v61  ;;  %v4887_v17 = vadd.f32 %v18149_v34, %v4619_v49  ;;  %v15336_v6 = vadd.f32 %v18150_v46, %v4621_v50  ;;  %v18151_v53 = vld [vmem:[#allocation61_spill] sm:$0xff]  ;;  %v5134_v63 = vadd.f32 %v18152_v30, %v4875_v16  ;;  %v18154_v9 = vld [vmem:[#allocation30_spill] sm:$0xff]  ;;  %v18157_v50 = vld [vmem:[#allocation59_spill] sm:$0xff] }
 0x5b7   : > { %v15325_v26 = vadd.f32 %v10412_v51, %v18143_v25  ;;  %v5388_v28 = vadd.f32 %v18151_v53, %v5129_v58  ;;  %v15341_v22 = vadd.f32 %v18153_v15, %v4623_v7  ;;  %v15344_v11 = vadd.f32 %v18154_v9, %v4625_v3  ;;  %v18155_v29 = vld [vmem:[#allocation57_spill] sm:$0xff]  ;;  %v18158_v31 = vld [vmem:[#allocation119_spill] sm:$0xff]  ;;  %v18159_v7 = vld [vmem:[#allocation92_spill] sm:$0xff] }
 0x5b8   : > { %v15331_v20 = vpop.f32.mrf.mxu0  ;;  %v15347_v18 = vadd.f32 %v18155_v29, %v4627_v59  ;;  %v15352_v61 = vld [vmem:[%s17084_s6] ss:$0 sm:$0xff]  ;;  %v15358_v16 = vadd.f32 %v18157_v50, %v4629_v52  ;;  %v5387_v10 = vadd.f32 %v18158_v31, %v5128_v60  ;;  %v5136_v56 = vadd.f32 %v18159_v7, %v4877_v24  ;;  %v18160_v3 = vld [vmem:[#allocation34_spill] sm:$0xff]  ;;  %v18161_v19 = vld [vmem:[#allocation44_spill] sm:$0xff] }
 0x5b9   : > { %v18156_v49 = vld [vmem:[#allocation33_spill] sm:$0xff]  ;;  %v5138_v59 = vadd.f32 %v18160_v3, %v4879_v42  ;;  %v5390_v35 = vadd.f32 %v18161_v19, %v5131_v43  ;;  %v18163_v33 = vld [vmem:[#allocation103_spill] sm:$0xff]  ;;  %v18164_v21 = vld [vmem:[#allocation96_spill] sm:$0xff] }
 0x5ba   : > { %v10467_v45 = vpop.f32.mrf.mxu0  ;;  %v15355_v38 = vadd.f32 %v18156_v49, %v4362_v27  ;;  %v18162_v13 = vld [vmem:[#allocation77_spill] sm:$0xff]  ;;  %v5392_v52 = vadd.f32 %v18164_v21, %v18163_v33  ;;  %v18165_v40 = vld [vmem:[#allocation102_spill] sm:$0xff]  ;;  %v18166_v34 = vld [vmem:[#allocation48_spill] sm:$0xff] }
 0x5bb   : > { %v5647_v58 = vadd.f32 %v10467_v45, %v5388_v28  ;;  %v5389_v25 = vadd.f32 %v18162_v13, %v5130_v47  ;;  %v5391_v14 = vadd.f32 %v18165_v40, %v5132_v41  ;;  %v5140_v60 = vadd.f32 %v18166_v34, %v4881_v4  ;;  %v18167_v46 = vld [vmem:[#allocation36_spill] sm:$0xff]  ;;  %v18170_v15 = vld [vmem:[#allocation86_spill] sm:$0xff]  ;;  %v18172_v49 = vld [vmem:[#allocation115_spill] sm:$0xff] }
 0x5bc   : > { %v5487_v51 = vpop.f32.mrf.mxu0  ;;  %v5142_v24 = vadd.f32 %v18167_v46, %v4883_v55  ;;  %v18168_v42 = vld [vmem:[#allocation84_spill] sm:$0xff]  ;;  %v5393_v43 = vadd.f32 %v18170_v15, %v5134_v63  ;;  %v18173_v41 = vld [vmem:[#allocation85_spill] sm:$0xff]  ;;  %v18176_v3 = vld [vmem:[#allocation87_spill] sm:$0xff] }
 0x5bd   : > { %v5686_v32 = vadd.f32 %v15352_v61, %v5647_v58  ;;  %v5646_v27 = vadd.f32 %v5487_v51, %v5387_v10  ;;  %v18169_v28 = vld [vmem:[#allocation112_spill] sm:$0xff]  ;;  %v10444_v58 = vpop.f32.mrf.mxu1  ;;  %v5144_v31 = vadd.f32 %v18173_v41, %v4885_v5  ;;  %v18177_v63 = vld [vmem:[#allocation50_spill] sm:$0xff]  ;;  %v18179_v40 = vld [vmem:[#allocation27_spill] sm:$0xff] }
 0x5be   : > { %v10470_v53 = vpop.f32.mrf.mxu0  ;;  %v5394_v30 = vadd.f32 %v18169_v28, %v18168_v42  ;;  %v18171_v45 = vld [vmem:[#allocation80_spill] sm:$0xff]  ;;  %v15388_v19 = vadd.f32 %v18177_v63, %v5138_v59  ;;  %v15400_v34 = vadd.f32 %v15285_v12, %v18179_v40  ;;  %v15403_v59 = vadd.f32 %v15309_v39, %v5142_v24 }
 0x5bf   : > { %v5718_v9 = vmax.f32 %v5686_v32, 0.0  ;;  %v5685_v47 = vadd.f32 %v15352_v61, %v5646_v27  ;;  %v5649_v29 = vadd.f32 %v10470_v53, %v5390_v35  ;;  %v15377_v50 = vadd.f32 %v18172_v49, %v18171_v45  ;;  %v18174_v10 = vld [vmem:[#allocation116_spill] sm:$0xff]  ;;  %v5318_v15 = vpop.f32.mrf.mxu1 }
 0x5c0   : > { %v5497_v4 = vpop.f32.mrf.mxu0  ;;  %v15381_v55 = vadd.f32 %v18174_v10, %v5136_v56  ;;  %v18175_v7 = vld [vmem:[#allocation68_spill] sm:$0xff]  ;;  %v15396_v56 = vadd.f32 %v15263_v2, %v5140_v60  ;;  %v15413_v12 = vadd.f32 %v5308_v48, %v5144_v31  ;;  %v15428_v31 = vld [vmem:[#allocation7 + $0x58] sm:$0xff] }
 0x5c1   : > { %v15385_v51 = vadd.f32 %v18176_v3, %v18175_v7  ;;  %v5782_v13 = vrot.slane %v5718_v9, 7  ;;  %v5717_v35 = vmax.f32 %v5685_v47, 0.0  ;;  %v5688_v32 = vadd.f32 %v15352_v61, %v5649_v29  ;;  %v18178_v21 = vld [vmem:[#allocation88_spill] sm:$0xff]  ;;  %10773 = vmatprep.subr.mxu0 %v15428_v31  ;;  %v10447_v63 = vpop.f32.mrf.mxu1 }
 0x5c2   : > { %v5648_v27 = vadd.f32 %v5497_v4, %v5389_v25  ;;  %v10473_v33 = vpop.f32.mrf.mxu0  ;;  %v15393_v5 = vadd.f32 %v15238_v0, %v18178_v21  ;;  %v18180_v25 = vld [vmem:[#allocation15_spill] sm:$0xff]  ;;  %v18181_v0 = vld [vmem:[#allocation105_spill] sm:$0xff] }
 0x5c3   : > { %v5781_v46 = vrot.slane %v5717_v35, 7  ;;  %v5720_v53 = vmax.f32 %v5688_v32, 0.0  ;;  %v15407_v28 = vadd.f32 %v10441_v36, %v18180_v25  ;;  %v5146_v9 = vadd.f32 %v18181_v0, %v4887_v17 }
 0x5c4   : > { %v5687_v42 = vadd.f32 %v15352_v61, %v5648_v27  ;;  %v15411_v2 = vsel %vm762_vm1, %v5782_v13, 0.0  ;;  %v5651_v60 = vadd.f32 %v10473_v33, %v5392_v52  ;;  %v5507_v47 = vpop.f32.mrf.mxu0  ;;  %v18182_v52 = vld [vmem:[#allocation70_spill] sm:$0xff] }
 0x5c5   : > { %v5785_v29 = vrot.slane %v5720_v53, 7  ;;  %v5650_v24 = vadd.f32 %v5507_v47, %v5391_v14  ;;  %v15416_v45 = vsel %vm762_vm1, 0.0, %v5781_v46  ;;  %v15423_v17 = vsel %vm762_vm1, %v5781_v46, %v5782_v13  ;;  %v18183_v14 = vld [vmem:[#allocation111_spill] sm:$0xff] }
 0x5c6   : > { %v5719_v39 = vmax.f32 %v5687_v42, 0.0  ;;  %v5690_v49 = vadd.f32 %v15352_v61, %v5651_v60  ;;  %v10476_v36 = vpop.f32.mrf.mxu0  ;;  %v5925_v41 = vrot.slane %v15416_v45, 1  ;;  %10572 = vmatprep.mubr.msk.f32.mxu0 %vm6003_vm5, %v15416_v45  ;;  %v15426_v48 = vadd.f32 %v10444_v58, %v18182_v52 }
 0x5c7   : > { %v5148_v4 = vadd.f32 %v18183_v14, %v15336_v6  ;;  %v5689_v7 = vadd.f32 %v15352_v61, %v5650_v24  ;;  %v5653_v3 = vadd.f32 %v10476_v36, %v5394_v30  ;;  %10573 = vmatmul.mubr.msk.f32.gmra.mxu0 %vm6003_vm5, %v15423_v17  ;;  %v5928_v13 = vrot.slane %v15411_v2, 1 }
 0x5c8   : > { %v5784_v10 = vrot.slane %v5719_v39, 7  ;;  %v15438_v58 = vsel %vm762_vm1, %v5785_v29, 0.0  ;;  %v5722_v35 = vmax.f32 %v5690_v49, 0.0  ;;  %v5517_v32 = vpop.f32.mrf.mxu0  ;;  %v5926_v27 = vrot.slane %v15423_v17, 1  ;;  %v5328_v39 = vpop.f32.mrf.mxu1 }
 0x5c9   : > { %v5721_v6 = vmax.f32 %v5689_v7, 0.0  ;;  %v5692_v33 = vadd.f32 %v15352_v61, %v5653_v3  ;;  %v5652_v21 = vadd.f32 %v5517_v32, %v5393_v43  ;;  %v5933_v24 = vrot.slane %v15438_v58, 1 }
 0x5ca   : > { %v15443_v30 = vsel %vm762_vm1, 0.0, %v5784_v10  ;;  %v5788_v40 = vrot.slane %v5722_v35, 7  ;;  %v15446_v46 = vsel %vm1274_vm3, %v5925_v41, %v5926_v27  ;;  %v10479_v53 = vpop.f32.mrf.mxu0  ;;  %v15449_v42 = vsel %vm1274_vm3, %v5926_v27, %v5928_v13 }
 0x5cb   : > { %18184 = vst [vmem:[#allocation94_spill] sm:$0xff] %v15449_v42  ;;  %10575 = vmatprep.mubr.msk.f32.mxu0 %vm6003_vm5, %v15443_v30  ;;  %v15454_v25 = vsel %vm762_vm1, %v5784_v10, %v5785_v29  ;;  %v5787_v0 = vrot.slane %v5721_v6, 7  ;;  %v5724_v60 = vmax.f32 %v5692_v33, 0.0  ;;  %v5691_v43 = vadd.f32 %v15352_v61, %v5652_v21  ;;  %10520 = vmatprep.mubr.msk.f32.mxu1 %vm6003_vm5, %v15446_v46  ;;  %v18185_v10 = vld [vmem:[#allocation110_spill] sm:$0xff]  ;;  %v10450_v33 = vpop.f32.mrf.mxu1 }
 0x5cc   : > { %v5655_v47 = vadd.f32 %v10479_v53, %v15377_v50  ;;  %10576 = vmatmul.mubr.msk.f32.gmra.mxu0 %vm6003_vm5, %v15454_v25  ;;  %10521 = vmatmul.mubr.msk.f32.gmra.mxu1 %vm6003_vm5, %v15449_v42  ;;  %v5527_v29 = vpop.f32.mrf.mxu0  ;;  %v5930_v49 = vrot.slane %v15443_v30, 1  ;;  %v5931_v36 = vrot.slane %v15454_v25, 1  ;;  %v15467_v41 = vadd.f32 %v5318_v15, %v5146_v9 }
 0x5cd   : > { %v15470_v52 = vsel %vm762_vm1, %v5788_v40, 0.0  ;;  %v5791_v50 = vrot.slane %v5724_v60, 7  ;;  %v5723_v14 = vmax.f32 %v5691_v43, 0.0  ;;  %v15473_v7 = vadd.f32 %v10447_v63, %v18185_v10 }
 0x5ce   : > { %v5694_v3 = vadd.f32 %v15352_v61, %v5655_v47  ;;  %v5654_v13 = vadd.f32 %v5527_v29, %v15381_v55  ;;  %v15478_v35 = vsel %vm1274_vm3, %v5930_v49, %v5931_v36  ;;  %v10482_v32 = vpop.f32.mrf.mxu0  ;;  %v15481_v27 = vsel %vm1274_vm3, %v5931_v36, %v5933_v24 }
 0x5cf   : > { %18186 = vst [vmem:[#allocation20_spill] sm:$0xff] %v15478_v35  ;;  %18187 = vst [vmem:[#allocation40_spill] sm:$0xff] %v15481_v27  ;;  %v5790_v15 = vrot.slane %v5723_v14, 7  ;;  %10523 = vmatprep.mubr.msk.f32.mxu1 %vm6003_vm5, %v15478_v35  ;;  %v5657_v9 = vadd.f32 %v10482_v32, %v15385_v51  ;;  %v15487_v63 = vsel %vm762_vm1, 0.0, %v5787_v0  ;;  %v15489_v6 = vadd.f32 %v5328_v39, %v5148_v4 }
 0x5d0   : > { %v5938_v55 = vrot.slane %v15470_v52, 1  ;;  %v15493_v21 = vsel %vm762_vm1, %v5791_v50, 0.0  ;;  %v5726_v53 = vmax.f32 %v5694_v3, 0.0  ;;  %v5693_v60 = vadd.f32 %v15352_v61, %v5654_v13  ;;  %10524 = vmatmul.mubr.msk.f32.gmra.mxu1 %vm6003_vm5, %v15481_v27  ;;  %10578 = vmatprep.mubr.msk.f32.mxu0 %vm6003_vm5, %v15487_v63  ;;  %v5537_v51 = vpop.f32.mrf.mxu0 }
 0x5d1   : > { %v5696_v43 = vadd.f32 %v15352_v61, %v5657_v9  ;;  %v15502_v4 = vsel %vm762_vm1, %v5787_v0, %v5788_v40  ;;  %v5656_v47 = vadd.f32 %v5537_v51, %v15388_v19  ;;  %v5935_v39 = vrot.slane %v15487_v63, 1  ;;  %v5338_v0 = vpop.f32.mrf.mxu1 }
 0x5d2   : > { %v5794_v24 = vrot.slane %v5726_v53, 7  ;;  %v5725_v29 = vmax.f32 %v5693_v60, 0.0  ;;  %10579 = vmatmul.mubr.msk.f32.gmra.mxu0 %vm6003_vm5, %v15502_v4  ;;  %v5936_v49 = vrot.slane %v15502_v4, 1  ;;  %v10485_v36 = vpop.f32.mrf.mxu0  ;;  %v15510_v14 = vsel %vm762_vm1, 0.0, %v5790_v15 }
 0x5d3   : > { %v5728_v10 = vmax.f32 %v5696_v43, 0.0  ;;  %v5695_v3 = vadd.f32 %v15352_v61, %v5656_v47  ;;  %v5659_v40 = vadd.f32 %v10485_v36, %v15393_v5  ;;  %10581 = vmatprep.mubr.msk.f32.mxu0 %vm6003_vm5, %v15510_v14  ;;  %v15517_v19 = vsel %vm762_vm1, %v5790_v15, %v5791_v50 }
 0x5d4   : > { %v5150_v13 = vadd.f32 %v15240_v37, %v15341_v22  ;;  %v5793_v32 = vrot.slane %v5725_v29, 7  ;;  %v15522_v9 = vsel %vm1274_vm3, %v5935_v39, %v5936_v49  ;;  %v15525_v53 = vsel %vm1274_vm3, %v5936_v49, %v5938_v55  ;;  %v5547_v60 = vpop.f32.mrf.mxu0  ;;  %v10453_v49 = vpop.f32.mrf.mxu1 }
 0x5d5   : > { %18188 = vst [vmem:[#allocation49_spill] sm:$0xff] %v15522_v9  ;;  %18189 = vst [vmem:[#allocation93_spill] sm:$0xff] %v15525_v53  ;;  %v5943_v5 = vrot.slane %v15493_v21, 1  ;;  %v15529_v51 = vsel %vm762_vm1, %v5794_v24, 0.0  ;;  %v5727_v43 = vmax.f32 %v5695_v3, 0.0  ;;  %10526 = vmatprep.mubr.msk.f32.mxu1 %vm6003_vm5, %v15522_v9  ;;  %v15534_v50 = vadd.f32 %v10450_v33, %v15230_v57 }
 0x5d6   : > { %v5698_v37 = vadd.f32 %v15352_v61, %v5659_v40  ;;  %10527 = vmatmul.mubr.msk.f32.gmra.mxu1 %vm6003_vm5, %v15525_v53  ;;  %10582 = vmatmul.mubr.msk.f32.gmra.mxu0 %vm6003_vm5, %v15517_v19  ;;  %v5658_v22 = vadd.f32 %v5547_v60, %v15396_v56  ;;  %v5940_v15 = vrot.slane %v15510_v14, 1  ;;  %v5941_v55 = vrot.slane %v15517_v19, 1  ;;  %v10488_v47 = vpop.f32.mrf.mxu0 }
 0x5d7   : > { %v5797_v39 = vrot.slane %v5728_v10, 7  ;;  %v5796_v29 = vrot.slane %v5727_v43, 7  ;;  %v5661_v57 = vadd.f32 %v10488_v47, %v15400_v34  ;;  %v15546_v33 = vsel %vm762_vm1, 0.0, %v5793_v32 }
 0x5d8   : > { %v5152_v36 = vadd.f32 %v15265_v62, %v15344_v11  ;;  %v5730_v3 = vmax.f32 %v5698_v37, 0.0  ;;  %v5697_v40 = vadd.f32 %v15352_v61, %v5658_v22  ;;  %10584 = vmatprep.mubr.msk.f32.mxu0 %vm6003_vm5, %v15546_v33  ;;  %v5557_v56 = vpop.f32.mrf.mxu0  ;;  %v15553_v60 = vadd.f32 %v5338_v0, %v5150_v13 }
 0x5d9   : > { %v15556_v10 = vsel %vm1274_vm3, %v5940_v15, %v5941_v55  ;;  %v5700_v34 = vadd.f32 %v15352_v61, %v5661_v57  ;;  %v15560_v43 = vsel %vm1274_vm3, %v5941_v55, %v5943_v5  ;;  %v15563_v47 = vsel %vm762_vm1, %v5793_v32, %v5794_v24  ;;  %v5348_v15 = vpop.f32.mrf.mxu1 }
 0x5da   : > { %18190 = vst [vmem:[#allocation32_spill] sm:$0xff] %v15556_v10  ;;  %18191 = vst [vmem:[#allocation42_spill] sm:$0xff] %v15560_v43  ;;  %v5948_v62 = vrot.slane %v15529_v51, 1  ;;  %v5729_v11 = vmax.f32 %v5697_v40, 0.0  ;;  %10529 = vmatprep.mubr.msk.f32.mxu1 %vm6003_vm5, %v15556_v10  ;;  %10585 = vmatmul.mubr.msk.f32.gmra.mxu0 %vm6003_vm5, %v15563_v47  ;;  %v5660_v0 = vadd.f32 %v5557_v56, %v15403_v59  ;;  %v5945_v13 = vrot.slane %v15546_v33, 1  ;;  %v10491_v37 = vpop.f32.mrf.mxu0 }
 0x5db   : > { %18192 = vst [vmem:[#allocation38_spill] sm:$0xff] %v15563_v47  ;;  %v15573_v5 = vsel %vm762_vm1, %v5797_v39, 0.0  ;;  %10530 = vmatmul.mubr.msk.f32.gmra.mxu1 %vm6003_vm5, %v15560_v43  ;;  %v5946_v24 = vrot.slane %v15563_v47, 1  ;;  %v5663_v32 = vadd.f32 %v10491_v37, %v15407_v28  ;;  %v15580_v22 = vsel %vm762_vm1, 0.0, %v5796_v29 }
 0x5dc   : > { %v5800_v55 = vrot.slane %v5730_v3, 7  ;;  %v5732_v57 = vmax.f32 %v5700_v34, 0.0  ;;  %v5699_v59 = vadd.f32 %v15352_v61, %v5660_v0  ;;  %10587 = vmatprep.mubr.msk.f32.mxu0 %vm6003_vm5, %v15580_v22  ;;  %v15586_v40 = vsel %vm762_vm1, %v5796_v29, %v5797_v39  ;;  %v5567_v56 = vpop.f32.mrf.mxu0 }
 0x5dd   : > { %18193 = vst [vmem:[#allocation43_spill] sm:$0xff] %v15586_v40  ;;  %v5799_v43 = vrot.slane %v5729_v11, 7  ;;  %v15589_v10 = vsel %vm1274_vm3, %v5945_v13, %v5946_v24  ;;  %v15592_v28 = vadd.f32 %v10453_v49, %v15257_v8  ;;  %v15594_v37 = vadd.f32 %v5348_v15, %v5152_v36 }
 0x5de   : > { %18194 = vst [vmem:[#allocation104_spill] sm:$0xff] %v15589_v10  ;;  %v5731_v3 = vmax.f32 %v5699_v59, 0.0  ;;  %10532 = vmatprep.mubr.msk.f32.mxu1 %vm6003_vm5, %v15589_v10  ;;  %v5702_v34 = vadd.f32 %v15352_v61, %v5663_v32  ;;  %v15600_v0 = vsel %vm1274_vm3, %v5946_v24, %v5948_v62  ;;  %10588 = vmatmul.mubr.msk.f32.gmra.mxu0 %vm6003_vm5, %v15586_v40  ;;  %v10494_v29 = vpop.f32.mrf.mxu0  ;;  %v5953_v8 = vrot.slane %v15573_v5, 1 }
 0x5df   : > { %18195 = vst [vmem:[#allocation76_spill] sm:$0xff] %v15600_v0  ;;  %v5662_v39 = vadd.f32 %v5567_v56, %v15413_v12  ;;  %10533 = vmatmul.mubr.msk.f32.gmra.mxu1 %vm6003_vm5, %v15600_v0  ;;  %v5950_v49 = vrot.slane %v15580_v22, 1  ;;  %v5951_v36 = vrot.slane %v15586_v40, 1  ;;  %v5665_v11 = vadd.f32 %v10494_v29, %v15426_v48 }
 0x5e0   : > { %v15612_v62 = vsel %vm762_vm1, %v5800_v55, 0.0  ;;  %v5803_v13 = vrot.slane %v5732_v57, 7  ;;  %v5802_v24 = vrot.slane %v5731_v3, 7  ;;  %v5734_v32 = vmax.f32 %v5702_v34, 0.0  ;;  %v5577_v15 = vpop.f32.mrf.mxu0 }
 0x5e1   : > { %v5701_v12 = vadd.f32 %v15352_v61, %v5662_v39  ;;  %v15616_v59 = vsel %vm1274_vm3, %v5950_v49, %v5951_v36  ;;  %v5704_v56 = vadd.f32 %v15352_v61, %v5665_v11  ;;  %v15620_v0 = vsel %vm1274_vm3, %v5951_v36, %v5953_v8 }
 0x5e2   : > { %18196 = vst [vmem:[#allocation52_spill] sm:$0xff] %v15616_v59  ;;  %18197 = vst [vmem:[#allocation106_spill] sm:$0xff] %v15620_v0  ;;  %v5806_v10 = vrot.slane %v5734_v32, 7  ;;  %10535 = vmatprep.mubr.msk.f32.mxu1 %vm6003_vm5, %v15616_v59  ;;  %v15625_v48 = vsel %vm762_vm1, 0.0, %v5799_v43  ;;  %v15628_v57 = vsel %vm762_vm1, %v5799_v43, %v5800_v55  ;;  %v5664_v3 = vadd.f32 %v5577_v15, %v15467_v41  ;;  %v10497_v34 = vpop.f32.mrf.mxu0 }
 0x5e3   : > { %18198 = vst [vmem:[#allocation35_spill] sm:$0xff] %v15628_v57  ;;  %v5958_v39 = vrot.slane %v15612_v62, 1  ;;  %v5733_v29 = vmax.f32 %v5701_v12, 0.0  ;;  %10536 = vmatmul.mubr.msk.f32.gmra.mxu1 %vm6003_vm5, %v15620_v0  ;;  %10590 = vmatprep.mubr.msk.f32.mxu0 %vm6003_vm5, %v15625_v48  ;;  %v5955_v8 = vrot.slane %v15625_v48, 1  ;;  %v5956_v49 = vrot.slane %v15628_v57, 1 }
 0x5e4   : > { %v5736_v36 = vmax.f32 %v5704_v56, 0.0  ;;  %10591 = vmatmul.mubr.msk.f32.gmra.mxu0 %vm6003_vm5, %v15628_v57  ;;  %v5703_v41 = vadd.f32 %v15352_v61, %v5664_v3  ;;  %v5667_v43 = vadd.f32 %v10497_v34, %v15473_v7  ;;  %v15643_v55 = vsel %vm762_vm1, 0.0, %v5802_v24  ;;  %v5587_v11 = vpop.f32.mrf.mxu0  ;;  %v10456_v3 = vpop.f32.mrf.mxu1 }
 0x5e5   : > { %v5154_v32 = vadd.f32 %v15287_v54, %v15347_v18  ;;  %v15648_v15 = vsel %vm762_vm1, %v5803_v13, 0.0  ;;  %v15651_v12 = vsel %vm762_vm1, %v5806_v10, 0.0  ;;  %v5805_v56 = vrot.slane %v5733_v29, 7  ;;  %10593 = vmatprep.mubr.msk.f32.mxu0 %vm6003_vm5, %v15643_v55 }
 0x5e6   : > { %v5735_v0 = vmax.f32 %v5703_v41, 0.0  ;;  %v15656_v7 = vsel %vm1274_vm3, %v5955_v8, %v5956_v49  ;;  %v5706_v34 = vadd.f32 %v15352_v61, %v5667_v43  ;;  %v15660_v59 = vsel %vm1274_vm3, %v5956_v49, %v5958_v39  ;;  %v10500_v54 = vpop.f32.mrf.mxu0 }
 0x5e7   : > { %18199 = vst [vmem:[#allocation101_spill] sm:$0xff] %v15656_v7  ;;  %18200 = vst [vmem:[#allocation39_spill] sm:$0xff] %v15660_v59  ;;  %10538 = vmatprep.mubr.msk.f32.mxu1 %vm6003_vm5, %v15656_v7  ;;  %v15665_v18 = vsel %vm762_vm1, %v5802_v24, %v5803_v13  ;;  %v5666_v29 = vadd.f32 %v5587_v11, %v15489_v6  ;;  %v5960_v53 = vrot.slane %v15643_v55, 1  ;;  %v5963_v8 = vrot.slane %v15648_v15, 1 }
 0x5e8   : > { %18201 = vst [vmem:[#allocation19_spill] sm:$0xff] %v15665_v18  ;;  %v5414_v41 = vadd.f32 %v10456_v3, %v15279_v23  ;;  %v5968_v43 = vrot.slane %v15651_v12, 1  ;;  %v5809_v9 = vrot.slane %v5736_v36, 7  ;;  %v5738_v39 = vmax.f32 %v5706_v34, 0.0  ;;  %10539 = vmatmul.mubr.msk.f32.gmra.mxu1 %vm6003_vm5, %v15660_v59  ;;  %10594 = vmatmul.mubr.msk.f32.gmra.mxu0 %vm6003_vm5, %v15665_v18  ;;  %v5597_v13 = vpop.f32.mrf.mxu0 }
 0x5e9   : > { %v5705_v24 = vadd.f32 %v15352_v61, %v5666_v29  ;;  %v5961_v6 = vrot.slane %v15665_v18, 1  ;;  %v5669_v49 = vadd.f32 %v10500_v54, %v15534_v50  ;;  %v15680_v23 = vsel %vm762_vm1, 0.0, %v5805_v56 }
 0x5ea   : > { %v5808_v11 = vrot.slane %v5735_v0, 7  ;;  %10596 = vmatprep.mubr.msk.f32.mxu0 %vm6003_vm5, %v15680_v23  ;;  %v15685_v36 = vsel %vm762_vm1, %v5805_v56, %v5806_v10  ;;  %v5668_v3 = vadd.f32 %v5597_v13, %v15553_v60  ;;  %v5965_v34 = vrot.slane %v15680_v23, 1  ;;  %v10503_v59 = vpop.f32.mrf.mxu0  ;;  %v5358_v0 = vpop.f32.mrf.mxu1 }
 0x5eb   : > { %18202 = vst [vmem:[#allocation56_spill] sm:$0xff] %v15685_v36  ;;  %v5737_v29 = vmax.f32 %v5705_v24, 0.0  ;;  %v15690_v7 = vsel %vm1274_vm3, %v5960_v53, %v5961_v6  ;;  %v5708_v50 = vadd.f32 %v15352_v61, %v5669_v49  ;;  %v15694_v54 = vsel %vm1274_vm3, %v5961_v6, %v5963_v8 }
 0x5ec   : > { %18203 = vst [vmem:[#allocation54_spill] sm:$0xff] %v15690_v7  ;;  %18204 = vst [vmem:[#allocation23_spill] sm:$0xff] %v15694_v54  ;;  %v5812_v27 = vrot.slane %v5738_v39, 7  ;;  %10541 = vmatprep.mubr.msk.f32.mxu1 %vm6003_vm5, %v15690_v7  ;;  %10597 = vmatmul.mubr.msk.f32.gmra.mxu0 %vm6003_vm5, %v15685_v36  ;;  %v5707_v60 = vadd.f32 %v15352_v61, %v5668_v3  ;;  %v5966_v10 = vrot.slane %v15685_v36, 1  ;;  %v5607_v56 = vpop.f32.mrf.mxu0  ;;  %v15704_v13 = vsel %vm762_vm1, %v5809_v9, 0.0 }
 0x5ed   : > { %v5671_v53 = vadd.f32 %v10503_v59, %v15592_v28  ;;  %v5811_v8 = vrot.slane %v5737_v29, 7  ;;  %v5740_v24 = vmax.f32 %v5708_v50, 0.0  ;;  %10542 = vmatmul.mubr.msk.f32.gmra.mxu1 %vm6003_vm5, %v15694_v54  ;;  %v5413_v39 = vadd.f32 %v5358_v0, %v5154_v32  ;;  %v10459_v50 = vpop.f32.mrf.mxu1 }
 0x5ee   : > { %v5739_v6 = vmax.f32 %v5707_v60, 0.0  ;;  %v15709_v49 = vsel %vm1274_vm3, %v5965_v34, %v5966_v10  ;;  %v15713_v7 = vsel %vm1274_vm3, %v5966_v10, %v5968_v43  ;;  %v10506_v28 = vpop.f32.mrf.mxu0  ;;  %v5156_v59 = vadd.f32 %v15311_v44, %v15358_v16 }
 0x5ef   : > { %18205 = vst [vmem:[#allocation16_spill] sm:$0xff] %v15709_v49  ;;  %v5710_v3 = vadd.f32 %v15352_v61, %v5671_v53  ;;  %18206 = vst [vmem:[#allocation71_spill] sm:$0xff] %v15713_v7  ;;  %10544 = vmatprep.mubr.msk.f32.mxu1 %vm6003_vm5, %v15709_v49  ;;  %v15720_v29 = vsel %vm762_vm1, 0.0, %v5808_v11  ;;  %v15723_v32 = vsel %vm762_vm1, %v5808_v11, %v5809_v9  ;;  %v5973_v0 = vrot.slane %v15704_v13, 1 }
 0x5f0   : > { %18207 = vst [vmem:[#allocation81_spill] sm:$0xff] %v15723_v32  ;;  %v5670_v34 = vadd.f32 %v5607_v56, %v15594_v37  ;;  %v15728_v43 = vsel %vm762_vm1, %v5812_v27, 0.0  ;;  %10599 = vmatprep.mubr.msk.f32.mxu0 %vm6003_vm5, %v15720_v29  ;;  %v5970_v44 = vrot.slane %v15720_v29, 1  ;;  %v5971_v16 = vrot.slane %v15723_v32, 1  ;;  %v5617_v60 = vpop.f32.mrf.mxu0 }
 0x5f1   : > { %v5815_v10 = vrot.slane %v5740_v24, 7  ;;  %10545 = vmatmul.mubr.msk.f32.gmra.mxu1 %vm6003_vm5, %v15713_v7  ;;  %10600 = vmatmul.mubr.msk.f32.gmra.mxu0 %vm6003_vm5, %v15723_v32  ;;  %v5673_v37 = vadd.f32 %v10506_v28, %v5414_v41  ;;  %v15740_v11 = vsel %vm762_vm1, 0.0, %v5811_v8  ;;  %v5814_v53 = vrot.slane %v5739_v6, 7 }
 0x5f2   : > { %v5709_v9 = vadd.f32 %v15352_v61, %v5670_v34  ;;  %v5742_v56 = vmax.f32 %v5710_v3, 0.0  ;;  %v15743_v49 = vsel %vm1274_vm3, %v5970_v44, %v5971_v16  ;;  %10602 = vmatprep.mubr.msk.f32.mxu0 %vm6003_vm5, %v15740_v11  ;;  %v5416_v24 = vadd.f32 %v10459_v50, %v15303_v1  ;;  %v10509_v7 = vpop.f32.mrf.mxu0  ;;  %v5368_v3 = vpop.f32.mrf.mxu1 }
 0x5f3   : > { %18208 = vst [vmem:[#allocation113_spill] sm:$0xff] %v15743_v49  ;;  %10547 = vmatprep.mubr.msk.f32.mxu1 %vm6003_vm5, %v15743_v49  ;;  %v5712_v41 = vadd.f32 %v15352_v61, %v5673_v37  ;;  %v15752_v28 = vsel %vm1274_vm3, %v5971_v16, %v5973_v0  ;;  %v15755_v6 = vsel %vm762_vm1, %v5811_v8, %v5812_v27  ;;  %v5978_v34 = vrot.slane %v15728_v43, 1 }
 0x5f4   : > { %v5741_v54 = vmax.f32 %v5709_v9, 0.0  ;;  %18209 = vst [vmem:[#allocation24_spill] sm:$0xff] %v15752_v28  ;;  %18210 = vst [vmem:[#allocation97_spill] sm:$0xff] %v15755_v6  ;;  %v5672_v44 = vadd.f32 %v5617_v60, %v5413_v39  ;;  %v5975_v35 = vrot.slane %v15740_v11, 1  ;;  %v5976_v1 = vrot.slane %v15755_v6, 1  ;;  %v5627_v50 = vpop.f32.mrf.mxu0 }
 0x5f5   : > { %v15761_v9 = vsel %vm762_vm1, %v5815_v10, 0.0  ;;  %v5744_v37 = vmax.f32 %v5712_v41, 0.0  ;;  %10548 = vmatmul.mubr.msk.f32.gmra.mxu1 %vm6003_vm5, %v15752_v28  ;;  %10603 = vmatmul.mubr.msk.f32.gmra.mxu0 %vm6003_vm5, %v15755_v6  ;;  %v5415_v27 = vadd.f32 %v5368_v3, %v5156_v59  ;;  %v5675_v0 = vadd.f32 %v10509_v7, %v5416_v24 }
 0x5f6   : > { %v5817_v49 = vrot.slane %v5741_v54, 7  ;;  %v5711_v8 = vadd.f32 %v15352_v61, %v5672_v44  ;;  %v15769_v39 = vsel %vm1274_vm3, %v5975_v35, %v5976_v1  ;;  %v15772_v16 = vsel %vm1274_vm3, %v5976_v1, %v5978_v34  ;;  %v18214_v34 = vld [vmem:[#allocation108_spill] sm:$0xff] }
 0x5f7   : > { %18211 = vst [vmem:[#allocation90_spill] sm:$0xff] %v15769_v39  ;;  %18212 = vst [vmem:[#allocation72_spill] sm:$0xff] %v15772_v16  ;;  %v5818_v60 = vrot.slane %v5742_v56, 7  ;;  %10550 = vmatprep.mubr.msk.f32.mxu1 %vm6003_vm5, %v15769_v39  ;;  %v15777_v54 = vsel %vm762_vm1, 0.0, %v5814_v53  ;;  %v15780_v41 = vsel %vm762_vm1, %v5814_v53, %v5815_v10  ;;  %v5674_v59 = vadd.f32 %v5627_v50, %v5415_v27  ;;  %v10462_v56 = vpop.f32.mrf.mxu1 }
 0x5f8   : > { %18213 = vst [vmem:[#allocation89_spill] sm:$0xff] %v15780_v41  ;;  %v5743_v3 = vmax.f32 %v5711_v8, 0.0  ;;  %v5714_v44 = vadd.f32 %v15352_v61, %v5675_v0  ;;  %10605 = vmatprep.mubr.msk.f32.mxu0 %vm6003_vm5, %v15777_v54  ;;  %v5980_v35 = vrot.slane %v15777_v54, 1  ;;  %v5981_v7 = vrot.slane %v15780_v41, 1 }
 0x5f9   : > { %v5983_v24 = vrot.slane %v15761_v9, 1  ;;  %10551 = vmatmul.mubr.msk.f32.gmra.mxu1 %vm6003_vm5, %v15772_v16  ;;  %10606 = vmatmul.mubr.msk.f32.gmra.mxu0 %vm6003_vm5, %v15780_v41  ;;  %v5713_v10 = vadd.f32 %v15352_v61, %v5674_v59  ;;  %v15794_v53 = vsel %vm762_vm1, 0.0, %v5817_v49  ;;  %v4899_v1 = vadd.f32 %v18214_v34, %v15355_v38  ;;  %v10512_v59 = vpop.f32.mrf.mxu0 }
 0x5fa   : > { %v5821_v50 = vrot.slane %v5744_v37, 7  ;;  %v5820_v27 = vrot.slane %v5743_v3, 7  ;;  %v5746_v8 = vmax.f32 %v5714_v44, 0.0  ;;  %10608 = vmatprep.mubr.msk.f32.mxu0 %vm6003_vm5, %v15794_v53  ;;  %v15801_v0 = vsel %vm762_vm1, %v5818_v60, 0.0  ;;  %v5378_v3 = vpop.f32.mrf.mxu1 }
 0x5fb   : > { %v5745_v16 = vmax.f32 %v5713_v10, 0.0  ;;  %v15804_v39 = vsel %vm1274_vm3, %v5980_v35, %v5981_v7  ;;  %v15807_v28 = vsel %vm1274_vm3, %v5981_v7, %v5983_v24  ;;  %v5158_v42 = vadd.f32 %v15331_v20, %v4899_v1  ;;  %v5637_v24 = vpop.f32.mrf.mxu0 }
 0x5fc   : > { %18215 = vst [vmem:[#allocation65_spill] sm:$0xff] %v15804_v39  ;;  %18216 = vst [vmem:[#allocation98_spill] sm:$0xff] %v15807_v28  ;;  %10553 = vmatprep.mubr.msk.f32.mxu1 %vm6003_vm5, %v15804_v39  ;;  %v15813_v38 = vsel %vm762_vm1, %v5817_v49, %v5818_v60  ;;  %v5985_v37 = vrot.slane %v15794_v53, 1  ;;  %v5824_v44 = vrot.slane %v5746_v8, 7  ;;  %v15822_v20 = vsel %vm762_vm1, 0.0, %v5820_v27 }
 0x5fd   : > { %18217 = vst [vmem:[#allocation60_spill] sm:$0xff] %v15813_v38  ;;  %v5823_v10 = vrot.slane %v5745_v16, 7  ;;  %10554 = vmatmul.mubr.msk.f32.gmra.mxu1 %vm6003_vm5, %v15807_v28  ;;  %10609 = vmatmul.mubr.msk.f32.gmra.mxu0 %vm6003_vm5, %v15813_v38  ;;  %v5986_v35 = vrot.slane %v15813_v38, 1  ;;  %v5988_v7 = vrot.slane %v15801_v0, 1  ;;  %v15826_v49 = vsel %vm762_vm1, %v5821_v50, 0.0 }
 0x5fe   : > { %10611 = vmatprep.mubr.msk.f32.mxu0 %vm6003_vm5, %v15822_v20  ;;  %v15831_v16 = vsel %vm762_vm1, %v5820_v27, %v5821_v50  ;;  %v5990_v60 = vrot.slane %v15822_v20, 1  ;;  %v5417_v1 = vadd.f32 %v5378_v3, %v5158_v42  ;;  %v5993_v50 = vrot.slane %v15826_v49, 1 }
 0x5ff   : > { %18218 = vst [vmem:[#allocation67_spill] sm:$0xff] %v15831_v16  ;;  %v15835_v34 = vsel %vm1274_vm3, %v5985_v37, %v5986_v35  ;;  %v15840_v8 = vsel %vm1274_vm3, %v5986_v35, %v5988_v7  ;;  %v5991_v28 = vrot.slane %v15831_v16, 1  ;;  %v15844_v39 = vsel %vm762_vm1, 0.0, %v5823_v10 }
 0x600   : > { %18219 = vst [vmem:[#allocation99_spill] sm:$0xff] %v15835_v34  ;;  %10556 = vmatprep.mubr.msk.f32.mxu1 %vm6003_vm5, %v15835_v34  ;;  %18220 = vst [vmem:[#allocation63_spill] sm:$0xff] %v15840_v8  ;;  %v15848_v27 = vsel %vm762_vm1, %v5824_v44, 0.0  ;;  %v15855_v42 = vsel %vm762_vm1, %v5823_v10, %v5824_v44  ;;  %v5995_v37 = vrot.slane %v15844_v39, 1  ;;  %v5418_v3 = vadd.f32 %v10462_v56, %v15325_v26 }
 0x601   : > { %10557 = vmatmul.mubr.msk.f32.gmra.mxu1 %vm6003_vm5, %v15840_v8  ;;  %10612 = vmatmul.mubr.msk.f32.gmra.mxu0 %vm6003_vm5, %v15831_v16  ;;  %v5676_v35 = vadd.f32 %v5637_v24, %v5417_v1  ;;  %v15860_v7 = vsel %vm1274_vm3, %v5990_v60, %v5991_v28  ;;  %v15867_v8 = vsel %vm1274_vm3, %v5991_v28, %v5993_v50  ;;  %v5996_v44 = vrot.slane %v15855_v42, 1  ;;  %v7522_v1 = vld [vmem:[#allocation7 + $0x50] sm:$0xff] }
 0x602   : > { %10614 = vmatprep.mubr.msk.f32.mxu0 %vm6003_vm5, %v15844_v39  ;;  %10559 = vmatprep.mubr.msk.f32.mxu1 %vm6003_vm5, %v15860_v7  ;;  %v5998_v10 = vrot.slane %v15848_v27, 1  ;;  %v5677_v34 = vadd.f32 %v10512_v59, %v5418_v3  ;;  %v6582_v60 = vrot.slane %v15416_v45, 2  ;;  %v6583_v24 = vrot.slane %v15423_v17, 2 }
 0x603   : > { %v15876_v26 = vsel %vm1274_vm3, %v5995_v37, %v5996_v44  ;;  %v5715_v56 = vadd.f32 %v15352_v61, %v5676_v35  ;;  %v18221_v37 = vld [vmem:[#allocation31_spill] sm:$0xff]  ;;  %v6588_v35 = vrot.slane %v15454_v25, 2 }
 0x604   : > { %v15884_v28 = vsel %vm1274_vm3, %v5996_v44, %v5998_v10  ;;  %v5716_v59 = vadd.f32 %v15352_v61, %v5677_v34  ;;  %v18222_v34 = vld [vmem:[#allocation47_spill] sm:$0xff]  ;;  %v15901_v3 = vsel %vm1519_vm4, %v6582_v60, %v6583_v24  ;;  %v6585_v44 = vrot.slane %v15411_v2, 2  ;;  %v15919_v60 = vld [vmem:[#allocation7 + $0x68] sm:$0xff]  ;;  %v15921_v2 = vld [vmem:[#allocation7 + $0x78] sm:$0xff] }
 0x605   : > { %10560 = vmatmul.mubr.msk.f32.gmra.mxu1 %vm6003_vm5, %v15867_v8  ;;  %10615 = vmatmul.mubr.msk.f32.gmra.mxu0 %vm6003_vm5, %v15855_v42  ;;  %v5747_v50 = vmax.f32 %v5715_v56, 0.0 }
 0x606   : > { %10673 = vmatprep.mubr.msk.f32.mxu0 %vm6003_vm5, %v15416_v45  ;;  %10562 = vmatprep.mubr.msk.f32.mxu1 %vm6003_vm5, %v15876_v26  ;;  %v5748_v61 = vmax.f32 %v5716_v59, 0.0  ;;  %v7253_v45 = vld [vmem:[#allocation7 + $0x40] sm:$0xff]  ;;  %v15917_v59 = vsel %vm1519_vm4, %v6583_v24, %v6585_v44  ;;  %v6593_v24 = vrot.slane %v15502_v4, 2  ;;  %v10571_v44 = vpop.f32.mrf.mxu0 }
 0x607   : > { %v15908_v10 = vrot.slane %v5747_v50, 7 }
 0x608   : > { %v15914_v56 = vrot.slane %v5748_v61, 7  ;;  %v6592_v61 = vrot.slane %v15487_v63, 2 }
 0x609   : > { %10563 = vmatmul.mubr.msk.f32.gmra.mxu1 %vm6003_vm5, %v15884_v28  ;;  %10674 = vmatmul.mubr.msk.f32.vlgmr.msra.gmra.mxu0 %vm6003_vm5, %v15423_v17  ;;  %v6587_v17 = vrot.slane %v15443_v30, 2 }
 0x60a   : > { %10676 = vmatprep.mubr.msk.f32.mxu0 %vm6003_vm5, %v15443_v30  ;;  %10621 = vmatprep.mubr.msk.f32.mxu1 %vm6003_vm5, %v18221_v37  ;;  %v6597_v37 = vrot.slane %v15510_v14, 2 }
 0x60b   : > { %10774 = vmatpush3.msra.mxu0 %v15428_v31  ;;  %v11066_v31 = vld [vmem:[#allocation7 + $0x48] sm:$0xff]  ;;  %v15926_v50 = vsel %vm1519_vm4, %v6587_v17, %v6588_v35  ;;  %v15940_v17 = vsel %vm762_vm1, %v15908_v10, %v15914_v56 }
 0x60c   : > { %10775 = vmatprep.subr.mxu0 %v7522_v1 }
 0x60d   : > { %10622 = vmatmul.mubr.msk.f32.vlgmr.msra.gmra.mxu1 %vm6003_vm5, %v18222_v34  ;;  %10677 = vmatmul.mubr.msk.f32.gmra.mxu0 %vm6003_vm5, %v15454_v25 }
 0x60e   : > { %10722 = vmatpush3.msra.mxu1 %v11066_v31  ;;  %10624 = vmatprep.mubr.msk.f32.mxu1 %vm6003_vm5, %v15901_v3 }
 0x60f   : > { %10679 = vmatprep.mubr.msk.f32.mxu0 %vm6003_vm5, %v15487_v63  ;;  %10723 = vmatprep.subr.mxu1 %v7253_v45 }
 0x610   : > { %10724 = vmatpush3.msra.mxu1 %v7253_v45  ;;  %10776 = vmatpush3.msra.mxu0 %v7522_v1  ;;  %v10519_v45 = vpop.f32.mrf.mxu1  ;;  %v6590_v1 = vrot.slane %v15438_v58, 2  ;;  %v15952_v58 = vsel %vm1519_vm4, %v6592_v61, %v6593_v24 }
 0x611   : > { %10625 = vmatmul.mubr.msk.f32.gmra.mxu1 %vm6003_vm5, %v15917_v59  ;;  %10680 = vmatmul.mubr.msk.f32.gmra.mxu0 %vm6003_vm5, %v15502_v4  ;;  %v15942_v31 = vadd.f32 %v10571_v44, %v10519_v45  ;;  %v6598_v44 = vrot.slane %v15517_v19, 2  ;;  %v6595_v45 = vrot.slane %v15470_v52, 2  ;;  %v6602_v52 = vrot.slane %v15546_v33, 2 }
 0x612   : > { %10627 = vmatprep.mubr.msk.f32.mxu1 %vm6003_vm5, %v15926_v50  ;;  %10682 = vmatprep.mubr.msk.f32.mxu0 %vm6003_vm5, %v15510_v14  ;;  %v15947_v34 = vsel %vm1519_vm4, %v6588_v35, %v6590_v1  ;;  %v6603_v1 = vrot.slane %v15563_v47, 2 }
 0x613   : > { %18223 = vst [vmem:[#allocation100_spill] sm:$0xff] %v15942_v31  ;;  %10825 = vmatprep.subr.mxu1 %v15919_v60  ;;  %10877 = vmatprep.subr.mxu0 %v15921_v2  ;;  %v15964_v35 = vsel %vm1519_vm4, %v6593_v24, %v6595_v45  ;;  %v15969_v61 = vsel %vm1519_vm4, %v6597_v37, %v6598_v44  ;;  %v6600_v31 = vrot.slane %v15493_v21, 2  ;;  %v6607_v21 = vrot.slane %v15580_v22, 2 }
 0x614   : > { %v15986_v37 = vsel %vm1519_vm4, %v6602_v52, %v6603_v1  ;;  %v6608_v45 = vrot.slane %v15586_v40, 2  ;;  %v6613_v52 = vrot.slane %v15628_v57, 2 }
 0x615   : > { %10628 = vmatmul.mubr.msk.f32.gmra.mxu1 %vm6003_vm5, %v15947_v34  ;;  %10683 = vmatmul.mubr.msk.f32.gmra.mxu0 %vm6003_vm5, %v15517_v19  ;;  %v15981_v24 = vsel %vm1519_vm4, %v6598_v44, %v6600_v31  ;;  %18225 = vst [vmem:[#allocation75_spill] sm:$0xff] %v15986_v37 }
 0x616   : > { %10630 = vmatprep.mubr.msk.f32.mxu1 %vm6003_vm5, %v15952_v58  ;;  %10685 = vmatprep.mubr.msk.f32.mxu0 %vm6003_vm5, %v15546_v33  ;;  %18224 = vst [vmem:[#allocation69_spill] sm:$0xff] %v15981_v24  ;;  %v16003_v44 = vsel %vm1519_vm4, %v6607_v21, %v6608_v45  ;;  %v6618_v21 = vrot.slane %v15665_v18, 2 }
 0x617   : > { %18227 = vst [vmem:[#allocation73_spill] sm:$0xff] %v16003_v44 }
 0x619   : > { %10631 = vmatmul.mubr.msk.f32.gmra.mxu1 %vm6003_vm5, %v15964_v35  ;;  %10686 = vmatmul.mubr.msk.f32.gmra.mxu0 %vm6003_vm5, %v15563_v47  ;;  %v6605_v47 = vrot.slane %v15529_v51, 2  ;;  %v6612_v51 = vrot.slane %v15625_v48, 2 }
 0x61a   : > { %10633 = vmatprep.mubr.msk.f32.mxu1 %vm6003_vm5, %v15969_v61  ;;  %10688 = vmatprep.mubr.msk.f32.mxu0 %vm6003_vm5, %v15580_v22 }
 0x61b   : > { %v15998_v31 = vsel %vm1519_vm4, %v6603_v1, %v6605_v47  ;;  %v16020_v1 = vsel %vm1519_vm4, %v6612_v51, %v6613_v52  ;;  %v6623_v51 = vrot.slane %v15685_v36, 2 }
 0x61c   : > { %18226 = vst [vmem:[#allocation114_spill] sm:$0xff] %v15998_v31  ;;  %18229 = vst [vmem:[#allocation21_spill] sm:$0xff] %v16020_v1 }
 0x61d   : > { %10634 = vmatmul.mubr.msk.f32.gmra.mxu1 %vm6003_vm5, %v15981_v24  ;;  %10689 = vmatmul.mubr.msk.f32.gmra.mxu0 %vm6003_vm5, %v15586_v40  ;;  %v6610_v40 = vrot.slane %v15573_v5, 2  ;;  %v6617_v5 = vrot.slane %v15643_v55, 2 }
 0x61e   : > { %10636 = vmatprep.mubr.msk.f32.mxu1 %vm6003_vm5, %v15986_v37  ;;  %10691 = vmatprep.mubr.msk.f32.mxu0 %vm6003_vm5, %v15625_v48 }
 0x61f   : > { %v16015_v47 = vsel %vm1519_vm4, %v6608_v45, %v6610_v40  ;;  %v16037_v45 = vsel %vm1519_vm4, %v6617_v5, %v6618_v21  ;;  %v6628_v5 = vrot.slane %v15723_v32, 2 }
 0x620   : > { %18228 = vst [vmem:[#allocation25_spill] sm:$0xff] %v16015_v47  ;;  %18231 = vst [vmem:[#allocation74_spill] sm:$0xff] %v16037_v45 }
 0x621   : > { %10637 = vmatmul.mubr.msk.f32.gmra.mxu1 %vm6003_vm5, %v15998_v31  ;;  %10692 = vmatmul.mubr.msk.f32.gmra.mxu0 %vm6003_vm5, %v15628_v57  ;;  %v6615_v57 = vrot.slane %v15612_v62, 2  ;;  %v6622_v62 = vrot.slane %v15680_v23, 2 }
 0x622   : > { %10639 = vmatprep.mubr.msk.f32.mxu1 %vm6003_vm5, %v16003_v44  ;;  %10694 = vmatprep.mubr.msk.f32.mxu0 %vm6003_vm5, %v15643_v55 }
 0x623   : > { %v16032_v40 = vsel %vm1519_vm4, %v6613_v52, %v6615_v57  ;;  %v16054_v52 = vsel %vm1519_vm4, %v6622_v62, %v6623_v51  ;;  %v6633_v62 = vrot.slane %v15755_v6, 2 }
 0x624   : > { %18230 = vst [vmem:[#allocation58_spill] sm:$0xff] %v16032_v40  ;;  %18233 = vst [vmem:[#allocation118_spill] sm:$0xff] %v16054_v52 }
 0x625   : > { %10640 = vmatmul.mubr.msk.f32.gmra.mxu1 %vm6003_vm5, %v16015_v47  ;;  %10695 = vmatmul.mubr.msk.f32.gmra.mxu0 %vm6003_vm5, %v15665_v18  ;;  %v6620_v18 = vrot.slane %v15648_v15, 2  ;;  %v6627_v15 = vrot.slane %v15720_v29, 2 }
 0x626   : > { %10642 = vmatprep.mubr.msk.f32.mxu1 %vm6003_vm5, %v16020_v1  ;;  %10697 = vmatprep.mubr.msk.f32.mxu0 %vm6003_vm5, %v15680_v23 }
 0x627   : > { %v16049_v57 = vsel %vm1519_vm4, %v6618_v21, %v6620_v18  ;;  %v16071_v21 = vsel %vm1519_vm4, %v6627_v15, %v6628_v5  ;;  %v6638_v15 = vrot.slane %v15780_v41, 2 }
 0x628   : > { %18232 = vst [vmem:[#allocation91_spill] sm:$0xff] %v16049_v57  ;;  %18235 = vst [vmem:[#allocation62_spill] sm:$0xff] %v16071_v21 }
 0x629   : > { %10643 = vmatmul.mubr.msk.f32.gmra.mxu1 %vm6003_vm5, %v16032_v40  ;;  %10698 = vmatmul.mubr.msk.f32.gmra.mxu0 %vm6003_vm5, %v15685_v36  ;;  %v6625_v36 = vrot.slane %v15651_v12, 2  ;;  %v6632_v12 = vrot.slane %v15740_v11, 2 }
 0x62a   : > { %10645 = vmatprep.mubr.msk.f32.mxu1 %vm6003_vm5, %v16037_v45  ;;  %10700 = vmatprep.mubr.msk.f32.mxu0 %vm6003_vm5, %v15720_v29 }
 0x62b   : > { %v16066_v18 = vsel %vm1519_vm4, %v6623_v51, %v6625_v36  ;;  %v16088_v51 = vsel %vm1519_vm4, %v6632_v12, %v6633_v62  ;;  %v6643_v12 = vrot.slane %v15813_v38, 2 }
 0x62c   : > { %18234 = vst [vmem:[#allocation53_spill] sm:$0xff] %v16066_v18  ;;  %18237 = vst [vmem:[#allocation22_spill] sm:$0xff] %v16088_v51 }
 0x62d   : > { %10646 = vmatmul.mubr.msk.f32.gmra.mxu1 %vm6003_vm5, %v16049_v57  ;;  %10701 = vmatmul.mubr.msk.f32.gmra.mxu0 %vm6003_vm5, %v15723_v32  ;;  %v6630_v32 = vrot.slane %v15704_v13, 2  ;;  %v6637_v13 = vrot.slane %v15777_v54, 2 }
 0x62e   : > { %10648 = vmatprep.mubr.msk.f32.mxu1 %vm6003_vm5, %v16054_v52  ;;  %10703 = vmatprep.mubr.msk.f32.mxu0 %vm6003_vm5, %v15740_v11 }
 0x62f   : > { %v16083_v36 = vsel %vm1519_vm4, %v6628_v5, %v6630_v32  ;;  %v16105_v5 = vsel %vm1519_vm4, %v6637_v13, %v6638_v15  ;;  %v6648_v13 = vrot.slane %v15831_v16, 2 }
 0x630   : > { %18236 = vst [vmem:[#allocation64_spill] sm:$0xff] %v16083_v36  ;;  %18239 = vst [vmem:[#allocation66_spill] sm:$0xff] %v16105_v5 }
 0x631   : > { %10649 = vmatmul.mubr.msk.f32.gmra.mxu1 %vm6003_vm5, %v16066_v18  ;;  %10704 = vmatmul.mubr.msk.f32.gmra.mxu0 %vm6003_vm5, %v15755_v6  ;;  %v6635_v6 = vrot.slane %v15728_v43, 2  ;;  %v6642_v43 = vrot.slane %v15794_v53, 2 }
 0x632   : > { %10651 = vmatprep.mubr.msk.f32.mxu1 %vm6003_vm5, %v16071_v21  ;;  %10706 = vmatprep.mubr.msk.f32.mxu0 %vm6003_vm5, %v15777_v54 }
 0x633   : > { %v16100_v32 = vsel %vm1519_vm4, %v6633_v62, %v6635_v6  ;;  %v16122_v62 = vsel %vm1519_vm4, %v6642_v43, %v6643_v12  ;;  %v6652_v43 = vrot.slane %v15844_v39, 2 }
 0x634   : > { %18238 = vst [vmem:[#allocation55_spill] sm:$0xff] %v16100_v32  ;;  %18241 = vst [vmem:[#allocation82_spill] sm:$0xff] %v16122_v62 }
 0x635   : > { %10652 = vmatmul.mubr.msk.f32.gmra.mxu1 %vm6003_vm5, %v16083_v36  ;;  %10707 = vmatmul.mubr.msk.f32.gmra.mxu0 %vm6003_vm5, %v15780_v41  ;;  %v6640_v41 = vrot.slane %v15761_v9, 2  ;;  %v6647_v9 = vrot.slane %v15822_v20, 2 }
 0x636   : > { %10654 = vmatprep.mubr.msk.f32.mxu1 %vm6003_vm5, %v16088_v51  ;;  %10709 = vmatprep.mubr.msk.f32.mxu0 %vm6003_vm5, %v15794_v53 }
 0x637   : > { %v16117_v6 = vsel %vm1519_vm4, %v6638_v15, %v6640_v41  ;;  %v16139_v15 = vsel %vm1519_vm4, %v6647_v9, %v6648_v13 }
 0x638   : > { %18240 = vst [vmem:[#allocation29_spill] sm:$0xff] %v16117_v6  ;;  %18243 = vst [vmem:[#allocation107_spill] sm:$0xff] %v16139_v15 }
 0x639   : > { %10655 = vmatmul.mubr.msk.f32.gmra.mxu1 %vm6003_vm5, %v16100_v32  ;;  %10710 = vmatmul.mubr.msk.f32.gmra.mxu0 %vm6003_vm5, %v15813_v38  ;;  %v6645_v38 = vrot.slane %v15801_v0, 2  ;;  %v16145_v0 = vsel %vm762_vm1, 0.0, %v15908_v10 }
 0x63a   : > { %10657 = vmatprep.mubr.msk.f32.mxu1 %vm6003_vm5, %v16105_v5  ;;  %10712 = vmatprep.mubr.msk.f32.mxu0 %vm6003_vm5, %v15822_v20 }
 0x63b   : > { %v16134_v41 = vsel %vm1519_vm4, %v6643_v12, %v6645_v38  ;;  %v6650_v38 = vrot.slane %v15826_v49, 2  ;;  %v6655_v49 = vrot.slane %v15848_v27, 2  ;;  %v7786_v27 = vld [vmem:[#allocation7 + $0x60] sm:$0xff] }
 0x63c   : > { %18242 = vst [vmem:[#allocation78_spill] sm:$0xff] %v16134_v41 }
 0x63d   : > { %10658 = vmatmul.mubr.msk.f32.gmra.mxu1 %vm6003_vm5, %v16117_v6  ;;  %10713 = vmatmul.mubr.msk.f32.gmra.mxu0 %vm6003_vm5, %v15831_v16  ;;  %v6653_v16 = vrot.slane %v15855_v42, 2  ;;  %v16155_v12 = vsel %vm1519_vm4, %v6648_v13, %v6650_v38  ;;  %v8046_v13 = vld [vmem:[#allocation7 + $0x70] sm:$0xff]  ;;  %v18253_v38 = vld [vmem:[#allocation42_spill] sm:$0xff] }
 0x63e   : > { %10660 = vmatprep.mubr.msk.f32.mxu1 %vm6003_vm5, %v16122_v62  ;;  %10715 = vmatprep.mubr.msk.f32.mxu0 %vm6003_vm5, %v15844_v39  ;;  %18244 = vst [vmem:[#allocation37_spill] sm:$0xff] %v16155_v12 }
 0x63f   : > { %v16160_v10 = vsel %vm1519_vm4, %v6652_v43, %v6653_v16  ;;  %v16170_v9 = vsel %vm1519_vm4, %v6653_v16, %v6655_v49  ;;  %v18248_v16 = vld [vmem:[#allocation20_spill] sm:$0xff] }
 0x640   : > { %18245 = vst [vmem:[#allocation83_spill] sm:$0xff] %v16160_v10  ;;  %18246 = vst [vmem:[#allocation95_spill] sm:$0xff] %v16170_v9  ;;  %v18252_v43 = vld [vmem:[#allocation32_spill] sm:$0xff] }
 0x641   : > { %10661 = vmatmul.mubr.msk.f32.gmra.mxu1 %vm6003_vm5, %v16134_v41  ;;  %10716 = vmatmul.mubr.msk.f32.gmra.mxu0 %vm6003_vm5, %v15855_v42  ;;  %v18254_v49 = vld [vmem:[#allocation104_spill] sm:$0xff] }
 0x642   : > { %10663 = vmatprep.mubr.msk.f32.mxu1 %vm6003_vm5, %v16139_v15  ;;  %10718 = vmatprep.mubr.msk.f32.mxu0 %vm6003_vm5, %v16145_v0 }
 0x645   : > { %10664 = vmatmul.mubr.msk.f32.gmra.mxu1 %vm6003_vm5, %v16155_v12  ;;  %10719 = vmatmul.mubr.msk.f32.gmra.mxu0 %vm6003_vm5, %v15940_v17 }
 0x646   : > { %10666 = vmatprep.mubr.msk.f32.mxu1 %vm6003_vm5, %v16160_v10  ;;  %10777 = vmatprep.mubr.msk.f32.mxu0 %vm6003_vm5, %v15901_v3  ;;  %v18247_v3 = vld [vmem:[#allocation94_spill] sm:$0xff] }
 0x649   : > { %10667 = vmatmul.mubr.msk.f32.gmra.mxu1 %vm6003_vm5, %v16170_v9  ;;  %10778 = vmatmul.mubr.msk.f32.vlgmr.msra.gmra.mxu0 %vm6003_vm5, %v15917_v59  ;;  %v18249_v59 = vld [vmem:[#allocation40_spill] sm:$0xff] }
 0x64a   : > { %10725 = vmatprep.mubr.msk.f32.mxu1 %vm6003_vm5, %v15446_v46  ;;  %10780 = vmatprep.mubr.msk.f32.mxu0 %vm6003_vm5, %v15926_v50  ;;  %v16190_v46 = vld [vmem:[#allocation7 + $0x88] sm:$0xff] }
 0x64b   : > { %10878 = vmatpush3.msra.mxu0 %v15921_v2  ;;  %v18250_v2 = vld [vmem:[#allocation49_spill] sm:$0xff] }
 0x64c   : > { %10879 = vmatprep.subr.mxu0 %v8046_v13 }
 0x64d   : > { %10726 = vmatmul.mubr.msk.f32.vlgmr.msra.gmra.mxu1 %vm6003_vm5, %v18247_v3  ;;  %10781 = vmatmul.mubr.msk.f32.gmra.mxu0 %vm6003_vm5, %v15947_v34  ;;  %v18257_v3 = vld [vmem:[#allocation106_spill] sm:$0xff] }
 0x64e   : > { %10826 = vmatpush3.msra.mxu1 %v15919_v60  ;;  %10728 = vmatprep.mubr.msk.f32.mxu1 %vm6003_vm5, %v18248_v16  ;;  %v18251_v60 = vld [vmem:[#allocation93_spill] sm:$0xff] }
 0x64f   : > { %10783 = vmatprep.mubr.msk.f32.mxu0 %vm6003_vm5, %v15952_v58  ;;  %10827 = vmatprep.subr.mxu1 %v7786_v27 }
 0x650   : > { %10828 = vmatpush3.msra.mxu1 %v7786_v27  ;;  %10880 = vmatpush3.msra.mxu0 %v8046_v13  ;;  %v18255_v13 = vld [vmem:[#allocation76_spill] sm:$0xff] }
 0x651   : > { %10729 = vmatmul.mubr.msk.f32.gmra.mxu1 %vm6003_vm5, %v18249_v59  ;;  %10784 = vmatmul.mubr.msk.f32.gmra.mxu0 %vm6003_vm5, %v15964_v35  ;;  %v18256_v27 = vld [vmem:[#allocation52_spill] sm:$0xff] }
 0x652   : > { %10731 = vmatprep.mubr.msk.f32.mxu1 %vm6003_vm5, %v18250_v2  ;;  %10786 = vmatprep.mubr.msk.f32.mxu0 %vm6003_vm5, %v15969_v61 }
 0x653   : > { %10929 = vmatprep.subr.mxu1 %v16190_v46 }
 0x655   : > { %10732 = vmatmul.mubr.msk.f32.gmra.mxu1 %vm6003_vm5, %v18251_v60  ;;  %10787 = vmatmul.mubr.msk.f32.gmra.mxu0 %vm6003_vm5, %v15981_v24 }
 0x656   : > { %10734 = vmatprep.mubr.msk.f32.mxu1 %vm6003_vm5, %v18252_v43  ;;  %10789 = vmatprep.mubr.msk.f32.mxu0 %vm6003_vm5, %v15986_v37  ;;  %v7248_v37 = vrot.slane %v15940_v17, 1 }
 0x659   : > { %10735 = vmatmul.mubr.msk.f32.gmra.mxu1 %vm6003_vm5, %v18253_v38  ;;  %10790 = vmatmul.mubr.msk.f32.gmra.mxu0 %vm6003_vm5, %v15998_v31  ;;  %v18258_v31 = vld [vmem:[#allocation101_spill] sm:$0xff] }
 0x65a   : > { %10737 = vmatprep.mubr.msk.f32.mxu1 %vm6003_vm5, %v18254_v49  ;;  %10792 = vmatprep.mubr.msk.f32.mxu0 %vm6003_vm5, %v16003_v44  ;;  %v18259_v44 = vld [vmem:[#allocation39_spill] sm:$0xff] }
 0x65d   : > { %10738 = vmatmul.mubr.msk.f32.gmra.mxu1 %vm6003_vm5, %v18255_v13  ;;  %10793 = vmatmul.mubr.msk.f32.gmra.mxu0 %vm6003_vm5, %v16015_v47  ;;  %v18260_v47 = vld [vmem:[#allocation54_spill] sm:$0xff] }
 0x65e   : > { %10740 = vmatprep.mubr.msk.f32.mxu1 %vm6003_vm5, %v18256_v27  ;;  %10795 = vmatprep.mubr.msk.f32.mxu0 %vm6003_vm5, %v16020_v1  ;;  %v18261_v1 = vld [vmem:[#allocation23_spill] sm:$0xff] }
 0x661   : > { %10741 = vmatmul.mubr.msk.f32.gmra.mxu1 %vm6003_vm5, %v18257_v3  ;;  %10796 = vmatmul.mubr.msk.f32.gmra.mxu0 %vm6003_vm5, %v16032_v40  ;;  %v18262_v40 = vld [vmem:[#allocation16_spill] sm:$0xff] }
 0x662   : > { %10743 = vmatprep.mubr.msk.f32.mxu1 %vm6003_vm5, %v18258_v31  ;;  %10798 = vmatprep.mubr.msk.f32.mxu0 %vm6003_vm5, %v16037_v45  ;;  %v18263_v45 = vld [vmem:[#allocation71_spill] sm:$0xff] }
 0x665   : > { %10744 = vmatmul.mubr.msk.f32.gmra.mxu1 %vm6003_vm5, %v18259_v44  ;;  %10799 = vmatmul.mubr.msk.f32.gmra.mxu0 %vm6003_vm5, %v16049_v57  ;;  %v18264_v57 = vld [vmem:[#allocation113_spill] sm:$0xff] }
 0x666   : > { %10746 = vmatprep.mubr.msk.f32.mxu1 %vm6003_vm5, %v18260_v47  ;;  %10801 = vmatprep.mubr.msk.f32.mxu0 %vm6003_vm5, %v16054_v52  ;;  %v18265_v52 = vld [vmem:[#allocation24_spill] sm:$0xff] }
 0x669   : > { %10747 = vmatmul.mubr.msk.f32.gmra.mxu1 %vm6003_vm5, %v18261_v1  ;;  %10802 = vmatmul.mubr.msk.f32.gmra.mxu0 %vm6003_vm5, %v16066_v18  ;;  %v18266_v18 = vld [vmem:[#allocation90_spill] sm:$0xff] }
 0x66a   : > { %10749 = vmatprep.mubr.msk.f32.mxu1 %vm6003_vm5, %v18262_v40  ;;  %10804 = vmatprep.mubr.msk.f32.mxu0 %vm6003_vm5, %v16071_v21  ;;  %v18267_v21 = vld [vmem:[#allocation72_spill] sm:$0xff] }
 0x66d   : > { %10750 = vmatmul.mubr.msk.f32.gmra.mxu1 %vm6003_vm5, %v18263_v45  ;;  %10805 = vmatmul.mubr.msk.f32.gmra.mxu0 %vm6003_vm5, %v16083_v36  ;;  %v18268_v36 = vld [vmem:[#allocation65_spill] sm:$0xff] }
 0x66e   : > { %10752 = vmatprep.mubr.msk.f32.mxu1 %vm6003_vm5, %v18264_v57  ;;  %10807 = vmatprep.mubr.msk.f32.mxu0 %vm6003_vm5, %v16088_v51  ;;  %v18269_v51 = vld [vmem:[#allocation98_spill] sm:$0xff] }
 0x671   : > { %10753 = vmatmul.mubr.msk.f32.gmra.mxu1 %vm6003_vm5, %v18265_v52  ;;  %10808 = vmatmul.mubr.msk.f32.gmra.mxu0 %vm6003_vm5, %v16100_v32  ;;  %v18270_v32 = vld [vmem:[#allocation99_spill] sm:$0xff] }
 0x672   : > { %10755 = vmatprep.mubr.msk.f32.mxu1 %vm6003_vm5, %v18266_v18  ;;  %10810 = vmatprep.mubr.msk.f32.mxu0 %vm6003_vm5, %v16105_v5  ;;  %v18271_v5 = vld [vmem:[#allocation63_spill] sm:$0xff] }
 0x675   : > { %10756 = vmatmul.mubr.msk.f32.gmra.mxu1 %vm6003_vm5, %v18267_v21  ;;  %10811 = vmatmul.mubr.msk.f32.gmra.mxu0 %vm6003_vm5, %v16117_v6  ;;  %v7516_v6 = vrot.slane %v16145_v0, 2 }
 0x676   : > { %10758 = vmatprep.mubr.msk.f32.mxu1 %vm6003_vm5, %v18268_v36  ;;  %10813 = vmatprep.mubr.msk.f32.mxu0 %vm6003_vm5, %v16122_v62  ;;  %v7517_v62 = vrot.slane %v15940_v17, 2 }
 0x679   : > { %10759 = vmatmul.mubr.msk.f32.gmra.mxu1 %vm6003_vm5, %v18269_v51  ;;  %10814 = vmatmul.mubr.msk.f32.gmra.mxu0 %vm6003_vm5, %v16134_v41  ;;  %v5892_v41 = vsel %vm762_vm1, %v15914_v56, 0.0  ;;  %v16306_v56 = vpop.f32.mrf.mxu0 }
 0x67a   : > { %10761 = vmatprep.mubr.msk.f32.mxu1 %vm6003_vm5, %v18270_v32  ;;  %10816 = vmatprep.mubr.msk.f32.mxu0 %vm6003_vm5, %v16139_v15  ;;  %v7247_v15 = vrot.slane %v16145_v0, 1  ;;  %v7519_v24 = vrot.slane %v5892_v41, 2 }
 0x67d   : > { %10762 = vmatmul.mubr.msk.f32.gmra.mxu1 %vm6003_vm5, %v18271_v5  ;;  %10817 = vmatmul.mubr.msk.f32.gmra.mxu0 %vm6003_vm5, %v16155_v12  ;;  %v16299_v12 = vsel %vm1519_vm4, %v7516_v6, %v7517_v62  ;;  %v16314_v6 = vsel %vm1274_vm3, %v7247_v15, %v7248_v37 }
 0x67e   : > { %10764 = vmatprep.mubr.msk.f32.mxu1 %vm6003_vm5, %v15860_v7  ;;  %10819 = vmatprep.mubr.msk.f32.mxu0 %vm6003_vm5, %v16160_v10  ;;  %18272 = vst [vmem:[#allocation45_spill] sm:$0xff] %v16299_v12  ;;  %v16309_v10 = vsel %vm1519_vm4, %v7517_v62, %v7519_v24 }
 0x67f   : > { %18273 = vst [vmem:[#allocation51_spill] sm:$0xff] %v16309_v10 }
 0x681   : > { %10765 = vmatmul.mubr.msk.f32.gmra.mxu1 %vm6003_vm5, %v15867_v8  ;;  %10820 = vmatmul.mubr.msk.f32.gmra.mxu0 %vm6003_vm5, %v16170_v9  ;;  %v7250_v9 = vrot.slane %v5892_v41, 1  ;;  %v16333_v41 = vpop.f32.mrf.mxu1 }
 0x682   : > { %10767 = vmatprep.mubr.msk.f32.mxu1 %vm6003_vm5, %v15876_v26  ;;  %10822 = vmatprep.mubr.msk.f32.mxu0 %vm6003_vm5, %v16299_v12 }
 0x683   : > { %v16323_v24 = vsel %vm1274_vm3, %v7248_v37, %v7250_v9 }
 0x685   : > { %10768 = vmatmul.mubr.msk.f32.gmra.mxu1 %vm6003_vm5, %v15884_v28  ;;  %10823 = vmatmul.mubr.msk.f32.gmra.mxu0 %vm6003_vm5, %v16309_v10  ;;  %v8306_v10 = vld [vmem:[#allocation7 + $0x80] sm:$0xff] }
 0x686   : > { %10770 = vmatprep.mubr.msk.f32.mxu1 %vm6003_vm5, %v16314_v6  ;;  %10881 = vmatprep.mubr.msk.f32.mxu0 %vm6003_vm5, %v18248_v16 }
 0x687   : > { %v10574_v12 = vpop.f32.mrf.mxu0 }
 0x689   : > { %10771 = vmatmul.mubr.msk.f32.gmra.mxu1 %vm6003_vm5, %v16323_v24  ;;  %10882 = vmatmul.mubr.msk.f32.vlgmr.msra.gmra.mxu0 %vm6003_vm5, %v18249_v59  ;;  %v6433_v62 = vpop.f32.mrf.mxu0 }
 0x68a   : > { %10829 = vmatprep.mubr.msk.f32.mxu1 %vm6003_vm5, %v15443_v30  ;;  %10884 = vmatprep.mubr.msk.f32.mxu0 %vm6003_vm5, %v18250_v2 }
 0x68c   : > { %v10577_v15 = vpop.f32.mrf.mxu0  ;;  %v10522_v16 = vpop.f32.mrf.mxu1 }
 0x68d   : > { %10830 = vmatmul.mubr.msk.f32.vlgmr.msra.gmra.mxu1 %vm6003_vm5, %v15454_v25  ;;  %10885 = vmatmul.mubr.msk.f32.gmra.mxu0 %vm6003_vm5, %v18251_v60  ;;  %v16339_v37 = vadd.f32 %v10574_v12, %v10522_v16 }
 0x68e   : > { %10930 = vmatpush3.msra.mxu1 %v16190_v46  ;;  %10832 = vmatprep.mubr.msk.f32.mxu1 %vm6003_vm5, %v15487_v63  ;;  %v6144_v30 = vpop.f32.mrf.mxu1  ;;  %v6443_v9 = vpop.f32.mrf.mxu0 }
 0x68f   : > { %10887 = vmatprep.mubr.msk.f32.mxu0 %vm6003_vm5, %v18252_v43  ;;  %v16346_v59 = vadd.f32 %v6433_v62, %v6144_v30  ;;  %10931 = vmatprep.subr.mxu1 %v8306_v10 }
 0x690   : > { %v10525_v2 = vpop.f32.mrf.mxu1  ;;  %10932 = vmatpush3.msra.mxu1 %v8306_v10 }
 0x691   : > { %10833 = vmatmul.mubr.msk.f32.gmra.mxu1 %vm6003_vm5, %v15502_v4  ;;  %10888 = vmatmul.mubr.msk.f32.gmra.mxu0 %vm6003_vm5, %v18253_v38  ;;  %v16352_v25 = vadd.f32 %v10577_v15, %v10525_v2  ;;  %v18275_v15 = vld [vmem:[#allocation43_spill] sm:$0xff] }
 0x692   : > { %10835 = vmatprep.mubr.msk.f32.mxu1 %vm6003_vm5, %v15510_v14  ;;  %10890 = vmatprep.mubr.msk.f32.mxu0 %vm6003_vm5, %v18254_v49  ;;  %v10580_v63 = vpop.f32.mrf.mxu0  ;;  %v6154_v12 = vpop.f32.mrf.mxu1  ;;  %v18274_v49 = vld [vmem:[#allocation38_spill] sm:$0xff]  ;;  %v18276_v2 = vld [vmem:[#allocation35_spill] sm:$0xff] }
 0x693   : > { %v16358_v46 = vadd.f32 %v6443_v9, %v6154_v12 }
 0x694   : > { %v6453_v60 = vpop.f32.mrf.mxu0 }
 0x695   : > { %10836 = vmatmul.mubr.msk.f32.gmra.mxu1 %vm6003_vm5, %v15517_v19  ;;  %10891 = vmatmul.mubr.msk.f32.gmra.mxu0 %vm6003_vm5, %v18255_v13 }
 0x696   : > { %10838 = vmatprep.mubr.msk.f32.mxu1 %vm6003_vm5, %v15546_v33  ;;  %10893 = vmatprep.mubr.msk.f32.mxu0 %vm6003_vm5, %v18256_v27  ;;  %v10528_v4 = vpop.f32.mrf.mxu1  ;;  %v10583_v14 = vpop.f32.mrf.mxu0 }
 0x697   : > { %v16368_v10 = vadd.f32 %v10580_v63, %v10528_v4 }
 0x698   : > { %v6164_v43 = vpop.f32.mrf.mxu1  ;;  %v6463_v38 = vpop.f32.mrf.mxu0 }
 0x699   : > { %10839 = vmatmul.mubr.msk.f32.gmra.mxu1 %vm6003_vm5, %v18274_v49  ;;  %10894 = vmatmul.mubr.msk.f32.gmra.mxu0 %vm6003_vm5, %v18257_v3  ;;  %v16374_v19 = vadd.f32 %v6453_v60, %v6164_v43  ;;  %v18277_v60 = vld [vmem:[#allocation19_spill] sm:$0xff] }
 0x69a   : > { %10841 = vmatprep.mubr.msk.f32.mxu1 %vm6003_vm5, %v15580_v22  ;;  %10896 = vmatprep.mubr.msk.f32.mxu0 %vm6003_vm5, %v18258_v31  ;;  %v10586_v33 = vpop.f32.mrf.mxu0 }
 0x69b   : > { %v10531_v13 = vpop.f32.mrf.mxu1 }
 0x69c   : > { %v16380_v27 = vadd.f32 %v10583_v14, %v10531_v13  ;;  %v6473_v62 = vpop.f32.mrf.mxu0  ;;  %v18279_v13 = vld [vmem:[#allocation81_spill] sm:$0xff] }
 0x69d   : > { %10842 = vmatmul.mubr.msk.f32.gmra.mxu1 %vm6003_vm5, %v18275_v15  ;;  %10897 = vmatmul.mubr.msk.f32.gmra.mxu0 %vm6003_vm5, %v18259_v44  ;;  %v6174_v3 = vpop.f32.mrf.mxu1 }
 0x69e   : > { %10844 = vmatprep.mubr.msk.f32.mxu1 %vm6003_vm5, %v15625_v48  ;;  %v16388_v16 = vadd.f32 %v6463_v38, %v6174_v3  ;;  %10899 = vmatprep.mubr.msk.f32.mxu0 %vm6003_vm5, %v18260_v47  ;;  %v10589_v22 = vpop.f32.mrf.mxu0  ;;  %v18278_v38 = vld [vmem:[#allocation56_spill] sm:$0xff]  ;;  %v18280_v3 = vld [vmem:[#allocation97_spill] sm:$0xff] }
 0x69f   : > { %v10534_v31 = vpop.f32.mrf.mxu1 }
 0x6a0   : > { %v16392_v30 = vadd.f32 %v10586_v33, %v10534_v31  ;;  %v6483_v9 = vpop.f32.mrf.mxu0 }
 0x6a1   : > { %10845 = vmatmul.mubr.msk.f32.gmra.mxu1 %vm6003_vm5, %v18276_v2  ;;  %10900 = vmatmul.mubr.msk.f32.gmra.mxu0 %vm6003_vm5, %v18261_v1  ;;  %v6184_v44 = vpop.f32.mrf.mxu1  ;;  %v18281_v2 = vld [vmem:[#allocation89_spill] sm:$0xff] }
 0x6a2   : > { %10847 = vmatprep.mubr.msk.f32.mxu1 %vm6003_vm5, %v15643_v55  ;;  %v16400_v48 = vadd.f32 %v6473_v62, %v6184_v44  ;;  %10902 = vmatprep.mubr.msk.f32.mxu0 %vm6003_vm5, %v18262_v40 }
 0x6a3   : > { %v10537_v47 = vpop.f32.mrf.mxu1 }
 0x6a4   : > { %v16404_v63 = vadd.f32 %v10589_v22, %v10537_v47  ;;  %v10592_v12 = vpop.f32.mrf.mxu0 }
 0x6a5   : > { %10848 = vmatmul.mubr.msk.f32.gmra.mxu1 %vm6003_vm5, %v18277_v60  ;;  %10903 = vmatmul.mubr.msk.f32.gmra.mxu0 %vm6003_vm5, %v18263_v45  ;;  %v6194_v1 = vpop.f32.mrf.mxu1  ;;  %v18282_v60 = vld [vmem:[#allocation60_spill] sm:$0xff] }
 0x6a6   : > { %10850 = vmatprep.mubr.msk.f32.mxu1 %vm6003_vm5, %v15680_v23  ;;  %v16412_v55 = vadd.f32 %v6483_v9, %v6194_v1  ;;  %10905 = vmatprep.mubr.msk.f32.mxu0 %vm6003_vm5, %v18264_v57  ;;  %v6493_v40 = vpop.f32.mrf.mxu0 }
 0x6a8   : > { %v10540_v4 = vpop.f32.mrf.mxu1  ;;  %v10595_v14 = vpop.f32.mrf.mxu0 }
 0x6a9   : > { %v16416_v43 = vadd.f32 %v10592_v12, %v10540_v4  ;;  %10851 = vmatmul.mubr.msk.f32.gmra.mxu1 %vm6003_vm5, %v18278_v38  ;;  %10906 = vmatmul.mubr.msk.f32.gmra.mxu0 %vm6003_vm5, %v18265_v52 }
 0x6aa   : > { %10853 = vmatprep.mubr.msk.f32.mxu1 %vm6003_vm5, %v15720_v29  ;;  %v6204_v23 = vpop.f32.mrf.mxu1  ;;  %10908 = vmatprep.mubr.msk.f32.mxu0 %vm6003_vm5, %v18266_v18  ;;  %v6503_v45 = vpop.f32.mrf.mxu0 }
 0x6ab   : > { %v16426_v57 = vadd.f32 %v6493_v40, %v6204_v23 }
 0x6ac   : > { %v10598_v49 = vpop.f32.mrf.mxu0 }
 0x6ad   : > { %v10543_v33 = vpop.f32.mrf.mxu1  ;;  %10854 = vmatmul.mubr.msk.f32.gmra.mxu1 %vm6003_vm5, %v18279_v13  ;;  %10909 = vmatmul.mubr.msk.f32.gmra.mxu0 %vm6003_vm5, %v18267_v21 }
 0x6ae   : > { %v16432_v62 = vadd.f32 %v10595_v14, %v10543_v33  ;;  %10856 = vmatprep.mubr.msk.f32.mxu1 %vm6003_vm5, %v15740_v11  ;;  %10911 = vmatprep.mubr.msk.f32.mxu0 %vm6003_vm5, %v18268_v36  ;;  %v6513_v29 = vpop.f32.mrf.mxu0  ;;  %v18283_v14 = vld [vmem:[#allocation67_spill] sm:$0xff] }
 0x6af   : > { %v6214_v52 = vpop.f32.mrf.mxu1 }
 0x6b0   : > { %v16438_v18 = vadd.f32 %v6503_v45, %v6214_v52  ;;  %v18285_v52 = vld [vmem:[#allocation18_spill] sm:$0xff] }
 0x6b1   : > { %v10546_v15 = vpop.f32.mrf.mxu1  ;;  %10857 = vmatmul.mubr.msk.f32.gmra.mxu1 %vm6003_vm5, %v18280_v3  ;;  %v10601_v22 = vpop.f32.mrf.mxu0  ;;  %10912 = vmatmul.mubr.msk.f32.gmra.mxu0 %vm6003_vm5, %v18269_v51 }
 0x6b2   : > { %v16444_v21 = vadd.f32 %v10598_v49, %v10546_v15  ;;  %10859 = vmatprep.mubr.msk.f32.mxu1 %vm6003_vm5, %v15777_v54  ;;  %10914 = vmatprep.mubr.msk.f32.mxu0 %vm6003_vm5, %v18270_v32  ;;  %v18286_v15 = vld [vmem:[#allocation14_spill] sm:$0xff] }
 0x6b3   : > { %v6224_v11 = vpop.f32.mrf.mxu1  ;;  %v6523_v36 = vpop.f32.mrf.mxu0 }
 0x6b4   : > { %v16450_v31 = vadd.f32 %v6513_v29, %v6224_v11 }
 0x6b5   : > { %v10549_v9 = vpop.f32.mrf.mxu1  ;;  %10860 = vmatmul.mubr.msk.f32.gmra.mxu1 %vm6003_vm5, %v18281_v2  ;;  %v10604_v44 = vpop.f32.mrf.mxu0  ;;  %10915 = vmatmul.mubr.msk.f32.gmra.mxu0 %vm6003_vm5, %v18271_v5 }
 0x6b6   : > { %v16456_v51 = vadd.f32 %v10601_v22, %v10549_v9  ;;  %10862 = vmatprep.mubr.msk.f32.mxu1 %vm6003_vm5, %v15794_v53  ;;  %10917 = vmatprep.mubr.msk.f32.mxu0 %vm6003_vm5, %v15860_v7 }
 0x6b7   : > { %v6234_v54 = vpop.f32.mrf.mxu1  ;;  %v6533_v32 = vpop.f32.mrf.mxu0 }
 0x6b8   : > { %v16462_v47 = vadd.f32 %v6523_v36, %v6234_v54  ;;  %v18287_v36 = vld [vmem:[#allocation13_spill] sm:$0xff] }
 0x6b9   : > { %v10552_v12 = vpop.f32.mrf.mxu1  ;;  %10863 = vmatmul.mubr.msk.f32.gmra.mxu1 %vm6003_vm5, %v18282_v60  ;;  %v10607_v1 = vpop.f32.mrf.mxu0  ;;  %10918 = vmatmul.mubr.msk.f32.gmra.mxu0 %vm6003_vm5, %v15867_v8  ;;  %v6424_v60 = vadd.f32 %v16306_v56, %v16333_v41 }
 0x6ba   : > { %v16468_v5 = vadd.f32 %v10604_v44, %v10552_v12  ;;  %10865 = vmatprep.mubr.msk.f32.mxu1 %vm6003_vm5, %v15822_v20  ;;  %10920 = vmatprep.mubr.msk.f32.mxu0 %vm6003_vm5, %v15876_v26 }
 0x6bb   : > { %v6244_v53 = vpop.f32.mrf.mxu1  ;;  %v6543_v7 = vpop.f32.mrf.mxu0 }
 0x6bc   : > { %v16474_v40 = vadd.f32 %v6533_v32, %v6244_v53 }
 0x6bd   : > { %v10555_v4 = vpop.f32.mrf.mxu1  ;;  %10866 = vmatmul.mubr.msk.f32.gmra.mxu1 %vm6003_vm5, %v18283_v14  ;;  %v10610_v38 = vpop.f32.mrf.mxu0  ;;  %10921 = vmatmul.mubr.msk.f32.gmra.mxu0 %vm6003_vm5, %v15884_v28 }
 0x6be   : > { %v16480_v8 = vadd.f32 %v10607_v1, %v10555_v4  ;;  %10868 = vmatprep.mubr.msk.f32.mxu1 %vm6003_vm5, %v15844_v39  ;;  %10923 = vmatprep.mubr.msk.f32.mxu0 %vm6003_vm5, %v16314_v6  ;;  %v18284_v39 = vld [vmem:[#allocation17_spill] sm:$0xff]  ;;  %v18288_v1 = vld [vmem:[#allocation100_spill] sm:$0xff] }
 0x6bf   : > { %v6254_v20 = vpop.f32.mrf.mxu1  ;;  %v6553_v26 = vpop.f32.mrf.mxu0 }
 0x6c0   : > { %v16486_v23 = vadd.f32 %v6543_v7, %v6254_v20 }
 0x6c1   : > { %v10558_v45 = vpop.f32.mrf.mxu1  ;;  %10869 = vmatmul.mubr.msk.f32.gmra.mxu1 %vm6003_vm5, %v15855_v42  ;;  %v10613_v49 = vpop.f32.mrf.mxu0  ;;  %10924 = vmatmul.mubr.msk.f32.gmra.mxu0 %vm6003_vm5, %v16323_v24 }
 0x6c2   : > { %v16492_v28 = vadd.f32 %v10610_v38, %v10558_v45  ;;  %10871 = vmatprep.mubr.msk.f32.mxu1 %vm6003_vm5, %v16145_v0  ;;  %10926 = vmatprep.mubr.msk.f32.mxu0 %vm6003_vm5, %v18284_v39  ;;  %v18289_v39 = vld [vmem:[#allocation69_spill] sm:$0xff] }
 0x6c3   : > { %v6264_v6 = vpop.f32.mrf.mxu1  ;;  %v6563_v33 = vpop.f32.mrf.mxu0 }
 0x6c4   : > { %v16498_v13 = vadd.f32 %v6553_v26, %v6264_v6 }
 0x6c5   : > { %v10561_v29 = vpop.f32.mrf.mxu1  ;;  %10872 = vmatmul.mubr.msk.f32.gmra.mxu1 %vm6003_vm5, %v15940_v17  ;;  %v10616_v42 = vpop.f32.mrf.mxu0  ;;  %10927 = vmatmul.mubr.msk.f32.gmra.mxu0 %vm6003_vm5, %v18285_v52 }
 0x6c6   : > { %v16504_v24 = vadd.f32 %v10613_v49, %v10561_v29  ;;  %10874 = vmatprep.mubr.msk.f32.mxu1 %vm6003_vm5, %v18286_v15  ;;  %v18291_v15 = vld [vmem:[#allocation114_spill] sm:$0xff] }
 0x6c7   : > { %v6274_v0 = vpop.f32.mrf.mxu1  ;;  %v6573_v3 = vpop.f32.mrf.mxu0 }
 0x6c8   : > { %v16508_v22 = vadd.f32 %v6563_v33, %v6274_v0  ;;  %v18290_v33 = vld [vmem:[#allocation75_spill] sm:$0xff] }
 0x6c9   : > { %v10564_v11 = vpop.f32.mrf.mxu1  ;;  %10875 = vmatmul.mubr.msk.f32.gmra.mxu1 %vm6003_vm5, %v18287_v36  ;;  %v10675_v9 = vpop.f32.mrf.mxu0 }
 0x6ca   : > { %v16512_v2 = vadd.f32 %v10616_v42, %v10564_v11  ;;  %10933 = vmatprep.mubr.msk.f32.mxu1 %vm6003_vm5, %v15926_v50  ;;  %v18292_v11 = vld [vmem:[#allocation73_spill] sm:$0xff] }
 0x6cb   : > { %v6284_v17 = vpop.f32.mrf.mxu1  ;;  %v7055_v44 = vpop.f32.mrf.mxu0 }
 0x6cc   : > { %v16516_v54 = vadd.f32 %v6573_v3, %v6284_v17 }
 0x6cd   : > { %v10623_v32 = vpop.f32.mrf.mxu1  ;;  %10934 = vmatmul.mubr.msk.f32.vlgmr.msra.gmra.mxu1 %vm6003_vm5, %v15947_v34  ;;  %v10678_v12 = vpop.f32.mrf.mxu0 }
 0x6ce   : > { %v6950_v53 = vadd.f32 %v10623_v32, %v18288_v1  ;;  %10936 = vmatprep.mubr.msk.f32.mxu1 %vm6003_vm5, %v15952_v58  ;;  %v18293_v32 = vld [vmem:[#allocation25_spill] sm:$0xff] }
 0x6cf   : > { %v6790_v7 = vpop.f32.mrf.mxu1  ;;  %v7065_v4 = vpop.f32.mrf.mxu0  ;;  %v18294_v1 = vld [vmem:[#allocation21_spill] sm:$0xff] }
 0x6d0   : > { %v6949_v50 = vadd.f32 %v6790_v7, %v6424_v60  ;;  %v16525_v14 = vadd.f32 %v10675_v9, %v6950_v53 }
 0x6d1   : > { %v10626_v38 = vpop.f32.mrf.mxu1  ;;  %10937 = vmatmul.mubr.msk.f32.gmra.mxu1 %vm6003_vm5, %v15964_v35  ;;  %v10681_v20 = vpop.f32.mrf.mxu0 }
 0x6d2   : > { %v6952_v34 = vadd.f32 %v10626_v38, %v16339_v37  ;;  %10939 = vmatprep.mubr.msk.f32.mxu1 %vm6003_vm5, %v15969_v61  ;;  %v16532_v56 = vadd.f32 %v7055_v44, %v6949_v50  ;;  %v18295_v38 = vld [vmem:[#allocation58_spill] sm:$0xff] }
 0x6d3   : > { %v6800_v41 = vpop.f32.mrf.mxu1  ;;  %v7075_v26 = vpop.f32.mrf.mxu0 }
 0x6d4   : > { %v6951_v58 = vadd.f32 %v6800_v41, %v16346_v59  ;;  %v16535_v45 = vadd.f32 %v10678_v12, %v6952_v34  ;;  %v18296_v41 = vld [vmem:[#allocation74_spill] sm:$0xff] }
 0x6d5   : > { %v10629_v49 = vpop.f32.mrf.mxu1  ;;  %10940 = vmatmul.mubr.msk.f32.gmra.mxu1 %vm6003_vm5, %v18289_v39  ;;  %v10684_v6 = vpop.f32.mrf.mxu0 }
 0x6d6   : > { %v6954_v35 = vadd.f32 %v10629_v49, %v16352_v25  ;;  %10942 = vmatprep.mubr.msk.f32.mxu1 %vm6003_vm5, %v18290_v33  ;;  %v16542_v37 = vadd.f32 %v7065_v4, %v6951_v58 }
 0x6d7   : > { %v6810_v61 = vpop.f32.mrf.mxu1  ;;  %v7085_v29 = vpop.f32.mrf.mxu0 }
 0x6d8   : > { %v6953_v42 = vadd.f32 %v6810_v61, %v16358_v46  ;;  %v16545_v52 = vadd.f32 %v10681_v20, %v6954_v35  ;;  %v18298_v61 = vld [vmem:[#allocation118_spill] sm:$0xff] }
 0x6d9   : > { %v10632_v59 = vpop.f32.mrf.mxu1  ;;  %10943 = vmatmul.mubr.msk.f32.gmra.mxu1 %vm6003_vm5, %v18291_v15  ;;  %v10687_v0 = vpop.f32.mrf.mxu0 }
 0x6da   : > { %v6956_v3 = vadd.f32 %v10632_v59, %v16368_v10  ;;  %10945 = vmatprep.mubr.msk.f32.mxu1 %vm6003_vm5, %v18292_v11  ;;  %v16552_v25 = vadd.f32 %v7075_v26, %v6953_v42 }
 0x6db   : > { %v6820_v36 = vpop.f32.mrf.mxu1  ;;  %v7095_v9 = vpop.f32.mrf.mxu0 }
 0x6dc   : > { %v6955_v17 = vadd.f32 %v6820_v36, %v16374_v19  ;;  %v16555_v44 = vadd.f32 %v10684_v6, %v6956_v3  ;;  %v18297_v6 = vld [vmem:[#allocation91_spill] sm:$0xff]  ;;  %v18300_v36 = vld [vmem:[#allocation62_spill] sm:$0xff] }
 0x6dd   : > { %v10635_v46 = vpop.f32.mrf.mxu1  ;;  %10946 = vmatmul.mubr.msk.f32.gmra.mxu1 %vm6003_vm5, %v18293_v32  ;;  %v10690_v12 = vpop.f32.mrf.mxu0 }
 0x6de   : > { %v6958_v60 = vadd.f32 %v10635_v46, %v16380_v27  ;;  %10948 = vmatprep.mubr.msk.f32.mxu1 %vm6003_vm5, %v18294_v1  ;;  %v16562_v10 = vadd.f32 %v7085_v29, %v6955_v17 }
 0x6df   : > { %v6830_v53 = vpop.f32.mrf.mxu1  ;;  %v7105_v7 = vpop.f32.mrf.mxu0 }
 0x6e0   : > { %v6957_v4 = vadd.f32 %v6830_v53, %v16388_v16  ;;  %v16565_v50 = vadd.f32 %v10687_v0, %v6958_v60  ;;  %v18299_v0 = vld [vmem:[#allocation53_spill] sm:$0xff]  ;;  %v18302_v53 = vld [vmem:[#allocation22_spill] sm:$0xff] }
 0x6e1   : > { %v10638_v19 = vpop.f32.mrf.mxu1  ;;  %10949 = vmatmul.mubr.msk.f32.gmra.mxu1 %vm6003_vm5, %v18295_v38  ;;  %v10693_v20 = vpop.f32.mrf.mxu0 }
 0x6e2   : > { %v6960_v34 = vadd.f32 %v10638_v19, %v16392_v30  ;;  %10951 = vmatprep.mubr.msk.f32.mxu1 %vm6003_vm5, %v18296_v41  ;;  %v16572_v27 = vadd.f32 %v7095_v9, %v6957_v4 }
 0x6e3   : > { %v6840_v26 = vpop.f32.mrf.mxu1  ;;  %v7115_v58 = vpop.f32.mrf.mxu0 }
 0x6e4   : > { %v6959_v49 = vadd.f32 %v6840_v26, %v16400_v48  ;;  %v16575_v39 = vadd.f32 %v10690_v12, %v6960_v34  ;;  %v18301_v12 = vld [vmem:[#allocation64_spill] sm:$0xff]  ;;  %v18304_v26 = vld [vmem:[#allocation66_spill] sm:$0xff] }
 0x6e5   : > { %v10641_v16 = vpop.f32.mrf.mxu1  ;;  %10952 = vmatmul.mubr.msk.f32.gmra.mxu1 %vm6003_vm5, %v18297_v6  ;;  %v10696_v35 = vpop.f32.mrf.mxu0 }
 0x6e6   : > { %v6962_v33 = vadd.f32 %v10641_v16, %v16404_v63  ;;  %10954 = vmatprep.mubr.msk.f32.mxu1 %vm6003_vm5, %v18298_v61  ;;  %v16582_v30 = vadd.f32 %v7105_v7, %v6959_v49 }
 0x6e7   : > { %v6850_v29 = vpop.f32.mrf.mxu1  ;;  %v7125_v42 = vpop.f32.mrf.mxu0 }
 0x6e8   : > { %v6961_v59 = vadd.f32 %v6850_v29, %v16412_v55  ;;  %v16585_v15 = vadd.f32 %v10693_v20, %v6962_v33  ;;  %v18303_v20 = vld [vmem:[#allocation55_spill] sm:$0xff]  ;;  %v18306_v29 = vld [vmem:[#allocation82_spill] sm:$0xff] }
 0x6e9   : > { %v10644_v48 = vpop.f32.mrf.mxu1  ;;  %10955 = vmatmul.mubr.msk.f32.gmra.mxu1 %vm6003_vm5, %v18299_v0  ;;  %v10699_v3 = vpop.f32.mrf.mxu0 }
 0x6ea   : > { %v6964_v11 = vadd.f32 %v10644_v48, %v16416_v43  ;;  %10957 = vmatprep.mubr.msk.f32.mxu1 %vm6003_vm5, %v18300_v36  ;;  %v16592_v63 = vadd.f32 %v7115_v58, %v6961_v59 }
 0x6eb   : > { %v6860_v9 = vpop.f32.mrf.mxu1  ;;  %v7135_v17 = vpop.f32.mrf.mxu0 }
 0x6ec   : > { %v6963_v46 = vadd.f32 %v6860_v9, %v16426_v57  ;;  %v16595_v32 = vadd.f32 %v10696_v35, %v6964_v11  ;;  %v18305_v35 = vld [vmem:[#allocation29_spill] sm:$0xff]  ;;  %v18308_v9 = vld [vmem:[#allocation107_spill] sm:$0xff] }
 0x6ed   : > { %v10647_v55 = vpop.f32.mrf.mxu1  ;;  %10958 = vmatmul.mubr.msk.f32.gmra.mxu1 %vm6003_vm5, %v18301_v12  ;;  %v10702_v60 = vpop.f32.mrf.mxu0 }
 0x6ee   : > { %v6966_v1 = vadd.f32 %v10647_v55, %v16432_v62  ;;  %10960 = vmatprep.mubr.msk.f32.mxu1 %vm6003_vm5, %v18302_v53  ;;  %v16602_v43 = vadd.f32 %v7125_v42, %v6963_v46 }
 0x6ef   : > { %v6870_v7 = vpop.f32.mrf.mxu1  ;;  %v7145_v4 = vpop.f32.mrf.mxu0 }
 0x6f0   : > { %v6965_v19 = vadd.f32 %v6870_v7, %v16438_v18  ;;  %v16605_v38 = vadd.f32 %v10699_v3, %v6966_v1  ;;  %v18307_v3 = vld [vmem:[#allocation78_spill] sm:$0xff]  ;;  %v18310_v7 = vld [vmem:[#allocation83_spill] sm:$0xff] }
 0x6f1   : > { %v10650_v57 = vpop.f32.mrf.mxu1  ;;  %10961 = vmatmul.mubr.msk.f32.gmra.mxu1 %vm6003_vm5, %v18303_v20  ;;  %v10705_v34 = vpop.f32.mrf.mxu0 }
 0x6f2   : > { %v6968_v41 = vadd.f32 %v10650_v57, %v16444_v21  ;;  %10963 = vmatprep.mubr.msk.f32.mxu1 %vm6003_vm5, %v18304_v26  ;;  %v16612_v62 = vadd.f32 %v7135_v17, %v6965_v19 }
 0x6f3   : > { %v6880_v58 = vpop.f32.mrf.mxu1  ;;  %v7155_v49 = vpop.f32.mrf.mxu0 }
 0x6f4   : > { %v6967_v16 = vadd.f32 %v6880_v58, %v16450_v31  ;;  %v16615_v6 = vadd.f32 %v10702_v60, %v6968_v41  ;;  %v18309_v60 = vld [vmem:[#allocation37_spill] sm:$0xff] }
 0x6f5   : > { %v10653_v18 = vpop.f32.mrf.mxu1  ;;  %10964 = vmatmul.mubr.msk.f32.gmra.mxu1 %vm6003_vm5, %v18305_v35  ;;  %v10708_v33 = vpop.f32.mrf.mxu0  ;;  %v18312_v58 = vld [vmem:[#allocation45_spill] sm:$0xff] }
 0x6f6   : > { %v6970_v61 = vadd.f32 %v10653_v18, %v16456_v51  ;;  %10966 = vmatprep.mubr.msk.f32.mxu1 %vm6003_vm5, %v18306_v29  ;;  %v16622_v21 = vadd.f32 %v7145_v4, %v6967_v16 }
 0x6f7   : > { %v6890_v42 = vpop.f32.mrf.mxu1  ;;  %v7165_v59 = vpop.f32.mrf.mxu0 }
 0x6f8   : > { %v6969_v48 = vadd.f32 %v6890_v42, %v16462_v47  ;;  %v16625_v0 = vadd.f32 %v10705_v34, %v6970_v61  ;;  %v18311_v34 = vld [vmem:[#allocation95_spill] sm:$0xff] }
 0x6f9   : > { %v10656_v31 = vpop.f32.mrf.mxu1  ;;  %10967 = vmatmul.mubr.msk.f32.gmra.mxu1 %vm6003_vm5, %v18307_v3  ;;  %v10711_v11 = vpop.f32.mrf.mxu0  ;;  %v18314_v42 = vld [vmem:[#allocation31_spill] sm:$0xff] }
 0x6fa   : > { %v6972_v36 = vadd.f32 %v10656_v31, %v16468_v5  ;;  %10969 = vmatprep.mubr.msk.f32.mxu1 %vm6003_vm5, %v18308_v9  ;;  %v16632_v51 = vadd.f32 %v7155_v49, %v6969_v48 }
 0x6fb   : > { %v6900_v17 = vpop.f32.mrf.mxu1  ;;  %v7175_v46 = vpop.f32.mrf.mxu0 }
 0x6fc   : > { %v6971_v55 = vadd.f32 %v6900_v17, %v16474_v40  ;;  %v16635_v12 = vadd.f32 %v10708_v33, %v6972_v36  ;;  %v18313_v33 = vld [vmem:[#allocation51_spill] sm:$0xff] }
 0x6fd   : > { %v10659_v47 = vpop.f32.mrf.mxu1  ;;  %10970 = vmatmul.mubr.msk.f32.gmra.mxu1 %vm6003_vm5, %v18309_v60  ;;  %v10714_v1 = vpop.f32.mrf.mxu0 }
 0x6fe   : > { %v6974_v53 = vadd.f32 %v10659_v47, %v16480_v8  ;;  %10972 = vmatprep.mubr.msk.f32.mxu1 %vm6003_vm5, %v18310_v7  ;;  %v16642_v5 = vadd.f32 %v7165_v59, %v6971_v55 }
 0x6ff   : > { %v6910_v4 = vpop.f32.mrf.mxu1  ;;  %v7185_v19 = vpop.f32.mrf.mxu0 }
 0x700   : > { %v6973_v57 = vadd.f32 %v6910_v4, %v16486_v23  ;;  %v16645_v20 = vadd.f32 %v10711_v11, %v6974_v53  ;;  %v18315_v11 = vld [vmem:[#allocation47_spill] sm:$0xff] }
 0x701   : > { %v10662_v40 = vpop.f32.mrf.mxu1  ;;  %10973 = vmatmul.mubr.msk.f32.gmra.mxu1 %vm6003_vm5, %v18311_v34  ;;  %v10717_v41 = vpop.f32.mrf.mxu0 }
 0x702   : > { %v6976_v26 = vadd.f32 %v10662_v40, %v16492_v28  ;;  %10975 = vmatprep.mubr.msk.f32.mxu1 %vm6003_vm5, %v18312_v58  ;;  %v16652_v8 = vadd.f32 %v7175_v46, %v6973_v57 }
 0x703   : > { %v6920_v49 = vpop.f32.mrf.mxu1  ;;  %v7195_v16 = vpop.f32.mrf.mxu0 }
 0x704   : > { %v6975_v18 = vadd.f32 %v6920_v49, %v16498_v13  ;;  %v16655_v35 = vadd.f32 %v10714_v1, %v6976_v26 }
 0x705   : > { %v10665_v23 = vpop.f32.mrf.mxu1  ;;  %10976 = vmatmul.mubr.msk.f32.gmra.mxu1 %vm6003_vm5, %v18313_v33  ;;  %v10720_v61 = vpop.f32.mrf.mxu0 }
 0x706   : > { %v6978_v29 = vadd.f32 %v10665_v23, %v16504_v24  ;;  %10978 = vmatprep.mubr.msk.f32.mxu1 %vm6003_vm5, %v18314_v42  ;;  %v16662_v28 = vadd.f32 %v7185_v19, %v6975_v18 }
 0x707   : > { %v6930_v59 = vpop.f32.mrf.mxu1  ;;  %v7205_v48 = vpop.f32.mrf.mxu0 }
 0x708   : > { %v6977_v31 = vadd.f32 %v6930_v59, %v16508_v22  ;;  %v16665_v3 = vadd.f32 %v10717_v41, %v6978_v29 }
 0x709   : > { %v10668_v13 = vpop.f32.mrf.mxu1  ;;  %10979 = vmatmul.mubr.msk.f32.gmra.mxu1 %vm6003_vm5, %v18315_v11  ;;  %v10779_v36 = vpop.f32.mrf.mxu0 }
 0x70a   : > { %v6980_v9 = vadd.f32 %v10668_v13, %v16512_v2  ;;  %v16670_v17 = vadd.f32 %v7195_v16, %v6977_v31 }
 0x70b   : > { %v6940_v24 = vpop.f32.mrf.mxu1  ;;  %v16672_v46 = vpop.f32.mrf.mxu0 }
 0x70c   : > { %v6979_v55 = vadd.f32 %v6940_v24, %v16516_v54  ;;  %v16675_v47 = vadd.f32 %v10720_v61, %v6980_v9 }
 0x70d   : > { %v10727_v60 = vpop.f32.mrf.mxu1  ;;  %v10782_v22 = vpop.f32.mrf.mxu0 }
 0x70e   : > { %v7485_v1 = vadd.f32 %v10727_v60, %v16525_v14  ;;  %v16678_v53 = vadd.f32 %v7205_v48, %v6979_v55 }
 0x70f   : > { %v7325_v7 = vpop.f32.mrf.mxu1  ;;  %v7604_v4 = vpop.f32.mrf.mxu0 }
 0x710   : > { %v16681_v19 = vadd.f32 %v7325_v7, %v16532_v56  ;;  %v16683_v2 = vadd.f32 %v10779_v36, %v7485_v1 }
 0x711   : > { %v10730_v57 = vpop.f32.mrf.mxu1  ;;  %v10785_v40 = vpop.f32.mrf.mxu0 }
 0x712   : > { %v7487_v34 = vadd.f32 %v10730_v57, %v16535_v45 }
 0x713   : > { %v7335_v54 = vpop.f32.mrf.mxu1  ;;  %v7614_v41 = vpop.f32.mrf.mxu0 }
 0x714   : > { %v7486_v26 = vadd.f32 %v7335_v54, %v16542_v37  ;;  %v16687_v58 = vadd.f32 %v10782_v22, %v7487_v34 }
 0x715   : > { %v10733_v14 = vpop.f32.mrf.mxu1  ;;  %v10788_v49 = vpop.f32.mrf.mxu0 }
 0x716   : > { %v7489_v16 = vadd.f32 %v10733_v14, %v16545_v52  ;;  %v16690_v18 = vadd.f32 %v7604_v4, %v7486_v26 }
 0x717   : > { %v7345_v56 = vpop.f32.mrf.mxu1  ;;  %v7624_v23 = vpop.f32.mrf.mxu0 }
 0x718   : > { %v7488_v33 = vadd.f32 %v7345_v56, %v16552_v25  ;;  %v16693_v61 = vadd.f32 %v10785_v40, %v7489_v16 }
 0x719   : > { %v10736_v29 = vpop.f32.mrf.mxu1  ;;  %v10791_v45 = vpop.f32.mrf.mxu0 }
 0x71a   : > { %v7491_v42 = vadd.f32 %v10736_v29, %v16555_v44  ;;  %v16696_v59 = vadd.f32 %v7614_v41, %v7488_v33 }
 0x71b   : > { %v7355_v37 = vpop.f32.mrf.mxu1  ;;  %v7634_v48 = vpop.f32.mrf.mxu0 }
 0x71c   : > { %v7490_v31 = vadd.f32 %v7355_v37, %v16562_v10  ;;  %v16699_v13 = vadd.f32 %v10788_v49, %v7491_v42 }
 0x71d   : > { %v10739_v52 = vpop.f32.mrf.mxu1  ;;  %v10794_v11 = vpop.f32.mrf.mxu0 }
 0x71e   : > { %v7493_v36 = vadd.f32 %v10739_v52, %v16565_v50  ;;  %v16702_v9 = vadd.f32 %v7624_v23, %v7490_v31 }
 0x71f   : > { %v7365_v25 = vpop.f32.mrf.mxu1  ;;  %v7644_v24 = vpop.f32.mrf.mxu0 }
 0x720   : > { %v7492_v55 = vadd.f32 %v7365_v25, %v16572_v27  ;;  %v16705_v60 = vadd.f32 %v10791_v45, %v7493_v36 }
 0x721   : > { %v10742_v44 = vpop.f32.mrf.mxu1  ;;  %v10797_v22 = vpop.f32.mrf.mxu0 }
 0x722   : > { %v7495_v1 = vadd.f32 %v10742_v44, %v16575_v39  ;;  %v16708_v7 = vadd.f32 %v7634_v48, %v7492_v55 }
 0x723   : > { %v7375_v10 = vpop.f32.mrf.mxu1  ;;  %v7654_v4 = vpop.f32.mrf.mxu0 }
 0x724   : > { %v7494_v57 = vadd.f32 %v7375_v10, %v16582_v30  ;;  %v16711_v40 = vadd.f32 %v10794_v11, %v7495_v1 }
 0x725   : > { %v10745_v50 = vpop.f32.mrf.mxu1  ;;  %v10800_v34 = vpop.f32.mrf.mxu0 }
 0x726   : > { %v7497_v54 = vadd.f32 %v10745_v50, %v16585_v15  ;;  %v16714_v41 = vadd.f32 %v7644_v24, %v7494_v57 }
 0x727   : > { %v7385_v27 = vpop.f32.mrf.mxu1  ;;  %v7664_v26 = vpop.f32.mrf.mxu0 }
 0x728   : > { %v7496_v14 = vadd.f32 %v7385_v27, %v16592_v63  ;;  %v16717_v49 = vadd.f32 %v10797_v22, %v7497_v54 }
 0x729   : > { %v10748_v39 = vpop.f32.mrf.mxu1  ;;  %v10803_v16 = vpop.f32.mrf.mxu0 }
 0x72a   : > { %v7499_v56 = vadd.f32 %v10748_v39, %v16595_v32  ;;  %v16720_v23 = vadd.f32 %v7654_v4, %v7496_v14 }
 0x72b   : > { %v7395_v30 = vpop.f32.mrf.mxu1  ;;  %v16722_v33 = vpop.f32.mrf.mxu0 }
 0x72c   : > { %v7498_v29 = vadd.f32 %v7395_v30, %v16602_v43  ;;  %v16725_v15 = vadd.f32 %v10800_v34, %v7499_v56 }
 0x72d   : > { %v10751_v45 = vpop.f32.mrf.mxu1  ;;  %v10806_v42 = vpop.f32.mrf.mxu0 }
 0x72e   : > { %v7501_v37 = vadd.f32 %v10751_v45, %v16605_v38  ;;  %v16728_v63 = vadd.f32 %v7664_v26, %v7498_v29 }
 0x72f   : > { %v7405_v48 = vpop.f32.mrf.mxu1  ;;  %v7684_v31 = vpop.f32.mrf.mxu0 }
 0x730   : > { %v16731_v52 = vadd.f32 %v7405_v48, %v16612_v62  ;;  %v16733_v32 = vadd.f32 %v10803_v16, %v7501_v37 }
 0x731   : > { %v10754_v11 = vpop.f32.mrf.mxu1  ;;  %v10809_v36 = vpop.f32.mrf.mxu0 }
 0x732   : > { %v7503_v25 = vadd.f32 %v10754_v11, %v16615_v6 }
 0x733   : > { %v7415_v43 = vpop.f32.mrf.mxu1  ;;  %v7694_v24 = vpop.f32.mrf.mxu0 }
 0x734   : > { %v7502_v55 = vadd.f32 %v7415_v43, %v16622_v21  ;;  %v16737_v44 = vadd.f32 %v10806_v42, %v7503_v25 }
 0x735   : > { %v10757_v38 = vpop.f32.mrf.mxu1  ;;  %v10812_v22 = vpop.f32.mrf.mxu0 }
 0x736   : > { %v7505_v1 = vadd.f32 %v10757_v38, %v16625_v0  ;;  %v16740_v10 = vadd.f32 %v7684_v31, %v7502_v55 }
 0x737   : > { %v7425_v62 = vpop.f32.mrf.mxu1  ;;  %v7704_v4 = vpop.f32.mrf.mxu0 }
 0x738   : > { %v7504_v57 = vadd.f32 %v7425_v62, %v16632_v51  ;;  %v16743_v50 = vadd.f32 %v10809_v36, %v7505_v1 }
 0x739   : > { %v10760_v34 = vpop.f32.mrf.mxu1  ;;  %v10815_v6 = vpop.f32.mrf.mxu0 }
 0x73a   : > { %v7507_v54 = vadd.f32 %v10760_v34, %v16635_v12  ;;  %v16746_v27 = vadd.f32 %v7694_v24, %v7504_v57 }
 0x73b   : > { %v7435_v21 = vpop.f32.mrf.mxu1  ;;  %v7714_v26 = vpop.f32.mrf.mxu0 }
 0x73c   : > { %v7506_v14 = vadd.f32 %v7435_v21, %v16642_v5  ;;  %v16749_v39 = vadd.f32 %v10812_v22, %v7507_v54 }
 0x73d   : > { %v10763_v0 = vpop.f32.mrf.mxu1  ;;  %v10818_v16 = vpop.f32.mrf.mxu0 }
 0x73e   : > { %v7509_v56 = vadd.f32 %v10763_v0, %v16645_v20  ;;  %v16752_v30 = vadd.f32 %v7704_v4, %v7506_v14 }
 0x73f   : > { %v7445_v51 = vpop.f32.mrf.mxu1  ;;  %v7724_v29 = vpop.f32.mrf.mxu0 }
 0x740   : > { %v7508_v45 = vadd.f32 %v7445_v51, %v16652_v8  ;;  %v16755_v42 = vadd.f32 %v10815_v6, %v7509_v56 }
 0x741   : > { %v10766_v12 = vpop.f32.mrf.mxu1  ;;  %v10821_v37 = vpop.f32.mrf.mxu0 }
 0x742   : > { %v7511_v48 = vadd.f32 %v10766_v12, %v16655_v35  ;;  %v16758_v31 = vadd.f32 %v7714_v26, %v7508_v45 }
 0x743   : > { %v7455_v5 = vpop.f32.mrf.mxu1  ;;  %v7734_v11 = vpop.f32.mrf.mxu0 }
 0x744   : > { %v7510_v36 = vadd.f32 %v7455_v5, %v16662_v28  ;;  %v16761_v25 = vadd.f32 %v10818_v16, %v7511_v48 }
 0x745   : > { %v10769_v20 = vpop.f32.mrf.mxu1  ;;  %v10824_v43 = vpop.f32.mrf.mxu0 }
 0x746   : > { %v7513_v24 = vadd.f32 %v10769_v20, %v16665_v3  ;;  %v16764_v55 = vadd.f32 %v7724_v29, %v7510_v36 }
 0x747   : > { %v7465_v8 = vpop.f32.mrf.mxu1  ;;  %v7744_v35 = vpop.f32.mrf.mxu0 }
 0x748   : > { %v7512_v38 = vadd.f32 %v7465_v8, %v16670_v17  ;;  %v16767_v22 = vadd.f32 %v10821_v37, %v7513_v24 }
 0x749   : > { %v10772_v1 = vpop.f32.mrf.mxu1  ;;  %v16775_v6 = vpop.f32.mrf.mxu0 }
 0x74a   : > { %v7515_v62 = vadd.f32 %v10772_v1, %v16675_v47  ;;  %v16770_v4 = vadd.f32 %v7734_v11, %v7512_v38 }
 0x74b   : > { %v7475_v28 = vpop.f32.mrf.mxu1  ;;  %v16784_v26 = vpop.f32.mrf.mxu0 }
 0x74c   : > { %v7514_v57 = vadd.f32 %v7475_v28, %v16678_v53  ;;  %v16773_v34 = vadd.f32 %v10824_v43, %v7515_v62 }
 0x74d   : > { %v10831_v3 = vpop.f32.mrf.mxu1  ;;  %v16792_v16 = vpop.f32.mrf.mxu0 }
 0x74e   : > { %v16778_v54 = vadd.f32 %v10831_v3, %v16683_v2  ;;  %v16780_v17 = vadd.f32 %v7744_v35, %v7514_v57 }
 0x74f   : > { %v16782_v21 = vpop.f32.mrf.mxu1  ;;  %v16800_v45 = vpop.f32.mrf.mxu0 }
 0x751   : > { %v10834_v47 = vpop.f32.mrf.mxu1  ;;  %v16808_v48 = vpop.f32.mrf.mxu0 }
 0x752   : > { %v16787_v14 = vadd.f32 %v10834_v47, %v16687_v58 }
 0x753   : > { %v7864_v0 = vpop.f32.mrf.mxu1  ;;  %v16816_v36 = vpop.f32.mrf.mxu0 }
 0x754   : > { %v16790_v53 = vadd.f32 %v7864_v0, %v16690_v18 }
 0x755   : > { %v10837_v56 = vpop.f32.mrf.mxu1  ;;  %v16824_v24 = vpop.f32.mrf.mxu0 }
 0x756   : > { %v16795_v2 = vadd.f32 %v10837_v56, %v16693_v61 }
 0x757   : > { %v7874_v51 = vpop.f32.mrf.mxu1  ;;  %v16832_v35 = vpop.f32.mrf.mxu0 }
 0x758   : > { %v16798_v29 = vadd.f32 %v7874_v51, %v16696_v59 }
 0x759   : > { %v10840_v12 = vpop.f32.mrf.mxu1  ;;  %v16840_v28 = vpop.f32.mrf.mxu0 }
 0x75a   : > { %v16803_v58 = vadd.f32 %v10840_v12, %v16699_v13 }
 0x75b   : > { %v7884_v37 = vpop.f32.mrf.mxu1 }
 0x75c   : > { %v16806_v18 = vadd.f32 %v7884_v37, %v16702_v9 }
 0x75d   : > { %v10843_v5 = vpop.f32.mrf.mxu1 }
 0x75e   : > { %v16811_v61 = vadd.f32 %v10843_v5, %v16705_v60 }
 0x75f   : > { %v7894_v11 = vpop.f32.mrf.mxu1 }
 0x760   : > { %v16814_v59 = vadd.f32 %v7894_v11, %v16708_v7 }
 0x761   : > { %v10846_v20 = vpop.f32.mrf.mxu1 }
 0x762   : > { %v16819_v13 = vadd.f32 %v10846_v20, %v16711_v40 }
 0x763   : > { %v7904_v43 = vpop.f32.mrf.mxu1 }
 0x764   : > { %v16822_v9 = vadd.f32 %v7904_v43, %v16714_v41 }
 0x765   : > { %v10849_v8 = vpop.f32.mrf.mxu1 }
 0x766   : > { %v16827_v60 = vadd.f32 %v10849_v8, %v16717_v49 }
 0x767   : > { %v7914_v38 = vpop.f32.mrf.mxu1 }
 0x768   : > { %v16830_v7 = vadd.f32 %v7914_v38, %v16720_v23  ;;  %v16847_v23 = vpop.f32.mrf.mxu0 }
 0x769   : > { %v10852_v1 = vpop.f32.mrf.mxu1 }
 0x76a   : > { %v16835_v40 = vadd.f32 %v10852_v1, %v16725_v15 }
 0x76b   : > { %v7924_v62 = vpop.f32.mrf.mxu1 }
 0x76c   : > { %v16838_v41 = vadd.f32 %v7924_v62, %v16728_v63  ;;  %v16855_v63 = vpop.f32.mrf.mxu0 }
 0x76d   : > { %v10855_v57 = vpop.f32.mrf.mxu1 }
 0x76e   : > { %v16843_v49 = vadd.f32 %v10855_v57, %v16733_v32  ;;  %v16863_v5 = vpop.f32.mrf.mxu0 }
 0x76f   : > { %v16845_v3 = vpop.f32.mrf.mxu1 }
 0x770   : > { %v16871_v43 = vpop.f32.mrf.mxu0 }
 0x771   : > { %v10858_v47 = vpop.f32.mrf.mxu1 }
 0x772   : > { %v16850_v0 = vadd.f32 %v10858_v47, %v16737_v44  ;;  %v16879_v1 = vpop.f32.mrf.mxu0 }
 0x773   : > { %v7944_v15 = vpop.f32.mrf.mxu1 }
 0x774   : > { %v16853_v56 = vadd.f32 %v7944_v15, %v16740_v10  ;;  %v16887_v47 = vpop.f32.mrf.mxu0 }
 0x775   : > { %v10861_v51 = vpop.f32.mrf.mxu1 }
 0x776   : > { %v16858_v12 = vadd.f32 %v10861_v51, %v16743_v50 }
 0x777   : > { %v7954_v32 = vpop.f32.mrf.mxu1 }
 0x778   : > { %v16861_v37 = vadd.f32 %v7954_v32, %v16746_v27 }
 0x779   : > { %v10864_v11 = vpop.f32.mrf.mxu1 }
 0x77a   : > { %v16866_v44 = vadd.f32 %v10864_v11, %v16749_v39  ;;  %v16897_v11 = vpop.f32.mrf.mxu0 }
 0x77b   : > { %v7964_v20 = vpop.f32.mrf.mxu1 }
 0x77c   : > { %v16869_v10 = vadd.f32 %v7964_v20, %v16752_v30 }
 0x77d   : > { %v10867_v8 = vpop.f32.mrf.mxu1 }
 0x77e   : > { %v16874_v50 = vadd.f32 %v10867_v8, %v16755_v42 }
 0x77f   : > { %v7974_v38 = vpop.f32.mrf.mxu1 }
 0x780   : > { %v16877_v27 = vadd.f32 %v7974_v38, %v16758_v31  ;;  %v7753_v31 = vadd.f32 %v16672_v46, %v16681_v19  ;;  %v8274_v46 = vadd.f32 %v16775_v6, %v16778_v54 }
 0x781   : > { %v10870_v62 = vpop.f32.mrf.mxu1 }
 0x782   : > { %v16882_v39 = vadd.f32 %v10870_v62, %v16761_v25  ;;  %v8013_v20 = vadd.f32 %v16782_v21, %v7753_v31  ;;  %v8275_v31 = vadd.f32 %v16800_v45, %v16790_v53  ;;  %v8277_v53 = vadd.f32 %v16816_v36, %v16798_v29 }
 0x783   : > { %v7984_v57 = vpop.f32.mrf.mxu1  ;;  %v8279_v36 = vadd.f32 %v16832_v35, %v16806_v18 }
 0x784   : > { %v16885_v30 = vadd.f32 %v7984_v57, %v16764_v55  ;;  %v8273_v19 = vadd.f32 %v16784_v26, %v8013_v20 }
 0x785   : > { %v10873_v15 = vpop.f32.mrf.mxu1 }
 0x786   : > { %v16890_v42 = vadd.f32 %v10873_v15, %v16767_v22  ;;  %v16906_v22 = vpop.f32.mrf.mxu0 }
 0x787   : > { %v7994_v51 = vpop.f32.mrf.mxu1 }
 0x788   : > { %v16895_v32 = vadd.f32 %v7994_v51, %v16770_v4  ;;  %v16911_v51 = vpop.f32.mrf.mxu0 }
 0x789   : > { %v10876_v25 = vpop.f32.mrf.mxu1 }
 0x78a   : > { %v16901_v55 = vadd.f32 %v10876_v25, %v16773_v34  ;;  %v16916_v34 = vld [vmem:[%s17086_s8] ss:$0 sm:$0xff]  ;;  %v16922_v20 = vpop.f32.mrf.mxu0 }
 0x78b   : > { %v8004_v8 = vpop.f32.mrf.mxu1 }
 0x78c   : > { %18316 = vst [vmem:[#allocation117_spill] sm:$0xff] %v16901_v55  ;;  %v16904_v38 = vadd.f32 %v8004_v8, %v16780_v17 }
 0x78d   : > { %v10935_v62 = vpop.f32.mrf.mxu1 }
 0x78e   : > { %18317 = vst [vmem:[#allocation28_spill] sm:$0xff] %v16904_v38  ;;  %v8534_v57 = vadd.f32 %v10935_v62, %v8274_v46  ;;  %v8276_v62 = vadd.f32 %v16792_v16, %v16787_v14  ;;  %v8204_v38 = vpop.f32.mrf.mxu0  ;;  %v8278_v16 = vadd.f32 %v16808_v48, %v16795_v2  ;;  %v8280_v48 = vadd.f32 %v16824_v24, %v16803_v58 }
 0x78f   : > { %v8374_v4 = vpop.f32.mrf.mxu1 }
 0x790   : > { %v8533_v15 = vadd.f32 %v8374_v4, %v8273_v19  ;;  %v8573_v6 = vadd.f32 %v16916_v34, %v8534_v57 }
 0x791   : > { %v10938_v17 = vpop.f32.mrf.mxu1 }
 0x792   : > { %v8572_v21 = vadd.f32 %v16916_v34, %v8533_v15  ;;  %v8605_v19 = vmax.f32 %v8573_v6, 0.0  ;;  %v8536_v4 = vadd.f32 %v10938_v17, %v8276_v62 }
 0x793   : > { %v8384_v25 = vpop.f32.mrf.mxu1 }
 0x794   : > { %v8604_v54 = vmax.f32 %v8572_v21, 0.0  ;;  %v8535_v26 = vadd.f32 %v8384_v25, %v8275_v31  ;;  %v8575_v57 = vadd.f32 %v16916_v34, %v8536_v4  ;;  %v16930_v25 = vpop.f32.mrf.mxu0 }
 0x795   : > { %v10941_v8 = vpop.f32.mrf.mxu1 }
 0x796   : > { %8636 = vxpose.xlu1.b32.start [1/16] (narrow) %v8604_v54, 32  ;;  %v8574_v15 = vadd.f32 %v16916_v34, %v8535_v26  ;;  %v8607_v6 = vmax.f32 %v8575_v57, 0.0  ;;  %v8538_v54 = vadd.f32 %v10941_v8, %v8278_v16  ;;  %v16935_v62 = vpop.f32.mrf.mxu0  ;;  %v7769_v57 = vadd.f32 %v16722_v33, %v16731_v52 }
 0x797   : > { %v8394_v46 = vpop.f32.mrf.mxu1 }
 0x798   : > { %v8606_v21 = vmax.f32 %v8574_v15, 0.0  ;;  %v8537_v31 = vadd.f32 %v8394_v46, %v8277_v53  ;;  %v16940_v53 = vpop.f32.mrf.mxu0 }
 0x799   : > { %v10944_v55 = vpop.f32.mrf.mxu1 }
 0x79a   : > { %8637 = vxpose.xlu1.b32.cont [2/16] (narrow) %v8605_v19, 32  ;;  %v8576_v26 = vadd.f32 %v16916_v34, %v8537_v31  ;;  %v8577_v19 = vadd.f32 %v16916_v34, %v8538_v54  ;;  %v8540_v18 = vadd.f32 %v10944_v55, %v8280_v48  ;;  %v16949_v31 = vpop.f32.mrf.mxu0  ;;  %v8282_v55 = vadd.f32 %v16840_v28, %v16811_v61 }
 0x79b   : > { %v8404_v45 = vpop.f32.mrf.mxu1  ;;  %v8291_v28 = vadd.f32 %v8204_v38, %v16853_v56 }
 0x79c   : > { %v8608_v4 = vmax.f32 %v8576_v26, 0.0  ;;  %v8539_v15 = vadd.f32 %v8404_v45, %v8279_v36  ;;  %v8281_v45 = vadd.f32 %v16847_v23, %v16814_v59  ;;  %v8579_v54 = vadd.f32 %v16916_v34, %v8540_v18  ;;  %v10919_v52 = vpop.f32.mrf.mxu0 }
 0x79d   : > { %v10947_v14 = vpop.f32.mrf.mxu1  ;;  %v8290_v36 = vadd.f32 %v16906_v22, %v16843_v49 }
 0x79e   : > { %8638 = vxpose.xlu1.b32.cont [3/16] (narrow) %v8606_v21, 32  ;;  %v8609_v21 = vmax.f32 %v8577_v19, 0.0  ;;  %v8578_v35 = vadd.f32 %v16916_v34, %v8539_v15  ;;  %v8542_v23 = vadd.f32 %v10947_v14, %v8282_v55  ;;  %v8611_v19 = vmax.f32 %v8579_v54, 0.0  ;;  %v8234_v48 = vpop.f32.mrf.mxu0 }
 0x79f   : > { %v8414_v17 = vpop.f32.mrf.mxu1 }
 0x7a0   : > { %v8541_v58 = vadd.f32 %v8414_v17, %v8281_v45  ;;  %v8610_v33 = vmax.f32 %v8578_v35, 0.0  ;;  %v8581_v49 = vadd.f32 %v16916_v34, %v8542_v23  ;;  %v8298_v23 = vadd.f32 %v10919_v52, %v16874_v50 }
 0x7a1   : > { %v10950_v29 = vpop.f32.mrf.mxu1 }
 0x7a2   : > { %8639 = vxpose.xlu1.b32.cont [4/16] (narrow) %v8607_v6, 32  ;;  %v8029_v6 = vadd.f32 %v16845_v3, %v7769_v57  ;;  %v8580_v3 = vadd.f32 %v16916_v34, %v8541_v58  ;;  %v8284_v58 = vadd.f32 %v16855_v63, %v16819_v13  ;;  %v8613_v56 = vmax.f32 %v8581_v49, 0.0 }
 0x7a3   : > { %v8424_v46 = vpop.f32.mrf.mxu1 }
 0x7a4   : > { %v8289_v59 = vadd.f32 %v16911_v51, %v8029_v6  ;;  %v8612_v22 = vmax.f32 %v8580_v3, 0.0  ;;  %v10922_v6 = vpop.f32.mrf.mxu0 }
 0x7a5   : > { %v16942_v2 = vpop.f32.mrf.mxu1  ;;  %v8300_v50 = vadd.f32 %v10922_v6, %v16882_v39  ;;  %v8295_v39 = vadd.f32 %v16949_v31, %v16869_v10 }
 0x7a6   : > { %8640 = vxpose.xlu1.b32.cont [5/16] (narrow) %v8608_v4, 32 }
 0x7a7   : > { %v8434_v8 = vpop.f32.mrf.mxu1 }
 0x7a9   : > { %v16953_v16 = vpop.f32.mrf.mxu1 }
 0x7aa   : > { %8641 = vxpose.xlu1.b32.cont [6/16] (narrow) %v8609_v21, 32  ;;  %v8283_v21 = vadd.f32 %v16863_v5, %v16822_v9  ;;  %v8292_v9 = vadd.f32 %v16922_v20, %v16850_v0  ;;  %v8544_v5 = vadd.f32 %v10950_v29, %v8284_v58  ;;  %v8293_v0 = vadd.f32 %v16935_v62, %v16861_v37 }
 0x7ab   : > { %v16956_v24 = vpop.f32.mrf.mxu1  ;;  %v8294_v37 = vadd.f32 %v16930_v25, %v16858_v12 }
 0x7ac   : > { %v8543_v14 = vadd.f32 %v8424_v46, %v8283_v21  ;;  %v8583_v63 = vadd.f32 %v16916_v34, %v8544_v5  ;;  %v18318_v5 = vld [vmem:[#allocation117_spill] sm:$0xff] }
 0x7ad   : > { %v10959_v26 = vpop.f32.mrf.mxu1 }
 0x7ae   : > { %8642 = vxpose.xlu1.b32.cont [7/16] (narrow) %v8610_v33, 32  ;;  %v8550_v4 = vadd.f32 %v10959_v26, %v8290_v36  ;;  %v8582_v33 = vadd.f32 %v16916_v34, %v8543_v14  ;;  %v8244_v36 = vpop.f32.mrf.mxu0  ;;  %v8615_v52 = vmax.f32 %v8583_v63, 0.0  ;;  %v18319_v63 = vld [vmem:[#allocation28_spill] sm:$0xff] }
 0x7af   : > { %v8454_v17 = vpop.f32.mrf.mxu1 }
 0x7b0   : > { %v8549_v15 = vadd.f32 %v8454_v17, %v8289_v59  ;;  %v8589_v18 = vadd.f32 %v16916_v34, %v8550_v4  ;;  %v8285_v59 = vadd.f32 %v16879_v1, %v16830_v7  ;;  %v8614_v3 = vmax.f32 %v8582_v33, 0.0 }
 0x7b1   : > { %v10962_v57 = vpop.f32.mrf.mxu1  ;;  %v8286_v7 = vadd.f32 %v16871_v43, %v16827_v60 }
 0x7b2   : > { %v8588_v61 = vadd.f32 %v16916_v34, %v8549_v15  ;;  %8643 = vxpose.xlu1.b32.cont [8/16] (narrow) %v8611_v19, 32  ;;  %v8621_v46 = vmax.f32 %v8589_v18, 0.0  ;;  %v8552_v55 = vadd.f32 %v10962_v57, %v8292_v9  ;;  %v8545_v20 = vadd.f32 %v8434_v8, %v8285_v59  ;;  %v10925_v15 = vpop.f32.mrf.mxu0 }
 0x7b3   : > { %v8464_v51 = vpop.f32.mrf.mxu1  ;;  %v8297_v8 = vadd.f32 %v8234_v48, %v16877_v27  ;;  %v8546_v57 = vadd.f32 %v16942_v2, %v8286_v7  ;;  %v8287_v27 = vadd.f32 %v16897_v11, %v16838_v41  ;;  %v8299_v2 = vadd.f32 %v8244_v36, %v16885_v30 }
 0x7b4   : > { %v8620_v35 = vmax.f32 %v8588_v61, 0.0  ;;  %v8551_v45 = vadd.f32 %v8464_v51, %v8291_v28  ;;  %v8591_v17 = vadd.f32 %v16916_v34, %v8552_v55  ;;  %v8584_v21 = vadd.f32 %v16916_v34, %v8545_v20  ;;  %v8254_v25 = vpop.f32.mrf.mxu0 }
 0x7b5   : > { %v10965_v54 = vpop.f32.mrf.mxu1  ;;  %v8302_v14 = vadd.f32 %v10925_v15, %v16890_v42  ;;  %v8547_v6 = vadd.f32 %v16956_v24, %v8287_v27  ;;  %v8296_v42 = vadd.f32 %v16940_v53, %v16866_v44 }
 0x7b6   : > { %8644 = vxpose.xlu1.b32.cont [9/16] (narrow) %v8612_v22, 32  ;;  %8668 = vxpose.xlu0.b32.start [1/16] (narrow) %v8620_v35, 32  ;;  %v8590_v26 = vadd.f32 %v16916_v34, %v8551_v45  ;;  %v8554_v61 = vadd.f32 %v10965_v54, %v8294_v37  ;;  %v8623_v49 = vmax.f32 %v8591_v17, 0.0  ;;  %v10928_v18 = vpop.f32.mrf.mxu0  ;;  %v8585_v35 = vadd.f32 %v16916_v34, %v8546_v57 }
 0x7b7   : > { %v8474_v38 = vpop.f32.mrf.mxu1  ;;  %v8616_v45 = vmax.f32 %v8584_v21, 0.0  ;;  %v8288_v54 = vadd.f32 %v16887_v47, %v16835_v40  ;;  %v8586_v36 = vadd.f32 %v16916_v34, %v8547_v6 }
 0x7b8   : > { %v8622_v19 = vmax.f32 %v8590_v26, 0.0  ;;  %v8553_v4 = vadd.f32 %v8474_v38, %v8293_v0  ;;  %v8593_v41 = vadd.f32 %v16916_v34, %v8554_v61  ;;  %v8304_v38 = vadd.f32 %v10928_v18, %v18318_v5 }
 0x7b9   : > { %v16979_v13 = vpop.f32.mrf.mxu1  ;;  %v8617_v55 = vmax.f32 %v8585_v35, 0.0  ;;  %v8548_v26 = vadd.f32 %v16953_v16, %v8288_v54 }
 0x7ba   : > { %8645 = vxpose.xlu1.b32.cont [10/16] (narrow) %v8613_v56, 32  ;;  %8669 = vxpose.xlu0.b32.cont [2/16] (narrow) %v8621_v46, 32  ;;  %v8592_v60 = vadd.f32 %v16916_v34, %v8553_v4  ;;  %v8301_v56 = vadd.f32 %v8254_v25, %v16895_v32  ;;  %v8264_v46 = vpop.f32.mrf.mxu0  ;;  %v8625_v40 = vmax.f32 %v8593_v41, 0.0  ;;  %v8556_v44 = vadd.f32 %v16979_v13, %v8296_v42 }
 0x7bb   : > { %v8484_v29 = vpop.f32.mrf.mxu1  ;;  %v8303_v20 = vadd.f32 %v8264_v46, %v18319_v63  ;;  %v8587_v16 = vadd.f32 %v16916_v34, %v8548_v26 }
 0x7bc   : > { %v8624_v10 = vmax.f32 %v8592_v60, 0.0  ;;  %v8555_v31 = vadd.f32 %v8484_v29, %v8295_v39 }
 0x7bd   : > { %v10971_v1 = vpop.f32.mrf.mxu1  ;;  %v8619_v37 = vmax.f32 %v8587_v16, 0.0 }
 0x7be   : > { %v8558_v62 = vadd.f32 %v10971_v1, %v8298_v23  ;;  %8646 = vxpose.xlu1.b32.cont [11/16] (narrow) %v8614_v3, 32  ;;  %8670 = vxpose.xlu0.b32.cont [3/16] (narrow) %v8622_v19, 32  ;;  %v8594_v53 = vadd.f32 %v16916_v34, %v8555_v31  ;;  %v8618_v3 = vmax.f32 %v8586_v36, 0.0  ;;  %v8595_v19 = vadd.f32 %v16916_v34, %v8556_v44 }
 0x7bf   : > { %v8494_v28 = vpop.f32.mrf.mxu1 }
 0x7c0   : > { %v16996_v12 = vadd.f32 %v16916_v34, %v8558_v62  ;;  %v8557_v43 = vadd.f32 %v8494_v28, %v8297_v8  ;;  %v8626_v13 = vmax.f32 %v8594_v53, 0.0  ;;  %v8627_v1 = vmax.f32 %v8595_v19, 0.0 }
 0x7c1   : > { %v10974_v48 = vpop.f32.mrf.mxu1 }
 0x7c2   : > { %v8596_v22 = vadd.f32 %v16916_v34, %v8557_v43  ;;  %v8560_v51 = vadd.f32 %v10974_v48, %v8300_v50  ;;  %8647 = vxpose.xlu1.b32.cont [12/16] (narrow) %v8615_v52, 32  ;;  %8671 = vxpose.xlu0.b32.cont [4/16] (narrow) %v8623_v49, 32  ;;  %v8629_v8 = vmax.f32 %v16996_v12, 0.0 }
 0x7c3   : > { %v8504_v11 = vpop.f32.mrf.mxu1 }
 0x7c4   : > { %v8599_v30 = vadd.f32 %v16916_v34, %v8560_v51  ;;  %v8559_v58 = vadd.f32 %v8504_v11, %v8299_v2  ;;  %v8628_v62 = vmax.f32 %v8596_v22, 0.0 }
 0x7c5   : > { %v10977_v9 = vpop.f32.mrf.mxu1 }
 0x7c6   : > { %v8598_v24 = vadd.f32 %v16916_v34, %v8559_v58  ;;  %v8562_v33 = vadd.f32 %v10977_v9, %v8302_v14  ;;  %8648 = vxpose.xlu1.b32.cont [13/16] (narrow) %v8616_v45, 32  ;;  %8672 = vxpose.xlu0.b32.cont [5/16] (narrow) %v8624_v10, 32  ;;  %v8631_v52 = vmax.f32 %v8599_v30, 0.0 }
 0x7c7   : > { %v8514_v47 = vpop.f32.mrf.mxu1 }
 0x7c8   : > { %v8601_v32 = vadd.f32 %v16916_v34, %v8562_v33  ;;  %v8561_v59 = vadd.f32 %v8514_v47, %v8301_v56  ;;  %v8630_v50 = vmax.f32 %v8598_v24, 0.0 }
 0x7c9   : > { %v10980_v0 = vpop.f32.mrf.mxu1 }
 0x7ca   : > { %v8600_v29 = vadd.f32 %v16916_v34, %v8561_v59  ;;  %v8564_v23 = vadd.f32 %v10980_v0, %v8304_v38  ;;  %8649 = vxpose.xlu1.b32.cont [14/16] (narrow) %v8617_v55, 32  ;;  %8673 = vxpose.xlu0.b32.cont [6/16] (narrow) %v8625_v40, 32  ;;  %v8633_v21 = vmax.f32 %v8601_v32, 0.0 }
 0x7cb   : > { %v8524_v17 = vpop.f32.mrf.mxu1 }
 0x7cc   : > { %v8603_v4 = vadd.f32 %v16916_v34, %v8564_v23  ;;  %v8563_v15 = vadd.f32 %v8524_v17, %v8303_v20  ;;  %v8632_v57 = vmax.f32 %v8600_v29, 0.0 }
 0x7ce   : > { %v8602_v7 = vadd.f32 %v16916_v34, %v8563_v15  ;;  %8650 = vxpose.xlu1.b32.cont [15/16] (narrow) %v8618_v3, 32  ;;  %8674 = vxpose.xlu0.b32.cont [7/16] (narrow) %v8626_v13, 32  ;;  %v8635_v61 = vmax.f32 %v8603_v4, 0.0 }
 0x7d0   : > { %v8634_v34 = vmax.f32 %v8602_v7, 0.0 }
 0x7d2   : > { %8651 = vxpose.xlu1.b32.end [16/16] (narrow) %v8619_v37, 32  ;;  %8675 = vxpose.xlu0.b32.cont [8/16] (narrow) %v8627_v1, 32 }
 0x7d6   : > { %8676 = vxpose.xlu0.b32.cont [9/16] (narrow) %v8628_v62, 32 }
 0x7da   : > { %8677 = vxpose.xlu0.b32.cont [10/16] (narrow) %v8629_v8, 32 }
 0x7de   : > { %8678 = vxpose.xlu0.b32.cont [11/16] (narrow) %v8630_v50, 32 }
 0x7e2   : > { %8679 = vxpose.xlu0.b32.cont [12/16] (narrow) %v8631_v52, 32 }
 0x7e6   : > { %8680 = vxpose.xlu0.b32.cont [13/16] (narrow) %v8632_v57, 32 }
 0x7ea   : > { %8681 = vxpose.xlu0.b32.cont [14/16] (narrow) %v8633_v21, 32 }
 0x7ee   : > { %8682 = vxpose.xlu0.b32.cont [15/16] (narrow) %v8634_v34, 32 }
 0x7f2   : > { %8683 = vxpose.xlu0.b32.end [16/16] (narrow) %v8635_v61, 32 }
 0x812   : > { %v8652_v28 = vpop.trf.xlu1 }
 0x813   : > { %8700 = vst [vmem:[%s379_s19] sm:$0xff] %v8652_v28 }
 0x816   : > { %v8653_v49 = vpop.trf.xlu1 }
 0x817   : > { %8702 = vst [vmem:[%s379_s19 + $0x10] sm:$0xff] %v8653_v49 }
 0x81a   : > { %v8654_v60 = vpop.trf.xlu1 }
 0x81b   : > { %8704 = vst [vmem:[%s379_s19 + $0x20] sm:$0xff] %v8654_v60 }
 0x81e   : > { %v8655_v12 = vpop.trf.xlu1 }
 0x81f   : > { %8706 = vst [vmem:[%s379_s19 + $0x30] sm:$0xff] %v8655_v12 }
 0x832   : > { %v8684_v43 = vpop.trf.xlu0 }
 0x833   : > { %8701 = vst [vmem:[%s379_s19 + $0x8] sm:$0xff] %v8684_v43 }
 0x836   : > { %v8685_v25 = vpop.trf.xlu0 }
 0x837   : > { %8703 = vst [vmem:[%s379_s19 + $0x18] sm:$0xff] %v8685_v25 }
 0x83a   : > { %v8686_v27 = vpop.trf.xlu0 }
 0x83b   : > { %8705 = vst [vmem:[%s379_s19 + $0x28] sm:$0xff] %v8686_v27 }
 0x83e   : > { %v8687_v39 = vpop.trf.xlu0 }
 0x83f   : > { %8707 = vst [vmem:[%s379_s19 + $0x38] sm:$0xff] %v8687_v39 }
 0x840   : > { %11160 = shalt.err (!%p11157_p3)
}
 0x841   : > { %s11161_s24 = scalar_lea.hbm %s17035_s28, 1024  ;;  %s11165_s14 = scalar_lea.hbm %s17087_s9, 2048 }
 0x842   : > { %p11162_p11 = scmp.ne.s32.totalorder %s17035_s28, %s11161_s24  ;;  %p11166_p4 = scmp.lt.s32.totalorder %s17035_s28, %s17087_s9 }
 0x843   : > { %p11167_p6 = scmp.lt.s32.totalorder %s11165_s14, %s11161_s24 }
 0x844   : > { %p11163_p9 = pnand %p11162_p11, %p18320_p2 }
 0x845   : > { %p11168_p8 = por %p11167_p6, %p11166_p4 }
 0x846   : > { %p11164_p1 = pneg %p11163_p9 }
 0x848   : > { %p11169_p5 = pnand %p11168_p8, %p11164_p1 }
 0x84a   : > { %11172 = shalt.err (!%p11169_p5)
}
 0x84b   : > { %s11225_s22 = smov 256   ;;  %s11226_s1 = smov 16  }
 0x84c   : > { %10991 = dma.vmem_to_hbm [thread:$0]  (%p18320_p2), %s17030_s20, 1024, %s17035_s28, %s8709_s23, %s11225_s22, %s11225_s22, %s11226_s1  }
 0x84d PF: > { %s8737_s27 = sand.u32 1, %s11203_s30   ;;  %p18321_p7 = scmp.ne.s32.totalorder %s17419_s16, 0 }
 0x84e   : > { %p18322_p12 = scmp.ge.s32.totalorder %s11215_s12, 2  ;;  %s8738_s13 = scalar_lea.sflag [#allocation4], %s8737_s27 }
 0x850   : > { %p11005_p13 = pnand %p18322_p12, %p18321_p7 }
 0x852   : > { %p11006_p0 = pneg %p11005_p13 }
 0x854   : > { %11198 = dma.done.wait (%p11006_p0), %s8738_s13, 1024  }
 0x855   : > { %11200 = vsyncadd (%p11006_p0), %s8738_s13, 4294966272  ;;  %s18323_s29 = sld [smem:[#allocation12_spill]]  ;;  %p23_p10 = scmp.ge.s32.totalorder %s11355_s18, 4  }
 0x856   : > { %s18324_s30 = smov %s11207_s10  ;;  %s18325_s10 = smov %s11211_s11 }
 0x857   : > { %s18327_s12 = smov %s11355_s18  ;;  %25 = sbr.rel (!%p23_p10) target bundleno = 9 (0x9), region = 125 }
 0x85b   : > { %s18326_s11 = smov %s18323_s29 }
 0x85c   :  { %8743 = vsyncpa [#allocation3], 1 }
 0x85d   :  { %8745 = vsyncpa [#allocation3 + $0x1], 1 }
 0x85e   :  { %8746 = vsyncpa [#allocation6], 1 }
 0x85f   :  { %8747 = vsyncpa [#allocation4], 1 }
 0x860   :  { %8749 = vsyncpa [#allocation4 + $0x1], 1 }

</bundles_post_ra>
